<compile_context>
chip_gen: v6e
topology: v6e:2x2x1
jax: 0.10.0
libtpu: 0.0.40
codegen_flags: <defaults>
</compile_context>

<pallas_src>
import functools

import numpy as np
import jax
import jax.numpy as jnp
from jax import lax
from jax.experimental import pallas as pl
from jax.experimental.pallas import tpu as pltpu

# ----------------------------------------------------------------------------
# Scaled-down, lane-dense config (same structure/axis conventions as reference).
CFG = dict(
    img=64, in_chans=3, t_patch=2, patch=16,
    enc_dim=256, enc_depth=4, enc_heads=4,      # reference: 768 / 12 / 12
    dec_dim=128, dec_depth=2, dec_heads=4,      # reference: 384 / 4  / 16
    mlp_ratio=4, ln_eps=1e-6, shared_norm_eps=1e-5,
)
CFG["n_patches"] = (CFG["img"] // CFG["patch"]) ** 2            # time axis collapses: 2/2 = 1
CFG["head_out"] = CFG["t_patch"] * CFG["patch"] * CFG["patch"] * CFG["in_chans"]   # 1536


# ----------------------------------------------------------------------------
# In-kernel math helpers (f32)
def _ln_inline(x, g, b, eps):
    """LayerNorm over the last dim. x:[M,D] f32, g/b:[1,D] f32 (biased variance, like torch)."""
    mu = jnp.mean(x, axis=-1, keepdims=True)
    xc = x - mu
    var = jnp.mean(xc * xc, axis=-1, keepdims=True)
    return xc * lax.rsqrt(var + eps) * g + b


def _recip(x):
    """EUP approx reciprocal + one Newton step (avoids a VALU divide)."""
    r = pl.reciprocal(x, approx=True)
    return r * (2.0 - x * r)


def _erf(x):
    """Abramowitz-Stegun 7.1.26 polynomial erf (matches torch erf to ~1e-7)."""
    a1, a2, a3, a4, a5 = 0.254829592, -0.284496736, 1.421413741, -1.453152027, 1.061405429
    p = 0.3275911
    sgn = jnp.where(x >= 0.0, 1.0, -1.0)
    ax = jnp.abs(x)
    t = _recip(1.0 + p * ax)
    poly = ((((a5 * t + a4) * t + a3) * t + a2) * t + a1) * t
    return sgn * (1.0 - poly * jnp.exp(-ax * ax))


def _gelu_exact(x):
    """Exact-erf GELU (torch nn.GELU default)."""
    return 0.5 * x * (1.0 + _erf(x * 0.7071067811865476))


# ----------------------------------------------------------------------------
# Stacked transformer blocks: one pallas_call per stack, grid = (group, layer).
# The activation is kept VMEM-resident in the output block across the layer
# axis (same block index for every l), initialised from the input at l == 0.
def _block_stack_kernel(x_ref, g1_ref, b1_ref, wqkv_ref, bqkv_ref,
                        wproj_ref, bproj_ref, g2_ref, b2_ref,
                        wfc1_ref, bfc1_ref, wfc2_ref, bfc2_ref, o_ref,
                        *, num_heads, eps, scale, batch, seq):
    l = pl.program_id(1)

    @pl.when(l == 0)
    def _():
        o_ref[...] = x_ref[...]            # bring the stack input into the resident block

    x = o_ref[0]                            # [M, D] f32, M = batch*seq
    D = x.shape[-1]
    Dh = D // num_heads

    # ---- pre-norm 1 + fused QKV projection (bf16 MXU, f32 accumulate, batch-packed M)
    h = _ln_inline(x, g1_ref[0, 0], b1_ref[0, 0], eps)
    qkv = jnp.dot(h.astype(jnp.bfloat16), wqkv_ref[0, 0],
                  preferred_element_type=jnp.float32) + bqkv_ref[0, 0]     # [M, 3D]

    # ---- multi-head self attention; attention is per-batch (B-batched einsum),
    #      each head's output is folded straight through its rows of the proj
    #      weight into a full-width [M, D] accumulator (no concat / narrow store).
    wp = wproj_ref[0, 0]                    # [D, D] bf16
    attn_acc = jnp.zeros((batch * seq, D), jnp.float32)
    for hd in range(num_heads):             # static unroll (small H)
        c0 = hd * Dh
        qh = (qkv[:, c0:c0 + Dh] * scale).reshape(batch, seq, Dh).astype(jnp.bfloat16)
        kh = qkv[:, D + c0:D + c0 + Dh].reshape(batch, seq, Dh).astype(jnp.bfloat16)
        vh = qkv[:, 2 * D + c0:2 * D + c0 + Dh].reshape(batch, seq, Dh).astype(jnp.bfloat16)
        s = jnp.einsum('bqd,bkd->bqk', qh, kh,
                       preferred_element_type=jnp.float32)                 # [B, S, S]
        s = s - jnp.max(s, axis=-1, keepdims=True)                         # exact softmax (f32)
        p = jnp.exp(s)
        p = p * pl.reciprocal(jnp.sum(p, axis=-1, keepdims=True), approx=True)
        oh = jnp.einsum('bqk,bkd->bqd', p.astype(jnp.bfloat16), vh,
                        preferred_element_type=jnp.float32)                # [B, S, Dh]
        attn_acc = attn_acc + jnp.dot(
            oh.reshape(batch * seq, Dh).astype(jnp.bfloat16),
            wp[c0:c0 + Dh, :], preferred_element_type=jnp.float32)
    x = x + attn_acc + bproj_ref[0, 0]                                      # residual (f32)

    # ---- pre-norm 2 + MLP, GELU kept in VMEM
    h = _ln_inline(x, g2_ref[0, 0], b2_ref[0, 0], eps)
    h = jnp.dot(h.astype(jnp.bfloat16), wfc1_ref[0, 0],
                preferred_element_type=jnp.float32) + bfc1_ref[0, 0]        # [M, 4D]
    h = _gelu_exact(h)
    h = jnp.dot(h.astype(jnp.bfloat16), wfc2_ref[0, 0],
                preferred_element_type=jnp.float32) + bfc2_ref[0, 0]        # [M, D]
    o_ref[0] = x + h


def block_stack(x, p, num_heads, eps, *, batch, seq):
    """x: [G, M, D] f32 with M=batch*seq; p: params stacked with leading (G, L) axes."""
    G, M, D = x.shape
    L = p["w_qkv"].shape[1]
    hid = p["w_fc1"].shape[-1]
    scale = float((D // num_heads) ** -0.5)

    def wspec(*tail):
        nt = len(tail)
        return pl.BlockSpec((1, 1) + tuple(tail), lambda g, l: (g, l) + (0,) * nt)

    x_spec = pl.BlockSpec((1, M, D), lambda g, l: (g, 0, 0))   # same block across L -> resident

    return pl.pallas_call(
        functools.partial(_block_stack_kernel, num_heads=num_heads, eps=eps,
                          scale=scale, batch=batch, seq=seq),
        out_shape=jax.ShapeDtypeStruct((G, M, D), jnp.float32),
        grid=(G, L),
        in_specs=[
            x_spec,
            wspec(1, D), wspec(1, D),                 # ln1 gamma/beta
            wspec(D, 3 * D), wspec(1, 3 * D),         # qkv
            wspec(D, D), wspec(1, D),                 # proj
            wspec(1, D), wspec(1, D),                 # ln2 gamma/beta
            wspec(D, hid), wspec(1, hid),             # fc1
            wspec(hid, D), wspec(1, D),               # fc2
        ],
        out_specs=x_spec,
        compiler_params=pltpu.CompilerParams(
            dimension_semantics=("parallel", "arbitrary")),
    )(x, p["ln1_g"], p["ln1_b"], p["w_qkv"], p["b_qkv"],
      p["w_proj"], p["b_proj"], p["ln2_g"], p["ln2_b"],
      p["w_fc1"], p["b_fc1"], p["w_fc2"], p["b_fc2"])


# ----------------------------------------------------------------------------
# Patch embed (time-folded Conv3d-as-matmul) fused with the pos-embed add.
def _patch_embed_kernel(x_ref, w_ref, b_ref, pos_ref, o_ref):
    o_ref[...] = (jnp.dot(x_ref[...].astype(jnp.bfloat16), w_ref[...],
                          preferred_element_type=jnp.float32)
                  + b_ref[...] + pos_ref[...])


def patch_embed(x2d, pos2d, p):
    """x2d: [M, K] visible patch vectors, pos2d: [M, De] gathered pos embed."""
    M, K = x2d.shape
    De = p["w_patch"].shape[-1]
    return pl.pallas_call(
        _patch_embed_kernel,
        out_shape=jax.ShapeDtypeStruct((M, De), jnp.float32),
        grid=(1,),
        in_specs=[pl.BlockSpec((M, K), lambda i: (0, 0)),
                  pl.BlockSpec((K, De), lambda i: (0, 0)),
                  pl.BlockSpec((1, De), lambda i: (0, 0)),
                  pl.BlockSpec((M, De), lambda i: (0, 0))],
        out_specs=pl.BlockSpec((M, De), lambda i: (0, 0)),
    )(x2d, p["w_patch"], p["b_patch"], pos2d)


# ----------------------------------------------------------------------------
# Fused LayerNorm + Linear.  Used for (encoder final norm + 3-branch decoder
# embed, G=1) and (shared norm + per-modality reconstruction heads, G=3).
def _ln_matmul_kernel(x_ref, g_ref, b_ref, w_ref, wb_ref, o_ref, *, eps):
    h = _ln_inline(x_ref[0], g_ref[...], b_ref[...], eps)
    o_ref[0] = (jnp.dot(h.astype(jnp.bfloat16), w_ref[0],
                        preferred_element_type=jnp.float32) + wb_ref[0])


def ln_matmul(x3, gamma, beta, w3, b3, eps):
    """x3: [G, M, Din] f32, gamma/beta: [1, Din] (shared), w3: [G, Din, Dout] bf16."""
    G, M, Din = x3.shape
    Dout = w3.shape[-1]
    return pl.pallas_call(
        functools.partial(_ln_matmul_kernel, eps=eps),
        out_shape=jax.ShapeDtypeStruct((G, M, Dout), jnp.float32),
        grid=(G,),
        in_specs=[
            pl.BlockSpec((1, M, Din), lambda g: (g, 0, 0)),
            pl.BlockSpec((1, Din), lambda g: (0, 0)),
            pl.BlockSpec((1, Din), lambda g: (0, 0)),
            pl.BlockSpec((1, Din, Dout), lambda g: (g, 0, 0)),
            pl.BlockSpec((1, 1, Dout), lambda g: (g, 0, 0)),
        ],
        out_specs=pl.BlockSpec((1, M, Dout), lambda g: (g, 0, 0)),
        compiler_params=pltpu.CompilerParams(dimension_semantics=("parallel",)),
    )(x3, gamma, beta, w3, b3)


# ----------------------------------------------------------------------------
# Host/XLA glue: patch extraction + mask bookkeeping (data-dependent gathers).
def extract_patches(rgb):
    B, C, H, W = rgb.shape
    pp = CFG["patch"]
    x = rgb.reshape(B, C, H // pp, pp, W // pp, pp)
    x = x.transpose(0, 2, 4, 1, 3, 5)                       # [B, h', w', C, ph, pw]
    return x.reshape(B, (H // pp) * (W // pp), C * pp * pp)  # per-patch (C,h,w) order


def model_forward(params, rgb_input, mask, *, n_vis):
    B, N = mask.shape
    De, Dd = CFG["enc_dim"], CFG["dec_dim"]

    # mask bookkeeping hoisted (shared by encoder patch-drop and decoder restore)
    ids_shuffle = jnp.argsort(mask.astype(jnp.int32), axis=1, stable=True)  # visible first
    ids_keep = ids_shuffle[:, :n_vis]
    ids_restore = jnp.argsort(ids_shuffle, axis=1, stable=True)

    # ---- encoder: gather visible patches + their pos embed first (identical to
    #      embed-all-then-drop, since patch embed is per-token), then embed+add.
    enc = params["encoder"]
    patches = extract_patches(rgb_input)                                    # [B, N, K]
    vis_patches = jnp.take_along_axis(patches, ids_keep[:, :, None], axis=1)
    vis_pos = jnp.take_along_axis(jnp.broadcast_to(enc["pos_embed"], (B, N, De)),
                                  ids_keep[:, :, None], axis=1)
    x = patch_embed(vis_patches.reshape(B * n_vis, -1),
                    vis_pos.reshape(B * n_vis, De), enc)                    # [B*nv, De]
    x = block_stack(x[None], enc["blocks"], CFG["enc_heads"], CFG["ln_eps"],
                    batch=B, seq=n_vis)[0]                                  # [B*nv, De]

    # ---- final encoder LN fused with the (3-branch, column-stacked) decoder embed
    dec = params["decoders"]
    emb = ln_matmul(x[None], enc["norm_g"], enc["norm_b"],
                    dec["w_embed"], dec["b_embed"], CFG["ln_eps"])[0]       # [B*nv, 3*Dd]
    emb = emb.reshape(B, n_vis, 3, Dd).transpose(2, 0, 1, 3)                # [3, B, nv, Dd]

    # ---- restore masked positions + decoder pos embed (XLA glue)
    # TODO(synk): the reference passes the *encoder* pos_embed into Decoder.forward;
    # the canonical OmniMAE decoder uses its own sinusoidal pos embed, used here.
    mask_tokens = jnp.broadcast_to(dec["mask_token"], (3, B, N - n_vis, Dd))
    x_ = jnp.concatenate([emb, mask_tokens], axis=2)                        # [3, B, N, Dd]
    idx = jnp.broadcast_to(ids_restore[None, :, :, None], (3, B, N, 1))
    x_full = jnp.take_along_axis(x_, idx, axis=2) + dec["dec_pos_embed"][None, None]

    # ---- decoder blocks: all 3 branches on the parallel grid axis, batch packed in M
    d = block_stack(x_full.reshape(3, B * N, Dd), dec["blocks"], CFG["dec_heads"],
                    CFG["ln_eps"], batch=B, seq=N)                          # [3, B*N, Dd]

    # ---- shared LayerNorm + per-modality reconstruction head (one call, grid=(3,))
    out = ln_matmul(d, params["norm_g"], params["norm_b"],
                    params["head_w"], params["head_b"], CFG["shared_norm_eps"])
    out = out.reshape(3, B, N, CFG["head_out"])
    return out[0], out[1], out[2]                            # ir, rgb, depth reconstructions


# ----------------------------------------------------------------------------
# Deterministic parameter construction (synthetic; shapes mirror the module,
# matmul weights stored bf16, everything else f32).
def sinusoid_pos_embed(n, d):
    pos = np.arange(n, dtype=np.float64)[:, None]
    i = np.arange(d, dtype=np.float64)[None, :]
    angle = pos / np.power(10000.0, 2.0 * (i // 2) / d)
    tbl = np.zeros((n, d), dtype=np.float64)
    tbl[:, 0::2] = np.sin(angle[:, 0::2])
    tbl[:, 1::2] = np.cos(angle[:, 1::2])
    return jnp.asarray(tbl[None], dtype=jnp.float32)         # [1, n, d]


def init_params(key):
    kiter = iter(jax.random.split(key, 64))
    wgt = lambda shape, std=0.02: (std * jax.random.normal(next(kiter), shape, jnp.float32)
                                   ).astype(jnp.bfloat16)
    zeros = lambda shape: jnp.zeros(shape, jnp.float32)
    ones = lambda shape: jnp.ones(shape, jnp.float32)

    def stack_params(G, L, dim):
        hid = dim * CFG["mlp_ratio"]
        return dict(
            ln1_g=ones((G, L, 1, dim)), ln1_b=zeros((G, L, 1, dim)),
            w_qkv=wgt((G, L, dim, 3 * dim)), b_qkv=zeros((G, L, 1, 3 * dim)),
            w_proj=wgt((G, L, dim, dim)), b_proj=zeros((G, L, 1, dim)),
            ln2_g=ones((G, L, 1, dim)), ln2_b=zeros((G, L, 1, dim)),
            w_fc1=wgt((G, L, dim, hid)), b_fc1=zeros((G, L, 1, hid)),
            w_fc2=wgt((G, L, hid, dim)), b_fc2=zeros((G, L, 1, dim)),
        )

    N = CFG["n_patches"]
    De, Dd, Ho = CFG["enc_dim"], CFG["dec_dim"], CFG["head_out"]
    C, pt, pp = CFG["in_chans"], CFG["t_patch"], CFG["patch"]

    # Conv3d(k=s=(2,16,16)) patch-embed weight with the PadIm2Video x2 time-repeat
    # folded in host-side: the two temporal taps see identical pixels, so
    # w_eff[c,h,w] = w[c,t=0,h,w] + w[c,t=1,h,w]  (halves the contraction depth).
    w_conv = 0.02 * jax.random.normal(next(kiter), (C, pt, pp * pp, De), jnp.float32)
    w_patch = w_conv.sum(axis=1).reshape(C * pp * pp, De).astype(jnp.bfloat16)

    encoder = dict(
        w_patch=w_patch, b_patch=zeros((1, De)),
        pos_embed=sinusoid_pos_embed(N, De),                  # [1, N, De] fixed sinusoidal
        blocks=stack_params(1, CFG["enc_depth"], De),
        norm_g=ones((1, De)), norm_b=zeros((1, De)),
    )
    decoders = dict(
        w_embed=wgt((1, De, 3 * Dd)), b_embed=zeros((1, 1, 3 * Dd)),  # 3 branch embeds, column-stacked
        mask_token=zeros((3, 1, 1, Dd)),
        dec_pos_embed=sinusoid_pos_embed(N, Dd)[0],            # [N, Dd]
        blocks=stack_params(3, CFG["dec_depth"], Dd),
    )
    return dict(
        encoder=encoder, decoders=decoders,
        head_w=wgt((3, Dd, Ho)), head_b=zeros((3, 1, Ho)),
        norm_g=ones((1, Dd)), norm_b=zeros((1, Dd)),           # shared nn.LayerNorm(dec_dim)
    )


# ----------------------------------------------------------------------------
if __name__ == "__main__":
    key = jax.random.PRNGKey(0)
    k_param, k_x, k_mask = jax.random.split(key, 3)
    params = init_params(k_param)

    B = 2
    rgb_input = jax.random.normal(
        k_x, (B, CFG["in_chans"], CFG["img"], CFG["img"]), jnp.float32)   # NCHW image

    N = CFG["n_patches"]
    n_vis = N // 2
    noise = jax.random.uniform(k_mask, (B, N))
    rank = jnp.argsort(jnp.argsort(noise, axis=1), axis=1)
    mask = rank >= n_vis        # True = masked (dropped) patch; same count per sample

    fwd = jax.jit(functools.partial(model_forward, n_vis=n_vis))
    ir_rec, rgb_rec, depth_rec = fwd(params, rgb_input, mask)
    jax.block_until_ready((ir_rec, rgb_rec, depth_rec))

    assert ir_rec.shape == (B, N, CFG["head_out"])
    assert rgb_rec.shape == (B, N, CFG["head_out"])
    assert depth_rec.shape == (B, N, CFG["head_out"])
    assert ir_rec.dtype == rgb_rec.dtype == depth_rec.dtype == jnp.float32
    assert bool(jnp.all(jnp.isfinite(ir_rec))) and bool(jnp.all(jnp.isfinite(rgb_rec)))
    print("KERNEL_OK")
</pallas_src>

<mosaic_0001>
module attributes {stable_mosaic.version = 11 : i64} {
  func.func @_patch_embed_kernel(%arg0: i32, %arg1: memref<16x768xf32, #tpu.memory_space<vmem>>, %arg2: memref<768x256xbf16, #tpu.memory_space<vmem>>, %arg3: memref<1x256xf32, #tpu.memory_space<vmem>>, %arg4: memref<16x256xf32, #tpu.memory_space<vmem>>, %arg5: memref<16x256xf32, #tpu.memory_space<vmem>>) attributes {dimension_semantics = [#tpu.dimension_semantics<arbitrary>], iteration_bounds = array<i64: 1>, scalar_prefetch = 0 : i64, scratch_operands = 0 : i64, tpu.core_type = #tpu.core_type<tc>, window_params = [{pipeline_mode = #tpu.pipeline_mode<synchronous>, transform_indices = @transform_0, window_bounds = array<i64: 16, 768>}, {pipeline_mode = #tpu.pipeline_mode<synchronous>, transform_indices = @transform_1, window_bounds = array<i64: 768, 256>}, {pipeline_mode = #tpu.pipeline_mode<synchronous>, transform_indices = @transform_2, window_bounds = array<i64: 1, 256>}, {pipeline_mode = #tpu.pipeline_mode<synchronous>, transform_indices = @transform_3, window_bounds = array<i64: 16, 256>}, {pipeline_mode = #tpu.pipeline_mode<synchronous>, transform_indices = @transform_4, window_bounds = array<i64: 16, 256>}]} {
    %c0 = arith.constant 0 : index
    %c0_0 = arith.constant 0 : index
    %0 = vector.load %arg1[%c0, %c0_0] : memref<16x768xf32, #tpu.memory_space<vmem>>, vector<16x768xf32>
    %1 = arith.truncf %0 : vector<16x768xf32> to vector<16x768xbf16>
    %c0_1 = arith.constant 0 : index
    %c0_2 = arith.constant 0 : index
    %2 = vector.load %arg2[%c0_1, %c0_2] : memref<768x256xbf16, #tpu.memory_space<vmem>>, vector<768x256xbf16>
    %cst = arith.constant dense<0.000000e+00> : vector<16x256xf32>
    %3 = tpu.matmul %1, %2, %cst {dimension_numbers = #tpu.dot_dimension_numbers<[1], [0], [0], [1], [0, 0, 1, 1], [], []>} : vector<16x768xbf16>, vector<768x256xbf16>, vector<16x256xf32> -> vector<16x256xf32>
    %c0_3 = arith.constant 0 : index
    %c0_4 = arith.constant 0 : index
    %4 = vector.load %arg3[%c0_3, %c0_4] : memref<1x256xf32, #tpu.memory_space<vmem>>, vector<1x256xf32>
    %5 = vector.broadcast %4 : vector<1x256xf32> to vector<16x256xf32>
    %6 = arith.addf %3, %5 : vector<16x256xf32>
    %c0_5 = arith.constant 0 : index
    %c0_6 = arith.constant 0 : index
    %7 = vector.load %arg4[%c0_5, %c0_6] : memref<16x256xf32, #tpu.memory_space<vmem>>, vector<16x256xf32>
    %8 = arith.addf %6, %7 : vector<16x256xf32>
    %c0_7 = arith.constant 0 : index
    %c0_8 = arith.constant 0 : index
    %9 = vector.load %arg5[%c0_7, %c0_8] : memref<16x256xf32, #tpu.memory_space<vmem>>, vector<16x256xf32>
    tpu.vector_store %arg5[%c0_7, %c0_8], %8 {strides = array<i32>} : memref<16x256xf32, #tpu.memory_space<vmem>>, vector<16x256xf32>,
    return
  }
  func.func @transform_0(%arg0: i32) -> (i32, i32) {
    %c0_i32 = arith.constant 0 : i32
    %c0_i32_0 = arith.constant 0 : i32
    %c0_i32_1 = arith.constant 0 : i32
    return %c0_i32, %c0_i32_0 : i32, i32
  }
  func.func @transform_1(%arg0: i32) -> (i32, i32) {
    %c0_i32 = arith.constant 0 : i32
    %c0_i32_0 = arith.constant 0 : i32
    %c0_i32_1 = arith.constant 0 : i32
    return %c0_i32, %c0_i32_0 : i32, i32
  }
  func.func @transform_2(%arg0: i32) -> (i32, i32) {
    %c0_i32 = arith.constant 0 : i32
    %c0_i32_0 = arith.constant 0 : i32
    %c0_i32_1 = arith.constant 0 : i32
    return %c0_i32, %c0_i32_0 : i32, i32
  }
  func.func @transform_3(%arg0: i32) -> (i32, i32) {
    %c0_i32 = arith.constant 0 : i32
    %c0_i32_0 = arith.constant 0 : i32
    %c0_i32_1 = arith.constant 0 : i32
    return %c0_i32, %c0_i32_0 : i32, i32
  }
  func.func @transform_4(%arg0: i32) -> (i32, i32) {
    %c0_i32 = arith.constant 0 : i32
    %c0_i32_0 = arith.constant 0 : i32
    %c0_i32_1 = arith.constant 0 : i32
    return %c0_i32, %c0_i32_0 : i32, i32
  }
}

module attributes {stable_mosaic.version = 11 : i64} {
  func.func @_block_stack_kernel(%arg0: i32, %arg1: i32, %arg2: memref<1x16x256xf32, #tpu.memory_space<vmem>>, %arg3: memref<1x1x1x256xf32, #tpu.memory_space<vmem>>, %arg4: memref<1x1x1x256xf32, #tpu.memory_space<vmem>>, %arg5: memref<1x1x256x768xbf16, #tpu.memory_space<vmem>>, %arg6: memref<1x1x1x768xf32, #tpu.memory_space<vmem>>, %arg7: memref<1x1x256x256xbf16, #tpu.memory_space<vmem>>, %arg8: memref<1x1x1x256xf32, #tpu.memory_space<vmem>>, %arg9: memref<1x1x1x256xf32, #tpu.memory_space<vmem>>, %arg10: memref<1x1x1x256xf32, #tpu.memory_space<vmem>>, %arg11: memref<1x1x256x1024xbf16, #tpu.memory_space<vmem>>, %arg12: memref<1x1x1x1024xf32, #tpu.memory_space<vmem>>, %arg13: memref<1x1x1024x256xbf16, #tpu.memory_space<vmem>>, %arg14: memref<1x1x1x256xf32, #tpu.memory_space<vmem>>, %arg15: memref<1x16x256xf32, #tpu.memory_space<vmem>>) attributes {dimension_semantics = [#tpu.dimension_semantics<parallel>, #tpu.dimension_semantics<arbitrary>], iteration_bounds = array<i64: 1, 4>, scalar_prefetch = 0 : i64, scratch_operands = 0 : i64, tpu.core_type = #tpu.core_type<tc>, window_params = [{transform_indices = @transform_0, window_bounds = array<i64: 1, 16, 256>}, {transform_indices = @transform_1, window_bounds = array<i64: 1, 1, 1, 256>}, {transform_indices = @transform_2, window_bounds = array<i64: 1, 1, 1, 256>}, {transform_indices = @transform_3, window_bounds = array<i64: 1, 1, 256, 768>}, {transform_indices = @transform_4, window_bounds = array<i64: 1, 1, 1, 768>}, {transform_indices = @transform_5, window_bounds = array<i64: 1, 1, 256, 256>}, {transform_indices = @transform_6, window_bounds = array<i64: 1, 1, 1, 256>}, {transform_indices = @transform_7, window_bounds = array<i64: 1, 1, 1, 256>}, {transform_indices = @transform_8, window_bounds = array<i64: 1, 1, 1, 256>}, {transform_indices = @transform_9, window_bounds = array<i64: 1, 1, 256, 1024>}, {transform_indices = @transform_10, window_bounds = array<i64: 1, 1, 1, 1024>}, {transform_indices = @transform_11, window_bounds = array<i64: 1, 1, 1024, 256>}, {transform_indices = @transform_12, window_bounds = array<i64: 1, 1, 1, 256>}, {transform_indices = @transform_13, window_bounds = array<i64: 1, 16, 256>}]} {
    %c0_i32 = arith.constant 0 : i32
    %0 = arith.cmpi eq, %arg1, %c0_i32 : i32
    %1 = arith.extui %0 : i1 to i32
    %c0_i32_0 = arith.constant 0 : i32
    %2 = arith.cmpi ne, %1, %c0_i32_0 : i32
    scf.if %2 {
      %c0_107 = arith.constant 0 : index
      %c0_108 = arith.constant 0 : index
      %c0_109 = arith.constant 0 : index
      %249 = vector.load %arg2[%c0_107, %c0_108, %c0_109] : memref<1x16x256xf32, #tpu.memory_space<vmem>>, vector<1x16x256xf32>
      %c0_110 = arith.constant 0 : index
      %c0_111 = arith.constant 0 : index
      %c0_112 = arith.constant 0 : index
      %250 = vector.load %arg15[%c0_110, %c0_111, %c0_112] : memref<1x16x256xf32, #tpu.memory_space<vmem>>, vector<1x16x256xf32>
      tpu.vector_store %arg15[%c0_110, %c0_111, %c0_112], %249 {strides = array<i32>} : memref<1x16x256xf32, #tpu.memory_space<vmem>>, vector<1x16x256xf32>,
    } else {
    }
    %c0 = arith.constant 0 : index
    %c0_1 = arith.constant 0 : index
    %c0_2 = arith.constant 0 : index
    %3 = vector.load %arg15[%c0, %c0_1, %c0_2] : memref<1x16x256xf32, #tpu.memory_space<vmem>>, vector<1x16x256xf32>
    %4 = vector.shape_cast %3 : vector<1x16x256xf32> to vector<16x256xf32>
    %c0_3 = arith.constant 0 : index
    %c0_4 = arith.constant 0 : index
    %c0_5 = arith.constant 0 : index
    %c0_6 = arith.constant 0 : index
    %5 = vector.load %arg3[%c0_3, %c0_4, %c0_5, %c0_6] : memref<1x1x1x256xf32, #tpu.memory_space<vmem>>, vector<1x1x1x256xf32>
    %6 = vector.shape_cast %5 : vector<1x1x1x256xf32> to vector<1x256xf32>
    %c0_7 = arith.constant 0 : index
    %c0_8 = arith.constant 0 : index
    %c0_9 = arith.constant 0 : index
    %c0_10 = arith.constant 0 : index
    %7 = vector.load %arg4[%c0_7, %c0_8, %c0_9, %c0_10] : memref<1x1x1x256xf32, #tpu.memory_space<vmem>>, vector<1x1x1x256xf32>
    %8 = vector.shape_cast %7 : vector<1x1x1x256xf32> to vector<1x256xf32>
    %cst = arith.constant dense<0.000000e+00> : vector<16xf32>
    %9 = vector.multi_reduction <add>, %4, %cst [1] : vector<16x256xf32> to vector<16xf32>
    %10 = vector.shape_cast %9 : vector<16xf32> to vector<16x1xf32>
    %cst_11 = arith.constant 2.560000e+02 : f32
    %11 = vector.broadcast %cst_11 : f32 to vector<16x1xf32>
    %12 = arith.divf %10, %11 : vector<16x1xf32>
    %13 = vector.broadcast %12 : vector<16x1xf32> to vector<16x256xf32>
    %14 = arith.subf %4, %13 : vector<16x256xf32>
    %15 = arith.mulf %14, %14 : vector<16x256xf32>
    %cst_12 = arith.constant dense<0.000000e+00> : vector<16xf32>
    %16 = vector.multi_reduction <add>, %15, %cst_12 [1] : vector<16x256xf32> to vector<16xf32>
    %17 = vector.shape_cast %16 : vector<16xf32> to vector<16x1xf32>
    %cst_13 = arith.constant 2.560000e+02 : f32
    %18 = vector.broadcast %cst_13 : f32 to vector<16x1xf32>
    %19 = arith.divf %17, %18 : vector<16x1xf32>
    %cst_14 = arith.constant 9.99999997E-7 : f32
    %20 = vector.broadcast %cst_14 : f32 to vector<16x1xf32>
    %21 = arith.addf %19, %20 : vector<16x1xf32>
    %22 = math.rsqrt %21 : vector<16x1xf32>
    %23 = vector.broadcast %22 : vector<16x1xf32> to vector<16x256xf32>
    %24 = arith.mulf %14, %23 : vector<16x256xf32>
    %25 = vector.broadcast %6 : vector<1x256xf32> to vector<16x256xf32>
    %26 = arith.mulf %24, %25 : vector<16x256xf32>
    %27 = vector.broadcast %8 : vector<1x256xf32> to vector<16x256xf32>
    %28 = arith.addf %26, %27 : vector<16x256xf32>
    %29 = arith.truncf %28 : vector<16x256xf32> to vector<16x256xbf16>
    %c0_15 = arith.constant 0 : index
    %c0_16 = arith.constant 0 : index
    %c0_17 = arith.constant 0 : index
    %c0_18 = arith.constant 0 : index
    %30 = vector.load %arg5[%c0_15, %c0_16, %c0_17, %c0_18] : memref<1x1x256x768xbf16, #tpu.memory_space<vmem>>, vector<1x1x256x768xbf16>
    %31 = vector.shape_cast %30 : vector<1x1x256x768xbf16> to vector<256x768xbf16>
    %cst_19 = arith.constant dense<0.000000e+00> : vector<16x768xf32>
    %32 = tpu.matmul %29, %31, %cst_19 {dimension_numbers = #tpu.dot_dimension_numbers<[1], [0], [0], [1], [0, 0, 1, 1], [], []>} : vector<16x256xbf16>, vector<256x768xbf16>, vector<16x768xf32> -> vector<16x768xf32>
    %c0_20 = arith.constant 0 : index
    %c0_21 = arith.constant 0 : index
    %c0_22 = arith.constant 0 : index
    %c0_23 = arith.constant 0 : index
    %33 = vector.load %arg6[%c0_20, %c0_21, %c0_22, %c0_23] : memref<1x1x1x768xf32, #tpu.memory_space<vmem>>, vector<1x1x1x768xf32>
    %34 = vector.shape_cast %33 : vector<1x1x1x768xf32> to vector<1x768xf32>
    %35 = vector.broadcast %34 : vector<1x768xf32> to vector<16x768xf32>
    %36 = arith.addf %32, %35 : vector<16x768xf32>
    %c0_24 = arith.constant 0 : index
    %c0_25 = arith.constant 0 : index
    %c0_26 = arith.constant 0 : index
    %c0_27 = arith.constant 0 : index
    %37 = vector.load %arg7[%c0_24, %c0_25, %c0_26, %c0_27] : memref<1x1x256x256xbf16, #tpu.memory_space<vmem>>, vector<1x1x256x256xbf16>
    %38 = vector.shape_cast %37 : vector<1x1x256x256xbf16> to vector<256x256xbf16>
    %cst_28 = arith.constant 0.000000e+00 : f32
    %39 = vector.broadcast %cst_28 : f32 to vector<16x256xf32>
    %40 = vector.extract_strided_slice %36 {offsets = [0, 0], sizes = [16, 64], strides = [1, 1]} : vector<16x768xf32> to vector<16x64xf32>
    %cst_29 = arith.constant 1.250000e-01 : f32
    %41 = vector.broadcast %cst_29 : f32 to vector<16x64xf32>
    %42 = arith.mulf %40, %41 : vector<16x64xf32>
    %43 = vector.shape_cast %42 : vector<16x64xf32> to vector<2x8x64xf32>
    %44 = arith.truncf %43 : vector<2x8x64xf32> to vector<2x8x64xbf16>
    %45 = vector.extract_strided_slice %36 {offsets = [0, 256], sizes = [16, 64], strides = [1, 1]} : vector<16x768xf32> to vector<16x64xf32>
    %46 = vector.shape_cast %45 : vector<16x64xf32> to vector<2x8x64xf32>
    %47 = arith.truncf %46 : vector<2x8x64xf32> to vector<2x8x64xbf16>
    %48 = vector.extract_strided_slice %36 {offsets = [0, 512], sizes = [16, 64], strides = [1, 1]} : vector<16x768xf32> to vector<16x64xf32>
    %49 = vector.shape_cast %48 : vector<16x64xf32> to vector<2x8x64xf32>
    %50 = arith.truncf %49 : vector<2x8x64xf32> to vector<2x8x64xbf16>
    "tpu.trace_start"() <{level = 10 : i32, message = "bqd,bkd->bqk"}> : () -> ()
    %cst_30 = arith.constant dense<0.000000e+00> : vector<2x8x8xf32>
    %51 = tpu.matmul %44, %47, %cst_30 {dimension_numbers = #tpu.dot_dimension_numbers<[2], [2], [1], [1], [0, 0, 0, 1, 1, 1], [0], [0]>} : vector<2x8x64xbf16>, vector<2x8x64xbf16>, vector<2x8x8xf32> -> vector<2x8x8xf32>
    "tpu.trace_stop"() : () -> ()
    %cst_31 = arith.constant dense<0xFF800000> : vector<2x8xf32>
    %52 = vector.multi_reduction <maximumf>, %51, %cst_31 [2] : vector<2x8x8xf32> to vector<2x8xf32>
    %53 = vector.shape_cast %52 : vector<2x8xf32> to vector<2x8x1xf32>
    %54 = vector.broadcast %53 : vector<2x8x1xf32> to vector<2x8x8xf32>
    %55 = arith.subf %51, %54 : vector<2x8x8xf32>
    %56 = math.exp %55 : vector<2x8x8xf32>
    %cst_32 = arith.constant dense<0.000000e+00> : vector<2x8xf32>
    %57 = vector.multi_reduction <add>, %56, %cst_32 [2] : vector<2x8x8xf32> to vector<2x8xf32>
    %58 = vector.shape_cast %57 : vector<2x8xf32> to vector<2x8x1xf32>
    %59 = tpu.reciprocal %58 {approx = true} : vector<2x8x1xf32> -> vector<2x8x1xf32>
    %60 = vector.broadcast %59 : vector<2x8x1xf32> to vector<2x8x8xf32>
    %61 = arith.mulf %56, %60 : vector<2x8x8xf32>
    %62 = arith.truncf %61 : vector<2x8x8xf32> to vector<2x8x8xbf16>
    "tpu.trace_start"() <{level = 10 : i32, message = "bqk,bkd->bqd"}> : () -> ()
    %cst_33 = arith.constant dense<0.000000e+00> : vector<2x8x64xf32>
    %63 = tpu.matmul %62, %50, %cst_33 {dimension_numbers = #tpu.dot_dimension_numbers<[2], [1], [1], [2], [0, 0, 0, 1, 1, 2], [0], [0]>} : vector<2x8x8xbf16>, vector<2x8x64xbf16>, vector<2x8x64xf32> -> vector<2x8x64xf32>
    "tpu.trace_stop"() : () -> ()
    %64 = vector.shape_cast %63 : vector<2x8x64xf32> to vector<16x64xf32>
    %65 = arith.truncf %64 : vector<16x64xf32> to vector<16x64xbf16>
    %66 = vector.extract_strided_slice %38 {offsets = [0, 0], sizes = [64, 256], strides = [1, 1]} : vector<256x256xbf16> to vector<64x256xbf16>
    %cst_34 = arith.constant dense<0.000000e+00> : vector<16x256xf32>
    %67 = tpu.matmul %65, %66, %cst_34 {dimension_numbers = #tpu.dot_dimension_numbers<[1], [0], [0], [1], [0, 0, 1, 1], [], []>} : vector<16x64xbf16>, vector<64x256xbf16>, vector<16x256xf32> -> vector<16x256xf32>
    %68 = arith.addf %39, %67 : vector<16x256xf32>
    %69 = vector.extract_strided_slice %36 {offsets = [0, 64], sizes = [16, 64], strides = [1, 1]} : vector<16x768xf32> to vector<16x64xf32>
    %cst_35 = arith.constant 1.250000e-01 : f32
    %70 = vector.broadcast %cst_35 : f32 to vector<16x64xf32>
    %71 = arith.mulf %69, %70 : vector<16x64xf32>
    %72 = vector.shape_cast %71 : vector<16x64xf32> to vector<2x8x64xf32>
    %73 = arith.truncf %72 : vector<2x8x64xf32> to vector<2x8x64xbf16>
    %74 = vector.extract_strided_slice %36 {offsets = [0, 320], sizes = [16, 64], strides = [1, 1]} : vector<16x768xf32> to vector<16x64xf32>
    %75 = vector.shape_cast %74 : vector<16x64xf32> to vector<2x8x64xf32>
    %76 = arith.truncf %75 : vector<2x8x64xf32> to vector<2x8x64xbf16>
    %77 = vector.extract_strided_slice %36 {offsets = [0, 576], sizes = [16, 64], strides = [1, 1]} : vector<16x768xf32> to vector<16x64xf32>
    %78 = vector.shape_cast %77 : vector<16x64xf32> to vector<2x8x64xf32>
    %79 = arith.truncf %78 : vector<2x8x64xf32> to vector<2x8x64xbf16>
    "tpu.trace_start"() <{level = 10 : i32, message = "bqd,bkd->bqk"}> : () -> ()
    %cst_36 = arith.constant dense<0.000000e+00> : vector<2x8x8xf32>
    %80 = tpu.matmul %73, %76, %cst_36 {dimension_numbers = #tpu.dot_dimension_numbers<[2], [2], [1], [1], [0, 0, 0, 1, 1, 1], [0], [0]>} : vector<2x8x64xbf16>, vector<2x8x64xbf16>, vector<2x8x8xf32> -> vector<2x8x8xf32>
    "tpu.trace_stop"() : () -> ()
    %cst_37 = arith.constant dense<0xFF800000> : vector<2x8xf32>
    %81 = vector.multi_reduction <maximumf>, %80, %cst_37 [2] : vector<2x8x8xf32> to vector<2x8xf32>
    %82 = vector.shape_cast %81 : vector<2x8xf32> to vector<2x8x1xf32>
    %83 = vector.broadcast %82 : vector<2x8x1xf32> to vector<2x8x8xf32>
    %84 = arith.subf %80, %83 : vector<2x8x8xf32>
    %85 = math.exp %84 : vector<2x8x8xf32>
    %cst_38 = arith.constant dense<0.000000e+00> : vector<2x8xf32>
    %86 = vector.multi_reduction <add>, %85, %cst_38 [2] : vector<2x8x8xf32> to vector<2x8xf32>
    %87 = vector.shape_cast %86 : vector<2x8xf32> to vector<2x8x1xf32>
    %88 = tpu.reciprocal %87 {approx = true} : vector<2x8x1xf32> -> vector<2x8x1xf32>
    %89 = vector.broadcast %88 : vector<2x8x1xf32> to vector<2x8x8xf32>
    %90 = arith.mulf %85, %89 : vector<2x8x8xf32>
    %91 = arith.truncf %90 : vector<2x8x8xf32> to vector<2x8x8xbf16>
    "tpu.trace_start"() <{level = 10 : i32, message = "bqk,bkd->bqd"}> : () -> ()
    %cst_39 = arith.constant dense<0.000000e+00> : vector<2x8x64xf32>
    %92 = tpu.matmul %91, %79, %cst_39 {dimension_numbers = #tpu.dot_dimension_numbers<[2], [1], [1], [2], [0, 0, 0, 1, 1, 2], [0], [0]>} : vector<2x8x8xbf16>, vector<2x8x64xbf16>, vector<2x8x64xf32> -> vector<2x8x64xf32>
    "tpu.trace_stop"() : () -> ()
    %93 = vector.shape_cast %92 : vector<2x8x64xf32> to vector<16x64xf32>
    %94 = arith.truncf %93 : vector<16x64xf32> to vector<16x64xbf16>
    %95 = vector.extract_strided_slice %38 {offsets = [64, 0], sizes = [64, 256], strides = [1, 1]} : vector<256x256xbf16> to vector<64x256xbf16>
    %cst_40 = arith.constant dense<0.000000e+00> : vector<16x256xf32>
    %96 = tpu.matmul %94, %95, %cst_40 {dimension_numbers = #tpu.dot_dimension_numbers<[1], [0], [0], [1], [0, 0, 1, 1], [], []>} : vector<16x64xbf16>, vector<64x256xbf16>, vector<16x256xf32> -> vector<16x256xf32>
    %97 = arith.addf %68, %96 : vector<16x256xf32>
    %98 = vector.extract_strided_slice %36 {offsets = [0, 128], sizes = [16, 64], strides = [1, 1]} : vector<16x768xf32> to vector<16x64xf32>
    %cst_41 = arith.constant 1.250000e-01 : f32
    %99 = vector.broadcast %cst_41 : f32 to vector<16x64xf32>
    %100 = arith.mulf %98, %99 : vector<16x64xf32>
    %101 = vector.shape_cast %100 : vector<16x64xf32> to vector<2x8x64xf32>
    %102 = arith.truncf %101 : vector<2x8x64xf32> to vector<2x8x64xbf16>
    %103 = vector.extract_strided_slice %36 {offsets = [0, 384], sizes = [16, 64], strides = [1, 1]} : vector<16x768xf32> to vector<16x64xf32>
    %104 = vector.shape_cast %103 : vector<16x64xf32> to vector<2x8x64xf32>
    %105 = arith.truncf %104 : vector<2x8x64xf32> to vector<2x8x64xbf16>
    %106 = vector.extract_strided_slice %36 {offsets = [0, 640], sizes = [16, 64], strides = [1, 1]} : vector<16x768xf32> to vector<16x64xf32>
    %107 = vector.shape_cast %106 : vector<16x64xf32> to vector<2x8x64xf32>
    %108 = arith.truncf %107 : vector<2x8x64xf32> to vector<2x8x64xbf16>
    "tpu.trace_start"() <{level = 10 : i32, message = "bqd,bkd->bqk"}> : () -> ()
    %cst_42 = arith.constant dense<0.000000e+00> : vector<2x8x8xf32>
    %109 = tpu.matmul %102, %105, %cst_42 {dimension_numbers = #tpu.dot_dimension_numbers<[2], [2], [1], [1], [0, 0, 0, 1, 1, 1], [0], [0]>} : vector<2x8x64xbf16>, vector<2x8x64xbf16>, vector<2x8x8xf32> -> vector<2x8x8xf32>
    "tpu.trace_stop"() : () -> ()
    %cst_43 = arith.constant dense<0xFF800000> : vector<2x8xf32>
    %110 = vector.multi_reduction <maximumf>, %109, %cst_43 [2] : vector<2x8x8xf32> to vector<2x8xf32>
    %111 = vector.shape_cast %110 : vector<2x8xf32> to vector<2x8x1xf32>
    %112 = vector.broadcast %111 : vector<2x8x1xf32> to vector<2x8x8xf32>
    %113 = arith.subf %109, %112 : vector<2x8x8xf32>
    %114 = math.exp %113 : vector<2x8x8xf32>
    %cst_44 = arith.constant dense<0.000000e+00> : vector<2x8xf32>
    %115 = vector.multi_reduction <add>, %114, %cst_44 [2] : vector<2x8x8xf32> to vector<2x8xf32>
    %116 = vector.shape_cast %115 : vector<2x8xf32> to vector<2x8x1xf32>
    %117 = tpu.reciprocal %116 {approx = true} : vector<2x8x1xf32> -> vector<2x8x1xf32>
    %118 = vector.broadcast %117 : vector<2x8x1xf32> to vector<2x8x8xf32>
    %119 = arith.mulf %114, %118 : vector<2x8x8xf32>
    %120 = arith.truncf %119 : vector<2x8x8xf32> to vector<2x8x8xbf16>
    "tpu.trace_start"() <{level = 10 : i32, message = "bqk,bkd->bqd"}> : () -> ()
    %cst_45 = arith.constant dense<0.000000e+00> : vector<2x8x64xf32>
    %121 = tpu.matmul %120, %108, %cst_45 {dimension_numbers = #tpu.dot_dimension_numbers<[2], [1], [1], [2], [0, 0, 0, 1, 1, 2], [0], [0]>} : vector<2x8x8xbf16>, vector<2x8x64xbf16>, vector<2x8x64xf32> -> vector<2x8x64xf32>
    "tpu.trace_stop"() : () -> ()
    %122 = vector.shape_cast %121 : vector<2x8x64xf32> to vector<16x64xf32>
    %123 = arith.truncf %122 : vector<16x64xf32> to vector<16x64xbf16>
    %124 = vector.extract_strided_slice %38 {offsets = [128, 0], sizes = [64, 256], strides = [1, 1]} : vector<256x256xbf16> to vector<64x256xbf16>
    %cst_46 = arith.constant dense<0.000000e+00> : vector<16x256xf32>
    %125 = tpu.matmul %123, %124, %cst_46 {dimension_numbers = #tpu.dot_dimension_numbers<[1], [0], [0], [1], [0, 0, 1, 1], [], []>} : vector<16x64xbf16>, vector<64x256xbf16>, vector<16x256xf32> -> vector<16x256xf32>
    %126 = arith.addf %97, %125 : vector<16x256xf32>
    %127 = vector.extract_strided_slice %36 {offsets = [0, 192], sizes = [16, 64], strides = [1, 1]} : vector<16x768xf32> to vector<16x64xf32>
    %cst_47 = arith.constant 1.250000e-01 : f32
    %128 = vector.broadcast %cst_47 : f32 to vector<16x64xf32>
    %129 = arith.mulf %127, %128 : vector<16x64xf32>
    %130 = vector.shape_cast %129 : vector<16x64xf32> to vector<2x8x64xf32>
    %131 = arith.truncf %130 : vector<2x8x64xf32> to vector<2x8x64xbf16>
    %132 = vector.extract_strided_slice %36 {offsets = [0, 448], sizes = [16, 64], strides = [1, 1]} : vector<16x768xf32> to vector<16x64xf32>
    %133 = vector.shape_cast %132 : vector<16x64xf32> to vector<2x8x64xf32>
    %134 = arith.truncf %133 : vector<2x8x64xf32> to vector<2x8x64xbf16>
    %135 = vector.extract_strided_slice %36 {offsets = [0, 704], sizes = [16, 64], strides = [1, 1]} : vector<16x768xf32> to vector<16x64xf32>
    %136 = vector.shape_cast %135 : vector<16x64xf32> to vector<2x8x64xf32>
    %137 = arith.truncf %136 : vector<2x8x64xf32> to vector<2x8x64xbf16>
    "tpu.trace_start"() <{level = 10 : i32, message = "bqd,bkd->bqk"}> : () -> ()
    %cst_48 = arith.constant dense<0.000000e+00> : vector<2x8x8xf32>
    %138 = tpu.matmul %131, %134, %cst_48 {dimension_numbers = #tpu.dot_dimension_numbers<[2], [2], [1], [1], [0, 0, 0, 1, 1, 1], [0], [0]>} : vector<2x8x64xbf16>, vector<2x8x64xbf16>, vector<2x8x8xf32> -> vector<2x8x8xf32>
    "tpu.trace_stop"() : () -> ()
    %cst_49 = arith.constant dense<0xFF800000> : vector<2x8xf32>
    %139 = vector.multi_reduction <maximumf>, %138, %cst_49 [2] : vector<2x8x8xf32> to vector<2x8xf32>
    %140 = vector.shape_cast %139 : vector<2x8xf32> to vector<2x8x1xf32>
    %141 = vector.broadcast %140 : vector<2x8x1xf32> to vector<2x8x8xf32>
    %142 = arith.subf %138, %141 : vector<2x8x8xf32>
    %143 = math.exp %142 : vector<2x8x8xf32>
    %cst_50 = arith.constant dense<0.000000e+00> : vector<2x8xf32>
    %144 = vector.multi_reduction <add>, %143, %cst_50 [2] : vector<2x8x8xf32> to vector<2x8xf32>
    %145 = vector.shape_cast %144 : vector<2x8xf32> to vector<2x8x1xf32>
    %146 = tpu.reciprocal %145 {approx = true} : vector<2x8x1xf32> -> vector<2x8x1xf32>
    %147 = vector.broadcast %146 : vector<2x8x1xf32> to vector<2x8x8xf32>
    %148 = arith.mulf %143, %147 : vector<2x8x8xf32>
    %149 = arith.truncf %148 : vector<2x8x8xf32> to vector<2x8x8xbf16>
    "tpu.trace_start"() <{level = 10 : i32, message = "bqk,bkd->bqd"}> : () -> ()
    %cst_51 = arith.constant dense<0.000000e+00> : vector<2x8x64xf32>
    %150 = tpu.matmul %149, %137, %cst_51 {dimension_numbers = #tpu.dot_dimension_numbers<[2], [1], [1], [2], [0, 0, 0, 1, 1, 2], [0], [0]>} : vector<2x8x8xbf16>, vector<2x8x64xbf16>, vector<2x8x64xf32> -> vector<2x8x64xf32>
    "tpu.trace_stop"() : () -> ()
    %151 = vector.shape_cast %150 : vector<2x8x64xf32> to vector<16x64xf32>
    %152 = arith.truncf %151 : vector<16x64xf32> to vector<16x64xbf16>
    %153 = vector.extract_strided_slice %38 {offsets = [192, 0], sizes = [64, 256], strides = [1, 1]} : vector<256x256xbf16> to vector<64x256xbf16>
    %cst_52 = arith.constant dense<0.000000e+00> : vector<16x256xf32>
    %154 = tpu.matmul %152, %153, %cst_52 {dimension_numbers = #tpu.dot_dimension_numbers<[1], [0], [0], [1], [0, 0, 1, 1], [], []>} : vector<16x64xbf16>, vector<64x256xbf16>, vector<16x256xf32> -> vector<16x256xf32>
    %155 = arith.addf %126, %154 : vector<16x256xf32>
    %156 = arith.addf %4, %155 : vector<16x256xf32>
    %c0_53 = arith.constant 0 : index
    %c0_54 = arith.constant 0 : index
    %c0_55 = arith.constant 0 : index
    %c0_56 = arith.constant 0 : index
    %157 = vector.load %arg8[%c0_53, %c0_54, %c0_55, %c0_56] : memref<1x1x1x256xf32, #tpu.memory_space<vmem>>, vector<1x1x1x256xf32>
    %158 = vector.shape_cast %157 : vector<1x1x1x256xf32> to vector<1x256xf32>
    %159 = vector.broadcast %158 : vector<1x256xf32> to vector<16x256xf32>
    %160 = arith.addf %156, %159 : vector<16x256xf32>
    %c0_57 = arith.constant 0 : index
    %c0_58 = arith.constant 0 : index
    %c0_59 = arith.constant 0 : index
    %c0_60 = arith.constant 0 : index
    %161 = vector.load %arg9[%c0_57, %c0_58, %c0_59, %c0_60] : memref<1x1x1x256xf32, #tpu.memory_space<vmem>>, vector<1x1x1x256xf32>
    %162 = vector.shape_cast %161 : vector<1x1x1x256xf32> to vector<1x256xf32>
    %c0_61 = arith.constant 0 : index
    %c0_62 = arith.constant 0 : index
    %c0_63 = arith.constant 0 : index
    %c0_64 = arith.constant 0 : index
    %163 = vector.load %arg10[%c0_61, %c0_62, %c0_63, %c0_64] : memref<1x1x1x256xf32, #tpu.memory_space<vmem>>, vector<1x1x1x256xf32>
    %164 = vector.shape_cast %163 : vector<1x1x1x256xf32> to vector<1x256xf32>
    %cst_65 = arith.constant dense<0.000000e+00> : vector<16xf32>
    %165 = vector.multi_reduction <add>, %160, %cst_65 [1] : vector<16x256xf32> to vector<16xf32>
    %166 = vector.shape_cast %165 : vector<16xf32> to vector<16x1xf32>
    %cst_66 = arith.constant 2.560000e+02 : f32
    %167 = vector.broadcast %cst_66 : f32 to vector<16x1xf32>
    %168 = arith.divf %166, %167 : vector<16x1xf32>
    %169 = vector.broadcast %168 : vector<16x1xf32> to vector<16x256xf32>
    %170 = arith.subf %160, %169 : vector<16x256xf32>
    %171 = arith.mulf %170, %170 : vector<16x256xf32>
    %cst_67 = arith.constant dense<0.000000e+00> : vector<16xf32>
    %172 = vector.multi_reduction <add>, %171, %cst_67 [1] : vector<16x256xf32> to vector<16xf32>
    %173 = vector.shape_cast %172 : vector<16xf32> to vector<16x1xf32>
    %cst_68 = arith.constant 2.560000e+02 : f32
    %174 = vector.broadcast %cst_68 : f32 to vector<16x1xf32>
    %175 = arith.divf %173, %174 : vector<16x1xf32>
    %cst_69 = arith.constant 9.99999997E-7 : f32
    %176 = vector.broadcast %cst_69 : f32 to vector<16x1xf32>
    %177 = arith.addf %175, %176 : vector<16x1xf32>
    %178 = math.rsqrt %177 : vector<16x1xf32>
    %179 = vector.broadcast %178 : vector<16x1xf32> to vector<16x256xf32>
    %180 = arith.mulf %170, %179 : vector<16x256xf32>
    %181 = vector.broadcast %162 : vector<1x256xf32> to vector<16x256xf32>
    %182 = arith.mulf %180, %181 : vector<16x256xf32>
    %183 = vector.broadcast %164 : vector<1x256xf32> to vector<16x256xf32>
    %184 = arith.addf %182, %183 : vector<16x256xf32>
    %185 = arith.truncf %184 : vector<16x256xf32> to vector<16x256xbf16>
    %c0_70 = arith.constant 0 : index
    %c0_71 = arith.constant 0 : index
    %c0_72 = arith.constant 0 : index
    %c0_73 = arith.constant 0 : index
    %186 = vector.load %arg11[%c0_70, %c0_71, %c0_72, %c0_73] : memref<1x1x256x1024xbf16, #tpu.memory_space<vmem>>, vector<1x1x256x1024xbf16>
    %187 = vector.shape_cast %186 : vector<1x1x256x1024xbf16> to vector<256x1024xbf16>
    %cst_74 = arith.constant dense<0.000000e+00> : vector<16x1024xf32>
    %188 = tpu.matmul %185, %187, %cst_74 {dimension_numbers = #tpu.dot_dimension_numbers<[1], [0], [0], [1], [0, 0, 1, 1], [], []>} : vector<16x256xbf16>, vector<256x1024xbf16>, vector<16x1024xf32> -> vector<16x1024xf32>
    %c0_75 = arith.constant 0 : index
    %c0_76 = arith.constant 0 : index
    %c0_77 = arith.constant 0 : index
    %c0_78 = arith.constant 0 : index
    %189 = vector.load %arg12[%c0_75, %c0_76, %c0_77, %c0_78] : memref<1x1x1x1024xf32, #tpu.memory_space<vmem>>, vector<1x1x1x1024xf32>
    %190 = vector.shape_cast %189 : vector<1x1x1x1024xf32> to vector<1x1024xf32>
    %191 = vector.broadcast %190 : vector<1x1024xf32> to vector<16x1024xf32>
    %192 = arith.addf %188, %191 : vector<16x1024xf32>
    %cst_79 = arith.constant 5.000000e-01 : f32
    %193 = vector.broadcast %cst_79 : f32 to vector<16x1024xf32>
    %194 = arith.mulf %193, %192 : vector<16x1024xf32>
    %cst_80 = arith.constant 0.707106769 : f32
    %195 = vector.broadcast %cst_80 : f32 to vector<16x1024xf32>
    %196 = arith.mulf %192, %195 : vector<16x1024xf32>
    %cst_81 = arith.constant 0.000000e+00 : f32
    %197 = vector.broadcast %cst_81 : f32 to vector<16x1024xf32>
    %198 = arith.cmpf oge, %196, %197 : vector<16x1024xf32>
    %cst_82 = arith.constant 1.000000e+00 : f32
    %cst_83 = arith.constant -1.000000e+00 : f32
    %199 = vector.broadcast %cst_82 : f32 to vector<16x1024xf32>
    %200 = vector.broadcast %cst_83 : f32 to vector<16x1024xf32>
    %201 = arith.select %198, %199, %200 : vector<16x1024xi1>, vector<16x1024xf32>
    %202 = math.absf %196 : vector<16x1024xf32>
    %cst_84 = arith.constant 0.327591091 : f32
    %203 = vector.broadcast %cst_84 : f32 to vector<16x1024xf32>
    %204 = arith.mulf %203, %202 : vector<16x1024xf32>
    %cst_85 = arith.constant 1.000000e+00 : f32
    %205 = vector.broadcast %cst_85 : f32 to vector<16x1024xf32>
    %206 = arith.addf %205, %204 : vector<16x1024xf32>
    %207 = tpu.reciprocal %206 {approx = true} : vector<16x1024xf32> -> vector<16x1024xf32>
    %208 = arith.mulf %206, %207 : vector<16x1024xf32>
    %cst_86 = arith.constant 2.000000e+00 : f32
    %209 = vector.broadcast %cst_86 : f32 to vector<16x1024xf32>
    %210 = arith.subf %209, %208 : vector<16x1024xf32>
    %211 = arith.mulf %207, %210 : vector<16x1024xf32>
    %cst_87 = arith.constant 1.06140542 : f32
    %212 = vector.broadcast %cst_87 : f32 to vector<16x1024xf32>
    %213 = arith.mulf %212, %211 : vector<16x1024xf32>
    %cst_88 = arith.constant -1.45315206 : f32
    %214 = vector.broadcast %cst_88 : f32 to vector<16x1024xf32>
    %215 = arith.addf %213, %214 : vector<16x1024xf32>
    %216 = arith.mulf %215, %211 : vector<16x1024xf32>
    %cst_89 = arith.constant 1.42141378 : f32
    %217 = vector.broadcast %cst_89 : f32 to vector<16x1024xf32>
    %218 = arith.addf %216, %217 : vector<16x1024xf32>
    %219 = arith.mulf %218, %211 : vector<16x1024xf32>
    %cst_90 = arith.constant -0.284496725 : f32
    %220 = vector.broadcast %cst_90 : f32 to vector<16x1024xf32>
    %221 = arith.addf %219, %220 : vector<16x1024xf32>
    %222 = arith.mulf %221, %211 : vector<16x1024xf32>
    %cst_91 = arith.constant 0.254829586 : f32
    %223 = vector.broadcast %cst_91 : f32 to vector<16x1024xf32>
    %224 = arith.addf %222, %223 : vector<16x1024xf32>
    %225 = arith.mulf %224, %211 : vector<16x1024xf32>
    %cst_92 = arith.constant 0.000000e+00 : f32
    %226 = vector.broadcast %cst_92 : f32 to vector<16x1024xf32>
    %227 = arith.subf %226, %202 : vector<16x1024xf32>
    %228 = arith.mulf %227, %202 : vector<16x1024xf32>
    %229 = math.exp %228 : vector<16x1024xf32>
    %230 = arith.mulf %225, %229 : vector<16x1024xf32>
    %cst_93 = arith.constant 1.000000e+00 : f32
    %231 = vector.broadcast %cst_93 : f32 to vector<16x1024xf32>
    %232 = arith.subf %231, %230 : vector<16x1024xf32>
    %233 = arith.mulf %201, %232 : vector<16x1024xf32>
    %cst_94 = arith.constant 1.000000e+00 : f32
    %234 = vector.broadcast %cst_94 : f32 to vector<16x1024xf32>
    %235 = arith.addf %234, %233 : vector<16x1024xf32>
    %236 = arith.mulf %194, %235 : vector<16x1024xf32>
    %237 = arith.truncf %236 : vector<16x1024xf32> to vector<16x1024xbf16>
    %c0_95 = arith.constant 0 : index
    %c0_96 = arith.constant 0 : index
    %c0_97 = arith.constant 0 : index
    %c0_98 = arith.constant 0 : index
    %238 = vector.load %arg13[%c0_95, %c0_96, %c0_97, %c0_98] : memref<1x1x1024x256xbf16, #tpu.memory_space<vmem>>, vector<1x1x1024x256xbf16>
    %239 = vector.shape_cast %238 : vector<1x1x1024x256xbf16> to vector<1024x256xbf16>
    %cst_99 = arith.constant dense<0.000000e+00> : vector<16x256xf32>
    %240 = tpu.matmul %237, %239, %cst_99 {dimension_numbers = #tpu.dot_dimension_numbers<[1], [0], [0], [1], [0, 0, 1, 1], [], []>} : vector<16x1024xbf16>, vector<1024x256xbf16>, vector<16x256xf32> -> vector<16x256xf32>
    %c0_100 = arith.constant 0 : index
    %c0_101 = arith.constant 0 : index
    %c0_102 = arith.constant 0 : index
    %c0_103 = arith.constant 0 : index
    %241 = vector.load %arg14[%c0_100, %c0_101, %c0_102, %c0_103] : memref<1x1x1x256xf32, #tpu.memory_space<vmem>>, vector<1x1x1x256xf32>
    %242 = vector.shape_cast %241 : vector<1x1x1x256xf32> to vector<1x256xf32>
    %243 = vector.broadcast %242 : vector<1x256xf32> to vector<16x256xf32>
    %244 = arith.addf %240, %243 : vector<16x256xf32>
    %245 = arith.addf %160, %244 : vector<16x256xf32>
    %c0_104 = arith.constant 0 : index
    %c0_105 = arith.constant 0 : index
    %c0_106 = arith.constant 0 : index
    %246 = vector.load %arg15[%c0_104, %c0_105, %c0_106] : memref<1x16x256xf32, #tpu.memory_space<vmem>>, vector<1x16x256xf32>
    %247 = vector.shape_cast %246 : vector<1x16x256xf32> to vector<16x256xf32>
    %248 = vector.shape_cast %245 : vector<16x256xf32> to vector<1x16x256xf32>
    tpu.vector_store %arg15[%c0_104, %c0_105, %c0_106], %248 {strides = array<i32>} : memref<1x16x256xf32, #tpu.memory_space<vmem>>, vector<1x16x256xf32>,
    return
  }
  func.func @transform_0(%arg0: i32, %arg1: i32) -> (i32, i32, i32) {
    %c0_i32 = arith.constant 0 : i32
    %c0_i32_0 = arith.constant 0 : i32
    %c0_i32_1 = arith.constant 0 : i32
    return %arg0, %c0_i32, %c0_i32_0 : i32, i32, i32
  }
  func.func @transform_1(%arg0: i32, %arg1: i32) -> (i32, i32, i32, i32) {
    %c0_i32 = arith.constant 0 : i32
    %c0_i32_0 = arith.constant 0 : i32
    %c0_i32_1 = arith.constant 0 : i32
    return %arg0, %arg1, %c0_i32, %c0_i32_0 : i32, i32, i32, i32
  }
  func.func @transform_2(%arg0: i32, %arg1: i32) -> (i32, i32, i32, i32) {
    %c0_i32 = arith.constant 0 : i32
    %c0_i32_0 = arith.constant 0 : i32
    %c0_i32_1 = arith.constant 0 : i32
    return %arg0, %arg1, %c0_i32, %c0_i32_0 : i32, i32, i32, i32
  }
  func.func @transform_3(%arg0: i32, %arg1: i32) -> (i32, i32, i32, i32) {
    %c0_i32 = arith.constant 0 : i32
    %c0_i32_0 = arith.constant 0 : i32
    %c0_i32_1 = arith.constant 0 : i32
    return %arg0, %arg1, %c0_i32, %c0_i32_0 : i32, i32, i32, i32
  }
  func.func @transform_4(%arg0: i32, %arg1: i32) -> (i32, i32, i32, i32) {
    %c0_i32 = arith.constant 0 : i32
    %c0_i32_0 = arith.constant 0 : i32
    %c0_i32_1 = arith.constant 0 : i32
    return %arg0, %arg1, %c0_i32, %c0_i32_0 : i32, i32, i32, i32
  }
  func.func @transform_5(%arg0: i32, %arg1: i32) -> (i32, i32, i32, i32) {
    %c0_i32 = arith.constant 0 : i32
    %c0_i32_0 = arith.constant 0 : i32
    %c0_i32_1 = arith.constant 0 : i32
    return %arg0, %arg1, %c0_i32, %c0_i32_0 : i32, i32, i32, i32
  }
  func.func @transform_6(%arg0: i32, %arg1: i32) -> (i32, i32, i32, i32) {
    %c0_i32 = arith.constant 0 : i32
    %c0_i32_0 = arith.constant 0 : i32
    %c0_i32_1 = arith.constant 0 : i32
    return %arg0, %arg1, %c0_i32, %c0_i32_0 : i32, i32, i32, i32
  }
  func.func @transform_7(%arg0: i32, %arg1: i32) -> (i32, i32, i32, i32) {
    %c0_i32 = arith.constant 0 : i32
    %c0_i32_0 = arith.constant 0 : i32
    %c0_i32_1 = arith.constant 0 : i32
    return %arg0, %arg1, %c0_i32, %c0_i32_0 : i32, i32, i32, i32
  }
  func.func @transform_8(%arg0: i32, %arg1: i32) -> (i32, i32, i32, i32) {
    %c0_i32 = arith.constant 0 : i32
    %c0_i32_0 = arith.constant 0 : i32
    %c0_i32_1 = arith.constant 0 : i32
    return %arg0, %arg1, %c0_i32, %c0_i32_0 : i32, i32, i32, i32
  }
  func.func @transform_9(%arg0: i32, %arg1: i32) -> (i32, i32, i32, i32) {
    %c0_i32 = arith.constant 0 : i32
    %c0_i32_0 = arith.constant 0 : i32
    %c0_i32_1 = arith.constant 0 : i32
    return %arg0, %arg1, %c0_i32, %c0_i32_0 : i32, i32, i32, i32
  }
  func.func @transform_10(%arg0: i32, %arg1: i32) -> (i32, i32, i32, i32) {
    %c0_i32 = arith.constant 0 : i32
    %c0_i32_0 = arith.constant 0 : i32
    %c0_i32_1 = arith.constant 0 : i32
    return %arg0, %arg1, %c0_i32, %c0_i32_0 : i32, i32, i32, i32
  }
  func.func @transform_11(%arg0: i32, %arg1: i32) -> (i32, i32, i32, i32) {
    %c0_i32 = arith.constant 0 : i32
    %c0_i32_0 = arith.constant 0 : i32
    %c0_i32_1 = arith.constant 0 : i32
    return %arg0, %arg1, %c0_i32, %c0_i32_0 : i32, i32, i32, i32
  }
  func.func @transform_12(%arg0: i32, %arg1: i32) -> (i32, i32, i32, i32) {
    %c0_i32 = arith.constant 0 : i32
    %c0_i32_0 = arith.constant 0 : i32
    %c0_i32_1 = arith.constant 0 : i32
    return %arg0, %arg1, %c0_i32, %c0_i32_0 : i32, i32, i32, i32
  }
  func.func @transform_13(%arg0: i32, %arg1: i32) -> (i32, i32, i32) {
    %c0_i32 = arith.constant 0 : i32
    %c0_i32_0 = arith.constant 0 : i32
    %c0_i32_1 = arith.constant 0 : i32
    return %arg0, %c0_i32, %c0_i32_0 : i32, i32, i32
  }
}

module attributes {stable_mosaic.version = 11 : i64} {
  func.func @_ln_matmul_kernel(%arg0: i32, %arg1: memref<1x16x256xf32, #tpu.memory_space<vmem>>, %arg2: memref<1x256xf32, #tpu.memory_space<vmem>>, %arg3: memref<1x256xf32, #tpu.memory_space<vmem>>, %arg4: memref<1x256x384xbf16, #tpu.memory_space<vmem>>, %arg5: memref<1x1x384xf32, #tpu.memory_space<vmem>>, %arg6: memref<1x16x384xf32, #tpu.memory_space<vmem>>) attributes {dimension_semantics = [#tpu.dimension_semantics<parallel>], iteration_bounds = array<i64: 1>, scalar_prefetch = 0 : i64, scratch_operands = 0 : i64, tpu.core_type = #tpu.core_type<tc>, window_params = [{transform_indices = @transform_0, window_bounds = array<i64: 1, 16, 256>}, {pipeline_mode = #tpu.pipeline_mode<synchronous>, transform_indices = @transform_1, window_bounds = array<i64: 1, 256>}, {pipeline_mode = #tpu.pipeline_mode<synchronous>, transform_indices = @transform_2, window_bounds = array<i64: 1, 256>}, {transform_indices = @transform_3, window_bounds = array<i64: 1, 256, 384>}, {transform_indices = @transform_4, window_bounds = array<i64: 1, 1, 384>}, {transform_indices = @transform_5, window_bounds = array<i64: 1, 16, 384>}]} {
    %c0 = arith.constant 0 : index
    %c0_0 = arith.constant 0 : index
    %c0_1 = arith.constant 0 : index
    %0 = vector.load %arg1[%c0, %c0_0, %c0_1] : memref<1x16x256xf32, #tpu.memory_space<vmem>>, vector<1x16x256xf32>
    %1 = vector.shape_cast %0 : vector<1x16x256xf32> to vector<16x256xf32>
    %c0_2 = arith.constant 0 : index
    %c0_3 = arith.constant 0 : index
    %2 = vector.load %arg2[%c0_2, %c0_3] : memref<1x256xf32, #tpu.memory_space<vmem>>, vector<1x256xf32>
    %c0_4 = arith.constant 0 : index
    %c0_5 = arith.constant 0 : index
    %3 = vector.load %arg3[%c0_4, %c0_5] : memref<1x256xf32, #tpu.memory_space<vmem>>, vector<1x256xf32>
    %cst = arith.constant dense<0.000000e+00> : vector<16xf32>
    %4 = vector.multi_reduction <add>, %1, %cst [1] : vector<16x256xf32> to vector<16xf32>
    %5 = vector.shape_cast %4 : vector<16xf32> to vector<16x1xf32>
    %cst_6 = arith.constant 2.560000e+02 : f32
    %6 = vector.broadcast %cst_6 : f32 to vector<16x1xf32>
    %7 = arith.divf %5, %6 : vector<16x1xf32>
    %8 = vector.broadcast %7 : vector<16x1xf32> to vector<16x256xf32>
    %9 = arith.subf %1, %8 : vector<16x256xf32>
    %10 = arith.mulf %9, %9 : vector<16x256xf32>
    %cst_7 = arith.constant dense<0.000000e+00> : vector<16xf32>
    %11 = vector.multi_reduction <add>, %10, %cst_7 [1] : vector<16x256xf32> to vector<16xf32>
    %12 = vector.shape_cast %11 : vector<16xf32> to vector<16x1xf32>
    %cst_8 = arith.constant 2.560000e+02 : f32
    %13 = vector.broadcast %cst_8 : f32 to vector<16x1xf32>
    %14 = arith.divf %12, %13 : vector<16x1xf32>
    %cst_9 = arith.constant 9.99999997E-7 : f32
    %15 = vector.broadcast %cst_9 : f32 to vector<16x1xf32>
    %16 = arith.addf %14, %15 : vector<16x1xf32>
    %17 = math.rsqrt %16 : vector<16x1xf32>
    %18 = vector.broadcast %17 : vector<16x1xf32> to vector<16x256xf32>
    %19 = arith.mulf %9, %18 : vector<16x256xf32>
    %20 = vector.broadcast %2 : vector<1x256xf32> to vector<16x256xf32>
    %21 = arith.mulf %19, %20 : vector<16x256xf32>
    %22 = vector.broadcast %3 : vector<1x256xf32> to vector<16x256xf32>
    %23 = arith.addf %21, %22 : vector<16x256xf32>
    %24 = arith.truncf %23 : vector<16x256xf32> to vector<16x256xbf16>
    %c0_10 = arith.constant 0 : index
    %c0_11 = arith.constant 0 : index
    %c0_12 = arith.constant 0 : index
    %25 = vector.load %arg4[%c0_10, %c0_11, %c0_12] : memref<1x256x384xbf16, #tpu.memory_space<vmem>>, vector<1x256x384xbf16>
    %26 = vector.shape_cast %25 : vector<1x256x384xbf16> to vector<256x384xbf16>
    %cst_13 = arith.constant dense<0.000000e+00> : vector<16x384xf32>
    %27 = tpu.matmul %24, %26, %cst_13 {dimension_numbers = #tpu.dot_dimension_numbers<[1], [0], [0], [1], [0, 0, 1, 1], [], []>} : vector<16x256xbf16>, vector<256x384xbf16>, vector<16x384xf32> -> vector<16x384xf32>
    %c0_14 = arith.constant 0 : index
    %c0_15 = arith.constant 0 : index
    %c0_16 = arith.constant 0 : index
    %28 = vector.load %arg5[%c0_14, %c0_15, %c0_16] : memref<1x1x384xf32, #tpu.memory_space<vmem>>, vector<1x1x384xf32>
    %29 = vector.shape_cast %28 : vector<1x1x384xf32> to vector<1x384xf32>
    %30 = vector.broadcast %29 : vector<1x384xf32> to vector<16x384xf32>
    %31 = arith.addf %27, %30 : vector<16x384xf32>
    %c0_17 = arith.constant 0 : index
    %c0_18 = arith.constant 0 : index
    %c0_19 = arith.constant 0 : index
    %32 = vector.load %arg6[%c0_17, %c0_18, %c0_19] : memref<1x16x384xf32, #tpu.memory_space<vmem>>, vector<1x16x384xf32>
    %33 = vector.shape_cast %32 : vector<1x16x384xf32> to vector<16x384xf32>
    %34 = vector.shape_cast %31 : vector<16x384xf32> to vector<1x16x384xf32>
    tpu.vector_store %arg6[%c0_17, %c0_18, %c0_19], %34 {strides = array<i32>} : memref<1x16x384xf32, #tpu.memory_space<vmem>>, vector<1x16x384xf32>,
    return
  }
  func.func @transform_0(%arg0: i32) -> (i32, i32, i32) {
    %c0_i32 = arith.constant 0 : i32
    %c0_i32_0 = arith.constant 0 : i32
    %c0_i32_1 = arith.constant 0 : i32
    return %arg0, %c0_i32, %c0_i32_0 : i32, i32, i32
  }
  func.func @transform_1(%arg0: i32) -> (i32, i32) {
    %c0_i32 = arith.constant 0 : i32
    %c0_i32_0 = arith.constant 0 : i32
    %c0_i32_1 = arith.constant 0 : i32
    return %c0_i32, %c0_i32_0 : i32, i32
  }
  func.func @transform_2(%arg0: i32) -> (i32, i32) {
    %c0_i32 = arith.constant 0 : i32
    %c0_i32_0 = arith.constant 0 : i32
    %c0_i32_1 = arith.constant 0 : i32
    return %c0_i32, %c0_i32_0 : i32, i32
  }
  func.func @transform_3(%arg0: i32) -> (i32, i32, i32) {
    %c0_i32 = arith.constant 0 : i32
    %c0_i32_0 = arith.constant 0 : i32
    %c0_i32_1 = arith.constant 0 : i32
    return %arg0, %c0_i32, %c0_i32_0 : i32, i32, i32
  }
  func.func @transform_4(%arg0: i32) -> (i32, i32, i32) {
    %c0_i32 = arith.constant 0 : i32
    %c0_i32_0 = arith.constant 0 : i32
    %c0_i32_1 = arith.constant 0 : i32
    return %arg0, %c0_i32, %c0_i32_0 : i32, i32, i32
  }
  func.func @transform_5(%arg0: i32) -> (i32, i32, i32) {
    %c0_i32 = arith.constant 0 : i32
    %c0_i32_0 = arith.constant 0 : i32
    %c0_i32_1 = arith.constant 0 : i32
    return %arg0, %c0_i32, %c0_i32_0 : i32, i32, i32
  }
}

module attributes {stable_mosaic.version = 11 : i64} {
  func.func @_ln_matmul_kernel(%arg0: i32, %arg1: memref<1x32x128xf32, #tpu.memory_space<vmem>>, %arg2: memref<1x128xf32, #tpu.memory_space<vmem>>, %arg3: memref<1x128xf32, #tpu.memory_space<vmem>>, %arg4: memref<1x128x1536xbf16, #tpu.memory_space<vmem>>, %arg5: memref<1x1x1536xf32, #tpu.memory_space<vmem>>, %arg6: memref<1x32x1536xf32, #tpu.memory_space<vmem>>) attributes {dimension_semantics = [#tpu.dimension_semantics<parallel>], iteration_bounds = array<i64: 3>, scalar_prefetch = 0 : i64, scratch_operands = 0 : i64, tpu.core_type = #tpu.core_type<tc>, window_params = [{transform_indices = @transform_0, window_bounds = array<i64: 1, 32, 128>}, {pipeline_mode = #tpu.pipeline_mode<synchronous>, transform_indices = @transform_1, window_bounds = array<i64: 1, 128>}, {pipeline_mode = #tpu.pipeline_mode<synchronous>, transform_indices = @transform_2, window_bounds = array<i64: 1, 128>}, {transform_indices = @transform_3, window_bounds = array<i64: 1, 128, 1536>}, {transform_indices = @transform_4, window_bounds = array<i64: 1, 1, 1536>}, {transform_indices = @transform_5, window_bounds = array<i64: 1, 32, 1536>}]} {
    %c0 = arith.constant 0 : index
    %c0_0 = arith.constant 0 : index
    %c0_1 = arith.constant 0 : index
    %0 = vector.load %arg1[%c0, %c0_0, %c0_1] : memref<1x32x128xf32, #tpu.memory_space<vmem>>, vector<1x32x128xf32>
    %1 = vector.shape_cast %0 : vector<1x32x128xf32> to vector<32x128xf32>
    %c0_2 = arith.constant 0 : index
    %c0_3 = arith.constant 0 : index
    %2 = vector.load %arg2[%c0_2, %c0_3] : memref<1x128xf32, #tpu.memory_space<vmem>>, vector<1x128xf32>
    %c0_4 = arith.constant 0 : index
    %c0_5 = arith.constant 0 : index
    %3 = vector.load %arg3[%c0_4, %c0_5] : memref<1x128xf32, #tpu.memory_space<vmem>>, vector<1x128xf32>
    %cst = arith.constant dense<0.000000e+00> : vector<32xf32>
    %4 = vector.multi_reduction <add>, %1, %cst [1] : vector<32x128xf32> to vector<32xf32>
    %5 = vector.shape_cast %4 : vector<32xf32> to vector<32x1xf32>
    %cst_6 = arith.constant 1.280000e+02 : f32
    %6 = vector.broadcast %cst_6 : f32 to vector<32x1xf32>
    %7 = arith.divf %5, %6 : vector<32x1xf32>
    %8 = vector.broadcast %7 : vector<32x1xf32> to vector<32x128xf32>
    %9 = arith.subf %1, %8 : vector<32x128xf32>
    %10 = arith.mulf %9, %9 : vector<32x128xf32>
    %cst_7 = arith.constant dense<0.000000e+00> : vector<32xf32>
    %11 = vector.multi_reduction <add>, %10, %cst_7 [1] : vector<32x128xf32> to vector<32xf32>
    %12 = vector.shape_cast %11 : vector<32xf32> to vector<32x1xf32>
    %cst_8 = arith.constant 1.280000e+02 : f32
    %13 = vector.broadcast %cst_8 : f32 to vector<32x1xf32>
    %14 = arith.divf %12, %13 : vector<32x1xf32>
    %cst_9 = arith.constant 9.99999974E-6 : f32
    %15 = vector.broadcast %cst_9 : f32 to vector<32x1xf32>
    %16 = arith.addf %14, %15 : vector<32x1xf32>
    %17 = math.rsqrt %16 : vector<32x1xf32>
    %18 = vector.broadcast %17 : vector<32x1xf32> to vector<32x128xf32>
    %19 = arith.mulf %9, %18 : vector<32x128xf32>
    %20 = vector.broadcast %2 : vector<1x128xf32> to vector<32x128xf32>
    %21 = arith.mulf %19, %20 : vector<32x128xf32>
    %22 = vector.broadcast %3 : vector<1x128xf32> to vector<32x128xf32>
    %23 = arith.addf %21, %22 : vector<32x128xf32>
    %24 = arith.truncf %23 : vector<32x128xf32> to vector<32x128xbf16>
    %c0_10 = arith.constant 0 : index
    %c0_11 = arith.constant 0 : index
    %c0_12 = arith.constant 0 : index
    %25 = vector.load %arg4[%c0_10, %c0_11, %c0_12] : memref<1x128x1536xbf16, #tpu.memory_space<vmem>>, vector<1x128x1536xbf16>
    %26 = vector.shape_cast %25 : vector<1x128x1536xbf16> to vector<128x1536xbf16>
    %cst_13 = arith.constant dense<0.000000e+00> : vector<32x1536xf32>
    %27 = tpu.matmul %24, %26, %cst_13 {dimension_numbers = #tpu.dot_dimension_numbers<[1], [0], [0], [1], [0, 0, 1, 1], [], []>} : vector<32x128xbf16>, vector<128x1536xbf16>, vector<32x1536xf32> -> vector<32x1536xf32>
    %c0_14 = arith.constant 0 : index
    %c0_15 = arith.constant 0 : index
    %c0_16 = arith.constant 0 : index
    %28 = vector.load %arg5[%c0_14, %c0_15, %c0_16] : memref<1x1x1536xf32, #tpu.memory_space<vmem>>, vector<1x1x1536xf32>
    %29 = vector.shape_cast %28 : vector<1x1x1536xf32> to vector<1x1536xf32>
    %30 = vector.broadcast %29 : vector<1x1536xf32> to vector<32x1536xf32>
    %31 = arith.addf %27, %30 : vector<32x1536xf32>
    %c0_17 = arith.constant 0 : index
    %c0_18 = arith.constant 0 : index
    %c0_19 = arith.constant 0 : index
    %32 = vector.load %arg6[%c0_17, %c0_18, %c0_19] : memref<1x32x1536xf32, #tpu.memory_space<vmem>>, vector<1x32x1536xf32>
    %33 = vector.shape_cast %32 : vector<1x32x1536xf32> to vector<32x1536xf32>
    %34 = vector.shape_cast %31 : vector<32x1536xf32> to vector<1x32x1536xf32>
    tpu.vector_store %arg6[%c0_17, %c0_18, %c0_19], %34 {strides = array<i32>} : memref<1x32x1536xf32, #tpu.memory_space<vmem>>, vector<1x32x1536xf32>,
    return
  }
  func.func @transform_0(%arg0: i32) -> (i32, i32, i32) {
    %c0_i32 = arith.constant 0 : i32
    %c0_i32_0 = arith.constant 0 : i32
    %c0_i32_1 = arith.constant 0 : i32
    return %arg0, %c0_i32, %c0_i32_0 : i32, i32, i32
  }
  func.func @transform_1(%arg0: i32) -> (i32, i32) {
    %c0_i32 = arith.constant 0 : i32
    %c0_i32_0 = arith.constant 0 : i32
    %c0_i32_1 = arith.constant 0 : i32
    return %c0_i32, %c0_i32_0 : i32, i32
  }
  func.func @transform_2(%arg0: i32) -> (i32, i32) {
    %c0_i32 = arith.constant 0 : i32
    %c0_i32_0 = arith.constant 0 : i32
    %c0_i32_1 = arith.constant 0 : i32
    return %c0_i32, %c0_i32_0 : i32, i32
  }
  func.func @transform_3(%arg0: i32) -> (i32, i32, i32) {
    %c0_i32 = arith.constant 0 : i32
    %c0_i32_0 = arith.constant 0 : i32
    %c0_i32_1 = arith.constant 0 : i32
    return %arg0, %c0_i32, %c0_i32_0 : i32, i32, i32
  }
  func.func @transform_4(%arg0: i32) -> (i32, i32, i32) {
    %c0_i32 = arith.constant 0 : i32
    %c0_i32_0 = arith.constant 0 : i32
    %c0_i32_1 = arith.constant 0 : i32
    return %arg0, %c0_i32, %c0_i32_0 : i32, i32, i32
  }
  func.func @transform_5(%arg0: i32) -> (i32, i32, i32) {
    %c0_i32 = arith.constant 0 : i32
    %c0_i32_0 = arith.constant 0 : i32
    %c0_i32_1 = arith.constant 0 : i32
    return %arg0, %c0_i32, %c0_i32_0 : i32, i32, i32
  }
}

module attributes {stable_mosaic.version = 11 : i64} {
  func.func @_block_stack_kernel(%arg0: i32, %arg1: i32, %arg2: memref<1x32x128xf32, #tpu.memory_space<vmem>>, %arg3: memref<1x1x1x128xf32, #tpu.memory_space<vmem>>, %arg4: memref<1x1x1x128xf32, #tpu.memory_space<vmem>>, %arg5: memref<1x1x128x384xbf16, #tpu.memory_space<vmem>>, %arg6: memref<1x1x1x384xf32, #tpu.memory_space<vmem>>, %arg7: memref<1x1x128x128xbf16, #tpu.memory_space<vmem>>, %arg8: memref<1x1x1x128xf32, #tpu.memory_space<vmem>>, %arg9: memref<1x1x1x128xf32, #tpu.memory_space<vmem>>, %arg10: memref<1x1x1x128xf32, #tpu.memory_space<vmem>>, %arg11: memref<1x1x128x512xbf16, #tpu.memory_space<vmem>>, %arg12: memref<1x1x1x512xf32, #tpu.memory_space<vmem>>, %arg13: memref<1x1x512x128xbf16, #tpu.memory_space<vmem>>, %arg14: memref<1x1x1x128xf32, #tpu.memory_space<vmem>>, %arg15: memref<1x32x128xf32, #tpu.memory_space<vmem>>) attributes {dimension_semantics = [#tpu.dimension_semantics<parallel>, #tpu.dimension_semantics<arbitrary>], iteration_bounds = array<i64: 3, 2>, scalar_prefetch = 0 : i64, scratch_operands = 0 : i64, tpu.core_type = #tpu.core_type<tc>, window_params = [{transform_indices = @transform_0, window_bounds = array<i64: 1, 32, 128>}, {transform_indices = @transform_1, window_bounds = array<i64: 1, 1, 1, 128>}, {transform_indices = @transform_2, window_bounds = array<i64: 1, 1, 1, 128>}, {transform_indices = @transform_3, window_bounds = array<i64: 1, 1, 128, 384>}, {transform_indices = @transform_4, window_bounds = array<i64: 1, 1, 1, 384>}, {transform_indices = @transform_5, window_bounds = array<i64: 1, 1, 128, 128>}, {transform_indices = @transform_6, window_bounds = array<i64: 1, 1, 1, 128>}, {transform_indices = @transform_7, window_bounds = array<i64: 1, 1, 1, 128>}, {transform_indices = @transform_8, window_bounds = array<i64: 1, 1, 1, 128>}, {transform_indices = @transform_9, window_bounds = array<i64: 1, 1, 128, 512>}, {transform_indices = @transform_10, window_bounds = array<i64: 1, 1, 1, 512>}, {transform_indices = @transform_11, window_bounds = array<i64: 1, 1, 512, 128>}, {transform_indices = @transform_12, window_bounds = array<i64: 1, 1, 1, 128>}, {transform_indices = @transform_13, window_bounds = array<i64: 1, 32, 128>}]} {
    %c0_i32 = arith.constant 0 : i32
    %0 = arith.cmpi eq, %arg1, %c0_i32 : i32
    %1 = arith.extui %0 : i1 to i32
    %c0_i32_0 = arith.constant 0 : i32
    %2 = arith.cmpi ne, %1, %c0_i32_0 : i32
    scf.if %2 {
      %c0_107 = arith.constant 0 : index
      %c0_108 = arith.constant 0 : index
      %c0_109 = arith.constant 0 : index
      %249 = vector.load %arg2[%c0_107, %c0_108, %c0_109] : memref<1x32x128xf32, #tpu.memory_space<vmem>>, vector<1x32x128xf32>
      %c0_110 = arith.constant 0 : index
      %c0_111 = arith.constant 0 : index
      %c0_112 = arith.constant 0 : index
      %250 = vector.load %arg15[%c0_110, %c0_111, %c0_112] : memref<1x32x128xf32, #tpu.memory_space<vmem>>, vector<1x32x128xf32>
      tpu.vector_store %arg15[%c0_110, %c0_111, %c0_112], %249 {strides = array<i32>} : memref<1x32x128xf32, #tpu.memory_space<vmem>>, vector<1x32x128xf32>,
    } else {
    }
    %c0 = arith.constant 0 : index
    %c0_1 = arith.constant 0 : index
    %c0_2 = arith.constant 0 : index
    %3 = vector.load %arg15[%c0, %c0_1, %c0_2] : memref<1x32x128xf32, #tpu.memory_space<vmem>>, vector<1x32x128xf32>
    %4 = vector.shape_cast %3 : vector<1x32x128xf32> to vector<32x128xf32>
    %c0_3 = arith.constant 0 : index
    %c0_4 = arith.constant 0 : index
    %c0_5 = arith.constant 0 : index
    %c0_6 = arith.constant 0 : index
    %5 = vector.load %arg3[%c0_3, %c0_4, %c0_5, %c0_6] : memref<1x1x1x128xf32, #tpu.memory_space<vmem>>, vector<1x1x1x128xf32>
    %6 = vector.shape_cast %5 : vector<1x1x1x128xf32> to vector<1x128xf32>
    %c0_7 = arith.constant 0 : index
    %c0_8 = arith.constant 0 : index
    %c0_9 = arith.constant 0 : index
    %c0_10 = arith.constant 0 : index
    %7 = vector.load %arg4[%c0_7, %c0_8, %c0_9, %c0_10] : memref<1x1x1x128xf32, #tpu.memory_space<vmem>>, vector<1x1x1x128xf32>
    %8 = vector.shape_cast %7 : vector<1x1x1x128xf32> to vector<1x128xf32>
    %cst = arith.constant dense<0.000000e+00> : vector<32xf32>
    %9 = vector.multi_reduction <add>, %4, %cst [1] : vector<32x128xf32> to vector<32xf32>
    %10 = vector.shape_cast %9 : vector<32xf32> to vector<32x1xf32>
    %cst_11 = arith.constant 1.280000e+02 : f32
    %11 = vector.broadcast %cst_11 : f32 to vector<32x1xf32>
    %12 = arith.divf %10, %11 : vector<32x1xf32>
    %13 = vector.broadcast %12 : vector<32x1xf32> to vector<32x128xf32>
    %14 = arith.subf %4, %13 : vector<32x128xf32>
    %15 = arith.mulf %14, %14 : vector<32x128xf32>
    %cst_12 = arith.constant dense<0.000000e+00> : vector<32xf32>
    %16 = vector.multi_reduction <add>, %15, %cst_12 [1] : vector<32x128xf32> to vector<32xf32>
    %17 = vector.shape_cast %16 : vector<32xf32> to vector<32x1xf32>
    %cst_13 = arith.constant 1.280000e+02 : f32
    %18 = vector.broadcast %cst_13 : f32 to vector<32x1xf32>
    %19 = arith.divf %17, %18 : vector<32x1xf32>
    %cst_14 = arith.constant 9.99999997E-7 : f32
    %20 = vector.broadcast %cst_14 : f32 to vector<32x1xf32>
    %21 = arith.addf %19, %20 : vector<32x1xf32>
    %22 = math.rsqrt %21 : vector<32x1xf32>
    %23 = vector.broadcast %22 : vector<32x1xf32> to vector<32x128xf32>
    %24 = arith.mulf %14, %23 : vector<32x128xf32>
    %25 = vector.broadcast %6 : vector<1x128xf32> to vector<32x128xf32>
    %26 = arith.mulf %24, %25 : vector<32x128xf32>
    %27 = vector.broadcast %8 : vector<1x128xf32> to vector<32x128xf32>
    %28 = arith.addf %26, %27 : vector<32x128xf32>
    %29 = arith.truncf %28 : vector<32x128xf32> to vector<32x128xbf16>
    %c0_15 = arith.constant 0 : index
    %c0_16 = arith.constant 0 : index
    %c0_17 = arith.constant 0 : index
    %c0_18 = arith.constant 0 : index
    %30 = vector.load %arg5[%c0_15, %c0_16, %c0_17, %c0_18] : memref<1x1x128x384xbf16, #tpu.memory_space<vmem>>, vector<1x1x128x384xbf16>
    %31 = vector.shape_cast %30 : vector<1x1x128x384xbf16> to vector<128x384xbf16>
    %cst_19 = arith.constant dense<0.000000e+00> : vector<32x384xf32>
    %32 = tpu.matmul %29, %31, %cst_19 {dimension_numbers = #tpu.dot_dimension_numbers<[1], [0], [0], [1], [0, 0, 1, 1], [], []>} : vector<32x128xbf16>, vector<128x384xbf16>, vector<32x384xf32> -> vector<32x384xf32>
    %c0_20 = arith.constant 0 : index
    %c0_21 = arith.constant 0 : index
    %c0_22 = arith.constant 0 : index
    %c0_23 = arith.constant 0 : index
    %33 = vector.load %arg6[%c0_20, %c0_21, %c0_22, %c0_23] : memref<1x1x1x384xf32, #tpu.memory_space<vmem>>, vector<1x1x1x384xf32>
    %34 = vector.shape_cast %33 : vector<1x1x1x384xf32> to vector<1x384xf32>
    %35 = vector.broadcast %34 : vector<1x384xf32> to vector<32x384xf32>
    %36 = arith.addf %32, %35 : vector<32x384xf32>
    %c0_24 = arith.constant 0 : index
    %c0_25 = arith.constant 0 : index
    %c0_26 = arith.constant 0 : index
    %c0_27 = arith.constant 0 : index
    %37 = vector.load %arg7[%c0_24, %c0_25, %c0_26, %c0_27] : memref<1x1x128x128xbf16, #tpu.memory_space<vmem>>, vector<1x1x128x128xbf16>
    %38 = vector.shape_cast %37 : vector<1x1x128x128xbf16> to vector<128x128xbf16>
    %cst_28 = arith.constant 0.000000e+00 : f32
    %39 = vector.broadcast %cst_28 : f32 to vector<32x128xf32>
    %40 = vector.extract_strided_slice %36 {offsets = [0, 0], sizes = [32, 32], strides = [1, 1]} : vector<32x384xf32> to vector<32x32xf32>
    %cst_29 = arith.constant 0.176776692 : f32
    %41 = vector.broadcast %cst_29 : f32 to vector<32x32xf32>
    %42 = arith.mulf %40, %41 : vector<32x32xf32>
    %43 = vector.shape_cast %42 : vector<32x32xf32> to vector<2x16x32xf32>
    %44 = arith.truncf %43 : vector<2x16x32xf32> to vector<2x16x32xbf16>
    %45 = vector.extract_strided_slice %36 {offsets = [0, 128], sizes = [32, 32], strides = [1, 1]} : vector<32x384xf32> to vector<32x32xf32>
    %46 = vector.shape_cast %45 : vector<32x32xf32> to vector<2x16x32xf32>
    %47 = arith.truncf %46 : vector<2x16x32xf32> to vector<2x16x32xbf16>
    %48 = vector.extract_strided_slice %36 {offsets = [0, 256], sizes = [32, 32], strides = [1, 1]} : vector<32x384xf32> to vector<32x32xf32>
    %49 = vector.shape_cast %48 : vector<32x32xf32> to vector<2x16x32xf32>
    %50 = arith.truncf %49 : vector<2x16x32xf32> to vector<2x16x32xbf16>
    "tpu.trace_start"() <{level = 10 : i32, message = "bqd,bkd->bqk"}> : () -> ()
    %cst_30 = arith.constant dense<0.000000e+00> : vector<2x16x16xf32>
    %51 = tpu.matmul %44, %47, %cst_30 {dimension_numbers = #tpu.dot_dimension_numbers<[2], [2], [1], [1], [0, 0, 0, 1, 1, 1], [0], [0]>} : vector<2x16x32xbf16>, vector<2x16x32xbf16>, vector<2x16x16xf32> -> vector<2x16x16xf32>
    "tpu.trace_stop"() : () -> ()
    %cst_31 = arith.constant dense<0xFF800000> : vector<2x16xf32>
    %52 = vector.multi_reduction <maximumf>, %51, %cst_31 [2] : vector<2x16x16xf32> to vector<2x16xf32>
    %53 = vector.shape_cast %52 : vector<2x16xf32> to vector<2x16x1xf32>
    %54 = vector.broadcast %53 : vector<2x16x1xf32> to vector<2x16x16xf32>
    %55 = arith.subf %51, %54 : vector<2x16x16xf32>
    %56 = math.exp %55 : vector<2x16x16xf32>
    %cst_32 = arith.constant dense<0.000000e+00> : vector<2x16xf32>
    %57 = vector.multi_reduction <add>, %56, %cst_32 [2] : vector<2x16x16xf32> to vector<2x16xf32>
    %58 = vector.shape_cast %57 : vector<2x16xf32> to vector<2x16x1xf32>
    %59 = tpu.reciprocal %58 {approx = true} : vector<2x16x1xf32> -> vector<2x16x1xf32>
    %60 = vector.broadcast %59 : vector<2x16x1xf32> to vector<2x16x16xf32>
    %61 = arith.mulf %56, %60 : vector<2x16x16xf32>
    %62 = arith.truncf %61 : vector<2x16x16xf32> to vector<2x16x16xbf16>
    "tpu.trace_start"() <{level = 10 : i32, message = "bqk,bkd->bqd"}> : () -> ()
    %cst_33 = arith.constant dense<0.000000e+00> : vector<2x16x32xf32>
    %63 = tpu.matmul %62, %50, %cst_33 {dimension_numbers = #tpu.dot_dimension_numbers<[2], [1], [1], [2], [0, 0, 0, 1, 1, 2], [0], [0]>} : vector<2x16x16xbf16>, vector<2x16x32xbf16>, vector<2x16x32xf32> -> vector<2x16x32xf32>
    "tpu.trace_stop"() : () -> ()
    %64 = vector.shape_cast %63 : vector<2x16x32xf32> to vector<32x32xf32>
    %65 = arith.truncf %64 : vector<32x32xf32> to vector<32x32xbf16>
    %66 = vector.extract_strided_slice %38 {offsets = [0, 0], sizes = [32, 128], strides = [1, 1]} : vector<128x128xbf16> to vector<32x128xbf16>
    %cst_34 = arith.constant dense<0.000000e+00> : vector<32x128xf32>
    %67 = tpu.matmul %65, %66, %cst_34 {dimension_numbers = #tpu.dot_dimension_numbers<[1], [0], [0], [1], [0, 0, 1, 1], [], []>} : vector<32x32xbf16>, vector<32x128xbf16>, vector<32x128xf32> -> vector<32x128xf32>
    %68 = arith.addf %39, %67 : vector<32x128xf32>
    %69 = vector.extract_strided_slice %36 {offsets = [0, 32], sizes = [32, 32], strides = [1, 1]} : vector<32x384xf32> to vector<32x32xf32>
    %cst_35 = arith.constant 0.176776692 : f32
    %70 = vector.broadcast %cst_35 : f32 to vector<32x32xf32>
    %71 = arith.mulf %69, %70 : vector<32x32xf32>
    %72 = vector.shape_cast %71 : vector<32x32xf32> to vector<2x16x32xf32>
    %73 = arith.truncf %72 : vector<2x16x32xf32> to vector<2x16x32xbf16>
    %74 = vector.extract_strided_slice %36 {offsets = [0, 160], sizes = [32, 32], strides = [1, 1]} : vector<32x384xf32> to vector<32x32xf32>
    %75 = vector.shape_cast %74 : vector<32x32xf32> to vector<2x16x32xf32>
    %76 = arith.truncf %75 : vector<2x16x32xf32> to vector<2x16x32xbf16>
    %77 = vector.extract_strided_slice %36 {offsets = [0, 288], sizes = [32, 32], strides = [1, 1]} : vector<32x384xf32> to vector<32x32xf32>
    %78 = vector.shape_cast %77 : vector<32x32xf32> to vector<2x16x32xf32>
    %79 = arith.truncf %78 : vector<2x16x32xf32> to vector<2x16x32xbf16>
    "tpu.trace_start"() <{level = 10 : i32, message = "bqd,bkd->bqk"}> : () -> ()
    %cst_36 = arith.constant dense<0.000000e+00> : vector<2x16x16xf32>
    %80 = tpu.matmul %73, %76, %cst_36 {dimension_numbers = #tpu.dot_dimension_numbers<[2], [2], [1], [1], [0, 0, 0, 1, 1, 1], [0], [0]>} : vector<2x16x32xbf16>, vector<2x16x32xbf16>, vector<2x16x16xf32> -> vector<2x16x16xf32>
    "tpu.trace_stop"() : () -> ()
    %cst_37 = arith.constant dense<0xFF800000> : vector<2x16xf32>
    %81 = vector.multi_reduction <maximumf>, %80, %cst_37 [2] : vector<2x16x16xf32> to vector<2x16xf32>
    %82 = vector.shape_cast %81 : vector<2x16xf32> to vector<2x16x1xf32>
    %83 = vector.broadcast %82 : vector<2x16x1xf32> to vector<2x16x16xf32>
    %84 = arith.subf %80, %83 : vector<2x16x16xf32>
    %85 = math.exp %84 : vector<2x16x16xf32>
    %cst_38 = arith.constant dense<0.000000e+00> : vector<2x16xf32>
    %86 = vector.multi_reduction <add>, %85, %cst_38 [2] : vector<2x16x16xf32> to vector<2x16xf32>
    %87 = vector.shape_cast %86 : vector<2x16xf32> to vector<2x16x1xf32>
    %88 = tpu.reciprocal %87 {approx = true} : vector<2x16x1xf32> -> vector<2x16x1xf32>
    %89 = vector.broadcast %88 : vector<2x16x1xf32> to vector<2x16x16xf32>
    %90 = arith.mulf %85, %89 : vector<2x16x16xf32>
    %91 = arith.truncf %90 : vector<2x16x16xf32> to vector<2x16x16xbf16>
    "tpu.trace_start"() <{level = 10 : i32, message = "bqk,bkd->bqd"}> : () -> ()
    %cst_39 = arith.constant dense<0.000000e+00> : vector<2x16x32xf32>
    %92 = tpu.matmul %91, %79, %cst_39 {dimension_numbers = #tpu.dot_dimension_numbers<[2], [1], [1], [2], [0, 0, 0, 1, 1, 2], [0], [0]>} : vector<2x16x16xbf16>, vector<2x16x32xbf16>, vector<2x16x32xf32> -> vector<2x16x32xf32>
    "tpu.trace_stop"() : () -> ()
    %93 = vector.shape_cast %92 : vector<2x16x32xf32> to vector<32x32xf32>
    %94 = arith.truncf %93 : vector<32x32xf32> to vector<32x32xbf16>
    %95 = vector.extract_strided_slice %38 {offsets = [32, 0], sizes = [32, 128], strides = [1, 1]} : vector<128x128xbf16> to vector<32x128xbf16>
    %cst_40 = arith.constant dense<0.000000e+00> : vector<32x128xf32>
    %96 = tpu.matmul %94, %95, %cst_40 {dimension_numbers = #tpu.dot_dimension_numbers<[1], [0], [0], [1], [0, 0, 1, 1], [], []>} : vector<32x32xbf16>, vector<32x128xbf16>, vector<32x128xf32> -> vector<32x128xf32>
    %97 = arith.addf %68, %96 : vector<32x128xf32>
    %98 = vector.extract_strided_slice %36 {offsets = [0, 64], sizes = [32, 32], strides = [1, 1]} : vector<32x384xf32> to vector<32x32xf32>
    %cst_41 = arith.constant 0.176776692 : f32
    %99 = vector.broadcast %cst_41 : f32 to vector<32x32xf32>
    %100 = arith.mulf %98, %99 : vector<32x32xf32>
    %101 = vector.shape_cast %100 : vector<32x32xf32> to vector<2x16x32xf32>
    %102 = arith.truncf %101 : vector<2x16x32xf32> to vector<2x16x32xbf16>
    %103 = vector.extract_strided_slice %36 {offsets = [0, 192], sizes = [32, 32], strides = [1, 1]} : vector<32x384xf32> to vector<32x32xf32>
    %104 = vector.shape_cast %103 : vector<32x32xf32> to vector<2x16x32xf32>
    %105 = arith.truncf %104 : vector<2x16x32xf32> to vector<2x16x32xbf16>
    %106 = vector.extract_strided_slice %36 {offsets = [0, 320], sizes = [32, 32], strides = [1, 1]} : vector<32x384xf32> to vector<32x32xf32>
    %107 = vector.shape_cast %106 : vector<32x32xf32> to vector<2x16x32xf32>
    %108 = arith.truncf %107 : vector<2x16x32xf32> to vector<2x16x32xbf16>
    "tpu.trace_start"() <{level = 10 : i32, message = "bqd,bkd->bqk"}> : () -> ()
    %cst_42 = arith.constant dense<0.000000e+00> : vector<2x16x16xf32>
    %109 = tpu.matmul %102, %105, %cst_42 {dimension_numbers = #tpu.dot_dimension_numbers<[2], [2], [1], [1], [0, 0, 0, 1, 1, 1], [0], [0]>} : vector<2x16x32xbf16>, vector<2x16x32xbf16>, vector<2x16x16xf32> -> vector<2x16x16xf32>
    "tpu.trace_stop"() : () -> ()
    %cst_43 = arith.constant dense<0xFF800000> : vector<2x16xf32>
    %110 = vector.multi_reduction <maximumf>, %109, %cst_43 [2] : vector<2x16x16xf32> to vector<2x16xf32>
    %111 = vector.shape_cast %110 : vector<2x16xf32> to vector<2x16x1xf32>
    %112 = vector.broadcast %111 : vector<2x16x1xf32> to vector<2x16x16xf32>
    %113 = arith.subf %109, %112 : vector<2x16x16xf32>
    %114 = math.exp %113 : vector<2x16x16xf32>
    %cst_44 = arith.constant dense<0.000000e+00> : vector<2x16xf32>
    %115 = vector.multi_reduction <add>, %114, %cst_44 [2] : vector<2x16x16xf32> to vector<2x16xf32>
    %116 = vector.shape_cast %115 : vector<2x16xf32> to vector<2x16x1xf32>
    %117 = tpu.reciprocal %116 {approx = true} : vector<2x16x1xf32> -> vector<2x16x1xf32>
    %118 = vector.broadcast %117 : vector<2x16x1xf32> to vector<2x16x16xf32>
    %119 = arith.mulf %114, %118 : vector<2x16x16xf32>
    %120 = arith.truncf %119 : vector<2x16x16xf32> to vector<2x16x16xbf16>
    "tpu.trace_start"() <{level = 10 : i32, message = "bqk,bkd->bqd"}> : () -> ()
    %cst_45 = arith.constant dense<0.000000e+00> : vector<2x16x32xf32>
    %121 = tpu.matmul %120, %108, %cst_45 {dimension_numbers = #tpu.dot_dimension_numbers<[2], [1], [1], [2], [0, 0, 0, 1, 1, 2], [0], [0]>} : vector<2x16x16xbf16>, vector<2x16x32xbf16>, vector<2x16x32xf32> -> vector<2x16x32xf32>
    "tpu.trace_stop"() : () -> ()
    %122 = vector.shape_cast %121 : vector<2x16x32xf32> to vector<32x32xf32>
    %123 = arith.truncf %122 : vector<32x32xf32> to vector<32x32xbf16>
    %124 = vector.extract_strided_slice %38 {offsets = [64, 0], sizes = [32, 128], strides = [1, 1]} : vector<128x128xbf16> to vector<32x128xbf16>
    %cst_46 = arith.constant dense<0.000000e+00> : vector<32x128xf32>
    %125 = tpu.matmul %123, %124, %cst_46 {dimension_numbers = #tpu.dot_dimension_numbers<[1], [0], [0], [1], [0, 0, 1, 1], [], []>} : vector<32x32xbf16>, vector<32x128xbf16>, vector<32x128xf32> -> vector<32x128xf32>
    %126 = arith.addf %97, %125 : vector<32x128xf32>
    %127 = vector.extract_strided_slice %36 {offsets = [0, 96], sizes = [32, 32], strides = [1, 1]} : vector<32x384xf32> to vector<32x32xf32>
    %cst_47 = arith.constant 0.176776692 : f32
    %128 = vector.broadcast %cst_47 : f32 to vector<32x32xf32>
    %129 = arith.mulf %127, %128 : vector<32x32xf32>
    %130 = vector.shape_cast %129 : vector<32x32xf32> to vector<2x16x32xf32>
    %131 = arith.truncf %130 : vector<2x16x32xf32> to vector<2x16x32xbf16>
    %132 = vector.extract_strided_slice %36 {offsets = [0, 224], sizes = [32, 32], strides = [1, 1]} : vector<32x384xf32> to vector<32x32xf32>
    %133 = vector.shape_cast %132 : vector<32x32xf32> to vector<2x16x32xf32>
    %134 = arith.truncf %133 : vector<2x16x32xf32> to vector<2x16x32xbf16>
    %135 = vector.extract_strided_slice %36 {offsets = [0, 352], sizes = [32, 32], strides = [1, 1]} : vector<32x384xf32> to vector<32x32xf32>
    %136 = vector.shape_cast %135 : vector<32x32xf32> to vector<2x16x32xf32>
    %137 = arith.truncf %136 : vector<2x16x32xf32> to vector<2x16x32xbf16>
    "tpu.trace_start"() <{level = 10 : i32, message = "bqd,bkd->bqk"}> : () -> ()
    %cst_48 = arith.constant dense<0.000000e+00> : vector<2x16x16xf32>
    %138 = tpu.matmul %131, %134, %cst_48 {dimension_numbers = #tpu.dot_dimension_numbers<[2], [2], [1], [1], [0, 0, 0, 1, 1, 1], [0], [0]>} : vector<2x16x32xbf16>, vector<2x16x32xbf16>, vector<2x16x16xf32> -> vector<2x16x16xf32>
    "tpu.trace_stop"() : () -> ()
    %cst_49 = arith.constant dense<0xFF800000> : vector<2x16xf32>
    %139 = vector.multi_reduction <maximumf>, %138, %cst_49 [2] : vector<2x16x16xf32> to vector<2x16xf32>
    %140 = vector.shape_cast %139 : vector<2x16xf32> to vector<2x16x1xf32>
    %141 = vector.broadcast %140 : vector<2x16x1xf32> to vector<2x16x16xf32>
    %142 = arith.subf %138, %141 : vector<2x16x16xf32>
    %143 = math.exp %142 : vector<2x16x16xf32>
    %cst_50 = arith.constant dense<0.000000e+00> : vector<2x16xf32>
    %144 = vector.multi_reduction <add>, %143, %cst_50 [2] : vector<2x16x16xf32> to vector<2x16xf32>
    %145 = vector.shape_cast %144 : vector<2x16xf32> to vector<2x16x1xf32>
    %146 = tpu.reciprocal %145 {approx = true} : vector<2x16x1xf32> -> vector<2x16x1xf32>
    %147 = vector.broadcast %146 : vector<2x16x1xf32> to vector<2x16x16xf32>
    %148 = arith.mulf %143, %147 : vector<2x16x16xf32>
    %149 = arith.truncf %148 : vector<2x16x16xf32> to vector<2x16x16xbf16>
    "tpu.trace_start"() <{level = 10 : i32, message = "bqk,bkd->bqd"}> : () -> ()
    %cst_51 = arith.constant dense<0.000000e+00> : vector<2x16x32xf32>
    %150 = tpu.matmul %149, %137, %cst_51 {dimension_numbers = #tpu.dot_dimension_numbers<[2], [1], [1], [2], [0, 0, 0, 1, 1, 2], [0], [0]>} : vector<2x16x16xbf16>, vector<2x16x32xbf16>, vector<2x16x32xf32> -> vector<2x16x32xf32>
    "tpu.trace_stop"() : () -> ()
    %151 = vector.shape_cast %150 : vector<2x16x32xf32> to vector<32x32xf32>
    %152 = arith.truncf %151 : vector<32x32xf32> to vector<32x32xbf16>
    %153 = vector.extract_strided_slice %38 {offsets = [96, 0], sizes = [32, 128], strides = [1, 1]} : vector<128x128xbf16> to vector<32x128xbf16>
    %cst_52 = arith.constant dense<0.000000e+00> : vector<32x128xf32>
    %154 = tpu.matmul %152, %153, %cst_52 {dimension_numbers = #tpu.dot_dimension_numbers<[1], [0], [0], [1], [0, 0, 1, 1], [], []>} : vector<32x32xbf16>, vector<32x128xbf16>, vector<32x128xf32> -> vector<32x128xf32>
    %155 = arith.addf %126, %154 : vector<32x128xf32>
    %156 = arith.addf %4, %155 : vector<32x128xf32>
    %c0_53 = arith.constant 0 : index
    %c0_54 = arith.constant 0 : index
    %c0_55 = arith.constant 0 : index
    %c0_56 = arith.constant 0 : index
    %157 = vector.load %arg8[%c0_53, %c0_54, %c0_55, %c0_56] : memref<1x1x1x128xf32, #tpu.memory_space<vmem>>, vector<1x1x1x128xf32>
    %158 = vector.shape_cast %157 : vector<1x1x1x128xf32> to vector<1x128xf32>
    %159 = vector.broadcast %158 : vector<1x128xf32> to vector<32x128xf32>
    %160 = arith.addf %156, %159 : vector<32x128xf32>
    %c0_57 = arith.constant 0 : index
    %c0_58 = arith.constant 0 : index
    %c0_59 = arith.constant 0 : index
    %c0_60 = arith.constant 0 : index
    %161 = vector.load %arg9[%c0_57, %c0_58, %c0_59, %c0_60] : memref<1x1x1x128xf32, #tpu.memory_space<vmem>>, vector<1x1x1x128xf32>
    %162 = vector.shape_cast %161 : vector<1x1x1x128xf32> to vector<1x128xf32>
    %c0_61 = arith.constant 0 : index
    %c0_62 = arith.constant 0 : index
    %c0_63 = arith.constant 0 : index
    %c0_64 = arith.constant 0 : index
    %163 = vector.load %arg10[%c0_61, %c0_62, %c0_63, %c0_64] : memref<1x1x1x128xf32, #tpu.memory_space<vmem>>, vector<1x1x1x128xf32>
    %164 = vector.shape_cast %163 : vector<1x1x1x128xf32> to vector<1x128xf32>
    %cst_65 = arith.constant dense<0.000000e+00> : vector<32xf32>
    %165 = vector.multi_reduction <add>, %160, %cst_65 [1] : vector<32x128xf32> to vector<32xf32>
    %166 = vector.shape_cast %165 : vector<32xf32> to vector<32x1xf32>
    %cst_66 = arith.constant 1.280000e+02 : f32
    %167 = vector.broadcast %cst_66 : f32 to vector<32x1xf32>
    %168 = arith.divf %166, %167 : vector<32x1xf32>
    %169 = vector.broadcast %168 : vector<32x1xf32> to vector<32x128xf32>
    %170 = arith.subf %160, %169 : vector<32x128xf32>
    %171 = arith.mulf %170, %170 : vector<32x128xf32>
    %cst_67 = arith.constant dense<0.000000e+00> : vector<32xf32>
    %172 = vector.multi_reduction <add>, %171, %cst_67 [1] : vector<32x128xf32> to vector<32xf32>
    %173 = vector.shape_cast %172 : vector<32xf32> to vector<32x1xf32>
    %cst_68 = arith.constant 1.280000e+02 : f32
    %174 = vector.broadcast %cst_68 : f32 to vector<32x1xf32>
    %175 = arith.divf %173, %174 : vector<32x1xf32>
    %cst_69 = arith.constant 9.99999997E-7 : f32
    %176 = vector.broadcast %cst_69 : f32 to vector<32x1xf32>
    %177 = arith.addf %175, %176 : vector<32x1xf32>
    %178 = math.rsqrt %177 : vector<32x1xf32>
    %179 = vector.broadcast %178 : vector<32x1xf32> to vector<32x128xf32>
    %180 = arith.mulf %170, %179 : vector<32x128xf32>
    %181 = vector.broadcast %162 : vector<1x128xf32> to vector<32x128xf32>
    %182 = arith.mulf %180, %181 : vector<32x128xf32>
    %183 = vector.broadcast %164 : vector<1x128xf32> to vector<32x128xf32>
    %184 = arith.addf %182, %183 : vector<32x128xf32>
    %185 = arith.truncf %184 : vector<32x128xf32> to vector<32x128xbf16>
    %c0_70 = arith.constant 0 : index
    %c0_71 = arith.constant 0 : index
    %c0_72 = arith.constant 0 : index
    %c0_73 = arith.constant 0 : index
    %186 = vector.load %arg11[%c0_70, %c0_71, %c0_72, %c0_73] : memref<1x1x128x512xbf16, #tpu.memory_space<vmem>>, vector<1x1x128x512xbf16>
    %187 = vector.shape_cast %186 : vector<1x1x128x512xbf16> to vector<128x512xbf16>
    %cst_74 = arith.constant dense<0.000000e+00> : vector<32x512xf32>
    %188 = tpu.matmul %185, %187, %cst_74 {dimension_numbers = #tpu.dot_dimension_numbers<[1], [0], [0], [1], [0, 0, 1, 1], [], []>} : vector<32x128xbf16>, vector<128x512xbf16>, vector<32x512xf32> -> vector<32x512xf32>
    %c0_75 = arith.constant 0 : index
    %c0_76 = arith.constant 0 : index
    %c0_77 = arith.constant 0 : index
    %c0_78 = arith.constant 0 : index
    %189 = vector.load %arg12[%c0_75, %c0_76, %c0_77, %c0_78] : memref<1x1x1x512xf32, #tpu.memory_space<vmem>>, vector<1x1x1x512xf32>
    %190 = vector.shape_cast %189 : vector<1x1x1x512xf32> to vector<1x512xf32>
    %191 = vector.broadcast %190 : vector<1x512xf32> to vector<32x512xf32>
    %192 = arith.addf %188, %191 : vector<32x512xf32>
    %cst_79 = arith.constant 5.000000e-01 : f32
    %193 = vector.broadcast %cst_79 : f32 to vector<32x512xf32>
    %194 = arith.mulf %193, %192 : vector<32x512xf32>
    %cst_80 = arith.constant 0.707106769 : f32
    %195 = vector.broadcast %cst_80 : f32 to vector<32x512xf32>
    %196 = arith.mulf %192, %195 : vector<32x512xf32>
    %cst_81 = arith.constant 0.000000e+00 : f32
    %197 = vector.broadcast %cst_81 : f32 to vector<32x512xf32>
    %198 = arith.cmpf oge, %196, %197 : vector<32x512xf32>
    %cst_82 = arith.constant 1.000000e+00 : f32
    %cst_83 = arith.constant -1.000000e+00 : f32
    %199 = vector.broadcast %cst_82 : f32 to vector<32x512xf32>
    %200 = vector.broadcast %cst_83 : f32 to vector<32x512xf32>
    %201 = arith.select %198, %199, %200 : vector<32x512xi1>, vector<32x512xf32>
    %202 = math.absf %196 : vector<32x512xf32>
    %cst_84 = arith.constant 0.327591091 : f32
    %203 = vector.broadcast %cst_84 : f32 to vector<32x512xf32>
    %204 = arith.mulf %203, %202 : vector<32x512xf32>
    %cst_85 = arith.constant 1.000000e+00 : f32
    %205 = vector.broadcast %cst_85 : f32 to vector<32x512xf32>
    %206 = arith.addf %205, %204 : vector<32x512xf32>
    %207 = tpu.reciprocal %206 {approx = true} : vector<32x512xf32> -> vector<32x512xf32>
    %208 = arith.mulf %206, %207 : vector<32x512xf32>
    %cst_86 = arith.constant 2.000000e+00 : f32
    %209 = vector.broadcast %cst_86 : f32 to vector<32x512xf32>
    %210 = arith.subf %209, %208 : vector<32x512xf32>
    %211 = arith.mulf %207, %210 : vector<32x512xf32>
    %cst_87 = arith.constant 1.06140542 : f32
    %212 = vector.broadcast %cst_87 : f32 to vector<32x512xf32>
    %213 = arith.mulf %212, %211 : vector<32x512xf32>
    %cst_88 = arith.constant -1.45315206 : f32
    %214 = vector.broadcast %cst_88 : f32 to vector<32x512xf32>
    %215 = arith.addf %213, %214 : vector<32x512xf32>
    %216 = arith.mulf %215, %211 : vector<32x512xf32>
    %cst_89 = arith.constant 1.42141378 : f32
    %217 = vector.broadcast %cst_89 : f32 to vector<32x512xf32>
    %218 = arith.addf %216, %217 : vector<32x512xf32>
    %219 = arith.mulf %218, %211 : vector<32x512xf32>
    %cst_90 = arith.constant -0.284496725 : f32
    %220 = vector.broadcast %cst_90 : f32 to vector<32x512xf32>
    %221 = arith.addf %219, %220 : vector<32x512xf32>
    %222 = arith.mulf %221, %211 : vector<32x512xf32>
    %cst_91 = arith.constant 0.254829586 : f32
    %223 = vector.broadcast %cst_91 : f32 to vector<32x512xf32>
    %224 = arith.addf %222, %223 : vector<32x512xf32>
    %225 = arith.mulf %224, %211 : vector<32x512xf32>
    %cst_92 = arith.constant 0.000000e+00 : f32
    %226 = vector.broadcast %cst_92 : f32 to vector<32x512xf32>
    %227 = arith.subf %226, %202 : vector<32x512xf32>
    %228 = arith.mulf %227, %202 : vector<32x512xf32>
    %229 = math.exp %228 : vector<32x512xf32>
    %230 = arith.mulf %225, %229 : vector<32x512xf32>
    %cst_93 = arith.constant 1.000000e+00 : f32
    %231 = vector.broadcast %cst_93 : f32 to vector<32x512xf32>
    %232 = arith.subf %231, %230 : vector<32x512xf32>
    %233 = arith.mulf %201, %232 : vector<32x512xf32>
    %cst_94 = arith.constant 1.000000e+00 : f32
    %234 = vector.broadcast %cst_94 : f32 to vector<32x512xf32>
    %235 = arith.addf %234, %233 : vector<32x512xf32>
    %236 = arith.mulf %194, %235 : vector<32x512xf32>
    %237 = arith.truncf %236 : vector<32x512xf32> to vector<32x512xbf16>
    %c0_95 = arith.constant 0 : index
    %c0_96 = arith.constant 0 : index
    %c0_97 = arith.constant 0 : index
    %c0_98 = arith.constant 0 : index
    %238 = vector.load %arg13[%c0_95, %c0_96, %c0_97, %c0_98] : memref<1x1x512x128xbf16, #tpu.memory_space<vmem>>, vector<1x1x512x128xbf16>
    %239 = vector.shape_cast %238 : vector<1x1x512x128xbf16> to vector<512x128xbf16>
    %cst_99 = arith.constant dense<0.000000e+00> : vector<32x128xf32>
    %240 = tpu.matmul %237, %239, %cst_99 {dimension_numbers = #tpu.dot_dimension_numbers<[1], [0], [0], [1], [0, 0, 1, 1], [], []>} : vector<32x512xbf16>, vector<512x128xbf16>, vector<32x128xf32> -> vector<32x128xf32>
    %c0_100 = arith.constant 0 : index
    %c0_101 = arith.constant 0 : index
    %c0_102 = arith.constant 0 : index
    %c0_103 = arith.constant 0 : index
    %241 = vector.load %arg14[%c0_100, %c0_101, %c0_102, %c0_103] : memref<1x1x1x128xf32, #tpu.memory_space<vmem>>, vector<1x1x1x128xf32>
    %242 = vector.shape_cast %241 : vector<1x1x1x128xf32> to vector<1x128xf32>
    %243 = vector.broadcast %242 : vector<1x128xf32> to vector<32x128xf32>
    %244 = arith.addf %240, %243 : vector<32x128xf32>
    %245 = arith.addf %160, %244 : vector<32x128xf32>
    %c0_104 = arith.constant 0 : index
    %c0_105 = arith.constant 0 : index
    %c0_106 = arith.constant 0 : index
    %246 = vector.load %arg15[%c0_104, %c0_105, %c0_106] : memref<1x32x128xf32, #tpu.memory_space<vmem>>, vector<1x32x128xf32>
    %247 = vector.shape_cast %246 : vector<1x32x128xf32> to vector<32x128xf32>
    %248 = vector.shape_cast %245 : vector<32x128xf32> to vector<1x32x128xf32>
    tpu.vector_store %arg15[%c0_104, %c0_105, %c0_106], %248 {strides = array<i32>} : memref<1x32x128xf32, #tpu.memory_space<vmem>>, vector<1x32x128xf32>,
    return
  }
  func.func @transform_0(%arg0: i32, %arg1: i32) -> (i32, i32, i32) {
    %c0_i32 = arith.constant 0 : i32
    %c0_i32_0 = arith.constant 0 : i32
    %c0_i32_1 = arith.constant 0 : i32
    return %arg0, %c0_i32, %c0_i32_0 : i32, i32, i32
  }
  func.func @transform_1(%arg0: i32, %arg1: i32) -> (i32, i32, i32, i32) {
    %c0_i32 = arith.constant 0 : i32
    %c0_i32_0 = arith.constant 0 : i32
    %c0_i32_1 = arith.constant 0 : i32
    return %arg0, %arg1, %c0_i32, %c0_i32_0 : i32, i32, i32, i32
  }
  func.func @transform_2(%arg0: i32, %arg1: i32) -> (i32, i32, i32, i32) {
    %c0_i32 = arith.constant 0 : i32
    %c0_i32_0 = arith.constant 0 : i32
    %c0_i32_1 = arith.constant 0 : i32
    return %arg0, %arg1, %c0_i32, %c0_i32_0 : i32, i32, i32, i32
  }
  func.func @transform_3(%arg0: i32, %arg1: i32) -> (i32, i32, i32, i32) {
    %c0_i32 = arith.constant 0 : i32
    %c0_i32_0 = arith.constant 0 : i32
    %c0_i32_1 = arith.constant 0 : i32
    return %arg0, %arg1, %c0_i32, %c0_i32_0 : i32, i32, i32, i32
  }
  func.func @transform_4(%arg0: i32, %arg1: i32) -> (i32, i32, i32, i32) {
    %c0_i32 = arith.constant 0 : i32
    %c0_i32_0 = arith.constant 0 : i32
    %c0_i32_1 = arith.constant 0 : i32
    return %arg0, %arg1, %c0_i32, %c0_i32_0 : i32, i32, i32, i32
  }
  func.func @transform_5(%arg0: i32, %arg1: i32) -> (i32, i32, i32, i32) {
    %c0_i32 = arith.constant 0 : i32
    %c0_i32_0 = arith.constant 0 : i32
    %c0_i32_1 = arith.constant 0 : i32
    return %arg0, %arg1, %c0_i32, %c0_i32_0 : i32, i32, i32, i32
  }
  func.func @transform_6(%arg0: i32, %arg1: i32) -> (i32, i32, i32, i32) {
    %c0_i32 = arith.constant 0 : i32
    %c0_i32_0 = arith.constant 0 : i32
    %c0_i32_1 = arith.constant 0 : i32
    return %arg0, %arg1, %c0_i32, %c0_i32_0 : i32, i32, i32, i32
  }
  func.func @transform_7(%arg0: i32, %arg1: i32) -> (i32, i32, i32, i32) {
    %c0_i32 = arith.constant 0 : i32
    %c0_i32_0 = arith.constant 0 : i32
    %c0_i32_1 = arith.constant 0 : i32
    return %arg0, %arg1, %c0_i32, %c0_i32_0 : i32, i32, i32, i32
  }
  func.func @transform_8(%arg0: i32, %arg1: i32) -> (i32, i32, i32, i32) {
    %c0_i32 = arith.constant 0 : i32
    %c0_i32_0 = arith.constant 0 : i32
    %c0_i32_1 = arith.constant 0 : i32
    return %arg0, %arg1, %c0_i32, %c0_i32_0 : i32, i32, i32, i32
  }
  func.func @transform_9(%arg0: i32, %arg1: i32) -> (i32, i32, i32, i32) {
    %c0_i32 = arith.constant 0 : i32
    %c0_i32_0 = arith.constant 0 : i32
    %c0_i32_1 = arith.constant 0 : i32
    return %arg0, %arg1, %c0_i32, %c0_i32_0 : i32, i32, i32, i32
  }
  func.func @transform_10(%arg0: i32, %arg1: i32) -> (i32, i32, i32, i32) {
    %c0_i32 = arith.constant 0 : i32
    %c0_i32_0 = arith.constant 0 : i32
    %c0_i32_1 = arith.constant 0 : i32
    return %arg0, %arg1, %c0_i32, %c0_i32_0 : i32, i32, i32, i32
  }
  func.func @transform_11(%arg0: i32, %arg1: i32) -> (i32, i32, i32, i32) {
    %c0_i32 = arith.constant 0 : i32
    %c0_i32_0 = arith.constant 0 : i32
    %c0_i32_1 = arith.constant 0 : i32
    return %arg0, %arg1, %c0_i32, %c0_i32_0 : i32, i32, i32, i32
  }
  func.func @transform_12(%arg0: i32, %arg1: i32) -> (i32, i32, i32, i32) {
    %c0_i32 = arith.constant 0 : i32
    %c0_i32_0 = arith.constant 0 : i32
    %c0_i32_1 = arith.constant 0 : i32
    return %arg0, %arg1, %c0_i32, %c0_i32_0 : i32, i32, i32, i32
  }
  func.func @transform_13(%arg0: i32, %arg1: i32) -> (i32, i32, i32) {
    %c0_i32 = arith.constant 0 : i32
    %c0_i32_0 = arith.constant 0 : i32
    %c0_i32_1 = arith.constant 0 : i32
    return %arg0, %c0_i32, %c0_i32_0 : i32, i32, i32
  }
}

</mosaic_0001>

<bundles_post_ra>
// kernel: model_forward.7
= control target key start
LH: loop header
LB: loop body
LE: loop exit
PB: predicated region body
PF: predicated region fallthrough
CT: control target
= control target key end

     0   :  { %s894_s0 = inlined_call_operand.vmem [shape: f32[1,16,256], index: 0, kind: input, shape index: {}]   ;;  %s895_s3 = inlined_call_operand.vmem [shape: bf16[1,256,384], index: 3, kind: input, shape index: {}]   ;;  %s896_s1 = inlined_call_operand.vmem [shape: f32[1,256], index: 1, kind: input, shape index: {}]   ;;  %s897_s2 = inlined_call_operand.vmem [shape: f32[1,256], index: 2, kind: input, shape index: {}]   ;;  %s898_s4 = inlined_call_operand.vmem [shape: f32[1,1,384], index: 4, kind: input, shape index: {}]   ;;  %s899_s5 = inlined_call_operand.vmem [shape: f32[1,16,384], index: 5, kind: output, shape index: {}]  }
   0x1   :  { %v21_v0 = vld [vmem:[%s894_s0] sm:$0xff]  ;;  %v22_v1 = vld [vmem:[%s894_s0 + $0x8] sm:$0xff]  ;;  %v23_v2 = vld [vmem:[%s894_s0 + $0x10] sm:$0xff] }
   0x2   :  { %v27_v3 = vadd.f32 %v22_v1, %v21_v0  ;;  %v24_v4 = vld [vmem:[%s894_s0 + $0x18] sm:$0xff]  ;;  %v595_v7 = vld [vmem:[%s895_s3 + $0xa8] ss:$12 sps:$4 sm:$0xff]   ;;  %v602_v12 = vld [vmem:[%s895_s3 + $0x64] ss:$12 sps:$4 sm:$0xff]  }
   0x3   :  { %v30_v5 = vadd.f32 %v24_v4, %v23_v2  ;;  %v593_v6 = vld [vmem:[%s895_s3 + $0xac] ss:$12 sps:$4 sm:$0xff]   ;;  %v596_v8 = vld [vmem:[%s895_s3 + $0x94] ss:$12 sps:$4 sm:$0xff]   ;;  %v598_v9 = vld [vmem:[%s895_s3 + $0x90] ss:$12 sps:$4 sm:$0xff]  }
   0x4   :  { %28 = vadd.xlane.f32.xlu0 %v27_v3  ;;  %429 = vmatprep.subr.bf16.mxu0 %v593_v6  ;;  %v599_v10 = vld [vmem:[%s895_s3 + $0x7c] ss:$12 sps:$4 sm:$0xff]   ;;  %v601_v11 = vld [vmem:[%s895_s3 + $0x78] ss:$12 sps:$4 sm:$0xff]   ;;  %v604_v13 = vld [vmem:[%s895_s3 + $0x60] ss:$12 sps:$4 sm:$0xff]  }
   0x5   :  { %430 = vmatpush1.bf16.msra.mxu0 %v595_v7  ;;  %v605_v14 = vld [vmem:[%s895_s3 + $0x4c] ss:$12 sps:$4 sm:$0xff]   ;;  %v619_v15 = vld [vmem:[%s895_s3 + $0x170] ss:$12 sps:$4 sm:$0xff]   ;;  %v607_v16 = vld [vmem:[%s895_s3 + $0x48] ss:$12 sps:$4 sm:$0xff]  }
   0x6   :  { %431 = vmatprep.subr.bf16.mxu0 %v596_v8  ;;  %v608_v17 = vld [vmem:[%s895_s3 + $0x34] ss:$12 sps:$4 sm:$0xff]   ;;  %571 = vmatprep.subr.bf16.mxu1 %v619_v15  ;;  %v610_v18 = vld [vmem:[%s895_s3 + $0x30] ss:$12 sps:$4 sm:$0xff]   ;;  %v613_v20 = vld [vmem:[%s895_s3 + $0x18] ss:$12 sps:$4 sm:$0xff]  }
   0x7   :  { %v611_v19 = vld [vmem:[%s895_s3 + $0x1c] ss:$12 sps:$4 sm:$0xff]   ;;  %v614_v21 = vld [vmem:[%s895_s3 + $0x4] ss:$12 sps:$4 sm:$0xff]   ;;  %v616_v22 = vld [vmem:[%s895_s3] ss:$12 sps:$4 sm:$0xff]  }
   0x8   :  { %31 = vadd.xlane.f32.xlu0 %v30_v5  ;;  %v617_v23 = vld [vmem:[%s895_s3 + $0x16c] ss:$12 sps:$4 sm:$0xff]   ;;  %v620_v38 = vld [vmem:[%s895_s3 + $0x168] ss:$12 sps:$4 sm:$0xff]   ;;  %v621_v39 = vld [vmem:[%s895_s3 + $0xb0] ss:$12 sps:$4 sm:$0xff]  }
   0x9   :  { %432 = vmatpush1.bf16.msra.mxu0 %v598_v9  ;;  %572 = vmatpush3.bf16.msra.mxu1 %v621_v39  ;;  %v622_v40 = vld [vmem:[%s895_s3 + $0x154] ss:$12 sps:$4 sm:$0xff]   ;;  %v624_v41 = vld [vmem:[%s895_s3 + $0x158] ss:$12 sps:$4 sm:$0xff]   ;;  %v625_v42 = vld [vmem:[%s895_s3 + $0x150] ss:$12 sps:$4 sm:$0xff]  }
   0xa   :  { %433 = vmatprep.subr.bf16.mxu0 %v599_v10  ;;  %v626_v43 = vld [vmem:[%s895_s3 + $0x98] ss:$12 sps:$4 sm:$0xff]   ;;  %573 = vmatprep.subr.bf16.mxu1 %v624_v41  ;;  %v627_v44 = vld [vmem:[%s895_s3 + $0x13c] ss:$12 sps:$4 sm:$0xff]   ;;  %v629_v45 = vld [vmem:[%s895_s3 + $0x140] ss:$12 sps:$4 sm:$0xff]   ;;  %v61_v10 = vlaneseq }
   0xb   :  { %v630_v46 = vld [vmem:[%s895_s3 + $0x138] ss:$12 sps:$4 sm:$0xff]   ;;  %v631_v47 = vld [vmem:[%s895_s3 + $0x80] ss:$12 sps:$4 sm:$0xff]   ;;  %v634_v49 = vld [vmem:[%s895_s3 + $0x128] ss:$12 sps:$4 sm:$0xff]  }
   0xc   :  { %v632_v48 = vld [vmem:[%s895_s3 + $0x124] ss:$12 sps:$4 sm:$0xff]   ;;  %v635_v50 = vld [vmem:[%s895_s3 + $0x120] ss:$12 sps:$4 sm:$0xff]   ;;  %v636_v51 = vld [vmem:[%s895_s3 + $0x68] ss:$12 sps:$4 sm:$0xff]  }
   0xd   :  { %434 = vmatpush1.bf16.msra.mxu0 %v601_v11  ;;  %574 = vmatpush3.bf16.msra.mxu1 %v626_v43  ;;  %v637_v52 = vld [vmem:[%s895_s3 + $0x10c] ss:$12 sps:$4 sm:$0xff]   ;;  %v639_v53 = vld [vmem:[%s895_s3 + $0x110] ss:$12 sps:$4 sm:$0xff]   ;;  %v640_v54 = vld [vmem:[%s895_s3 + $0x108] ss:$12 sps:$4 sm:$0xff]  }
   0xe   :  { %435 = vmatprep.subr.bf16.mxu0 %v602_v12  ;;  %575 = vmatprep.subr.bf16.mxu1 %v629_v45  ;;  %v641_v55 = vld [vmem:[%s895_s3 + $0x50] ss:$12 sps:$4 sm:$0xff]   ;;  %v642_v56 = vld [vmem:[%s895_s3 + $0xf4] ss:$12 sps:$4 sm:$0xff]   ;;  %v644_v57 = vld [vmem:[%s895_s3 + $0xf8] ss:$12 sps:$4 sm:$0xff]  }
   0xf   :  { %v645_v58 = vld [vmem:[%s895_s3 + $0xf0] ss:$12 sps:$4 sm:$0xff]   ;;  %v646_v59 = vld [vmem:[%s895_s3 + $0x38] ss:$12 sps:$4 sm:$0xff]   ;;  %v649_v61 = vld [vmem:[%s895_s3 + $0xe0] ss:$12 sps:$4 sm:$0xff]  }
  0x10   :  { %v647_v60 = vld [vmem:[%s895_s3 + $0xdc] ss:$12 sps:$4 sm:$0xff]   ;;  %v650_v62 = vld [vmem:[%s895_s3 + $0xd8] ss:$12 sps:$4 sm:$0xff]   ;;  %v651_v63 = vld [vmem:[%s895_s3 + $0x20] ss:$12 sps:$4 sm:$0xff]  }
  0x11   :  { %436 = vmatpush1.bf16.msra.mxu0 %v604_v13  ;;  %576 = vmatpush3.bf16.msra.mxu1 %v631_v47  ;;  %v656_v3 = vld [vmem:[%s895_s3 + $0x8] ss:$12 sps:$4 sm:$0xff]   ;;  %v62_v11 = vshrl.u32 %v61_v10, 7 }
  0x12   :  { %437 = vmatprep.subr.bf16.mxu0 %v605_v14  ;;  %577 = vmatprep.subr.bf16.mxu1 %v634_v49  ;;  %v25_v14 = vld [vmem:[%s896_s1] sm:$0x3] }
  0x13   :  { %v63_v12 = vsub.s32 0, %v62_v11  ;;  %v67_v13 = vsub.s32 1, %v62_v11  ;;  %v168_v39 = vsub.s32 2, %v62_v11 }
  0x15   :  { %438 = vmatpush1.bf16.msra.mxu0 %v607_v16  ;;  %578 = vmatpush3.bf16.msra.mxu1 %v636_v51  ;;  %v26_v16 = vld [vmem:[%s897_s2] sm:$0x3] }
  0x16   :  { %439 = vmatprep.subr.bf16.mxu0 %v608_v17  ;;  %579 = vmatprep.subr.bf16.mxu1 %v639_v53 }
  0x19   :  { %440 = vmatpush1.bf16.msra.mxu0 %v610_v18  ;;  %580 = vmatpush3.bf16.msra.mxu1 %v641_v55  ;;  %v64_v18 = vrot.slane %v25_v14, %v63_v12 }
  0x1a   :  { %441 = vmatprep.subr.bf16.mxu0 %v611_v19  ;;  %581 = vmatprep.subr.bf16.mxu1 %v644_v57  ;;  %v68_v19 = vrot.slane %v25_v14, %v67_v13 }
  0x1d   :  { %442 = vmatpush1.bf16.msra.mxu0 %v613_v20  ;;  %582 = vmatpush3.bf16.msra.mxu1 %v646_v59 }
  0x1e   :  { %443 = vmatprep.subr.bf16.mxu0 %v614_v21  ;;  %583 = vmatprep.subr.bf16.mxu1 %v649_v61 }
  0x21   :  { %444 = vmatpush1.bf16.msra.mxu0 %v616_v22  ;;  %584 = vmatpush3.bf16.msra.mxu1 %v651_v63  ;;  %v79_v22 = vrot.slane %v26_v16, %v63_v12 }
  0x22   :  { %445 = vmatprep.subr.bf16.mxu0 %v617_v23  ;;  %v83_v23 = vrot.slane %v26_v16, %v67_v13 }
  0x25   :  { %446 = vmatpush2.bf16.msra.mxu0 %v620_v38 }
  0x26   :  { %447 = vmatprep.subr.bf16.mxu0 %v622_v40 }
  0x29   :  { %448 = vmatpush2.bf16.msra.mxu0 %v625_v42 }
  0x2a   :  { %449 = vmatprep.subr.bf16.mxu0 %v627_v44 }
  0x2d   :  { %450 = vmatpush2.bf16.msra.mxu0 %v630_v46 }
  0x2e   :  { %451 = vmatprep.subr.bf16.mxu0 %v632_v48 }
  0x31   :  { %452 = vmatpush2.bf16.msra.mxu0 %v635_v50 }
  0x32   :  { %453 = vmatprep.subr.bf16.mxu0 %v637_v52 }
  0x35   :  { %454 = vmatpush2.bf16.msra.mxu0 %v640_v54 }
  0x36   :  { %455 = vmatprep.subr.bf16.mxu0 %v642_v56 }
  0x39   :  { %456 = vmatpush2.bf16.msra.mxu0 %v645_v58 }
  0x3a   :  { %457 = vmatprep.subr.bf16.mxu0 %v647_v60 }
  0x3d   :  { %458 = vmatpush2.bf16.msra.mxu0 %v650_v62 }
  0x8d   :  { %v29_v24 = vpop.xlane.xlu0 %28 }
  0x8e   :  { %v34_v25 = vmul.f32 0.00390625, %v29_v24 }
  0x90   :  { %v757_v26 = vsub.f32 %v21_v0, %v34_v25  ;;  %v759_v27 = vsub.f32 %v22_v1, %v34_v25  ;;  %v652_v0 = vld [vmem:[%s895_s3 + $0xc4] ss:$12 sps:$4 sm:$0xff]   ;;  %v654_v1 = vld [vmem:[%s895_s3 + $0xc8] ss:$12 sps:$4 sm:$0xff]  }
  0x91   :  { %v32_v28 = vpop.xlane.xlu0 %31  ;;  %459 = vmatprep.subr.bf16.mxu0 %v652_v0  ;;  %585 = vmatprep.subr.bf16.mxu1 %v654_v1 }
  0x92   :  { %v35_v29 = vmul.f32 0.00390625, %v32_v28  ;;  %v40_v30 = vmul.f32 %v757_v26, %v757_v26  ;;  %v41_v31 = vmul.f32 %v759_v27, %v759_v27  ;;  %586 = vmatpush3.bf16.msra.mxu1 %v656_v3 }
  0x94   :  { %v765_v32 = vsub.f32 %v23_v2, %v35_v29  ;;  %v767_v33 = vsub.f32 %v24_v4, %v35_v29  ;;  %v44_v34 = vadd.f32 %v41_v31, %v40_v30  ;;  %v655_v2 = vld [vmem:[%s895_s3 + $0xc0] ss:$12 sps:$4 sm:$0xff]  }
  0x95   :  { %460 = vmatpush2.bf16.msra.mxu0 %v655_v2 }
  0x96   :  { %45 = vadd.xlane.f32.xlu1 %v44_v34  ;;  %v42_v35 = vmul.f32 %v765_v32, %v765_v32  ;;  %v43_v36 = vmul.f32 %v767_v33, %v767_v33 }
  0x98   :  { %v47_v37 = vadd.f32 %v43_v36, %v42_v35 }
  0x9a   :  { %48 = vadd.xlane.f32.xlu1 %v47_v37 }
 0x11f   :  { %v46_v4 = vpop.xlane.xlu1 %45 }
 0x120   :  { %v50_v5 = vmul.f32 0.00390625, %v46_v4 }
 0x122   :  { %v52_v6 = vadd.f32 1e-06, %v50_v5 }
 0x123   :  { %v49_v7 = vpop.xlane.xlu1 %48 }
 0x124   :  { %657 = vrsqrt.f32 %v52_v6  ;;  %v51_v8 = vmul.f32 0.00390625, %v49_v7 }
 0x126   :  { %v53_v9 = vadd.f32 1e-06, %v51_v8 }
 0x128   :  { %659 = vrsqrt.f32 %v53_v9 }
 0x131   :  { %v658_v15 = vpop.eup %657 }
 0x132   :  { %v57_v17 = vmul.f32 %v658_v15, %v759_v27  ;;  %v56_v20 = vmul.f32 %v658_v15, %v757_v26  ;;  %v156_v26 = vld [vmem:[%s898_s4] sm:$0x7] }
 0x133   :  { %v169_v43 = vrot.slane %v156_v26, %v168_v39 }
 0x134   :  { %v72_v25 = vmul.f32 %v68_v19, %v57_v17  ;;  %v71_v29 = vmul.f32 %v64_v18, %v56_v20 }
 0x135   :  { %v660_v21 = vpop.eup %659 }
 0x136   :  { %v59_v24 = vmul.f32 %v660_v21, %v767_v33  ;;  %v58_v28 = vmul.f32 %v660_v21, %v765_v32  ;;  %v87_v34 = vadd.f32 %v83_v23, %v72_v25  ;;  %v86_v36 = vadd.f32 %v79_v22, %v71_v29 }
 0x137   :  { %v161_v33 = vrot.slane %v156_v26, %v63_v12  ;;  %v165_v32 = vrot.slane %v156_v26, %v67_v13 }
 0x138   :  { %v74_v30 = vmul.f32 %v68_v19, %v59_v24  ;;  %v73_v31 = vmul.f32 %v64_v18, %v58_v28 }
 0x13a   :  { %v89_v35 = vadd.f32 %v83_v23, %v74_v30  ;;  %v88_v37 = vadd.f32 %v79_v22, %v73_v31 }
 0x13c   :  { %v91_v27 = vpack.c.bf16 %v89_v35, %v87_v34  ;;  %v90_v38 = vpack.c.bf16 %v88_v37, %v86_v36 }
 0x13e   :  { %461 = vmatprep.mubr.bf16.mxu0 %v91_v27  ;;  %504 = vmatprep.mubr.bf16.mxu1 %v91_v27 }
 0x13f   :  { %462 = vmatmul.mubr.bf16.vlgmr.msra.gmra.mxu0 %v90_v38  ;;  %505 = vmatmul.mubr.bf16.vlgmr.msra.gmra.mxu1 %v90_v38 }
 0x1ff   :  { %v463_v40 = vpop.f32.mrf.mxu0  ;;  %v587_v41 = vpop.f32.mrf.mxu1 }
 0x200   :  { %v464_v42 = vadd.f32 %v463_v40, %v161_v33 }
 0x201   :  { %v465_v44 = vpop.f32.mrf.mxu0  ;;  %v588_v45 = vpop.f32.mrf.mxu1 }
 0x202   :  { %513 = vst [vmem:[%s899_s5] sm:$0xff] %v464_v42  ;;  %v466_v46 = vadd.f32 %v465_v44, %v165_v32  ;;  %v589_v47 = vadd.f32 %v588_v45, %v587_v41 }
 0x203   :  { %v467_v48 = vpop.f32.mrf.mxu0  ;;  %v590_v49 = vpop.f32.mrf.mxu1 }
 0x204   :  { %514 = vst [vmem:[%s899_s5 + $0x8] sm:$0xff] %v466_v46  ;;  %v507_v50 = vadd.f32 %v589_v47, %v169_v43  ;;  %v468_v51 = vadd.f32 %v467_v48, %v161_v33 }
 0x205   :  { %v469_v52 = vpop.f32.mrf.mxu0  ;;  %v591_v53 = vpop.f32.mrf.mxu1 }
 0x206   :  { %515 = vst [vmem:[%s899_s5 + $0x10] sm:$0xff] %v507_v50  ;;  %516 = vst [vmem:[%s899_s5 + $0x18] sm:$0xff] %v468_v51  ;;  %v470_v54 = vadd.f32 %v469_v52, %v165_v32  ;;  %v592_v55 = vadd.f32 %v591_v53, %v590_v49 }
 0x208   :  { %517 = vst [vmem:[%s899_s5 + $0x20] sm:$0xff] %v470_v54  ;;  %v510_v56 = vadd.f32 %v592_v55, %v169_v43 }
 0x20a   :  { %518 = vst [vmem:[%s899_s5 + $0x28] sm:$0xff] %v510_v56 }

// kernel: model_forward.5
= control target key start
LH: loop header
LB: loop body
LE: loop exit
PB: predicated region body
PF: predicated region fallthrough
CT: control target
= control target key end

     0   :  { %9 = vsyncpa [#allocation3], 0  ;;  %s1048_s15 = smov [#allocation2]   ;;  %s1142_s0 = inlined_call_operand.vmem [shape: f32[16,768], index: 0, kind: input, shape index: {}]   ;;  %s1143_s1 = inlined_call_operand.hbm [shape: bf16[768,256], index: 1, kind: input, shape index: {}]   ;;  %s1144_s2 = inlined_call_operand.vmem [shape: f32[1,256], index: 2, kind: input, shape index: {}]   ;;  %s1145_s3 = inlined_call_operand.vmem [shape: f32[16,256], index: 3, kind: input, shape index: {}]   ;;  %s1146_s4 = inlined_call_operand.vmem [shape: f32[16,256], index: 4, kind: output, shape index: {}]  }
   0x1   :  { %s17_s16 = sshll.u32 %s1048_s15, 4  ;;  %s18_s16 = int_to_ptr.vmem [resolvable:$true] %s17_s16 }
   0x2   :  { %s1034_s17 = scalar_lea.vmem %s18_s16, 12288  ;;  %p1039_p1 = scmp.lt.s32.totalorder %s18_s16, %s18_s16 }
   0x3   :  { %p1035_p0 = scmp.ne.s32.totalorder %s18_s16, %s1034_s17  ;;  %p1040_p2 = scmp.lt.s32.totalorder %s1034_s17, %s1034_s17 }
   0x5   :  { %p1041_p3 = por %p1040_p2, %p1039_p1 }
   0x7   :  { %p1042_p4 = pnand %p1041_p3, %p1035_p0 }
   0x9   :  { %1045 = shalt.err (!%p1042_p4)
}
   0xa   :  { %s1049_s18 = smov 128   ;;  %s1050_s19 = smov 8  }
   0xb   :  { %23 = dma.hbm_to_vmem [thread:$0]  %s1143_s1, 12288, %s18_s16, [#allocation3], %s1049_s18, %s1049_s18, %s1050_s19  }
   0xc   :  { %1046 = dma.done.wait [#allocation3], 12288  }
   0xd   :  { %1047 = vsyncadd [#allocation3], 4294955008  ;;  %v882_v0 = vld [vmem:[#allocation2 + $0x74] ss:$8 sps:$4 sm:$0xff]   ;;  %v884_v1 = vld [vmem:[#allocation2 + $0x70] ss:$8 sps:$4 sm:$0xff]  }
   0xe   :  { %637 = vmatprep.subr.bf16.mxu0 %v882_v0  ;;  %v885_v2 = vld [vmem:[#allocation2 + $0x174] ss:$8 sps:$4 sm:$0xff]   ;;  %v887_v3 = vld [vmem:[#allocation2 + $0x170] ss:$8 sps:$4 sm:$0xff]   ;;  %v888_v4 = vld [vmem:[#allocation2 + $0x64] ss:$8 sps:$4 sm:$0xff]  }
   0xf   :  { %638 = vmatpush1.bf16.msra.mxu0 %v884_v1  ;;  %v890_v5 = vld [vmem:[#allocation2 + $0x60] ss:$8 sps:$4 sm:$0xff]   ;;  %680 = vmatprep.subr.bf16.mxu1 %v885_v2  ;;  %v891_v6 = vld [vmem:[#allocation2 + $0x164] ss:$8 sps:$4 sm:$0xff]   ;;  %v894_v8 = vld [vmem:[#allocation2 + $0x54] ss:$8 sps:$4 sm:$0xff]  }
  0x10   :  { %681 = vmatpush1.bf16.msra.mxu1 %v887_v3  ;;  %639 = vmatprep.subr.bf16.mxu0 %v888_v4  ;;  %v893_v7 = vld [vmem:[#allocation2 + $0x160] ss:$8 sps:$4 sm:$0xff]   ;;  %v896_v9 = vld [vmem:[#allocation2 + $0x50] ss:$8 sps:$4 sm:$0xff]   ;;  %v897_v10 = vld [vmem:[#allocation2 + $0x154] ss:$8 sps:$4 sm:$0xff]  }
  0x11   :  { %682 = vmatprep.subr.bf16.mxu1 %v891_v6  ;;  %v900_v11 = vld [vmem:[#allocation2 + $0x44] ss:$8 sps:$4 sm:$0xff]   ;;  %v899_v12 = vld [vmem:[#allocation2 + $0x150] ss:$8 sps:$4 sm:$0xff]   ;;  %v902_v14 = vld [vmem:[#allocation2 + $0x40] ss:$8 sps:$4 sm:$0xff]  }
  0x12   :  { %v903_v13 = vld [vmem:[#allocation2 + $0x144] ss:$8 sps:$4 sm:$0xff]   ;;  %v906_v15 = vld [vmem:[#allocation2 + $0x34] ss:$8 sps:$4 sm:$0xff]   ;;  %v905_v16 = vld [vmem:[#allocation2 + $0x140] ss:$8 sps:$4 sm:$0xff]  }
  0x13   :  { %640 = vmatpush1.bf16.msra.mxu0 %v890_v5  ;;  %v909_v17 = vld [vmem:[#allocation2 + $0x134] ss:$8 sps:$4 sm:$0xff]   ;;  %v908_v18 = vld [vmem:[#allocation2 + $0x30] ss:$8 sps:$4 sm:$0xff]   ;;  %v912_v19 = vld [vmem:[#allocation2 + $0x24] ss:$8 sps:$4 sm:$0xff]  }
  0x14   :  { %641 = vmatprep.subr.bf16.mxu0 %v894_v8  ;;  %683 = vmatpush1.bf16.msra.mxu1 %v893_v7  ;;  %v911_v20 = vld [vmem:[#allocation2 + $0x130] ss:$8 sps:$4 sm:$0xff]   ;;  %v915_v21 = vld [vmem:[#allocation2 + $0x124] ss:$8 sps:$4 sm:$0xff]   ;;  %v914_v22 = vld [vmem:[#allocation2 + $0x20] ss:$8 sps:$4 sm:$0xff]  }
  0x15   :  { %684 = vmatprep.subr.bf16.mxu1 %v897_v10  ;;  %v918_v23 = vld [vmem:[#allocation2 + $0x14] ss:$8 sps:$4 sm:$0xff]   ;;  %v917_v24 = vld [vmem:[#allocation2 + $0x120] ss:$8 sps:$4 sm:$0xff]   ;;  %v920_v26 = vld [vmem:[#allocation2 + $0x10] ss:$8 sps:$4 sm:$0xff]  }
  0x16   :  { %v921_v25 = vld [vmem:[#allocation2 + $0x114] ss:$8 sps:$4 sm:$0xff]   ;;  %v924_v27 = vld [vmem:[#allocation2 + $0x4] ss:$8 sps:$4 sm:$0xff]   ;;  %v923_v28 = vld [vmem:[#allocation2 + $0x110] ss:$8 sps:$4 sm:$0xff]  }
  0x17   :  { %642 = vmatpush1.bf16.msra.mxu0 %v896_v9  ;;  %v927_v29 = vld [vmem:[#allocation2 + $0x104] ss:$8 sps:$4 sm:$0xff]   ;;  %v926_v30 = vld [vmem:[#allocation2] ss:$8 sps:$4 sm:$0xff]   ;;  %v930_v31 = vld [vmem:[#allocation2 + $0xf4] ss:$8 sps:$4 sm:$0xff]  }
  0x18   :  { %643 = vmatprep.subr.bf16.mxu0 %v900_v11  ;;  %685 = vmatpush1.bf16.msra.mxu1 %v899_v12  ;;  %v929_v32 = vld [vmem:[#allocation2 + $0x100] ss:$8 sps:$4 sm:$0xff]   ;;  %v933_v33 = vld [vmem:[#allocation2 + $0x1f4] ss:$8 sps:$4 sm:$0xff]   ;;  %v932_v34 = vld [vmem:[#allocation2 + $0xf0] ss:$8 sps:$4 sm:$0xff]  }
  0x19   :  { %686 = vmatprep.subr.bf16.mxu1 %v903_v13  ;;  %v936_v35 = vld [vmem:[#allocation2 + $0xe4] ss:$8 sps:$4 sm:$0xff]   ;;  %v935_v36 = vld [vmem:[#allocation2 + $0x1f0] ss:$8 sps:$4 sm:$0xff]   ;;  %v938_v38 = vld [vmem:[#allocation2 + $0xe0] ss:$8 sps:$4 sm:$0xff]  }
  0x1a   :  { %v939_v37 = vld [vmem:[#allocation2 + $0x1e4] ss:$8 sps:$4 sm:$0xff]   ;;  %v942_v39 = vld [vmem:[#allocation2 + $0xd4] ss:$8 sps:$4 sm:$0xff]   ;;  %v941_v40 = vld [vmem:[#allocation2 + $0x1e0] ss:$8 sps:$4 sm:$0xff]  }
  0x1b   :  { %644 = vmatpush1.bf16.msra.mxu0 %v902_v14  ;;  %v945_v41 = vld [vmem:[#allocation2 + $0x1d4] ss:$8 sps:$4 sm:$0xff]   ;;  %v944_v42 = vld [vmem:[#allocation2 + $0xd0] ss:$8 sps:$4 sm:$0xff]   ;;  %v948_v43 = vld [vmem:[#allocation2 + $0xc4] ss:$8 sps:$4 sm:$0xff]  }
  0x1c   :  { %645 = vmatprep.subr.bf16.mxu0 %v906_v15  ;;  %687 = vmatpush1.bf16.msra.mxu1 %v905_v16  ;;  %v947_v44 = vld [vmem:[#allocation2 + $0x1d0] ss:$8 sps:$4 sm:$0xff]   ;;  %v951_v45 = vld [vmem:[#allocation2 + $0x1c4] ss:$8 sps:$4 sm:$0xff]   ;;  %v950_v48 = vld [vmem:[#allocation2 + $0xc0] ss:$8 sps:$4 sm:$0xff]  }
  0x1d   :  { %688 = vmatprep.subr.bf16.mxu1 %v909_v17  ;;  %v32_v46 = vld [vmem:[%s1142_s0 + $0x8] sm:$0xff]  ;;  %v38_v47 = vld [vmem:[%s1142_s0 + $0x38] sm:$0xff]  ;;  %v31_v5 = vld [vmem:[%s1142_s0] sm:$0xff] }
  0x1e   :  { %v44_v49 = vpack.c.bf16 %v38_v47, %v32_v46  ;;  %v954_v50 = vld [vmem:[#allocation2 + $0xb4] ss:$8 sps:$4 sm:$0xff]   ;;  %v953_v51 = vld [vmem:[#allocation2 + $0x1c0] ss:$8 sps:$4 sm:$0xff]   ;;  %v956_v56 = vld [vmem:[#allocation2 + $0xb0] ss:$8 sps:$4 sm:$0xff]  }
  0x1f   :  { %646 = vmatpush1.bf16.msra.mxu0 %v908_v18  ;;  %v34_v52 = vld [vmem:[%s1142_s0 + $0x18] sm:$0xff]  ;;  %v40_v53 = vld [vmem:[%s1142_s0 + $0x48] sm:$0xff]  ;;  %v37_v7 = vld [vmem:[%s1142_s0 + $0x30] sm:$0xff] }
  0x20   :  { %647 = vmatprep.subr.bf16.mxu0 %v912_v19  ;;  %689 = vmatpush1.bf16.msra.mxu1 %v911_v20  ;;  %v957_v54 = vld [vmem:[#allocation2 + $0x1b4] ss:$8 sps:$4 sm:$0xff]   ;;  %v46_v55 = vpack.c.bf16 %v40_v53, %v34_v52  ;;  %v960_v57 = vld [vmem:[#allocation2 + $0xa4] ss:$8 sps:$4 sm:$0xff]   ;;  %v959_v58 = vld [vmem:[#allocation2 + $0x1b0] ss:$8 sps:$4 sm:$0xff]   ;;  %v43_v11 = vpack.c.bf16 %v37_v7, %v31_v5 }
  0x21   :  { %690 = vmatprep.subr.bf16.mxu1 %v915_v21  ;;  %669 = vmatprep.mubr.bf16.mxu0 %v44_v49  ;;  %v963_v59 = vld [vmem:[#allocation2 + $0x1a4] ss:$8 sps:$4 sm:$0xff]   ;;  %v962_v60 = vld [vmem:[#allocation2 + $0xa0] ss:$8 sps:$4 sm:$0xff]   ;;  %v966_v61 = vld [vmem:[#allocation2 + $0x94] ss:$8 sps:$4 sm:$0xff]  }
  0x22   :  { %712 = vmatprep.mubr.bf16.mxu1 %v46_v55  ;;  %v965_v62 = vld [vmem:[#allocation2 + $0x1a0] ss:$8 sps:$4 sm:$0xff]   ;;  %v969_v63 = vld [vmem:[#allocation2 + $0x194] ss:$8 sps:$4 sm:$0xff]   ;;  %v968_v0 = vld [vmem:[#allocation2 + $0x90] ss:$8 sps:$4 sm:$0xff]  }
  0x23   :  { %648 = vmatpush1.bf16.msra.mxu0 %v914_v22  ;;  %v971_v1 = vld [vmem:[#allocation2 + $0x190] ss:$8 sps:$4 sm:$0xff]   ;;  %v972_v2 = vld [vmem:[#allocation2 + $0x84] ss:$8 sps:$4 sm:$0xff]   ;;  %v974_v3 = vld [vmem:[#allocation2 + $0x80] ss:$8 sps:$4 sm:$0xff]  }
  0x24   :  { %649 = vmatprep.subr.bf16.mxu0 %v918_v23  ;;  %691 = vmatpush1.bf16.msra.mxu1 %v917_v24  ;;  %v975_v4 = vld [vmem:[#allocation2 + $0x184] ss:$8 sps:$4 sm:$0xff]   ;;  %v977_v6 = vld [vmem:[#allocation2 + $0x180] ss:$8 sps:$4 sm:$0xff]   ;;  %v980_v8 = vld [vmem:[#allocation2 + $0x274] ss:$8 sps:$4 sm:$0xff]  }
  0x25   :  { %692 = vmatprep.subr.bf16.mxu1 %v921_v25  ;;  %v33_v9 = vld [vmem:[%s1142_s0 + $0x10] sm:$0xff]  ;;  %v39_v10 = vld [vmem:[%s1142_s0 + $0x40] sm:$0xff]  ;;  %v36_v15 = vld [vmem:[%s1142_s0 + $0x28] sm:$0xff] }
  0x26   :  { %v978_v12 = vld [vmem:[#allocation2 + $0x270] ss:$8 sps:$4 sm:$0xff]   ;;  %v45_v13 = vpack.c.bf16 %v39_v10, %v33_v9  ;;  %v983_v14 = vld [vmem:[#allocation2 + $0x264] ss:$8 sps:$4 sm:$0xff]   ;;  %v981_v16 = vld [vmem:[#allocation2 + $0x260] ss:$8 sps:$4 sm:$0xff]  }
  0x27   :  { %650 = vmatpush1.bf16.msra.mxu0 %v920_v26  ;;  %v42_v17 = vld [vmem:[%s1142_s0 + $0x58] sm:$0xff]  ;;  %v989_v21 = vld [vmem:[#allocation2 + $0x244] ss:$8 sps:$4 sm:$0xff]   ;;  %v987_v22 = vld [vmem:[#allocation2 + $0x240] ss:$8 sps:$4 sm:$0xff]  }
  0x28   :  { %651 = vmatprep.subr.bf16.mxu0 %v924_v27  ;;  %693 = vmatpush1.bf16.msra.mxu1 %v923_v28  ;;  %v986_v18 = vld [vmem:[#allocation2 + $0x254] ss:$8 sps:$4 sm:$0xff]   ;;  %v48_v19 = vpack.c.bf16 %v42_v17, %v36_v15  ;;  %v984_v20 = vld [vmem:[#allocation2 + $0x250] ss:$8 sps:$4 sm:$0xff]   ;;  %v995_v25 = vld [vmem:[#allocation2 + $0x224] ss:$8 sps:$4 sm:$0xff]  }
  0x29   :  { %694 = vmatprep.subr.bf16.mxu1 %v927_v29  ;;  %v992_v23 = vld [vmem:[#allocation2 + $0x234] ss:$8 sps:$4 sm:$0xff]   ;;  %v990_v24 = vld [vmem:[#allocation2 + $0x230] ss:$8 sps:$4 sm:$0xff]   ;;  %v993_v26 = vld [vmem:[#allocation2 + $0x220] ss:$8 sps:$4 sm:$0xff]  }
  0x2a   :  { %v998_v27 = vld [vmem:[#allocation2 + $0x214] ss:$8 sps:$4 sm:$0xff]   ;;  %v996_v28 = vld [vmem:[#allocation2 + $0x210] ss:$8 sps:$4 sm:$0xff]   ;;  %v1001_v29 = vld [vmem:[#allocation2 + $0x204] ss:$8 sps:$4 sm:$0xff]  }
  0x2b   :  { %652 = vmatpush1.bf16.msra.mxu0 %v926_v30  ;;  %v999_v30 = vld [vmem:[#allocation2 + $0x200] ss:$8 sps:$4 sm:$0xff]  }
  0x2c   :  { %653 = vmatprep.subr.bf16.mxu0 %v930_v31  ;;  %695 = vmatpush1.bf16.msra.mxu1 %v929_v32  ;;  %v1004_v31 = vld [vmem:[#allocation2 + $0x2f4] ss:$8 sps:$4 sm:$0xff]   ;;  %v1002_v32 = vld [vmem:[#allocation2 + $0x2f0] ss:$8 sps:$4 sm:$0xff]   ;;  %v1023_v46 = vld [vmem:[#allocation2 + $0x280] ss:$8 sps:$4 sm:$0xff]  }
  0x2d   :  { %696 = vmatprep.subr.bf16.mxu1 %v933_v33  ;;  %v1007_v33 = vld [vmem:[#allocation2 + $0x2e4] ss:$8 sps:$4 sm:$0xff]  }
  0x2e   :  { %v35_v47 = vld [vmem:[%s1142_s0 + $0x20] sm:$0xff] }
  0x2f   :  { %654 = vmatpush2.bf16.msra.mxu0 %v932_v34  ;;  %v1005_v34 = vld [vmem:[#allocation2 + $0x2e0] ss:$8 sps:$4 sm:$0xff]  }
  0x30   :  { %655 = vmatprep.subr.bf16.mxu0 %v936_v35  ;;  %697 = vmatpush2.bf16.msra.mxu1 %v935_v36  ;;  %v1010_v35 = vld [vmem:[#allocation2 + $0x2d4] ss:$8 sps:$4 sm:$0xff]   ;;  %v1008_v36 = vld [vmem:[#allocation2 + $0x2d0] ss:$8 sps:$4 sm:$0xff]   ;;  %v766_v5 = vld [vmem:[%s1145_s3] sm:$0xff] }
  0x31   :  { %698 = vmatprep.subr.bf16.mxu1 %v939_v37  ;;  %v1013_v37 = vld [vmem:[#allocation2 + $0x2c4] ss:$8 sps:$4 sm:$0xff]  }
  0x33   :  { %656 = vmatpush2.bf16.msra.mxu0 %v938_v38  ;;  %v1011_v38 = vld [vmem:[#allocation2 + $0x2c0] ss:$8 sps:$4 sm:$0xff]  }
  0x34   :  { %657 = vmatprep.subr.bf16.mxu0 %v942_v39  ;;  %699 = vmatpush2.bf16.msra.mxu1 %v941_v40  ;;  %v1016_v39 = vld [vmem:[#allocation2 + $0x2b4] ss:$8 sps:$4 sm:$0xff]   ;;  %v1014_v40 = vld [vmem:[#allocation2 + $0x2b0] ss:$8 sps:$4 sm:$0xff]  }
  0x35   :  { %700 = vmatprep.subr.bf16.mxu1 %v945_v41  ;;  %v1019_v41 = vld [vmem:[#allocation2 + $0x2a4] ss:$8 sps:$4 sm:$0xff]  }
  0x37   :  { %658 = vmatpush2.bf16.msra.mxu0 %v944_v42  ;;  %v1017_v42 = vld [vmem:[#allocation2 + $0x2a0] ss:$8 sps:$4 sm:$0xff]  }
  0x38   :  { %659 = vmatprep.subr.bf16.mxu0 %v948_v43  ;;  %701 = vmatpush2.bf16.msra.mxu1 %v947_v44  ;;  %v1022_v43 = vld [vmem:[#allocation2 + $0x294] ss:$8 sps:$4 sm:$0xff]   ;;  %v1020_v44 = vld [vmem:[#allocation2 + $0x290] ss:$8 sps:$4 sm:$0xff]  }
  0x39   :  { %702 = vmatprep.subr.bf16.mxu1 %v951_v45  ;;  %v1025_v45 = vld [vmem:[#allocation2 + $0x284] ss:$8 sps:$4 sm:$0xff]  }
  0x3b   :  { %660 = vmatpush2.bf16.msra.mxu0 %v950_v48  ;;  %v41_v48 = vld [vmem:[%s1142_s0 + $0x50] sm:$0xff] }
  0x3c   :  { %661 = vmatprep.subr.bf16.mxu0 %v954_v50  ;;  %703 = vmatpush2.bf16.msra.mxu1 %v953_v51  ;;  %v47_v49 = vpack.c.bf16 %v41_v48, %v35_v47  ;;  %v147_v50 = vlaneseq }
  0x3d   :  { %704 = vmatprep.subr.bf16.mxu1 %v957_v54  ;;  %v145_v54 = vld [vmem:[%s1144_s2] sm:$0x3] }
  0x3e   :  { %v148_v51 = vshrl.u32 %v147_v50, 7 }
  0x3f   :  { %662 = vmatpush2.bf16.msra.mxu0 %v956_v56 }
  0x40   :  { %663 = vmatprep.subr.bf16.mxu0 %v960_v57  ;;  %705 = vmatpush2.bf16.msra.mxu1 %v959_v58  ;;  %v149_v53 = vsub.s32 0, %v148_v51  ;;  %v153_v55 = vsub.s32 1, %v148_v51 }
  0x41   :  { %706 = vmatprep.subr.bf16.mxu1 %v963_v59 }
  0x42   :  { %v150_v58 = vrot.slane %v145_v54, %v149_v53  ;;  %v154_v59 = vrot.slane %v145_v54, %v153_v55 }
  0x43   :  { %664 = vmatpush2.bf16.msra.mxu0 %v962_v60 }
  0x44   :  { %665 = vmatprep.subr.bf16.mxu0 %v966_v61  ;;  %707 = vmatpush2.bf16.msra.mxu1 %v965_v62 }
  0x45   :  { %708 = vmatprep.subr.bf16.mxu1 %v969_v63 }
  0x47   :  { %666 = vmatpush2.bf16.msra.mxu0 %v968_v0 }
  0x48   :  { %667 = vmatprep.subr.bf16.mxu0 %v972_v2  ;;  %709 = vmatpush2.bf16.msra.mxu1 %v971_v1 }
  0x49   :  { %710 = vmatprep.subr.bf16.mxu1 %v975_v4 }
  0x4b   :  { %668 = vmatpush2.bf16.msra.mxu0 %v974_v3 }
  0x4c   :  { %723 = vmatprep.subr.bf16.mxu0 %v980_v8  ;;  %711 = vmatpush2.bf16.msra.mxu1 %v977_v6 }
  0x4e   :  { %670 = vmatmul.mubr.bf16.vlgmr.msra.gmra.mxu0 %v43_v11  ;;  %v767_v11 = vld [vmem:[%s1145_s3 + $0x8] sm:$0xff] }
  0x4f   :  { %724 = vmatpush1.bf16.msra.mxu0 %v978_v12  ;;  %713 = vmatmul.mubr.bf16.vlgmr.msra.gmra.mxu1 %v45_v13 }
  0x50   :  { %725 = vmatprep.subr.bf16.mxu0 %v983_v14  ;;  %755 = vmatprep.mubr.bf16.mxu0 %v48_v19 }
  0x53   :  { %726 = vmatpush1.bf16.msra.mxu0 %v981_v16  ;;  %v768_v16 = vld [vmem:[%s1145_s3 + $0x10] sm:$0xff] }
  0x54   :  { %727 = vmatprep.subr.bf16.mxu0 %v986_v18 }
  0x57   :  { %728 = vmatpush1.bf16.msra.mxu0 %v984_v20 }
  0x58   :  { %729 = vmatprep.subr.bf16.mxu0 %v989_v21  ;;  %v769_v21 = vld [vmem:[%s1145_s3 + $0x18] sm:$0xff] }
  0x5b   :  { %730 = vmatpush1.bf16.msra.mxu0 %v987_v22 }
  0x5c   :  { %731 = vmatprep.subr.bf16.mxu0 %v992_v23 }
  0x5f   :  { %732 = vmatpush1.bf16.msra.mxu0 %v990_v24 }
  0x60   :  { %733 = vmatprep.subr.bf16.mxu0 %v995_v25 }
  0x63   :  { %734 = vmatpush1.bf16.msra.mxu0 %v993_v26 }
  0x64   :  { %735 = vmatprep.subr.bf16.mxu0 %v998_v27 }
  0x67   :  { %736 = vmatpush1.bf16.msra.mxu0 %v996_v28 }
  0x68   :  { %737 = vmatprep.subr.bf16.mxu0 %v1001_v29 }
  0x6b   :  { %738 = vmatpush1.bf16.msra.mxu0 %v999_v30 }
  0x6c   :  { %739 = vmatprep.subr.bf16.mxu0 %v1004_v31 }
  0x6f   :  { %740 = vmatpush2.bf16.msra.mxu0 %v1002_v32 }
  0x70   :  { %741 = vmatprep.subr.bf16.mxu0 %v1007_v33 }
  0x73   :  { %742 = vmatpush2.bf16.msra.mxu0 %v1005_v34 }
  0x74   :  { %743 = vmatprep.subr.bf16.mxu0 %v1010_v35 }
  0x77   :  { %744 = vmatpush2.bf16.msra.mxu0 %v1008_v36 }
  0x78   :  { %745 = vmatprep.subr.bf16.mxu0 %v1013_v37 }
  0x7b   :  { %746 = vmatpush2.bf16.msra.mxu0 %v1011_v38 }
  0x7c   :  { %747 = vmatprep.subr.bf16.mxu0 %v1016_v39 }
  0x7f   :  { %748 = vmatpush2.bf16.msra.mxu0 %v1014_v40 }
  0x80   :  { %749 = vmatprep.subr.bf16.mxu0 %v1019_v41 }
  0x83   :  { %750 = vmatpush2.bf16.msra.mxu0 %v1017_v42 }
  0x84   :  { %751 = vmatprep.subr.bf16.mxu0 %v1022_v43 }
  0x87   :  { %752 = vmatpush2.bf16.msra.mxu0 %v1020_v44 }
  0x88   :  { %753 = vmatprep.subr.bf16.mxu0 %v1025_v45 }
  0x8b   :  { %754 = vmatpush2.bf16.msra.mxu0 %v1023_v46 }
  0x8e   :  { %756 = vmatmul.mubr.bf16.vlgmr.msra.gmra.mxu0 %v47_v49 }
 0x10e   :  { %v671_v52 = vpop.f32.mrf.mxu0 }
 0x10f   :  { %v714_v57 = vpop.f32.mrf.mxu1  ;;  %v672_v62 = vadd.f32 %v671_v52, %v150_v58 }
 0x110   :  { %v673_v56 = vpop.f32.mrf.mxu0 }
 0x111   :  { %v716_v61 = vpop.f32.mrf.mxu1  ;;  %v674_v63 = vadd.f32 %v673_v56, %v154_v59  ;;  %v715_v2 = vadd.f32 %v714_v57, %v672_v62 }
 0x112   :  { %v675_v60 = vpop.f32.mrf.mxu0 }
 0x113   :  { %v718_v1 = vpop.f32.mrf.mxu1  ;;  %v676_v3 = vadd.f32 %v675_v60, %v150_v58  ;;  %v717_v6 = vadd.f32 %v716_v61, %v674_v63 }
 0x114   :  { %v677_v0 = vpop.f32.mrf.mxu0 }
 0x115   :  { %v678_v7 = vadd.f32 %v677_v0, %v154_v59  ;;  %v720_v9 = vpop.f32.mrf.mxu1  ;;  %v719_v12 = vadd.f32 %v718_v1, %v676_v3 }
 0x117   :  { %v721_v17 = vadd.f32 %v720_v9, %v678_v7 }
 0x14e   :  { %v757_v4 = vpop.f32.mrf.mxu0 }
 0x14f   :  { %v758_v8 = vadd.f32 %v757_v4, %v715_v2 }
 0x150   :  { %v759_v10 = vpop.f32.mrf.mxu0 }
 0x151   :  { %v770_v13 = vadd.f32 %v766_v5, %v758_v8  ;;  %v760_v14 = vadd.f32 %v759_v10, %v717_v6 }
 0x152   :  { %v761_v15 = vpop.f32.mrf.mxu0 }
 0x153   :  { %774 = vst [vmem:[%s1146_s4] sm:$0xff] %v770_v13  ;;  %v771_v18 = vadd.f32 %v767_v11, %v760_v14  ;;  %v762_v19 = vadd.f32 %v761_v15, %v719_v12 }
 0x154   :  { %v763_v20 = vpop.f32.mrf.mxu0 }
 0x155   :  { %775 = vst [vmem:[%s1146_s4 + $0x8] sm:$0xff] %v771_v18  ;;  %v772_v22 = vadd.f32 %v768_v16, %v762_v19  ;;  %v764_v23 = vadd.f32 %v763_v20, %v721_v17 }
 0x157   :  { %776 = vst [vmem:[%s1146_s4 + $0x10] sm:$0xff] %v772_v22  ;;  %v773_v24 = vadd.f32 %v769_v21, %v764_v23 }
 0x159   :  { %777 = vst [vmem:[%s1146_s4 + $0x18] sm:$0xff] %v773_v24 }
 0x15a   :  { %782 = vsyncpa [#allocation3], 1 }

// kernel: model_forward.9
= control target key start
LH: loop header
LB: loop body
LE: loop exit
PB: predicated region body
PF: predicated region fallthrough
CT: control target
= control target key end

     0   :  { %s1734_s18 = smov 0   ;;  %s1999_s0 = inlined_call_operand.vmem [shape: f32[3,32,128], index: 0, kind: input, shape index: {}]   ;;  %s2000_s1 = inlined_call_operand.vmem [shape: f32[1,128], index: 1, kind: input, shape index: {}]   ;;  %s2001_s2 = inlined_call_operand.vmem [shape: f32[1,128], index: 2, kind: input, shape index: {}]   ;;  %s2002_s3 = inlined_call_operand.vmem [shape: bf16[3,128,1536], index: 3, kind: input, shape index: {}]   ;;  %s2003_s4 = inlined_call_operand.vmem [shape: f32[3,1,1536], index: 4, kind: input, shape index: {}]   ;;  %s2004_s5 = inlined_call_operand.vmem [shape: f32[3,32,1536], index: 5, kind: output, shape index: {}]  }
   0x1 LB: > { %s1421_s19 = sadd.s32 4294967295, %s1701_s18   ;;  %p1425_p0 = scmp.ge.s32.totalorder %s1701_s18, 1  ;;  %s1701_s18 = sphi %s1734_s18, %s15_s18  }
   0x2   : > { %p206_p1 = scmp.lt.s32.totalorder %s1701_s18, 4 }
   0x4   : > { %p207_p2 = pnand %p1425_p0, %p206_p1 }
   0x5   : > { %p243_p3 = scmp.lt.s32.totalorder (!%p207_p2), %s1421_s19, 2 }
   0x6   : > { %210 = sbr.rel (%p207_p2) target bundleno = 601 (0x259), region = 40 }
   0xb   : > { %s2006_s19 = smov (!%p243_p3, %s1421_s19), 2  ;;  %v1703_v54 = vmov 0  }
   0xc   : > { %s1530_s20 = sshll.u32 %s2006_s19, 5  ;;  %s1531_s24 = smul.u32 768, %s2006_s19  ;;  %1008 = vmatprep.mubr.bf16.mxu0 %v1703_v54  ;;  %1061 = vmatprep.mubr.bf16.mxu1 %v1703_v54 }
   0xd   : > { %s247_s23 = scalar_lea.vmem %s1999_s0, %s1530_s20  ;;  %s1532_s7 = smul.u32 12, %s2006_s19 }
   0xe   : > { %v263_v0 = vld [vmem:[%s247_s23] sm:$0xff]  ;;  %v265_v1 = vld [vmem:[%s247_s23 + $0x10] sm:$0xff]  ;;  %v264_v2 = vld [vmem:[%s247_s23 + $0x8] sm:$0xff]  ;;  %s1752_s27 = scalar_lea.vmem %s2002_s3, %s1531_s24  ;;  %s1533_s11 = smul.u32 384, %s2006_s19 }
   0xf   : > { %269 = vadd.xlane.f32.xlu0 %v263_v0  ;;  %273 = vadd.xlane.f32.xlu1 %v265_v1  ;;  %v266_v3 = vld [vmem:[%s247_s23 + $0x18] sm:$0xff]  ;;  %v1543_v4 = vld [vmem:[%s1752_s27 + $0x2a4] ss:$48 sps:$4 sm:$0xff]   ;;  %v1547_v6 = vld [vmem:[%s1752_s27 + $0x2a0] ss:$48 sps:$4 sm:$0xff]   ;;  %s256_s10 = scalar_lea.vmem %s2003_s4, %s1532_s7 }
  0x10   : > { %v1545_v5 = vld [vmem:[%s1752_s27 + $0x2ac] ss:$48 sps:$4 sm:$0xff]   ;;  %976 = vmatprep.subr.bf16.mxu0 %v1543_v4  ;;  %v1548_v7 = vld [vmem:[%s1752_s27 + $0x2a8] ss:$48 sps:$4 sm:$0xff]   ;;  %v1549_v24 = vld [vmem:[%s1752_s27 + $0x244] ss:$48 sps:$4 sm:$0xff]   ;;  %s1926_s14 = scalar_lea.vmem %s2004_s5, %s1533_s11 }
  0x11   : > { %1029 = vmatprep.subr.bf16.mxu1 %v1545_v5  ;;  %977 = vmatpush1.bf16.msra.mxu0 %v1547_v6  ;;  %v1551_v25 = vld [vmem:[%s1752_s27 + $0x24c] ss:$48 sps:$4 sm:$0xff]   ;;  %v1553_v26 = vld [vmem:[%s1752_s27 + $0x240] ss:$48 sps:$4 sm:$0xff]   ;;  %v1554_v27 = vld [vmem:[%s1752_s27 + $0x248] ss:$48 sps:$4 sm:$0xff]  }
  0x12   : > { %1030 = vmatpush1.bf16.msra.mxu1 %v1548_v7  ;;  %978 = vmatprep.subr.bf16.mxu0 %v1549_v24  ;;  %v1555_v28 = vld [vmem:[%s1752_s27 + $0x1e4] ss:$48 sps:$4 sm:$0xff]   ;;  %v1557_v29 = vld [vmem:[%s1752_s27 + $0x1ec] ss:$48 sps:$4 sm:$0xff]   ;;  %v1559_v30 = vld [vmem:[%s1752_s27 + $0x1e0] ss:$48 sps:$4 sm:$0xff]  }
  0x13   : > { %271 = vadd.xlane.f32.xlu0 %v264_v2  ;;  %275 = vadd.xlane.f32.xlu1 %v266_v3  ;;  %v1560_v31 = vld [vmem:[%s1752_s27 + $0x1e8] ss:$48 sps:$4 sm:$0xff]   ;;  %v1561_v32 = vld [vmem:[%s1752_s27 + $0x184] ss:$48 sps:$4 sm:$0xff]   ;;  %v1563_v33 = vld [vmem:[%s1752_s27 + $0x18c] ss:$48 sps:$4 sm:$0xff]  }
  0x14   : > { %1031 = vmatprep.subr.bf16.mxu1 %v1551_v25  ;;  %v1565_v34 = vld [vmem:[%s1752_s27 + $0x180] ss:$48 sps:$4 sm:$0xff]   ;;  %v1566_v35 = vld [vmem:[%s1752_s27 + $0x188] ss:$48 sps:$4 sm:$0xff]   ;;  %v1567_v36 = vld [vmem:[%s1752_s27 + $0x124] ss:$48 sps:$4 sm:$0xff]  }
  0x15   : > { %979 = vmatpush1.bf16.msra.mxu0 %v1553_v26  ;;  %v1569_v37 = vld [vmem:[%s1752_s27 + $0x12c] ss:$48 sps:$4 sm:$0xff]   ;;  %v1571_v38 = vld [vmem:[%s1752_s27 + $0x120] ss:$48 sps:$4 sm:$0xff]   ;;  %v1572_v39 = vld [vmem:[%s1752_s27 + $0x128] ss:$48 sps:$4 sm:$0xff]  }
  0x16   : > { %1032 = vmatpush1.bf16.msra.mxu1 %v1554_v27  ;;  %980 = vmatprep.subr.bf16.mxu0 %v1555_v28  ;;  %v1573_v40 = vld [vmem:[%s1752_s27 + $0xc4] ss:$48 sps:$4 sm:$0xff]   ;;  %v1575_v41 = vld [vmem:[%s1752_s27 + $0xcc] ss:$48 sps:$4 sm:$0xff]   ;;  %v1577_v42 = vld [vmem:[%s1752_s27 + $0xc0] ss:$48 sps:$4 sm:$0xff]  }
  0x17   : > { %1033 = vmatprep.subr.bf16.mxu1 %v1557_v29  ;;  %v1578_v43 = vld [vmem:[%s1752_s27 + $0xc8] ss:$48 sps:$4 sm:$0xff]   ;;  %v1579_v44 = vld [vmem:[%s1752_s27 + $0x64] ss:$48 sps:$4 sm:$0xff]   ;;  %v1581_v45 = vld [vmem:[%s1752_s27 + $0x6c] ss:$48 sps:$4 sm:$0xff]  }
  0x18   : > { %v1583_v46 = vld [vmem:[%s1752_s27 + $0x60] ss:$48 sps:$4 sm:$0xff]   ;;  %v1584_v47 = vld [vmem:[%s1752_s27 + $0x68] ss:$48 sps:$4 sm:$0xff]   ;;  %v1585_v48 = vld [vmem:[%s1752_s27 + $0x4] ss:$48 sps:$4 sm:$0xff]  }
  0x19   : > { %981 = vmatpush1.bf16.msra.mxu0 %v1559_v30  ;;  %v1587_v49 = vld [vmem:[%s1752_s27 + $0xc] ss:$48 sps:$4 sm:$0xff]   ;;  %v1589_v50 = vld [vmem:[%s1752_s27] ss:$48 sps:$4 sm:$0xff]   ;;  %v1590_v51 = vld [vmem:[%s1752_s27 + $0x8] ss:$48 sps:$4 sm:$0xff]  }
  0x1a   : > { %1034 = vmatpush1.bf16.msra.mxu1 %v1560_v31  ;;  %982 = vmatprep.subr.bf16.mxu0 %v1561_v32  ;;  %v1593_v52 = vld [vmem:[%s1752_s27 + $0x2b4] ss:$48 sps:$4 sm:$0xff]   ;;  %v1596_v53 = vld [vmem:[%s1752_s27 + $0x2bc] ss:$48 sps:$4 sm:$0xff]   ;;  %v1430_v5 = vld [vmem:[%s2000_s1] ss:$0 sm:$0xff] }
  0x1b   : > { %1035 = vmatprep.subr.bf16.mxu1 %v1563_v33  ;;  %v1602_v24 = vld [vmem:[%s1752_s27 + $0x25c] ss:$48 sps:$4 sm:$0xff]   ;;  %v1605_v27 = vld [vmem:[%s1752_s27 + $0x1f4] ss:$48 sps:$4 sm:$0xff]   ;;  %v1603_v30 = vld [vmem:[%s1752_s27 + $0x1f0] ss:$48 sps:$4 sm:$0xff]  }
  0x1c   : > { %v1608_v28 = vld [vmem:[%s1752_s27 + $0x1fc] ss:$48 sps:$4 sm:$0xff]   ;;  %v1606_v31 = vld [vmem:[%s1752_s27 + $0x1f8] ss:$48 sps:$4 sm:$0xff]   ;;  %v1611_v33 = vld [vmem:[%s1752_s27 + $0x194] ss:$48 sps:$4 sm:$0xff]  }
  0x1d   : > { %983 = vmatpush1.bf16.msra.mxu0 %v1565_v34  ;;  %v1614_v34 = vld [vmem:[%s1752_s27 + $0x19c] ss:$48 sps:$4 sm:$0xff]  }
  0x1e   : > { %1036 = vmatpush1.bf16.msra.mxu1 %v1566_v35  ;;  %984 = vmatprep.subr.bf16.mxu0 %v1567_v36  ;;  %v1609_v35 = vld [vmem:[%s1752_s27 + $0x190] ss:$48 sps:$4 sm:$0xff]   ;;  %v1612_v36 = vld [vmem:[%s1752_s27 + $0x198] ss:$48 sps:$4 sm:$0xff]  }
  0x1f   : > { %1037 = vmatprep.subr.bf16.mxu1 %v1569_v37  ;;  %v1617_v37 = vld [vmem:[%s1752_s27 + $0x134] ss:$48 sps:$4 sm:$0xff]  }
  0x21   : > { %985 = vmatpush1.bf16.msra.mxu0 %v1571_v38  ;;  %v1620_v38 = vld [vmem:[%s1752_s27 + $0x13c] ss:$48 sps:$4 sm:$0xff]  }
  0x22   : > { %1038 = vmatpush1.bf16.msra.mxu1 %v1572_v39  ;;  %986 = vmatprep.subr.bf16.mxu0 %v1573_v40  ;;  %v1615_v39 = vld [vmem:[%s1752_s27 + $0x130] ss:$48 sps:$4 sm:$0xff]   ;;  %v1618_v40 = vld [vmem:[%s1752_s27 + $0x138] ss:$48 sps:$4 sm:$0xff]  }
  0x23   : > { %1039 = vmatprep.subr.bf16.mxu1 %v1575_v41  ;;  %v1623_v41 = vld [vmem:[%s1752_s27 + $0xd4] ss:$48 sps:$4 sm:$0xff]  }
  0x25   : > { %987 = vmatpush1.bf16.msra.mxu0 %v1577_v42  ;;  %v1626_v42 = vld [vmem:[%s1752_s27 + $0xdc] ss:$48 sps:$4 sm:$0xff]  }
  0x26   : > { %1040 = vmatpush1.bf16.msra.mxu1 %v1578_v43  ;;  %988 = vmatprep.subr.bf16.mxu0 %v1579_v44  ;;  %v1621_v43 = vld [vmem:[%s1752_s27 + $0xd0] ss:$48 sps:$4 sm:$0xff]   ;;  %v1624_v44 = vld [vmem:[%s1752_s27 + $0xd8] ss:$48 sps:$4 sm:$0xff]  }
  0x27   : > { %1041 = vmatprep.subr.bf16.mxu1 %v1581_v45  ;;  %v1629_v45 = vld [vmem:[%s1752_s27 + $0x74] ss:$48 sps:$4 sm:$0xff]  }
  0x29   : > { %989 = vmatpush1.bf16.msra.mxu0 %v1583_v46  ;;  %v1632_v46 = vld [vmem:[%s1752_s27 + $0x7c] ss:$48 sps:$4 sm:$0xff]  }
  0x2a   : > { %1042 = vmatpush1.bf16.msra.mxu1 %v1584_v47  ;;  %990 = vmatprep.subr.bf16.mxu0 %v1585_v48  ;;  %v1627_v47 = vld [vmem:[%s1752_s27 + $0x70] ss:$48 sps:$4 sm:$0xff]   ;;  %v1630_v48 = vld [vmem:[%s1752_s27 + $0x78] ss:$48 sps:$4 sm:$0xff]  }
  0x2b   : > { %1043 = vmatprep.subr.bf16.mxu1 %v1587_v49  ;;  %v1635_v49 = vld [vmem:[%s1752_s27 + $0x14] ss:$48 sps:$4 sm:$0xff]  }
  0x2d   : > { %991 = vmatpush1.bf16.msra.mxu0 %v1589_v50  ;;  %v1638_v50 = vld [vmem:[%s1752_s27 + $0x1c] ss:$48 sps:$4 sm:$0xff]  }
  0x2e   : > { %1044 = vmatpush1.bf16.msra.mxu1 %v1590_v51  ;;  %1082 = vmatprep.subr.bf16.mxu0 %v1593_v52  ;;  %v1633_v51 = vld [vmem:[%s1752_s27 + $0x10] ss:$48 sps:$4 sm:$0xff]   ;;  %v1636_v52 = vld [vmem:[%s1752_s27 + $0x18] ss:$48 sps:$4 sm:$0xff]  }
  0x2f   : > { %1135 = vmatprep.subr.bf16.mxu1 %v1596_v53  ;;  %v1641_v53 = vld [vmem:[%s1752_s27 + $0x2c4] ss:$48 sps:$4 sm:$0xff]  }
  0x98   : > { %v270_v8 = vpop.xlane.xlu0 %269  ;;  %v274_v9 = vpop.xlane.xlu1 %273 }
  0x99   : > { %v278_v10 = vmul.f32 0.0078125, %v270_v8  ;;  %v280_v11 = vmul.f32 0.0078125, %v274_v9 }
  0x9b   : > { %v1758_v12 = vsub.f32 %v263_v0, %v278_v10  ;;  %v1760_v13 = vsub.f32 %v265_v1, %v280_v11  ;;  %v1431_v10 = vld [vmem:[%s2001_s2] ss:$0 sm:$0xff] }
  0x9c   : > { %v272_v14 = vpop.xlane.xlu0 %271  ;;  %v276_v15 = vpop.xlane.xlu1 %275 }
  0x9d   : > { %v279_v16 = vmul.f32 0.0078125, %v272_v14  ;;  %v286_v17 = vmul.f32 %v1758_v12, %v1758_v12  ;;  %v281_v18 = vmul.f32 0.0078125, %v276_v15  ;;  %v288_v21 = vmul.f32 %v1760_v13, %v1760_v13 }
  0x9f   : > { %v1764_v19 = vsub.f32 %v264_v2, %v279_v16  ;;  %290 = vadd.xlane.f32.xlu0 %v286_v17  ;;  %v1766_v20 = vsub.f32 %v266_v3, %v281_v18  ;;  %v1591_v18 = vld [vmem:[%s1752_s27 + $0x2b0] ss:$48 sps:$4 sm:$0xff]  }
  0xa1   : > { %v287_v22 = vmul.f32 %v1764_v19, %v1764_v19  ;;  %v289_v23 = vmul.f32 %v1766_v20, %v1766_v20 }
  0xa3   : > { %294 = vadd.xlane.f32.xlu0 %v288_v21  ;;  %292 = vadd.xlane.f32.xlu1 %v287_v22  ;;  %v1594_v21 = vld [vmem:[%s1752_s27 + $0x2b8] ss:$48 sps:$4 sm:$0xff]  }
  0xa7   : > { %296 = vadd.xlane.f32.xlu1 %v289_v23  ;;  %v1599_v23 = vld [vmem:[%s1752_s27 + $0x254] ss:$48 sps:$4 sm:$0xff]  }
 0x128   : > { %v291_v55 = vpop.xlane.xlu0 %290 }
 0x129   : > { %v298_v56 = vmul.f32 0.0078125, %v291_v55  ;;  %v1644_v55 = vld [vmem:[%s1752_s27 + $0x2cc] ss:$48 sps:$4 sm:$0xff]  }
 0x12b   : > { %v302_v57 = vadd.f32 1e-05, %v298_v56  ;;  %v1639_v56 = vld [vmem:[%s1752_s27 + $0x2c0] ss:$48 sps:$4 sm:$0xff]  }
 0x12c   : > { %v293_v58 = vpop.xlane.xlu1 %292  ;;  %v295_v59 = vpop.xlane.xlu0 %294 }
 0x12d   : > { %1687 = vrsqrt.f32 %v302_v57  ;;  %v299_v60 = vmul.f32 0.0078125, %v293_v58  ;;  %v300_v61 = vmul.f32 0.0078125, %v295_v59  ;;  %v1642_v57 = vld [vmem:[%s1752_s27 + $0x2c8] ss:$48 sps:$4 sm:$0xff]   ;;  %v1647_v58 = vld [vmem:[%s1752_s27 + $0x264] ss:$48 sps:$4 sm:$0xff]  }
 0x12e   : > { %v1650_v59 = vld [vmem:[%s1752_s27 + $0x26c] ss:$48 sps:$4 sm:$0xff]  }
 0x12f   : > { %v303_v62 = vadd.f32 1e-05, %v299_v60  ;;  %v304_v63 = vadd.f32 1e-05, %v300_v61  ;;  %v1645_v60 = vld [vmem:[%s1752_s27 + $0x260] ss:$48 sps:$4 sm:$0xff]  }
 0x130   : > { %v297_v0 = vpop.xlane.xlu1 %296  ;;  %v1648_v61 = vld [vmem:[%s1752_s27 + $0x268] ss:$48 sps:$4 sm:$0xff]  }
 0x131   : > { %1689 = vrsqrt.f32 %v303_v62  ;;  %v301_v1 = vmul.f32 0.0078125, %v297_v0  ;;  %v1653_v62 = vld [vmem:[%s1752_s27 + $0x204] ss:$48 sps:$4 sm:$0xff]   ;;  %v1651_v0 = vld [vmem:[%s1752_s27 + $0x200] ss:$48 sps:$4 sm:$0xff]  }
 0x132   : > { %1691 = vrsqrt.f32 %v304_v63  ;;  %v1656_v63 = vld [vmem:[%s1752_s27 + $0x20c] ss:$48 sps:$4 sm:$0xff]  }
 0x133   : > { %v305_v2 = vadd.f32 1e-05, %v301_v1  ;;  %v1654_v1 = vld [vmem:[%s1752_s27 + $0x208] ss:$48 sps:$4 sm:$0xff]  }
 0x135   : > { %1693 = vrsqrt.f32 %v305_v2  ;;  %v1659_v2 = vld [vmem:[%s1752_s27 + $0x1a4] ss:$48 sps:$4 sm:$0xff]  }
 0x13a   : > { %v1688_v3 = vpop.eup %1687 }
 0x13b   : > { %v310_v4 = vmul.f32 %v1688_v3, %v1758_v12  ;;  %v1662_v3 = vld [vmem:[%s1752_s27 + $0x1ac] ss:$48 sps:$4 sm:$0xff]  }
 0x13d   : > { %v320_v7 = vmul.f32 %v1430_v5, %v310_v4  ;;  %v1657_v4 = vld [vmem:[%s1752_s27 + $0x1a0] ss:$48 sps:$4 sm:$0xff]  }
 0x13e   : > { %v1690_v6 = vpop.eup %1689 }
 0x13f   : > { %v311_v8 = vmul.f32 %v1690_v6, %v1764_v19  ;;  %v1692_v9 = vpop.eup %1691  ;;  %v330_v16 = vadd.f32 %v1431_v10, %v320_v7  ;;  %v1665_v6 = vld [vmem:[%s1752_s27 + $0x144] ss:$48 sps:$4 sm:$0xff]   ;;  %v1668_v7 = vld [vmem:[%s1752_s27 + $0x14c] ss:$48 sps:$4 sm:$0xff]  }
 0x140   : > { %v312_v12 = vmul.f32 %v1692_v9, %v1760_v13  ;;  %v1597_v13 = vld [vmem:[%s1752_s27 + $0x250] ss:$48 sps:$4 sm:$0xff]   ;;  %v1666_v9 = vld [vmem:[%s1752_s27 + $0x148] ss:$48 sps:$4 sm:$0xff]  }
 0x141   : > { %v321_v11 = vmul.f32 %v1430_v5, %v311_v8  ;;  %v1663_v8 = vld [vmem:[%s1752_s27 + $0x140] ss:$48 sps:$4 sm:$0xff]  }
 0x142   : > { %v1694_v14 = vpop.eup %1693  ;;  %v322_v25 = vmul.f32 %v1430_v5, %v312_v12  ;;  %v1672_v12 = vld [vmem:[%s1752_s27 + $0xe8] ss:$48 sps:$4 sm:$0xff]  }
 0x143   : > { %v313_v15 = vmul.f32 %v1694_v14, %v1766_v20  ;;  %v331_v17 = vadd.f32 %v1431_v10, %v321_v11  ;;  %v1600_v20 = vld [vmem:[%s1752_s27 + $0x258] ss:$48 sps:$4 sm:$0xff]   ;;  %v1674_v11 = vld [vmem:[%s1752_s27 + $0xec] ss:$48 sps:$4 sm:$0xff]   ;;  %v1669_v14 = vld [vmem:[%s1752_s27 + $0xe0] ss:$48 sps:$4 sm:$0xff]  }
 0x144   : > { %v332_v29 = vadd.f32 %v1431_v10, %v322_v25  ;;  %v436_v25 = vlaneseq }
 0x145   : > { %v323_v19 = vmul.f32 %v1430_v5, %v313_v15  ;;  %v1818_v22 = vpack.c.bf16 %v331_v17, %v330_v16  ;;  %v1660_v5 = vld [vmem:[%s1752_s27 + $0x1a8] ss:$48 sps:$4 sm:$0xff]   ;;  %v1677_v15 = vld [vmem:[%s1752_s27 + $0x84] ss:$48 sps:$4 sm:$0xff]   ;;  %v1680_v16 = vld [vmem:[%s1752_s27 + $0x8c] ss:$48 sps:$4 sm:$0xff]  }
 0x146   : > { %v1675_v17 = vld [vmem:[%s1752_s27 + $0x80] ss:$48 sps:$4 sm:$0xff]  }
 0x147   : > { %1009 = vmatmul.mubr.bf16.vlgmr.msra.gmra.mxu0 %v1818_v22  ;;  %1062 = vmatmul.mubr.bf16.vlgmr.msra.gmra.mxu1 %v1818_v22  ;;  %v333_v26 = vadd.f32 %v1431_v10, %v323_v19  ;;  %v1671_v10 = vld [vmem:[%s1752_s27 + $0xe4] ss:$48 sps:$4 sm:$0xff]   ;;  %v1686_v19 = vld [vmem:[%s1752_s27 + $0x2c] ss:$48 sps:$4 sm:$0xff]  }
 0x148   : > { %1083 = vmatpush1.bf16.msra.mxu0 %v1591_v18  ;;  %1136 = vmatpush1.bf16.msra.mxu1 %v1594_v21  ;;  %v1678_v18 = vld [vmem:[%s1752_s27 + $0x88] ss:$48 sps:$4 sm:$0xff]   ;;  %v1683_v21 = vld [vmem:[%s1752_s27 + $0x24] ss:$48 sps:$4 sm:$0xff]  }
 0x149   : > { %1084 = vmatprep.subr.bf16.mxu0 %v1599_v23  ;;  %1137 = vmatprep.subr.bf16.mxu1 %v1602_v24  ;;  %v1832_v32 = vpack.c.bf16 %v333_v26, %v332_v29  ;;  %v1681_v23 = vld [vmem:[%s1752_s27 + $0x20] ss:$48 sps:$4 sm:$0xff]   ;;  %v1684_v24 = vld [vmem:[%s1752_s27 + $0x28] ss:$48 sps:$4 sm:$0xff]  }
 0x14a   : > { %1018 = vmatprep.mubr.bf16.mxu0 %v1703_v54  ;;  %1071 = vmatprep.mubr.bf16.mxu1 %v1703_v54 }
 0x14c   : > { %1085 = vmatpush1.bf16.msra.mxu0 %v1597_v13  ;;  %1138 = vmatpush1.bf16.msra.mxu1 %v1600_v20  ;;  %v1905_v13 = vshrl.u32 %v436_v25, 7 }
 0x14d   : > { %1086 = vmatprep.subr.bf16.mxu0 %v1605_v27  ;;  %1139 = vmatprep.subr.bf16.mxu1 %v1608_v28 }
 0x14e   : > { %v438_v20 = vsub.s32 0, %v1905_v13  ;;  %v442_v27 = vsub.s32 1, %v1905_v13  ;;  %v450_v28 = vsub.s32 3, %v1905_v13 }
 0x14f   : > { %1019 = vmatmul.mubr.bf16.gmra.mxu0 %v1832_v32  ;;  %1072 = vmatmul.mubr.bf16.gmra.mxu1 %v1832_v32 }
 0x150   : > { %1087 = vmatpush1.bf16.msra.mxu0 %v1603_v30  ;;  %1140 = vmatpush1.bf16.msra.mxu1 %v1606_v31 }
 0x151   : > { %1088 = vmatprep.subr.bf16.mxu0 %v1611_v33  ;;  %1141 = vmatprep.subr.bf16.mxu1 %v1614_v34 }
 0x152   : > { %1114 = vmatprep.mubr.bf16.mxu0 %v1703_v54  ;;  %1167 = vmatprep.mubr.bf16.mxu1 %v1703_v54 }
 0x154   : > { %1089 = vmatpush1.bf16.msra.mxu0 %v1609_v35  ;;  %1142 = vmatpush1.bf16.msra.mxu1 %v1612_v36 }
 0x155   : > { %1090 = vmatprep.subr.bf16.mxu0 %v1617_v37  ;;  %1143 = vmatprep.subr.bf16.mxu1 %v1620_v38 }
 0x158   : > { %1091 = vmatpush1.bf16.msra.mxu0 %v1615_v39  ;;  %1144 = vmatpush1.bf16.msra.mxu1 %v1618_v40 }
 0x159   : > { %1092 = vmatprep.subr.bf16.mxu0 %v1623_v41  ;;  %1145 = vmatprep.subr.bf16.mxu1 %v1626_v42 }
 0x15c   : > { %1093 = vmatpush1.bf16.msra.mxu0 %v1621_v43  ;;  %1146 = vmatpush1.bf16.msra.mxu1 %v1624_v44 }
 0x15d   : > { %1094 = vmatprep.subr.bf16.mxu0 %v1629_v45  ;;  %1147 = vmatprep.subr.bf16.mxu1 %v1632_v46 }
 0x160   : > { %1095 = vmatpush1.bf16.msra.mxu0 %v1627_v47  ;;  %1148 = vmatpush1.bf16.msra.mxu1 %v1630_v48 }
 0x161   : > { %1096 = vmatprep.subr.bf16.mxu0 %v1635_v49  ;;  %1149 = vmatprep.subr.bf16.mxu1 %v1638_v50 }
 0x164   : > { %1097 = vmatpush1.bf16.msra.mxu0 %v1633_v51  ;;  %1150 = vmatpush1.bf16.msra.mxu1 %v1636_v52 }
 0x165   : > { %1188 = vmatprep.subr.bf16.mxu0 %v1641_v53  ;;  %1241 = vmatprep.subr.bf16.mxu1 %v1644_v55 }
 0x167   : > { %1115 = vmatmul.mubr.bf16.vlgmr.msra.gmra.mxu0 %v1818_v22  ;;  %1168 = vmatmul.mubr.bf16.vlgmr.msra.gmra.mxu1 %v1818_v22 }
 0x168   : > { %1189 = vmatpush1.bf16.msra.mxu0 %v1639_v56  ;;  %1242 = vmatpush1.bf16.msra.mxu1 %v1642_v57 }
 0x169   : > { %1190 = vmatprep.subr.bf16.mxu0 %v1647_v58  ;;  %1243 = vmatprep.subr.bf16.mxu1 %v1650_v59 }
 0x16a   : > { %1124 = vmatprep.mubr.bf16.mxu0 %v1703_v54  ;;  %1177 = vmatprep.mubr.bf16.mxu1 %v1703_v54 }
 0x16c   : > { %1191 = vmatpush1.bf16.msra.mxu0 %v1645_v60  ;;  %1244 = vmatpush1.bf16.msra.mxu1 %v1648_v61 }
 0x16d   : > { %1192 = vmatprep.subr.bf16.mxu0 %v1653_v62  ;;  %1245 = vmatprep.subr.bf16.mxu1 %v1656_v63 }
 0x16f   : > { %1125 = vmatmul.mubr.bf16.gmra.mxu0 %v1832_v32  ;;  %1178 = vmatmul.mubr.bf16.gmra.mxu1 %v1832_v32 }
 0x170   : > { %1193 = vmatpush1.bf16.msra.mxu0 %v1651_v0  ;;  %1246 = vmatpush1.bf16.msra.mxu1 %v1654_v1 }
 0x171   : > { %1194 = vmatprep.subr.bf16.mxu0 %v1659_v2  ;;  %1247 = vmatprep.subr.bf16.mxu1 %v1662_v3 }
 0x172   : > { %1220 = vmatprep.mubr.bf16.mxu0 %v1703_v54  ;;  %1273 = vmatprep.mubr.bf16.mxu1 %v1703_v54 }
 0x174   : > { %1195 = vmatpush1.bf16.msra.mxu0 %v1657_v4  ;;  %1248 = vmatpush1.bf16.msra.mxu1 %v1660_v5 }
 0x175   : > { %1196 = vmatprep.subr.bf16.mxu0 %v1665_v6  ;;  %1249 = vmatprep.subr.bf16.mxu1 %v1668_v7  ;;  %v454_v6 = vsub.s32 4, %v1905_v13  ;;  %v462_v7 = vsub.s32 6, %v1905_v13 }
 0x178   : > { %1197 = vmatpush1.bf16.msra.mxu0 %v1663_v8  ;;  %1250 = vmatpush1.bf16.msra.mxu1 %v1666_v9  ;;  %v458_v8 = vsub.s32 5, %v1905_v13  ;;  %v466_v9 = vsub.s32 7, %v1905_v13 }
 0x179   : > { %1198 = vmatprep.subr.bf16.mxu0 %v1671_v10  ;;  %1251 = vmatprep.subr.bf16.mxu1 %v1674_v11 }
 0x17c   : > { %1199 = vmatpush1.bf16.msra.mxu0 %v1669_v14  ;;  %1252 = vmatpush1.bf16.msra.mxu1 %v1672_v12 }
 0x17d   : > { %1200 = vmatprep.subr.bf16.mxu0 %v1677_v15  ;;  %1253 = vmatprep.subr.bf16.mxu1 %v1680_v16 }
 0x180   : > { %1201 = vmatpush1.bf16.msra.mxu0 %v1675_v17  ;;  %1254 = vmatpush1.bf16.msra.mxu1 %v1678_v18 }
 0x181   : > { %1202 = vmatprep.subr.bf16.mxu0 %v1683_v21  ;;  %1255 = vmatprep.subr.bf16.mxu1 %v1686_v19 }
 0x184   : > { %1203 = vmatpush1.bf16.msra.mxu0 %v1681_v23  ;;  %1256 = vmatpush1.bf16.msra.mxu1 %v1684_v24 }
 0x187   : > { %1221 = vmatmul.mubr.bf16.vlgmr.msra.gmra.mxu0 %v1818_v22  ;;  %1274 = vmatmul.mubr.bf16.vlgmr.msra.gmra.mxu1 %v1818_v22  ;;  %v433_v22 = vld [vmem:[%s256_s10 + $0x8] sm:$0xf] }
 0x188   : > { %1230 = vmatprep.mubr.bf16.mxu0 %v1703_v54  ;;  %1283 = vmatprep.mubr.bf16.mxu1 %v1703_v54  ;;  %v1911_v26 = vrot.slane %v433_v22, %v438_v20  ;;  %v446_v54 = vsub.s32 2, %v1905_v13  ;;  %v1918_v30 = vrot.slane %v433_v22, %v442_v27  ;;  %v1920_v31 = vrot.slane %v433_v22, %v450_v28 }
 0x18a   : > { %v1916_v29 = vrot.slane %v433_v22, %v446_v54 }
 0x18f   : > { %1231 = vmatmul.mubr.bf16.gmra.mxu0 %v1832_v32  ;;  %1284 = vmatmul.mubr.bf16.gmra.mxu1 %v1832_v32  ;;  %v432_v32 = vld [vmem:[%s256_s10] sm:$0xff] }
 0x190   : > { %v439_v33 = vrot.slane %v432_v32, %v438_v20  ;;  %v447_v34 = vrot.slane %v432_v32, %v446_v54  ;;  %v443_v35 = vrot.slane %v432_v32, %v442_v27  ;;  %v451_v36 = vrot.slane %v432_v32, %v450_v28 }
 0x191   : > { %v455_v10 = vrot.slane %v432_v32, %v454_v6  ;;  %v463_v11 = vrot.slane %v432_v32, %v462_v7  ;;  %v459_v14 = vrot.slane %v432_v32, %v458_v8  ;;  %v467_v12 = vrot.slane %v432_v32, %v466_v9 }
 0x207   : > { %v1010_v37 = vpop.f32.mrf.mxu0  ;;  %v1063_v38 = vpop.f32.mrf.mxu1 }
 0x208   : > { %v1011_v39 = vadd.f32 %v1010_v37, %v439_v33  ;;  %v1064_v40 = vadd.f32 %v1063_v38, %v447_v34 }
 0x209   : > { %v1012_v41 = vpop.f32.mrf.mxu0  ;;  %v1065_v42 = vpop.f32.mrf.mxu1 }
 0x20a   : > { %1294 = vst [vmem:[%s1926_s14] sm:$0xff] %v1011_v39  ;;  %1296 = vst [vmem:[%s1926_s14 + $0x10] sm:$0xff] %v1064_v40  ;;  %v1013_v43 = vadd.f32 %v1012_v41, %v443_v35  ;;  %v1066_v44 = vadd.f32 %v1065_v42, %v451_v36 }
 0x20b   : > { %v1014_v45 = vpop.f32.mrf.mxu0  ;;  %v1067_v46 = vpop.f32.mrf.mxu1 }
 0x20c   : > { %1295 = vst [vmem:[%s1926_s14 + $0x8] sm:$0xff] %v1013_v43  ;;  %1297 = vst [vmem:[%s1926_s14 + $0x18] sm:$0xff] %v1066_v44  ;;  %v1015_v47 = vadd.f32 %v1014_v45, %v439_v33  ;;  %v1068_v48 = vadd.f32 %v1067_v46, %v447_v34 }
 0x20d   : > { %v1016_v49 = vpop.f32.mrf.mxu0  ;;  %v1069_v50 = vpop.f32.mrf.mxu1 }
 0x20e   : > { %1306 = vst [vmem:[%s1926_s14 + $0x60] sm:$0xff] %v1015_v47  ;;  %1308 = vst [vmem:[%s1926_s14 + $0x70] sm:$0xff] %v1068_v48  ;;  %v1017_v51 = vadd.f32 %v1016_v49, %v443_v35  ;;  %v1070_v52 = vadd.f32 %v1069_v50, %v451_v36 }
 0x20f   : > { %v1020_v53 = vpop.f32.mrf.mxu0  ;;  %v1073_v55 = vpop.f32.mrf.mxu1 }
 0x210   : > { %1307 = vst [vmem:[%s1926_s14 + $0x68] sm:$0xff] %v1017_v51  ;;  %1309 = vst [vmem:[%s1926_s14 + $0x78] sm:$0xff] %v1070_v52  ;;  %v1021_v56 = vadd.f32 %v1020_v53, %v439_v33  ;;  %v1074_v57 = vadd.f32 %v1073_v55, %v447_v34 }
 0x211   : > { %v1022_v58 = vpop.f32.mrf.mxu0  ;;  %v1075_v59 = vpop.f32.mrf.mxu1 }
 0x212   : > { %1318 = vst [vmem:[%s1926_s14 + $0xc0] sm:$0xff] %v1021_v56  ;;  %1320 = vst [vmem:[%s1926_s14 + $0xd0] sm:$0xff] %v1074_v57  ;;  %v1023_v60 = vadd.f32 %v1022_v58, %v443_v35  ;;  %v1076_v61 = vadd.f32 %v1075_v59, %v451_v36 }
 0x213   : > { %v1024_v62 = vpop.f32.mrf.mxu0  ;;  %v1077_v63 = vpop.f32.mrf.mxu1 }
 0x214   : > { %1319 = vst [vmem:[%s1926_s14 + $0xc8] sm:$0xff] %v1023_v60  ;;  %1321 = vst [vmem:[%s1926_s14 + $0xd8] sm:$0xff] %v1076_v61  ;;  %v1025_v0 = vadd.f32 %v1024_v62, %v439_v33  ;;  %v1078_v1 = vadd.f32 %v1077_v63, %v447_v34 }
 0x215   : > { %v1026_v2 = vpop.f32.mrf.mxu0  ;;  %v1079_v3 = vpop.f32.mrf.mxu1 }
 0x216   : > { %1330 = vst [vmem:[%s1926_s14 + $0x120] sm:$0xff] %v1025_v0  ;;  %1332 = vst [vmem:[%s1926_s14 + $0x130] sm:$0xff] %v1078_v1  ;;  %v1027_v4 = vadd.f32 %v1026_v2, %v443_v35  ;;  %v1080_v5 = vadd.f32 %v1079_v3, %v451_v36 }
 0x218   : > { %1331 = vst [vmem:[%s1926_s14 + $0x128] sm:$0xff] %v1027_v4  ;;  %1333 = vst [vmem:[%s1926_s14 + $0x138] sm:$0xff] %v1080_v5 }
 0x227   : > { %v1116_v15 = vpop.f32.mrf.mxu0  ;;  %v1169_v16 = vpop.f32.mrf.mxu1 }
 0x228   : > { %v1117_v17 = vadd.f32 %v1116_v15, %v455_v10  ;;  %v1170_v18 = vadd.f32 %v1169_v16, %v463_v11 }
 0x229   : > { %v1118_v21 = vpop.f32.mrf.mxu0  ;;  %v1171_v19 = vpop.f32.mrf.mxu1 }
 0x22a   : > { %1298 = vst [vmem:[%s1926_s14 + $0x20] sm:$0xff] %v1117_v17  ;;  %1300 = vst [vmem:[%s1926_s14 + $0x30] sm:$0xff] %v1170_v18  ;;  %v1119_v23 = vadd.f32 %v1118_v21, %v459_v14  ;;  %v1172_v24 = vadd.f32 %v1171_v19, %v467_v12 }
 0x22b   : > { %v1120_v25 = vpop.f32.mrf.mxu0  ;;  %v1173_v13 = vpop.f32.mrf.mxu1 }
 0x22c   : > { %1299 = vst [vmem:[%s1926_s14 + $0x28] sm:$0xff] %v1119_v23  ;;  %1301 = vst [vmem:[%s1926_s14 + $0x38] sm:$0xff] %v1172_v24  ;;  %v1121_v20 = vadd.f32 %v1120_v25, %v455_v10  ;;  %v1174_v22 = vadd.f32 %v1173_v13, %v463_v11 }
 0x22d   : > { %v1122_v54 = vpop.f32.mrf.mxu0  ;;  %v1175_v27 = vpop.f32.mrf.mxu1 }
 0x22e   : > { %1310 = vst [vmem:[%s1926_s14 + $0x80] sm:$0xff] %v1121_v20  ;;  %1312 = vst [vmem:[%s1926_s14 + $0x90] sm:$0xff] %v1174_v22  ;;  %v1123_v28 = vadd.f32 %v1122_v54, %v459_v14  ;;  %v1176_v32 = vadd.f32 %v1175_v27, %v467_v12 }
 0x22f   : > { %v1126_v33 = vpop.f32.mrf.mxu0  ;;  %v1179_v34 = vpop.f32.mrf.mxu1 }
 0x230   : > { %1311 = vst [vmem:[%s1926_s14 + $0x88] sm:$0xff] %v1123_v28  ;;  %1313 = vst [vmem:[%s1926_s14 + $0x98] sm:$0xff] %v1176_v32  ;;  %v1127_v35 = vadd.f32 %v1126_v33, %v455_v10  ;;  %v1180_v36 = vadd.f32 %v1179_v34, %v463_v11 }
 0x231   : > { %v1128_v37 = vpop.f32.mrf.mxu0  ;;  %v1181_v38 = vpop.f32.mrf.mxu1 }
 0x232   : > { %1322 = vst [vmem:[%s1926_s14 + $0xe0] sm:$0xff] %v1127_v35  ;;  %1324 = vst [vmem:[%s1926_s14 + $0xf0] sm:$0xff] %v1180_v36  ;;  %v1129_v39 = vadd.f32 %v1128_v37, %v459_v14  ;;  %v1182_v40 = vadd.f32 %v1181_v38, %v467_v12 }
 0x233   : > { %v1130_v41 = vpop.f32.mrf.mxu0  ;;  %v1183_v42 = vpop.f32.mrf.mxu1 }
 0x234   : > { %1323 = vst [vmem:[%s1926_s14 + $0xe8] sm:$0xff] %v1129_v39  ;;  %1325 = vst [vmem:[%s1926_s14 + $0xf8] sm:$0xff] %v1182_v40  ;;  %v1131_v43 = vadd.f32 %v1130_v41, %v455_v10  ;;  %v1184_v44 = vadd.f32 %v1183_v42, %v463_v11 }
 0x235   : > { %v1132_v45 = vpop.f32.mrf.mxu0  ;;  %v1185_v46 = vpop.f32.mrf.mxu1 }
 0x236   : > { %1334 = vst [vmem:[%s1926_s14 + $0x140] sm:$0xff] %v1131_v43  ;;  %1336 = vst [vmem:[%s1926_s14 + $0x150] sm:$0xff] %v1184_v44  ;;  %v1133_v47 = vadd.f32 %v1132_v45, %v459_v14  ;;  %v1186_v48 = vadd.f32 %v1185_v46, %v467_v12 }
 0x238   : > { %1335 = vst [vmem:[%s1926_s14 + $0x148] sm:$0xff] %v1133_v47  ;;  %1337 = vst [vmem:[%s1926_s14 + $0x158] sm:$0xff] %v1186_v48 }
 0x247   : > { %v1222_v49 = vpop.f32.mrf.mxu0  ;;  %v1275_v50 = vpop.f32.mrf.mxu1 }
 0x248   : > { %v1223_v51 = vadd.f32 %v1222_v49, %v1911_v26  ;;  %v1276_v52 = vadd.f32 %v1275_v50, %v1916_v29 }
 0x249   : > { %v1224_v53 = vpop.f32.mrf.mxu0  ;;  %v1277_v55 = vpop.f32.mrf.mxu1 }
 0x24a   : > { %1302 = vst [vmem:[%s1926_s14 + $0x40] sm:$0xff] %v1223_v51  ;;  %1304 = vst [vmem:[%s1926_s14 + $0x50] sm:$0xff] %v1276_v52  ;;  %v1225_v56 = vadd.f32 %v1224_v53, %v1918_v30  ;;  %v1278_v57 = vadd.f32 %v1277_v55, %v1920_v31 }
 0x24b   : > { %v1226_v58 = vpop.f32.mrf.mxu0  ;;  %v1279_v59 = vpop.f32.mrf.mxu1 }
 0x24c   : > { %1303 = vst [vmem:[%s1926_s14 + $0x48] sm:$0xff] %v1225_v56  ;;  %1305 = vst [vmem:[%s1926_s14 + $0x58] sm:$0xff] %v1278_v57  ;;  %v1227_v60 = vadd.f32 %v1226_v58, %v1911_v26  ;;  %v1280_v61 = vadd.f32 %v1279_v59, %v1916_v29 }
 0x24d   : > { %v1228_v62 = vpop.f32.mrf.mxu0  ;;  %v1281_v63 = vpop.f32.mrf.mxu1 }
 0x24e   : > { %1314 = vst [vmem:[%s1926_s14 + $0xa0] sm:$0xff] %v1227_v60  ;;  %1316 = vst [vmem:[%s1926_s14 + $0xb0] sm:$0xff] %v1280_v61  ;;  %v1229_v0 = vadd.f32 %v1228_v62, %v1918_v30  ;;  %v1282_v1 = vadd.f32 %v1281_v63, %v1920_v31 }
 0x24f   : > { %v1232_v2 = vpop.f32.mrf.mxu0  ;;  %v1285_v3 = vpop.f32.mrf.mxu1 }
 0x250   : > { %1315 = vst [vmem:[%s1926_s14 + $0xa8] sm:$0xff] %v1229_v0  ;;  %1317 = vst [vmem:[%s1926_s14 + $0xb8] sm:$0xff] %v1282_v1  ;;  %v1233_v4 = vadd.f32 %v1232_v2, %v1911_v26  ;;  %v1286_v5 = vadd.f32 %v1285_v3, %v1916_v29 }
 0x251   : > { %v1234_v6 = vpop.f32.mrf.mxu0  ;;  %v1287_v7 = vpop.f32.mrf.mxu1 }
 0x252   : > { %1326 = vst [vmem:[%s1926_s14 + $0x100] sm:$0xff] %v1233_v4  ;;  %1328 = vst [vmem:[%s1926_s14 + $0x110] sm:$0xff] %v1286_v5  ;;  %v1235_v8 = vadd.f32 %v1234_v6, %v1918_v30  ;;  %v1288_v9 = vadd.f32 %v1287_v7, %v1920_v31 }
 0x253   : > { %v1236_v10 = vpop.f32.mrf.mxu0  ;;  %v1289_v11 = vpop.f32.mrf.mxu1 }
 0x254   : > { %1327 = vst [vmem:[%s1926_s14 + $0x108] sm:$0xff] %v1235_v8  ;;  %1329 = vst [vmem:[%s1926_s14 + $0x118] sm:$0xff] %v1288_v9  ;;  %v1237_v14 = vadd.f32 %v1236_v10, %v1911_v26  ;;  %v1290_v12 = vadd.f32 %v1289_v11, %v1916_v29 }
 0x255   : > { %v1238_v15 = vpop.f32.mrf.mxu0  ;;  %v1291_v16 = vpop.f32.mrf.mxu1 }
 0x256   : > { %1338 = vst [vmem:[%s1926_s14 + $0x160] sm:$0xff] %v1237_v14  ;;  %1340 = vst [vmem:[%s1926_s14 + $0x170] sm:$0xff] %v1290_v12  ;;  %v1239_v17 = vadd.f32 %v1238_v15, %v1918_v30  ;;  %v1292_v18 = vadd.f32 %v1291_v16, %v1920_v31 }
 0x258   : > { %1339 = vst [vmem:[%s1926_s14 + $0x168] sm:$0xff] %v1239_v17  ;;  %1341 = vst [vmem:[%s1926_s14 + $0x178] sm:$0xff] %v1292_v18 }
 0x259 PF: > { %s15_s18 = sadd.s32 1, %s1701_s18  }
 0x25a   : > { %p12_p4 = scmp.ge.s32.totalorder %s15_s18, 5  }
 0x25c   :  { %14 = sbr.rel (!%p12_p4) target bundleno = 1 (0x1), region = 76 }

// kernel: model_forward.6
= control target key start
LH: loop header
LB: loop body
LE: loop exit
PB: predicated region body
PF: predicated region fallthrough
CT: control target
= control target key end

     0   :  { %s8412_s0 = inlined_call_operand.vmem [shape: f32[1,16,256], index: 0, kind: input, shape index: {}]   ;;  %s8413_s1 = inlined_call_operand.vmem [shape: f32[1,4,1,256], index: 1, kind: input, shape index: {}]   ;;  %s8414_s2 = inlined_call_operand.vmem [shape: f32[1,4,1,256], index: 2, kind: input, shape index: {}]   ;;  %s8415_s3 = inlined_call_operand.hbm [shape: bf16[1,4,256,768], index: 3, kind: input, shape index: {}]   ;;  %s8416_s4 = inlined_call_operand.vmem [shape: f32[1,4,1,768], index: 4, kind: input, shape index: {}]   ;;  %s8417_s5 = inlined_call_operand.vmem [shape: bf16[1,4,256,256], index: 5, kind: input, shape index: {}]   ;;  %s8418_s6 = inlined_call_operand.vmem [shape: f32[1,4,1,256], index: 6, kind: input, shape index: {}]   ;;  %s8419_s7 = inlined_call_operand.vmem [shape: f32[1,4,1,256], index: 7, kind: input, shape index: {}]   ;;  %s8420_s8 = inlined_call_operand.vmem [shape: f32[1,4,1,256], index: 8, kind: input, shape index: {}]   ;;  %s8421_s9 = inlined_call_operand.vmem [shape: bf16[1,4,256,1024], index: 9, kind: input, shape index: {}]   ;;  %s8422_s10 = inlined_call_operand.vmem [shape: f32[1,4,1,1024], index: 10, kind: input, shape index: {}]   ;;  %s8423_s11 = inlined_call_operand.vmem [shape: bf16[1,4,1024,256], index: 11, kind: input, shape index: {}]   ;;  %s8424_s12 = inlined_call_operand.vmem [shape: f32[1,4,1,256], index: 12, kind: input, shape index: {}]   ;;  %s8425_s13 = inlined_call_operand.vmem [shape: f32[1,16,256], index: 13, kind: output, shape index: {}]  }
   0x1   :  { %8434 = sst [smem:[#allocation12_spill]] %s8412_s0 }
   0x2   :  { %8435 = sst [smem:[#allocation13_spill]] %s8415_s3 }
   0x3   :  { %8436 = sst [smem:[#allocation14_spill]] %s8416_s4 }
   0x4   :  { %8437 = sst [smem:[#allocation15_spill]] %s8425_s13 }
   0x5   :  { %18 = vsyncpa [#allocation3], 0 }
   0x6   :  { %20 = vsyncpa [#allocation3 + $0x1], 0  ;;  %s7014_s25 = smov 0   ;;  %s7016_s26 = smov 0  }
   0x7   :  { %s7018_s27 = smov 0   ;;  %s7020_s28 = smov 0  }
   0x8   :  { %s7022_s29 = smov 0   ;;  %s7024_s30 = smov 0  }
   0x9 LB: > { %8438 = sst [smem:[#allocation5_spill]] %s6918_s26  ;;  %s5740_s14 = sadd.s32 4294967295, %s6934_s30   ;;  %s6934_s30 = sphi %s7024_s30, %s26_s30   ;;  %s6930_s29 = sphi %s7022_s29, %s8464_s29   ;;  %s6926_s28 = sphi %s7020_s28, %s8463_s28   ;;  %s6922_s27 = sphi %s7018_s27, %s8462_s27   ;;  %s6918_s26 = sphi %s7016_s26, %s8461_s26   ;;  %s6914_s25 = sphi %s7014_s25, %s8460_s25  }
   0xa   : > { %8439 = sst [smem:[#allocation6_spill]] %s6922_s27  ;;  %s35_s15 = sadd.s32 1, %s6930_s29 }
   0xb   : > { %8440 = sst [smem:[#allocation7_spill]] %s6930_s29  ;;  %p36_p0 = scmp.ge.s32.totalorder %s35_s15, 4 }
   0xc   : > { %8441 = sst [smem:[#allocation8_spill]] %s6934_s30  ;;  %s129_s16 = sadd.s32 1, %s6922_s27 }
   0xd   : > { %p136_p1 = scmp.ne.s32.totalorder %s6922_s27, %s6918_s26  ;;  %p137_p2 = scmp.eq.s32.totalorder %s6934_s30, 0 }
   0xe   : > { %s8466_s15 = smov (%p36_p0, %s35_s15), 0  ;;  %p142_p4 = scmp.ne.s32.totalorder %s6918_s26, %s6914_s25 }
   0xf   : > { %8442 = sst [smem:[#allocation9_spill]] %s8466_s15  ;;  %p138_p3 = por %p137_p2, %p136_p1 }
  0x10   : > { %s125_s17 = ssub.s32 %s6930_s29, %s8466_s15  ;;  %p143_p5 = scmp.eq.s32.totalorder %s5740_s14, 0 }
  0x11   : > { %p127_p6 = scmp.eq.s32.totalorder %s125_s17, 0  ;;  %p6308_p8 = scmp.lt.s32.totalorder %s6934_s30, 4 }
  0x12   : > { %p7053_p7 = por %p143_p5, %p142_p4  ;;  %s474_s20 = sand.u32 1, %s6922_s27  }
  0x13   : > { %s7059_s19 = scalar_select %p127_p6, %s6922_s27, %s129_s16  }
  0x14   : > { %s6299_s21 = smul.u32 12288, %s6930_s29  ;;  %s8445_s3 = sld [smem:[#allocation13_spill]] }
  0x15   : > { %8444 = sst [smem:[#allocation10_spill]] %s7059_s19  ;;  %s6298_s22 = smul.u32 768, %s474_s20 }
  0x16   : > { %p7066_p9 = pnand %p6308_p8, %p138_p3  ;;  %s475_s17 = scalar_lea.sflag [#allocation3], %s474_s20 }
  0x17   : > { %s478_s25 = scalar_lea.vmem [#allocation2], %s6298_s22  ;;  %s6936_s15 = smov [#allocation2]  }
  0x18   : > { %s487_s14 = sshll.u32 %s478_s25, 4  ;;  %p6858_p10 = pneg %p7066_p9  ;;  %s488_s14 = int_to_ptr.vmem [resolvable:$true] %s487_s14 }
  0x19   : > { %s6869_s16 = scalar_lea.vmem %s488_s14, 12288  ;;  %s6874_s29 = sshll.u32 %s6936_s15, 4  ;;  %s6875_s29 = int_to_ptr.vmem [resolvable:$false] %s6874_s29 }
  0x1a   : > { %s486_s13 = scalar_lea.hbm %s8445_s3, %s6299_s21  ;;  %p6870_p11 = scmp.ne.s32.totalorder %s488_s14, %s6869_s16 }
  0x1b   : > { %s6876_s23 = scalar_lea.vmem %s6875_s29, 24576  ;;  %p6877_p0 = scmp.lt.s32.totalorder %s488_s14, %s6875_s29 }
  0x1c   : > { %p6872_p12 = pnand %p6870_p11, %p6858_p10  ;;  %p6878_p1 = scmp.lt.s32.totalorder %s6876_s23, %s6869_s16 }
  0x1e   : > { %p6873_p13 = pneg %p6872_p12  ;;  %p6879_p2 = por %p6878_p1, %p6877_p0 }
  0x20   : > { %p6880_p3 = pnand %p6879_p2, %p6873_p13 }
  0x22   : > { %6883 = shalt.err (!%p6880_p3)
}
  0x23   : > { %s6937_s21 = smov 384   ;;  %s6938_s20 = smov 24  }
  0x24   : > { %6307 = dma.hbm_to_vmem [thread:$0]  (!%p7066_p9), %s486_s13, 12288, %s488_s14, %s475_s17, %s6937_s21, %s6937_s21, %s6938_s20  }
  0x25   : > { %p5745_p4 = scmp.ge.s32.totalorder %s6934_s30, 1  ;;  %p597_p5 = scmp.lt.s32.totalorder %s6934_s30, 5 }
  0x27   : > { %p598_p6 = pnand %p5745_p4, %p597_p5 }
  0x29   : > { %601 = sbr.rel (%p598_p6) target bundleno = 3958 (0xf76), region = 72 }
  0x2e   : > { %s603_s15 = sand.u32 1, %s6918_s26  }
  0x2f   : > { %s6300_s22 = smul.u32 768, %s603_s15  ;;  %s604_s29 = scalar_lea.sflag [#allocation3], %s603_s15 }
  0x31   : > { %s7077_s24 = scalar_lea.vmem [#allocation2], %s6300_s22 }
  0x32   : > { %6909 = dma.done.wait (%p7053_p7), %s604_s29, 12288  }
  0x33   : > { %6911 = vsyncadd (%p7053_p7), %s604_s29, 4294955008  ;;  %p753_p8 = scmp.lt.s32.totalorder %s6926_s28, 3  ;;  %s8447_s4 = sld [smem:[#allocation14_spill]] }
  0x34   : > { %p5759_p7 = scmp.ne.s32.totalorder %s6926_s28, 0 }
  0x35   : > { %s754_s0 = scalar_select %p753_p8, %s6926_s28, 3 }
  0x36   : > { %s8450_s30 = sld [smem:[#allocation15_spill]] (!%p5759_p7) }
  0x37   : > { %s7085_s13 = sshll.u32 %s754_s0, 1  ;;  %s6301_s25 = smul.u32 6, %s754_s0 }
  0x38   : > { %s6167_s29 = sshll.u32 %s754_s0, 8  ;;  %s799_s23 = scalar_lea.vmem %s8419_s7, %s7085_s13 }
  0x39   : > { %s7098_s22 = scalar_lea.vmem %s8447_s4, %s6301_s25  ;;  %s7103_s27 = scalar_lea.vmem %s8417_s5, %s6167_s29 }
  0x3a   : > { %8448 = sst [smem:[#allocation11_spill]] %s7098_s22  ;;  %s6168_s25 = sshll.u32 %s754_s0, 10 }
  0x3b   : > { %s5755_s15 = sshll.u32 %s754_s0, 3  ;;  %s7120_s3 = scalar_lea.vmem %s8421_s9, %s6168_s25 }
  0x3c   : > { %s7125_s26 = scalar_lea.vmem %s8422_s10, %s5755_s15  ;;  %s7130_s16 = scalar_lea.vmem %s8423_s11, %s6168_s25 }
  0x3d   : > { %851 = sbr.rel (%p5759_p7) target bundleno = 70 (0x46), region = 80  ;;  %s8449_s22 = sld [smem:[#allocation12_spill]] (!%p5759_p7) }
  0x43   : > { %v852_v0 = vld [vmem:[%s8449_s22] sm:$0xff]  ;;  %v853_v1 = vld [vmem:[%s8449_s22 + $0x8] sm:$0xff]  ;;  %v854_v2 = vld [vmem:[%s8449_s22 + $0x10] sm:$0xff] }
  0x44   : > { %856 = vst [vmem:[%s8450_s30] sm:$0xff] %v852_v0  ;;  %857 = vst [vmem:[%s8450_s30 + $0x8] sm:$0xff] %v853_v1  ;;  %v855_v3 = vld [vmem:[%s8449_s22 + $0x18] sm:$0xff] }
  0x45   : > { %858 = vst [vmem:[%s8450_s30 + $0x10] sm:$0xff] %v854_v2  ;;  %859 = vst [vmem:[%s8450_s30 + $0x18] sm:$0xff] %v855_v3 }
  0x46 PF: > { %s8451_s14 = sld [smem:[#allocation15_spill]]  ;;  %v6364_v10 = vld [vmem:[%s7077_s24 + $0x154] ss:$24 sps:$4 sm:$0xff]   ;;  %v6366_v11 = vld [vmem:[%s7077_s24 + $0x150] ss:$24 sps:$4 sm:$0xff]   ;;  %s8452_s20 = scalar_lea.vmem %s8413_s1, %s7085_s13  ;;  %vm6940_vm0 = vmmov 0  }
  0x47   : > { %v6367_v12 = vld [vmem:[%s7077_s24 + $0x15c] ss:$24 sps:$4 sm:$0xff]   ;;  %v6369_v13 = vld [vmem:[%s7077_s24 + $0x158] ss:$24 sps:$4 sm:$0xff]   ;;  %1539 = vmatprep.subr.bf16.mxu0 %v6364_v10  ;;  %v6373_v15 = vld [vmem:[%s7077_s24 + $0x12c] ss:$24 sps:$4 sm:$0xff]   ;;  %s8453_s29 = scalar_lea.vmem %s8414_s2, %s7085_s13  ;;  %s8455_s17 = scalar_lea.vmem %s8418_s6, %s7085_s13 }
  0x48   : > { %v6370_v14 = vld [vmem:[%s7077_s24 + $0x124] ss:$24 sps:$4 sm:$0xff]   ;;  %1582 = vmatprep.subr.bf16.mxu1 %v6367_v12  ;;  %1540 = vmatpush1.bf16.msra.mxu0 %v6366_v11  ;;  %v6372_v16 = vld [vmem:[%s7077_s24 + $0x120] ss:$24 sps:$4 sm:$0xff]   ;;  %v6376_v18 = vld [vmem:[%s7077_s24 + $0xf4] ss:$24 sps:$4 sm:$0xff]   ;;  %s8456_s25 = scalar_lea.vmem %s8420_s8, %s7085_s13 }
  0x49   : > { %1583 = vmatpush1.bf16.msra.mxu1 %v6369_v13  ;;  %v6375_v17 = vld [vmem:[%s7077_s24 + $0x128] ss:$24 sps:$4 sm:$0xff]   ;;  %1541 = vmatprep.subr.bf16.mxu0 %v6370_v14  ;;  %v6379_v19 = vld [vmem:[%s7077_s24 + $0xfc] ss:$24 sps:$4 sm:$0xff]   ;;  %v6381_v21 = vld [vmem:[%s7077_s24 + $0xf8] ss:$24 sps:$4 sm:$0xff]  }
  0x4a   : > { %1584 = vmatprep.subr.bf16.mxu1 %v6373_v15  ;;  %v6378_v20 = vld [vmem:[%s7077_s24 + $0xf0] ss:$24 sps:$4 sm:$0xff]   ;;  %v6382_v22 = vld [vmem:[%s7077_s24 + $0xc4] ss:$24 sps:$4 sm:$0xff]   ;;  %v6384_v24 = vld [vmem:[%s7077_s24 + $0xc0] ss:$24 sps:$4 sm:$0xff]  }
  0x4b   : > { %v6385_v23 = vld [vmem:[%s7077_s24 + $0xcc] ss:$24 sps:$4 sm:$0xff]   ;;  %v6387_v25 = vld [vmem:[%s7077_s24 + $0xc8] ss:$24 sps:$4 sm:$0xff]   ;;  %v6391_v27 = vld [vmem:[%s7077_s24 + $0x9c] ss:$24 sps:$4 sm:$0xff]  }
  0x4c   : > { %v7164_v4 = vld [vmem:[%s8451_s14] sm:$0xff]  ;;  %v7169_v5 = vld [vmem:[%s8451_s14 + $0x8] sm:$0xff]  ;;  %v7174_v6 = vld [vmem:[%s8451_s14 + $0x10] sm:$0xff]  ;;  %1542 = vmatpush1.bf16.msra.mxu0 %v6372_v16  ;;  %s8454_s18 = sld [smem:[#allocation11_spill]]  ;;  %vm1708_vm1 = vcmask 523264   ;;  %vm1829_vm2 = vcmask 1043456  }
  0x4d   : > { %v866_v7 = vadd.f32 %v7169_v5, %v7164_v4  ;;  %v7181_v8 = vld [vmem:[%s8451_s14 + $0x18] sm:$0xff]  ;;  %1585 = vmatpush1.bf16.msra.mxu1 %v6375_v17  ;;  %1543 = vmatprep.subr.bf16.mxu0 %v6376_v18  ;;  %v6388_v26 = vld [vmem:[%s7077_s24 + $0x94] ss:$24 sps:$4 sm:$0xff]   ;;  %v6390_v28 = vld [vmem:[%s7077_s24 + $0x90] ss:$24 sps:$4 sm:$0xff]   ;;  %vm1801_vm3 = vcmask 64512  }
  0x4e   : > { %v869_v9 = vadd.f32 %v7181_v8, %v7174_v6  ;;  %1586 = vmatprep.subr.bf16.mxu1 %v6379_v19  ;;  %v6393_v29 = vld [vmem:[%s7077_s24 + $0x98] ss:$24 sps:$4 sm:$0xff]   ;;  %v6394_v30 = vld [vmem:[%s7077_s24 + $0x64] ss:$24 sps:$4 sm:$0xff]   ;;  %v6399_v33 = vld [vmem:[%s7077_s24 + $0x68] ss:$24 sps:$4 sm:$0xff]  }
  0x4f   : > { %867 = vadd.xlane.f32.xlu0 %v866_v7  ;;  %v6397_v31 = vld [vmem:[%s7077_s24 + $0x6c] ss:$24 sps:$4 sm:$0xff]   ;;  %v6396_v32 = vld [vmem:[%s7077_s24 + $0x60] ss:$24 sps:$4 sm:$0xff]   ;;  %v6403_v35 = vld [vmem:[%s7077_s24 + $0x3c] ss:$24 sps:$4 sm:$0xff]  }
  0x50   : > { %1544 = vmatpush1.bf16.msra.mxu0 %v6378_v20  ;;  %v6400_v34 = vld [vmem:[%s7077_s24 + $0x34] ss:$24 sps:$4 sm:$0xff]   ;;  %v6402_v36 = vld [vmem:[%s7077_s24 + $0x30] ss:$24 sps:$4 sm:$0xff]   ;;  %v6406_v38 = vld [vmem:[%s7077_s24 + $0x4] ss:$24 sps:$4 sm:$0xff]  }
  0x51   : > { %1587 = vmatpush1.bf16.msra.mxu1 %v6381_v21  ;;  %1545 = vmatprep.subr.bf16.mxu0 %v6382_v22  ;;  %v6405_v37 = vld [vmem:[%s7077_s24 + $0x38] ss:$24 sps:$4 sm:$0xff]   ;;  %v6409_v39 = vld [vmem:[%s7077_s24 + $0xc] ss:$24 sps:$4 sm:$0xff]   ;;  %v6411_v41 = vld [vmem:[%s7077_s24 + $0x8] ss:$24 sps:$4 sm:$0xff]  }
  0x52   : > { %1588 = vmatprep.subr.bf16.mxu1 %v6385_v23  ;;  %v6408_v40 = vld [vmem:[%s7077_s24] ss:$24 sps:$4 sm:$0xff]   ;;  %v6412_v42 = vld [vmem:[%s7077_s24 + $0x2d4] ss:$24 sps:$4 sm:$0xff]   ;;  %v6414_v44 = vld [vmem:[%s7077_s24 + $0x2d0] ss:$24 sps:$4 sm:$0xff]  }
  0x53   : > { %870 = vadd.xlane.f32.xlu0 %v869_v9  ;;  %v6415_v43 = vld [vmem:[%s7077_s24 + $0x2dc] ss:$24 sps:$4 sm:$0xff]   ;;  %v6417_v59 = vld [vmem:[%s7077_s24 + $0x2d8] ss:$24 sps:$4 sm:$0xff]   ;;  %v6421_v62 = vld [vmem:[%s7077_s24 + $0x2ac] ss:$24 sps:$4 sm:$0xff]  }
  0x54   : > { %1546 = vmatpush1.bf16.msra.mxu0 %v6384_v24  ;;  %v6418_v60 = vld [vmem:[%s7077_s24 + $0x2a4] ss:$24 sps:$4 sm:$0xff]   ;;  %v6420_v61 = vld [vmem:[%s7077_s24 + $0x2a0] ss:$24 sps:$4 sm:$0xff]   ;;  %v6424_v0 = vld [vmem:[%s7077_s24 + $0x274] ss:$24 sps:$4 sm:$0xff]  }
  0x55   : > { %1589 = vmatpush1.bf16.msra.mxu1 %v6387_v25  ;;  %1547 = vmatprep.subr.bf16.mxu0 %v6388_v26  ;;  %v6423_v63 = vld [vmem:[%s7077_s24 + $0x2a8] ss:$24 sps:$4 sm:$0xff]   ;;  %v6427_v2 = vld [vmem:[%s7077_s24 + $0x27c] ss:$24 sps:$4 sm:$0xff]   ;;  %v6429_v3 = vld [vmem:[%s7077_s24 + $0x278] ss:$24 sps:$4 sm:$0xff]  }
  0x56   : > { %1590 = vmatprep.subr.bf16.mxu1 %v6391_v27  ;;  %v6426_v1 = vld [vmem:[%s7077_s24 + $0x270] ss:$24 sps:$4 sm:$0xff]   ;;  %v6439_v9 = vld [vmem:[%s7077_s24 + $0x21c] ss:$24 sps:$4 sm:$0xff]   ;;  %v6445_v13 = vld [vmem:[%s7077_s24 + $0x1ec] ss:$24 sps:$4 sm:$0xff]  }
  0x57   : > { %v6435_v7 = vld [vmem:[%s7077_s24 + $0x248] ss:$24 sps:$4 sm:$0xff]   ;;  %v6441_v11 = vld [vmem:[%s7077_s24 + $0x218] ss:$24 sps:$4 sm:$0xff]   ;;  %v6442_v12 = vld [vmem:[%s7077_s24 + $0x1e4] ss:$24 sps:$4 sm:$0xff]  }
  0x58   : > { %1548 = vmatpush1.bf16.msra.mxu0 %v6390_v28  ;;  %v6438_v10 = vld [vmem:[%s7077_s24 + $0x210] ss:$24 sps:$4 sm:$0xff]   ;;  %v6444_v14 = vld [vmem:[%s7077_s24 + $0x1e0] ss:$24 sps:$4 sm:$0xff]   ;;  %v6448_v16 = vld [vmem:[%s7077_s24 + $0x1b4] ss:$24 sps:$4 sm:$0xff]  }
  0x59   : > { %1591 = vmatpush1.bf16.msra.mxu1 %v6393_v29  ;;  %1549 = vmatprep.subr.bf16.mxu0 %v6394_v30  ;;  %v6447_v15 = vld [vmem:[%s7077_s24 + $0x1e8] ss:$24 sps:$4 sm:$0xff]   ;;  %v6451_v17 = vld [vmem:[%s7077_s24 + $0x1bc] ss:$24 sps:$4 sm:$0xff]   ;;  %v6453_v19 = vld [vmem:[%s7077_s24 + $0x1b8] ss:$24 sps:$4 sm:$0xff]  }
  0x5a   : > { %1592 = vmatprep.subr.bf16.mxu1 %v6397_v31  ;;  %v6450_v18 = vld [vmem:[%s7077_s24 + $0x1b0] ss:$24 sps:$4 sm:$0xff]   ;;  %v6454_v20 = vld [vmem:[%s7077_s24 + $0x184] ss:$24 sps:$4 sm:$0xff]   ;;  %v6456_v22 = vld [vmem:[%s7077_s24 + $0x180] ss:$24 sps:$4 sm:$0xff]   ;;  %v900_v31 = vlaneseq }
  0x5b   : > { %v6457_v21 = vld [vmem:[%s7077_s24 + $0x18c] ss:$24 sps:$4 sm:$0xff]   ;;  %v6459_v23 = vld [vmem:[%s7077_s24 + $0x188] ss:$24 sps:$4 sm:$0xff]  }
  0x5c   : > { %1550 = vmatpush1.bf16.msra.mxu0 %v6396_v32  ;;  %v6462_v24 = vld [vmem:[%s7077_s24 + $0x164] ss:$24 sps:$4 sm:$0xff]   ;;  %v7270_v32 = vshrl.u32 %v900_v31, 7 }
  0x5d   : > { %1593 = vmatpush1.bf16.msra.mxu1 %v6399_v33  ;;  %1551 = vmatprep.subr.bf16.mxu0 %v6400_v34 }
  0x5e   : > { %1594 = vmatprep.subr.bf16.mxu1 %v6403_v35  ;;  %v7273_v33 = vsub.s32 1, %v7270_v32  ;;  %v7276_v34 = vsub.s32 0, %v7270_v32  ;;  %v864_v35 = vld [vmem:[%s8452_s20] sm:$0x3] }
  0x60   : > { %1552 = vmatpush1.bf16.msra.mxu0 %v6402_v36 }
  0x61   : > { %1595 = vmatpush1.bf16.msra.mxu1 %v6405_v37  ;;  %1553 = vmatprep.subr.bf16.mxu0 %v6406_v38  ;;  %v865_v37 = vld [vmem:[%s8453_s29] sm:$0x3] }
  0x62   : > { %1596 = vmatprep.subr.bf16.mxu1 %v6409_v39  ;;  %v907_v39 = vrot.slane %v864_v35, %v7273_v33 }
  0x64   : > { %1554 = vmatpush1.bf16.msra.mxu0 %v6408_v40 }
  0x65   : > { %1597 = vmatpush1.bf16.msra.mxu1 %v6411_v41  ;;  %1555 = vmatprep.subr.bf16.mxu0 %v6412_v42  ;;  %v903_v41 = vrot.slane %v864_v35, %v7276_v34 }
  0x66   : > { %1598 = vmatprep.subr.bf16.mxu1 %v6415_v43  ;;  %v922_v43 = vrot.slane %v865_v37, %v7273_v33 }
  0x68   : > { %1556 = vmatpush2.bf16.msra.mxu0 %v6414_v44  ;;  %v918_v44 = vrot.slane %v865_v37, %v7276_v34 }
  0x69   : > { %1599 = vmatpush2.bf16.msra.mxu1 %v6417_v59  ;;  %1557 = vmatprep.subr.bf16.mxu0 %v6418_v60  ;;  %v6468_v60 = vld [vmem:[%s7077_s24 + $0x104] ss:$24 sps:$4 sm:$0xff]  }
  0x6a   : > { %1600 = vmatprep.subr.bf16.mxu1 %v6421_v62  ;;  %v6471_v62 = vld [vmem:[%s7077_s24 + $0xd4] ss:$24 sps:$4 sm:$0xff]  }
  0x6c   : > { %1558 = vmatpush2.bf16.msra.mxu0 %v6420_v61  ;;  %v6466_v61 = vld [vmem:[%s7077_s24 + $0x100] ss:$24 sps:$4 sm:$0xff]  }
  0x6d   : > { %1601 = vmatpush2.bf16.msra.mxu1 %v6423_v63  ;;  %1559 = vmatprep.subr.bf16.mxu0 %v6424_v0  ;;  %v6469_v63 = vld [vmem:[%s7077_s24 + $0xd0] ss:$24 sps:$4 sm:$0xff]   ;;  %v6474_v0 = vld [vmem:[%s7077_s24 + $0xa4] ss:$24 sps:$4 sm:$0xff]  }
  0x6e   : > { %1602 = vmatprep.subr.bf16.mxu1 %v6427_v2  ;;  %v6477_v2 = vld [vmem:[%s7077_s24 + $0x74] ss:$24 sps:$4 sm:$0xff]  }
  0x70   : > { %1560 = vmatpush2.bf16.msra.mxu0 %v6426_v1  ;;  %v6472_v1 = vld [vmem:[%s7077_s24 + $0xa0] ss:$24 sps:$4 sm:$0xff]  }
  0x71   : > { %1603 = vmatpush2.bf16.msra.mxu1 %v6429_v3  ;;  %v6475_v3 = vld [vmem:[%s7077_s24 + $0x70] ss:$24 sps:$4 sm:$0xff]  }
  0xd8   : > { %v868_v45 = vpop.xlane.xlu0 %867 }
  0xd9   : > { %v873_v46 = vmul.f32 0.00390625, %v868_v45 }
  0xdb   : > { %v7221_v47 = vsub.f32 %v7164_v4, %v873_v46  ;;  %v7224_v48 = vsub.f32 %v7169_v5, %v873_v46  ;;  %v6430_v4 = vld [vmem:[%s7077_s24 + $0x244] ss:$24 sps:$4 sm:$0xff]   ;;  %v6432_v5 = vld [vmem:[%s7077_s24 + $0x240] ss:$24 sps:$4 sm:$0xff]  }
  0xdc   : > { %v871_v49 = vpop.xlane.xlu0 %870  ;;  %1561 = vmatprep.subr.bf16.mxu0 %v6430_v4  ;;  %v6480_v4 = vld [vmem:[%s7077_s24 + $0x44] ss:$24 sps:$4 sm:$0xff]  }
  0xdd   : > { %v874_v50 = vmul.f32 0.00390625, %v871_v49  ;;  %v879_v51 = vmul.f32 %v7221_v47, %v7221_v47  ;;  %v880_v52 = vmul.f32 %v7224_v48, %v7224_v48  ;;  %1562 = vmatpush2.bf16.msra.mxu0 %v6432_v5  ;;  %v6478_v5 = vld [vmem:[%s7077_s24 + $0x40] ss:$24 sps:$4 sm:$0xff]  }
  0xdf   : > { %v7231_v53 = vsub.f32 %v7174_v6, %v874_v50  ;;  %v7234_v54 = vsub.f32 %v7181_v8, %v874_v50  ;;  %v883_v55 = vadd.f32 %v880_v52, %v879_v51  ;;  %v6433_v6 = vld [vmem:[%s7077_s24 + $0x24c] ss:$24 sps:$4 sm:$0xff]  }
  0xe0   : > { %v6436_v8 = vld [vmem:[%s7077_s24 + $0x214] ss:$24 sps:$4 sm:$0xff]   ;;  %1604 = vmatprep.subr.bf16.mxu1 %v6433_v6 }
  0xe1   : > { %884 = vadd.xlane.f32.xlu1 %v883_v55  ;;  %v881_v56 = vmul.f32 %v7231_v53, %v7231_v53  ;;  %v882_v57 = vmul.f32 %v7234_v54, %v7234_v54  ;;  %1605 = vmatpush2.bf16.msra.mxu1 %v6435_v7  ;;  %v6483_v6 = vld [vmem:[%s7077_s24 + $0x14] ss:$24 sps:$4 sm:$0xff]   ;;  %v6481_v7 = vld [vmem:[%s7077_s24 + $0x10] ss:$24 sps:$4 sm:$0xff]  }
  0xe2   : > { %1563 = vmatprep.subr.bf16.mxu0 %v6436_v8  ;;  %1606 = vmatprep.subr.bf16.mxu1 %v6439_v9  ;;  %v6486_v8 = vld [vmem:[%s7077_s24 + $0x2e4] ss:$24 sps:$4 sm:$0xff]   ;;  %v6484_v9 = vld [vmem:[%s7077_s24 + $0x2e0] ss:$24 sps:$4 sm:$0xff]  }
  0xe3   : > { %v886_v58 = vadd.f32 %v882_v57, %v881_v56  ;;  %1564 = vmatpush2.bf16.msra.mxu0 %v6438_v10  ;;  %v6489_v10 = vld [vmem:[%s7077_s24 + $0x2b4] ss:$24 sps:$4 sm:$0xff]  }
  0xe4   : > { %1565 = vmatprep.subr.bf16.mxu0 %v6442_v12  ;;  %v6492_v12 = vld [vmem:[%s7077_s24 + $0x284] ss:$24 sps:$4 sm:$0xff]  }
  0xe5   : > { %887 = vadd.xlane.f32.xlu1 %v886_v58  ;;  %1607 = vmatpush2.bf16.msra.mxu1 %v6441_v11  ;;  %v6460_v58 = vld [vmem:[%s7077_s24 + $0x160] ss:$24 sps:$4 sm:$0xff]   ;;  %v6487_v11 = vld [vmem:[%s7077_s24 + $0x2b0] ss:$24 sps:$4 sm:$0xff]  }
  0xe6   : > { %1608 = vmatprep.subr.bf16.mxu1 %v6445_v13  ;;  %v6490_v13 = vld [vmem:[%s7077_s24 + $0x280] ss:$24 sps:$4 sm:$0xff]  }
  0xe7   : > { %1566 = vmatpush2.bf16.msra.mxu0 %v6444_v14  ;;  %v6495_v14 = vld [vmem:[%s7077_s24 + $0x254] ss:$24 sps:$4 sm:$0xff]  }
  0xe8   : > { %1567 = vmatprep.subr.bf16.mxu0 %v6448_v16  ;;  %v6498_v16 = vld [vmem:[%s7077_s24 + $0x224] ss:$24 sps:$4 sm:$0xff]  }
  0xe9   : > { %1609 = vmatpush2.bf16.msra.mxu1 %v6447_v15  ;;  %v6493_v15 = vld [vmem:[%s7077_s24 + $0x250] ss:$24 sps:$4 sm:$0xff]  }
  0xea   : > { %1610 = vmatprep.subr.bf16.mxu1 %v6451_v17  ;;  %v6496_v17 = vld [vmem:[%s7077_s24 + $0x220] ss:$24 sps:$4 sm:$0xff]  }
  0xeb   : > { %1568 = vmatpush2.bf16.msra.mxu0 %v6450_v18  ;;  %v6501_v18 = vld [vmem:[%s7077_s24 + $0x1f4] ss:$24 sps:$4 sm:$0xff]  }
  0xec   : > { %1569 = vmatprep.subr.bf16.mxu0 %v6454_v20  ;;  %v6504_v20 = vld [vmem:[%s7077_s24 + $0x1c4] ss:$24 sps:$4 sm:$0xff]  }
  0xed   : > { %1611 = vmatpush2.bf16.msra.mxu1 %v6453_v19  ;;  %v6499_v19 = vld [vmem:[%s7077_s24 + $0x1f0] ss:$24 sps:$4 sm:$0xff]  }
  0xee   : > { %1612 = vmatprep.subr.bf16.mxu1 %v6457_v21  ;;  %v6502_v21 = vld [vmem:[%s7077_s24 + $0x1c0] ss:$24 sps:$4 sm:$0xff]  }
  0xef   : > { %1570 = vmatpush2.bf16.msra.mxu0 %v6456_v22  ;;  %v6507_v22 = vld [vmem:[%s7077_s24 + $0x194] ss:$24 sps:$4 sm:$0xff]  }
  0xf0   : > { %1625 = vmatprep.subr.bf16.mxu0 %v6462_v24  ;;  %v6939_v24 = vmov 0.0  }
  0xf1   : > { %1613 = vmatpush2.bf16.msra.mxu1 %v6459_v23  ;;  %v6505_v23 = vld [vmem:[%s7077_s24 + $0x190] ss:$24 sps:$4 sm:$0xff]  }
  0xf2   : > { %6202 = vmatprep.subr.bf16.mxu1 %v6939_v24 }
 0x16a   : > { %v885_v25 = vpop.xlane.xlu1 %884 }
 0x16b   : > { %v889_v26 = vmul.f32 0.00390625, %v885_v25  ;;  %v1039_v25 = vsub.s32 2, %v7270_v32 }
 0x16d   : > { %v891_v27 = vadd.f32 1e-06, %v889_v26  ;;  %v7337_v26 = vld [vmem:[%s8454_s18] sm:$0x3f] }
 0x16e   : > { %v888_v28 = vpop.xlane.xlu1 %887 }
 0x16f   : > { %6748 = vrsqrt.f32 %v891_v27  ;;  %v890_v29 = vmul.f32 0.00390625, %v888_v28  ;;  %v1040_v27 = vrot.slane %v7337_v26, %v1039_v25  ;;  %v1032_v28 = vrot.slane %v7337_v26, %v7276_v34 }
 0x171   : > { %v892_v30 = vadd.f32 1e-06, %v890_v29 }
 0x173   : > { %6750 = vrsqrt.f32 %v892_v30 }
 0x17c   : > { %v6749_v36 = vpop.eup %6748 }
 0x17d   : > { %v896_v38 = vmul.f32 %v6749_v36, %v7224_v48  ;;  %v895_v40 = vmul.f32 %v6749_v36, %v7221_v47 }
 0x17f   : > { %v911_v46 = vmul.f32 %v907_v39, %v896_v38  ;;  %v910_v50 = vmul.f32 %v903_v41, %v895_v40 }
 0x180   : > { %v6751_v42 = vpop.eup %6750 }
 0x181   : > { %v898_v45 = vmul.f32 %v6751_v42, %v7234_v54  ;;  %v897_v49 = vmul.f32 %v6751_v42, %v7231_v53  ;;  %v926_v52 = vadd.f32 %v922_v43, %v911_v46  ;;  %v925_v55 = vadd.f32 %v918_v44, %v910_v50  ;;  %v6465_v54 = vld [vmem:[%s7077_s24 + $0x134] ss:$24 sps:$4 sm:$0xff]   ;;  %v6463_v53 = vld [vmem:[%s7077_s24 + $0x130] ss:$24 sps:$4 sm:$0xff]   ;;  %s6941_s24 = smov 64  }
 0x183   : > { %v913_v48 = vmul.f32 %v907_v39, %v898_v45  ;;  %v912_v51 = vmul.f32 %v903_v41, %v897_v49 }
 0x185   : > { %v928_v47 = vadd.f32 %v922_v43, %v913_v48  ;;  %v927_v56 = vadd.f32 %v918_v44, %v912_v51  ;;  %v1047_v51 = vsub.s32 4, %v7270_v32 }
 0x187   : > { %v930_v57 = vpack.c.bf16 %v928_v47, %v926_v52  ;;  %v7297_v59 = vpack.c.bf16 %v927_v56, %v925_v55  ;;  %v1051_v52 = vsub.s32 5, %v7270_v32  ;;  %v1048_v47 = vrot.slane %v7337_v26, %v1047_v51 }
 0x189   : > { %1571 = vmatprep.mubr.bf16.mxu0 %v930_v57  ;;  %1614 = vmatprep.mubr.bf16.mxu1 %v930_v57  ;;  %v7371_v56 = vrot.slane %v7337_v26, %v1051_v52 }
 0x18a   : > { %1572 = vmatmul.mubr.bf16.vlgmr.msra.gmra.mxu0 %v7297_v59  ;;  %1615 = vmatmul.mubr.bf16.vlgmr.msra.gmra.mxu1 %v7297_v59 }
 0x18b   : > { %1626 = vmatpush1.bf16.msra.mxu0 %v6460_v58  ;;  %1657 = vmatprep.mubr.bf16.mxu0 %v930_v57 }
 0x18c   : > { %1627 = vmatprep.subr.bf16.mxu0 %v6465_v54  ;;  %6204 = vmatprep.mubr.msk.bf16.mxu1 %vm6940_vm0, %v6939_v24 }
 0x18f   : > { %1628 = vmatpush1.bf16.msra.mxu0 %v6463_v53 }
 0x190   : > { %1629 = vmatprep.subr.bf16.mxu0 %v6468_v60 }
 0x193   : > { %1630 = vmatpush1.bf16.msra.mxu0 %v6466_v61 }
 0x194   : > { %1631 = vmatprep.subr.bf16.mxu0 %v6471_v62 }
 0x197   : > { %1632 = vmatpush1.bf16.msra.mxu0 %v6469_v63 }
 0x198   : > { %1633 = vmatprep.subr.bf16.mxu0 %v6474_v0 }
 0x19b   : > { %1634 = vmatpush1.bf16.msra.mxu0 %v6472_v1 }
 0x19c   : > { %1635 = vmatprep.subr.bf16.mxu0 %v6477_v2 }
 0x19f   : > { %1636 = vmatpush1.bf16.msra.mxu0 %v6475_v3 }
 0x1a0   : > { %1637 = vmatprep.subr.bf16.mxu0 %v6480_v4 }
 0x1a3   : > { %1638 = vmatpush1.bf16.msra.mxu0 %v6478_v5 }
 0x1a4   : > { %1639 = vmatprep.subr.bf16.mxu0 %v6483_v6 }
 0x1a7   : > { %1640 = vmatpush1.bf16.msra.mxu0 %v6481_v7 }
 0x1a8   : > { %1641 = vmatprep.subr.bf16.mxu0 %v6486_v8 }
 0x1ab   : > { %1642 = vmatpush2.bf16.msra.mxu0 %v6484_v9 }
 0x1ac   : > { %1643 = vmatprep.subr.bf16.mxu0 %v6489_v10 }
 0x1af   : > { %1644 = vmatpush2.bf16.msra.mxu0 %v6487_v11 }
 0x1b0   : > { %1645 = vmatprep.subr.bf16.mxu0 %v6492_v12 }
 0x1b3   : > { %1646 = vmatpush2.bf16.msra.mxu0 %v6490_v13 }
 0x1b4   : > { %1647 = vmatprep.subr.bf16.mxu0 %v6495_v14 }
 0x1b7   : > { %1648 = vmatpush2.bf16.msra.mxu0 %v6493_v15 }
 0x1b8   : > { %1649 = vmatprep.subr.bf16.mxu0 %v6498_v16 }
 0x1bb   : > { %1650 = vmatpush2.bf16.msra.mxu0 %v6496_v17 }
 0x1bc   : > { %1651 = vmatprep.subr.bf16.mxu0 %v6501_v18 }
 0x1bf   : > { %1652 = vmatpush2.bf16.msra.mxu0 %v6499_v19 }
 0x1c0   : > { %1653 = vmatprep.subr.bf16.mxu0 %v6504_v20 }
 0x1c3   : > { %1654 = vmatpush2.bf16.msra.mxu0 %v6502_v21 }
 0x1c4   : > { %1655 = vmatprep.subr.bf16.mxu0 %v6507_v22 }
 0x1c7   : > { %1656 = vmatpush2.bf16.msra.mxu0 %v6505_v23 }
 0x1ca   : > { %1658 = vmatmul.mubr.bf16.vlgmr.msra.gmra.mxu0 %v7297_v59 }
 0x24a   : > { %v1573_v29 = vpop.f32.mrf.mxu0  ;;  %v1616_v30 = vpop.f32.mrf.mxu1 }
 0x24b   : > { %v1617_v31 = vadd.f32 %v1616_v30, %v1040_v27  ;;  %v1574_v36 = vadd.f32 %v1573_v29, %v1032_v28 }
 0x24c   : > { %v7344_v35 = vpop.f32.mrf.mxu1  ;;  %v7348_v38 = vpop.f32.mrf.mxu0 }
 0x24d   : > { %v7346_v37 = vpack.c.bf16 %v1617_v31, %v1617_v31  ;;  %v1700_v42 = vmul.f32 0.125, %v1574_v36 }
 0x24e   : > { %v1620_v39 = vpop.f32.mrf.mxu1  ;;  %v1577_v43 = vpop.f32.mrf.mxu0 }
 0x24f   : > { %v1713_v40 = vsel %vm1708_vm1, %v7346_v37, 0  ;;  %v1621_v41 = vadd.f32 %v1620_v39, %v1040_v27  ;;  %v1702_v45 = vpack.c.bf16 %v1700_v42, %v1700_v42  ;;  %v1578_v46 = vadd.f32 %v1577_v43, %v1032_v28 }
 0x250   : > { %6203 = vmatpush3.bf16.xpose.msra.mxu1 %v1713_v40  ;;  %v7366_v55 = vpop.f32.mrf.mxu0  ;;  %v7381_v61 = vpop.f32.mrf.mxu1 }
 0x251   : > { %6208 = vmatprep.subr.bf16.mxu1 %v6939_v24  ;;  %v1705_v44 = vpack.c.bf16 %v1621_v41, %v1621_v41  ;;  %v1701_v50 = vmul.f32 0.125, %v1578_v46 }
 0x253   : > { %v1759_v49 = vsel %vm1708_vm1, %v1705_v44, 0  ;;  %v1703_v48 = vpack.c.bf16 %v1701_v50, %v1701_v50 }
 0x257   : > { %6205 = vmatmul.mubr.msk.bf16.vlgmr.msra.gmra.mxu1 %vm1708_vm1, %v1702_v45 }
 0x258   : > { %6209 = vmatpush3.bf16.xpose.msra.mxu1 %v1759_v49  ;;  %6210 = vmatprep.mubr.msk.bf16.mxu1 %vm6940_vm0, %v6939_v24 }
 0x259   : > { %6214 = vmatprep.subr.bf16.mxu1 %v6939_v24 }
 0x25f   : > { %6211 = vmatmul.mubr.msk.bf16.vlgmr.msra.gmra.mxu1 %vm1708_vm1, %v1703_v48 }
 0x260   : > { %6216 = vmatprep.mubr.msk.bf16.mxu1 %vm6940_vm0, %v6939_v24 }
 0x28a   : > { %v1659_v57 = vpop.f32.mrf.mxu0 }
 0x28b   : > { %v1660_v58 = vadd.f32 %v1659_v57, %v1048_v47 }
 0x28c   : > { %v1661_v59 = vpop.f32.mrf.mxu0 }
 0x28d   : > { %v7373_v54 = vpack.c.bf16 %v1660_v58, %v1660_v58  ;;  %v7376_v53 = vadd.f32 %v1661_v59, %v7371_v56 }
 0x28e   : > { %v1663_v19 = vpop.f32.mrf.mxu0 }
 0x28f   : > { %v1831_v60 = vsel %vm1829_vm2, %v7373_v54, 0  ;;  %v1664_v21 = vadd.f32 %v1663_v19, %v1048_v47  ;;  %v6525_v19 = vld [vmem:[%s7103_s27 + $0x64] ss:$8 sps:$4 sm:$0xff]  }
 0x290   : > { %6215 = vmatpush3.bf16.msra.mxu1 %v1831_v60 }
 0x291   : > { %6220 = vmatprep.subr.bf16.mxu1 %v6939_v24  ;;  %v1707_v23 = vpack.c.bf16 %v1664_v21, %v1664_v21 }
 0x293   : > { %v1877_v29 = vsel %vm1829_vm2, %v1707_v23, 0 }
 0x317   : > { %v1749_v62 = vpop.f32.mrf.mxu1 }
 0x318   : > { %v1802_v63 = vsel %vm1801_vm3, %v1749_v62, -inf }
 0x319   : > { %1803 = vmax.xlane.f32.xlu0 %v1802_v63  ;;  %v6206_v0 = vpop.f32.mrf.mxu1 }
 0x31b   : > { %v1752_v1 = vpop.f32.mrf.mxu1 }
 0x31d   : > { %v6207_v2 = vpop.f32.mrf.mxu1 }
 0x31f   : > { %v1795_v3 = vpop.f32.mrf.mxu1 }
 0x320   : > { %v1805_v4 = vsel %vm1801_vm3, %v1795_v3, -inf }
 0x321   : > { %1806 = vmax.xlane.f32.xlu1 %v1805_v4  ;;  %v6212_v5 = vpop.f32.mrf.mxu1 }
 0x323   : > { %v1798_v6 = vpop.f32.mrf.mxu1 }
 0x325   : > { %v6213_v7 = vpop.f32.mrf.mxu1 }
 0x3a2   : > { %v1804_v8 = vpop.xlane.xlu0 %1803 }
 0x3a3   : > { %v1808_v9 = vsub.f32 %v1749_v62, %v1804_v8 }
 0x3a5   : > { %v1810_v10 = vmul.f32 1.442695, %v1808_v9 }
 0x3a7   : > { %6752 = vpow2.f32 %v1810_v10 }
 0x3aa   : > { %v1807_v11 = vpop.xlane.xlu1 %1806 }
 0x3ab   : > { %v1809_v12 = vsub.f32 %v1795_v3, %v1807_v11 }
 0x3ad   : > { %v1812_v13 = vmul.f32 1.442695, %v1809_v12 }
 0x3af   : > { %6754 = vpow2.f32 %v1812_v13 }
 0x3b4   : > { %v6753_v14 = vpop.eup %6752 }
 0x3b5   : > { %v1814_v15 = vsel %vm1801_vm3, %v6753_v14, 0.0 }
 0x3b6   : > { %1815 = vadd.xlane.f32.xlu0 %v1814_v15 }
 0x3bc   : > { %v6755_v16 = vpop.eup %6754 }
 0x3bd   : > { %v1817_v17 = vsel %vm1801_vm3, %v6755_v16, 0.0 }
 0x3be   : > { %1818 = vadd.xlane.f32.xlu1 %v1817_v17  ;;  %v6520_v17 = vld [vmem:[%s7103_s27 + $0x70] ss:$8 sps:$4 sm:$0xff]  }
 0x3cc   : > { %1924 = vrot.lane.b32.xlu0 %v7346_v37, %s6941_s24 }
 0x3cf   : > { %1921 = vrot.lane.b32.xlu1 %v1702_v45, %s6941_s24 }
 0x3d3   : > { %1976 = vrot.lane.b32.xlu1 %v1705_v44, %s6941_s24 }
 0x3d7   : > { %1973 = vrot.lane.b32.xlu1 %v1703_v48, %s6941_s24 }
 0x43f   : > { %v1816_v18 = vpop.xlane.xlu0 %1815 }
 0x440   : > { %6756 = vrcp.f32 %v1816_v18  ;;  %v6522_v18 = vld [vmem:[%s7103_s27 + $0x74] ss:$8 sps:$4 sm:$0xff]  }
 0x441   : > { %2198 = vmatprep.subr.bf16.mxu0 %v6522_v18 }
 0x442   : > { %2199 = vmatpush1.bf16.msra.mxu0 %v6520_v17 }
 0x443   : > { %v1925_v36 = vpop.permute.xlu0 %1924  ;;  %2200 = vmatprep.subr.bf16.mxu0 %v6525_v19 }
 0x444   : > { %v1930_v40 = vsel %vm1708_vm1, %v1925_v36, 0 }
 0x447   : > { %v1819_v20 = vpop.xlane.xlu1 %1818 }
 0x448   : > { %6758 = vrcp.f32 %v1819_v20  ;;  %v6523_v20 = vld [vmem:[%s7103_s27 + $0x60] ss:$8 sps:$4 sm:$0xff]  }
 0x449   : > { %2201 = vmatpush1.bf16.msra.mxu0 %v6523_v20 }
 0x44b   : > { %v1922_v39 = vpop.permute.xlu1 %1921 }
 0x44d   : > { %v6757_v22 = vpop.eup %6756 }
 0x44e   : > { %v1822_v27 = vmul.f32 %v6757_v22, %v6753_v14 }
 0x44f   : > { %v1977_v41 = vpop.permute.xlu1 %1976 }
 0x450   : > { %v1824_v28 = vpack.c.bf16 %v1822_v27, %v1822_v27  ;;  %v1982_v42 = vsel %vm1708_vm1, %v1977_v41, 0 }
 0x452   : > { %6217 = vmatmul.mubr.msk.bf16.vlgmr.msra.gmra.mxu1 %vm1801_vm3, %v1824_v28 }
 0x453   : > { %6221 = vmatpush3.bf16.msra.mxu1 %v1877_v29  ;;  %6222 = vmatprep.mubr.msk.bf16.mxu1 %vm6940_vm0, %v6939_v24  ;;  %v1974_v43 = vpop.permute.xlu1 %1973 }
 0x454   : > { %6226 = vmatprep.subr.bf16.mxu1 %v6939_v24 }
 0x455   : > { %v6759_v30 = vpop.eup %6758 }
 0x456   : > { %v1823_v31 = vmul.f32 %v6759_v30, %v6755_v16  ;;  %v6942_v16 = vmov 0  }
 0x457   : > { %2222 = vmatprep.mubr.bf16.mxu0 %v6942_v16 }
 0x458   : > { %v1825_v37 = vpack.c.bf16 %v1823_v31, %v1823_v31  ;;  %v6510_v31 = vld [vmem:[%s7103_s27 + $0x34] ss:$8 sps:$4 sm:$0xff]  }
 0x45a   : > { %6223 = vmatmul.mubr.msk.bf16.vlgmr.msra.gmra.mxu1 %vm1801_vm3, %v1825_v37 }
 0x45b   : > { %6227 = vmatpush3.bf16.xpose.msra.mxu1 %v1930_v40  ;;  %6228 = vmatprep.mubr.msk.bf16.mxu1 %vm6940_vm0, %v6939_v24  ;;  %v6508_v40 = vld [vmem:[%s7103_s27 + $0x30] ss:$8 sps:$4 sm:$0xff]  }
 0x45c   : > { %6232 = vmatprep.subr.bf16.mxu1 %v6939_v24 }
 0x462   : > { %6229 = vmatmul.mubr.msk.bf16.vlgmr.msra.gmra.mxu1 %vm1708_vm1, %v1922_v39 }
 0x463   : > { %6233 = vmatpush3.bf16.xpose.msra.mxu1 %v1982_v42  ;;  %6234 = vmatprep.mubr.msk.bf16.mxu1 %vm6940_vm0, %v6939_v24  ;;  %v6513_v42 = vld [vmem:[%s7103_s27 + $0x24] ss:$8 sps:$4 sm:$0xff]  }
 0x464   : > { %6238 = vmatprep.subr.bf16.mxu1 %v6939_v24 }
 0x46a   : > { %6235 = vmatmul.mubr.msk.bf16.vlgmr.msra.gmra.mxu1 %vm1708_vm1, %v1974_v43  ;;  %v1043_v43 = vsub.s32 3, %v7270_v32 }
 0x46b   : > { %6240 = vmatprep.mubr.msk.bf16.mxu1 %vm6940_vm0, %v6939_v24 }
 0x512   : > { %v7410_v44 = vpop.f32.mrf.mxu1 }
 0x514   : > { %v6218_v45 = vpop.f32.mrf.mxu1 }
 0x515   : > { %v6511_v45 = vld [vmem:[%s7103_s27 + $0x20] ss:$8 sps:$4 sm:$0xff]  }
 0x516   : > { %v1870_v46 = vpop.f32.mrf.mxu1 }
 0x517   : > { %v6516_v46 = vld [vmem:[%s7103_s27 + $0x14] ss:$8 sps:$4 sm:$0xff]  }
 0x518   : > { %v6219_v49 = vpop.f32.mrf.mxu1 }
 0x519   : > { %v1044_v49 = vrot.slane %v7337_v26, %v1043_v43 }
 0x51a   : > { %v7412_v50 = vpop.f32.mrf.mxu1 }
 0x51b   : > { %v1919_v48 = vpack.c.bf16 %v7412_v50, %v7410_v44 }
 0x51c   : > { %v6224_v47 = vpop.f32.mrf.mxu1 }
 0x51d   : > { %v6514_v47 = vld [vmem:[%s7103_s27 + $0x10] ss:$8 sps:$4 sm:$0xff]  }
 0x51e   : > { %v1916_v57 = vpop.f32.mrf.mxu1 }
 0x51f   : > { %v6519_v57 = vld [vmem:[%s7103_s27 + $0x4] ss:$8 sps:$4 sm:$0xff]  }
 0x520   : > { %v6225_v58 = vpop.f32.mrf.mxu1 }
 0x521   : > { %v1619_v58 = vadd.f32 %v7344_v35, %v1044_v49 }
 0x522   : > { %v1966_v59 = vpop.f32.mrf.mxu1 }
 0x523   : > { %v2024_v60 = vsel %vm1801_vm3, %v1966_v59, -inf }
 0x524   : > { %2025 = vmax.xlane.f32.xlu0 %v2024_v60  ;;  %v6230_v62 = vpop.f32.mrf.mxu1  ;;  %v1036_v60 = vrot.slane %v7337_v26, %v7273_v33 }
 0x525   : > { %v7451_v62 = vpack.c.bf16 %v1619_v58, %v1619_v58 }
 0x526   : > { %v1969_v63 = vpop.f32.mrf.mxu1 }
 0x527   : > { %v1576_v63 = vadd.f32 %v7348_v38, %v1036_v60  ;;  %v1665_v38 = vpop.f32.mrf.mxu0 }
 0x528   : > { %v6231_v0 = vpop.f32.mrf.mxu1  ;;  %v1666_v44 = vadd.f32 %v1665_v38, %v7371_v56  ;;  %v6528_v56 = vld [vmem:[%s7103_s27 + $0x54] ss:$8 sps:$4 sm:$0xff]  }
 0x529   : > { %v2331_v0 = vsel %vm1708_vm1, %v7451_v62, 0  ;;  %v2319_v26 = vmul.f32 0.125, %v1576_v63  ;;  %2202 = vmatprep.subr.bf16.mxu0 %v6528_v56 }
 0x52a   : > { %v2018_v1 = vpop.f32.mrf.mxu1 }
 0x52b   : > { %v2027_v2 = vsel %vm1801_vm3, %v2018_v1, -inf }
 0x52c   : > { %2028 = vmax.xlane.f32.xlu1 %v2027_v2  ;;  %v6236_v3 = vpop.f32.mrf.mxu1  ;;  %v2321_v2 = vpack.c.bf16 %v2319_v26, %v2319_v26 }
 0x52d   : > { %v1580_v3 = vadd.f32 %v7366_v55, %v1036_v60 }
 0x52e   : > { %v2021_v4 = vpop.f32.mrf.mxu1 }
 0x52f   : > { %v2320_v50 = vmul.f32 0.125, %v1580_v3 }
 0x530   : > { %v6237_v5 = vpop.f32.mrf.mxu1 }
 0x531   : > { %v2322_v4 = vpack.c.bf16 %v2320_v50, %v2320_v50  ;;  %v6526_v5 = vld [vmem:[%s7103_s27 + $0x50] ss:$8 sps:$4 sm:$0xff]  }
 0x532   : > { %2203 = vmatpush1.bf16.msra.mxu0 %v6526_v5 }
 0x53d   : > { %2098 = vrot.lane.b32.xlu1 %v1707_v23, %s6941_s24 }
 0x5ad   : > { %v2026_v6 = vpop.xlane.xlu0 %2025 }
 0x5ae   : > { %v2030_v7 = vsub.f32 %v1966_v59, %v2026_v6  ;;  %v6517_v59 = vld [vmem:[%s7103_s27] ss:$8 sps:$4 sm:$0xff]   ;;  %v6531_v6 = vld [vmem:[%s7103_s27 + $0x44] ss:$8 sps:$4 sm:$0xff]  }
 0x5af   : > { %2204 = vmatprep.subr.bf16.mxu0 %v6531_v6 }
 0x5b0   : > { %v2032_v8 = vmul.f32 1.442695, %v2030_v7  ;;  %v6529_v7 = vld [vmem:[%s7103_s27 + $0x40] ss:$8 sps:$4 sm:$0xff]  }
 0x5b1   : > { %2205 = vmatpush1.bf16.msra.mxu0 %v6529_v7 }
 0x5b2   : > { %6760 = vpow2.f32 %v2032_v8  ;;  %6262 = vmatprep.subr.bf16.mxu0 %v6939_v24 }
 0x5b5   : > { %v2029_v9 = vpop.xlane.xlu1 %2028 }
 0x5b6   : > { %v2031_v10 = vsub.f32 %v2018_v1, %v2029_v9  ;;  %v1623_v1 = vadd.f32 %v7381_v61, %v1044_v49 }
 0x5b8   : > { %v2034_v11 = vmul.f32 1.442695, %v2031_v10  ;;  %v2324_v35 = vpack.c.bf16 %v1623_v1, %v1623_v1 }
 0x5b9   : > { %v2099_v29 = vpop.permute.xlu1 %2098 }
 0x5ba   : > { %6762 = vpow2.f32 %v2034_v11  ;;  %v2104_v36 = vsel %vm1829_vm2, %v2099_v29, 0  ;;  %v2377_v61 = vsel %vm1708_vm1, %v2324_v35, 0 }
 0x5bf   : > { %v6761_v12 = vpop.eup %6760 }
 0x5c0   : > { %v2036_v13 = vsel %vm1801_vm3, %v6761_v12, 0.0 }
 0x5c1   : > { %2037 = vadd.xlane.f32.xlu0 %v2036_v13 }
 0x5c7   : > { %v6763_v14 = vpop.eup %6762 }
 0x5c8   : > { %v2039_v15 = vsel %vm1801_vm3, %v6763_v14, 0.0 }
 0x5c9   : > { %2040 = vadd.xlane.f32.xlu0 %v2039_v15 }
 0x5df   : > { %2049 = vrot.lane.b32.xlu0 %v7373_v54, %s6941_s24 }
 0x64a   : > { %v2038_v21 = vpop.xlane.xlu0 %2037 }
 0x64b   : > { %6764 = vrcp.f32 %v2038_v21 }
 0x652   : > { %v2041_v22 = vpop.xlane.xlu0 %2040 }
 0x653   : > { %6766 = vrcp.f32 %v2041_v22 }
 0x656   : > { %v2050_v23 = vpop.permute.xlu0 %2049 }
 0x657   : > { %v2055_v54 = vsel %vm1829_vm2, %v2050_v23, 0 }
 0x658   : > { %v6765_v27 = vpop.eup %6764  ;;  %6239 = vmatpush3.bf16.msra.mxu1 %v2055_v54 }
 0x659   : > { %6244 = vmatprep.subr.bf16.mxu1 %v6939_v24  ;;  %v2044_v28 = vmul.f32 %v6765_v27, %v6761_v12  ;;  %v7487_v12 = vpack.c.bf16 %v7376_v53, %v7376_v53 }
 0x65b   : > { %v2046_v30 = vpack.c.bf16 %v2044_v28, %v2044_v28  ;;  %v2447_v17 = vsel %vm1829_vm2, %v7487_v12, 0 }
 0x65d   : > { %6241 = vmatmul.mubr.msk.bf16.vlgmr.msra.gmra.mxu1 %vm1801_vm3, %v2046_v30 }
 0x65e   : > { %6245 = vmatpush3.bf16.msra.mxu1 %v2104_v36  ;;  %6246 = vmatprep.mubr.msk.bf16.mxu1 %vm6940_vm0, %v6939_v24 }
 0x65f   : > { %2284 = vmatprep.subr.bf16.mxu1 %v6510_v31 }
 0x660   : > { %v6767_v37 = vpop.eup %6766 }
 0x661   : > { %v2045_v39 = vmul.f32 %v6767_v37, %v6763_v14 }
 0x663   : > { %v2047_v41 = vpack.c.bf16 %v2045_v39, %v2045_v39 }
 0x665   : > { %6247 = vmatmul.mubr.msk.bf16.vlgmr.msra.gmra.mxu1 %vm1801_vm3, %v2047_v41 }
 0x666   : > { %2285 = vmatpush1.bf16.msra.mxu1 %v6508_v40  ;;  %2308 = vmatprep.mubr.bf16.mxu1 %v6942_v16 }
 0x667   : > { %2286 = vmatprep.subr.bf16.mxu1 %v6513_v42 }
 0x66a   : > { %2287 = vmatpush1.bf16.msra.mxu1 %v6511_v45 }
 0x66b   : > { %2288 = vmatprep.subr.bf16.mxu1 %v6516_v46 }
 0x66e   : > { %2289 = vmatpush1.bf16.msra.mxu1 %v6514_v47 }
 0x66f   : > { %2290 = vmatprep.subr.bf16.mxu1 %v6519_v57 }
 0x672   : > { %2291 = vmatpush1.bf16.msra.mxu1 %v6517_v59 }
 0x673   : > { %6250 = vmatprep.subr.bf16.mxu1 %v6939_v24 }
 0x675   : > { %5881 = vmatmul.mubr.msk.bf16.vlgmr.msra.gmra.mxu1 %vm1708_vm1, %v1919_v48  ;;  %v7472_v48 = vpack.c.bf16 %v1666_v44, %v1666_v44 }
 0x676   : > { %6251 = vmatpush3.bf16.xpose.msra.mxu1 %v2331_v0  ;;  %6252 = vmatprep.mubr.msk.bf16.mxu1 %vm6940_vm0, %v6939_v24 }
 0x677   : > { %6256 = vmatprep.subr.bf16.mxu1 %v6939_v24  ;;  %v2493_v55 = vsel %vm1829_vm2, %v7472_v48, 0 }
 0x67d   : > { %6253 = vmatmul.mubr.msk.bf16.vlgmr.msra.gmra.mxu1 %vm1708_vm1, %v2321_v2 }
 0x67e   : > { %6257 = vmatpush3.bf16.xpose.msra.mxu1 %v2377_v61  ;;  %6258 = vmatprep.mubr.msk.bf16.mxu1 %vm6940_vm0, %v6939_v24 }
 0x67f   : > { %6268 = vmatprep.subr.bf16.mxu1 %v6939_v24 }
 0x685   : > { %6259 = vmatmul.mubr.msk.bf16.vlgmr.msra.gmra.mxu1 %vm1708_vm1, %v2322_v4 }
 0x686   : > { %6269 = vmatpush3.bf16.msra.mxu1 %v2493_v55  ;;  %6270 = vmatprep.mubr.msk.bf16.mxu1 %vm6940_vm0, %v6939_v24 }
 0x687   : > { %6274 = vmatprep.subr.bf16.mxu1 %v6939_v24 }
 0x71d   : > { %v2091_v8 = vpop.f32.mrf.mxu1 }
 0x71f   : > { %v6242_v9 = vpop.f32.mrf.mxu1 }
 0x721   : > { %v2094_v10 = vpop.f32.mrf.mxu1 }
 0x723   : > { %v6243_v11 = vpop.f32.mrf.mxu1 }
 0x725   : > { %v2140_v13 = vpop.f32.mrf.mxu1 }
 0x726   : > { %v2146_v14 = vpack.c.bf16 %v2140_v13, %v2091_v8 }
 0x727   : > { %v6248_v15 = vpop.f32.mrf.mxu1 }
 0x728   : > { %5872 = vmatmul.mubr.msk.bf16.vlgmr.msra.gmra.mxu0 %vm1708_vm1, %v2146_v14 }
 0x729   : > { %6263 = vmatpush3.bf16.msra.mxu0 %v2447_v17  ;;  %v2143_v18 = vpop.f32.mrf.mxu1  ;;  %6264 = vmatprep.mubr.msk.bf16.mxu0 %vm6940_vm0, %v6939_v24 }
 0x72b   : > { %v6249_v19 = vpop.f32.mrf.mxu1 }
 0x72c   : > { %v6532_v19 = vld [vmem:[%s7103_s27 + $0xb0] ss:$8 sps:$4 sm:$0xff]  }
 0x735   : > { %v7494_v20 = vpop.f32.mrf.mxu1 }
 0x737   : > { %v7496_v21 = vpop.f32.mrf.mxu1 }
 0x739   : > { %v7498_v53 = vpop.f32.mrf.mxu1 }
 0x73b   : > { %v7500_v22 = vpop.f32.mrf.mxu1 }
 0x73d   : > { %v2367_v23 = vpop.f32.mrf.mxu1 }
 0x73e   : > { %v2419_v46 = vsel %vm1801_vm3, %v2367_v23, -inf }
 0x73f   : > { %v6254_v54 = vpop.f32.mrf.mxu1 }
 0x740   : > { %v6537_v54 = vld [vmem:[%s7103_s27 + $0xa4] ss:$8 sps:$4 sm:$0xff]  }
 0x741   : > { %v2370_v27 = vpop.f32.mrf.mxu1 }
 0x742   : > { %v6535_v27 = vld [vmem:[%s7103_s27 + $0xa0] ss:$8 sps:$4 sm:$0xff]  }
 0x743   : > { %v6255_v28 = vpop.f32.mrf.mxu1 }
 0x744   : > { %v6540_v28 = vld [vmem:[%s7103_s27 + $0x94] ss:$8 sps:$4 sm:$0xff]  }
 0x745   : > { %v2413_v29 = vpop.f32.mrf.mxu1 }
 0x746   : > { %v2422_v30 = vsel %vm1801_vm3, %v2413_v29, -inf }
 0x747   : > { %2423 = vmax.xlane.f32.xlu1 %v2422_v30  ;;  %v6260_v31 = vpop.f32.mrf.mxu1  ;;  %v6543_v30 = vld [vmem:[%s7103_s27 + $0x84] ss:$8 sps:$4 sm:$0xff]  }
 0x748   : > { %v6541_v31 = vld [vmem:[%s7103_s27 + $0x80] ss:$8 sps:$4 sm:$0xff]  }
 0x749   : > { %v2416_v36 = vpop.f32.mrf.mxu1 }
 0x74b   : > { %v6261_v37 = vpop.f32.mrf.mxu1 }
 0x758   : > { %2627 = vrot.lane.b32.xlu1 %v2321_v2, %s6941_s24 }
 0x75c   : > { %2682 = vrot.lane.b32.xlu1 %v2324_v35, %s6941_s24 }
 0x760   : > { %2679 = vrot.lane.b32.xlu1 %v2322_v4, %s6941_s24 }
 0x7d0   : > { %v2424_v39 = vpop.xlane.xlu1 %2423 }
 0x7d1   : > { %v2426_v40 = vsub.f32 %v2413_v29, %v2424_v39  ;;  %v6538_v29 = vld [vmem:[%s7103_s27 + $0x90] ss:$8 sps:$4 sm:$0xff]  }
 0x7d3   : > { %v2429_v41 = vmul.f32 1.442695, %v2426_v40 }
 0x7d4   : > { %v2628_v60 = vpop.permute.xlu1 %2627 }
 0x7d5   : > { %6768 = vpow2.f32 %v2429_v41 }
 0x7e2   : > { %v6769_v42 = vpop.eup %6768 }
 0x7e3   : > { %v2434_v45 = vsel %vm1801_vm3, %v6769_v42, 0.0 }
 0x7e4   : > { %2435 = vadd.xlane.f32.xlu0 %v2434_v45 }
 0x7fa   : > { %2630 = vrot.lane.b32.xlu0 %v7451_v62, %s6941_s24  ;;  %v2683_v62 = vpop.permute.xlu1 %2682 }
 0x7fb   : > { %v2688_v0 = vsel %vm1708_vm1, %v2683_v62, 0 }
 0x7fe   : > { %v2680_v1 = vpop.permute.xlu1 %2679 }
 0x819   : > { %2420 = vmax.xlane.f32.xlu0 %v2419_v46 }
 0x86d   : > { %v2436_v49 = vpop.xlane.xlu0 %2435 }
 0x86e   : > { %6770 = vrcp.f32 %v2436_v49 }
 0x871   : > { %v2631_v58 = vpop.permute.xlu0 %2630 }
 0x872   : > { %v2636_v63 = vsel %vm1708_vm1, %v2631_v58, 0 }
 0x87b   : > { %v6771_v47 = vpop.eup %6770 }
 0x87c   : > { %v2440_v57 = vmul.f32 %v6771_v47, %v6769_v42 }
 0x87e   : > { %v2442_v59 = vpack.c.bf16 %v2440_v57, %v2440_v57  ;;  %v2224_v57 = vpop.f32.mrf.mxu0 }
 0x880   : > { %6271 = vmatmul.mubr.msk.bf16.vlgmr.msra.gmra.mxu1 %vm1801_vm3, %v2442_v59  ;;  %v2226_v58 = vpop.f32.mrf.mxu0 }
 0x881   : > { %6275 = vmatpush3.bf16.xpose.msra.mxu1 %v2636_v63  ;;  %6276 = vmatprep.mubr.msk.bf16.mxu1 %vm6940_vm0, %v6939_v24 }
 0x882   : > { %6280 = vmatprep.subr.bf16.mxu1 %v6939_v24  ;;  %v2228_v59 = vpop.f32.mrf.mxu0 }
 0x888   : > { %6277 = vmatmul.mubr.msk.bf16.vlgmr.msra.gmra.mxu1 %vm1708_vm1, %v2628_v60  ;;  %v7543_v60 = vpop.f32.mrf.mxu0 }
 0x889   : > { %6281 = vmatpush3.bf16.xpose.msra.mxu1 %v2688_v0  ;;  %6282 = vmatprep.mubr.msk.bf16.mxu1 %vm6940_vm0, %v6939_v24 }
 0x88a   : > { %6292 = vmatprep.subr.bf16.mxu1 %v6939_v24 }
 0x890   : > { %6283 = vmatmul.mubr.msk.bf16.vlgmr.msra.gmra.mxu1 %vm1708_vm1, %v2680_v1 }
 0x891   : > { %6294 = vmatprep.mubr.msk.bf16.mxu1 %vm6940_vm0, %v6939_v24 }
 0x8a2   : > { %v2421_v26 = vpop.xlane.xlu0 %2420 }
 0x8a3   : > { %v2425_v35 = vsub.f32 %v2367_v23, %v2421_v26  ;;  %v6534_v23 = vld [vmem:[%s7103_s27 + $0xb4] ss:$8 sps:$4 sm:$0xff]  }
 0x8a4   : > { %2587 = vmatprep.subr.bf16.mxu0 %v6534_v23 }
 0x8a5   : > { %v2427_v38 = vmul.f32 1.442695, %v2425_v35 }
 0x8a7   : > { %6772 = vpow2.f32 %v2427_v38 }
 0x8b4   : > { %v6773_v2 = vpop.eup %6772 }
 0x8b5   : > { %v2431_v3 = vsel %vm1801_vm3, %v6773_v2, 0.0 }
 0x8b6   : > { %2432 = vadd.xlane.f32.xlu1 %v2431_v3 }
 0x93f   : > { %v2433_v61 = vpop.xlane.xlu1 %2432 }
 0x940   : > { %6774 = vrcp.f32 %v2433_v61  ;;  %v2529_v44 = vpop.f32.mrf.mxu1 }
 0x942   : > { %v6272_v50 = vpop.f32.mrf.mxu1 }
 0x943   : > { %v6544_v50 = vld [vmem:[%s7103_s27 + $0xf0] ss:$8 sps:$4 sm:$0xff]  }
 0x944   : > { %v2532_v4 = vpop.f32.mrf.mxu1 }
 0x946   : > { %v6273_v55 = vpop.f32.mrf.mxu1 }
 0x947   : > { %v6549_v55 = vld [vmem:[%s7103_s27 + $0xe4] ss:$8 sps:$4 sm:$0xff]  }
 0x948   : > { %v2672_v56 = vpop.f32.mrf.mxu1 }
 0x949   : > { %v2730_v5 = vsel %vm1801_vm3, %v2672_v56, -inf }
 0x94a   : > { %2731 = vmax.xlane.f32.xlu0 %v2730_v5  ;;  %v6278_v6 = vpop.f32.mrf.mxu1 }
 0x94c   : > { %v2675_v7 = vpop.f32.mrf.mxu1 }
 0x94d   : > { %v6775_v8 = vpop.eup %6774 }
 0x94e   : > { %v6279_v9 = vpop.f32.mrf.mxu1  ;;  %v2439_v10 = vmul.f32 %v6775_v8, %v6773_v2  ;;  %v6550_v8 = vld [vmem:[%s7103_s27 + $0xd0] ss:$8 sps:$4 sm:$0xff]  }
 0x94f   : > { %v6552_v9 = vld [vmem:[%s7103_s27 + $0xd4] ss:$8 sps:$4 sm:$0xff]  }
 0x950   : > { %v2724_v11 = vpop.f32.mrf.mxu1  ;;  %v2441_v13 = vpack.c.bf16 %v2439_v10, %v2439_v10  ;;  %v6553_v10 = vld [vmem:[%s7103_s27 + $0xc0] ss:$8 sps:$4 sm:$0xff]  }
 0x951   : > { %v2733_v14 = vsel %vm1801_vm3, %v2724_v11, -inf }
 0x952   : > { %6265 = vmatmul.mubr.msk.bf16.vlgmr.msra.gmra.mxu0 %vm1801_vm3, %v2441_v13  ;;  %2734 = vmax.xlane.f32.xlu0 %v2733_v14  ;;  %v6284_v15 = vpop.f32.mrf.mxu1  ;;  %v2311_v13 = vadd.f32 %v7494_v20, %v2224_v57 }
 0x953   : > { %2611 = vmatprep.mubr.bf16.mxu0 %v6942_v16  ;;  %2588 = vmatpush1.bf16.msra.mxu0 %v6532_v19 }
 0x954   : > { %v2727_v17 = vpop.f32.mrf.mxu1  ;;  %2589 = vmatprep.subr.bf16.mxu0 %v6537_v54 }
 0x956   : > { %v6285_v18 = vpop.f32.mrf.mxu1 }
 0x957   : > { %2590 = vmatpush1.bf16.msra.mxu0 %v6535_v27  ;;  %v2315_v18 = vadd.f32 %v7498_v53, %v2228_v59  ;;  %v2947_v53 = vld [vmem:[%s8455_s17] sm:$0x3] }
 0x958   : > { %2591 = vmatprep.subr.bf16.mxu0 %v6540_v28 }
 0x95b   : > { %2592 = vmatpush1.bf16.msra.mxu0 %v6538_v29 }
 0x95c   : > { %2593 = vmatprep.subr.bf16.mxu0 %v6543_v30 }
 0x95f   : > { %2594 = vmatpush1.bf16.msra.mxu0 %v6541_v31 }
 0x960   : > { %6286 = vmatprep.subr.bf16.mxu0 %v6939_v24 }
 0x9d3   : > { %v2732_v36 = vpop.xlane.xlu0 %2731 }
 0x9d4   : > { %v2736_v37 = vsub.f32 %v2672_v56, %v2732_v36  ;;  %v6547_v56 = vld [vmem:[%s7103_s27 + $0xe0] ss:$8 sps:$4 sm:$0xff]  }
 0x9d6   : > { %v2738_v39 = vmul.f32 1.442695, %v2736_v37 }
 0x9d8   : > { %6776 = vpow2.f32 %v2738_v39 }
 0x9db   : > { %v2735_v40 = vpop.xlane.xlu0 %2734 }
 0x9dc   : > { %v2737_v41 = vsub.f32 %v2724_v11, %v2735_v40  ;;  %v6555_v11 = vld [vmem:[%s7103_s27 + $0xc4] ss:$8 sps:$4 sm:$0xff]  }
 0x9de   : > { %v2740_v42 = vmul.f32 1.442695, %v2737_v41 }
 0x9e0   : > { %6778 = vpow2.f32 %v2740_v42  ;;  %v2317_v42 = vadd.f32 %v7500_v22, %v7543_v60 }
 0x9e5   : > { %v6777_v45 = vpop.eup %6776 }
 0x9e6   : > { %v2742_v46 = vsel %vm1801_vm3, %v6777_v45, 0.0 }
 0x9e7   : > { %2743 = vadd.xlane.f32.xlu0 %v2742_v46  ;;  %v6852_v46 = vld [vmem:[%s8451_s14] sm:$0xff] }
 0x9ed   : > { %v6779_v49 = vpop.eup %6778 }
 0x9ee   : > { %v2745_v47 = vsel %vm1801_vm3, %v6779_v49, 0.0 }
 0x9ef   : > { %2746 = vadd.xlane.f32.xlu1 %v2745_v47  ;;  %v2952_v47 = vrot.slane %v2947_v53, %v7276_v34 }
 0x9fd   : > { %2755 = vrot.lane.b32.xlu0 %v7487_v12, %s6941_s24 }
 0xa00   : > { %2804 = vrot.lane.b32.xlu1 %v7472_v48, %s6941_s24  ;;  %v6546_v48 = vld [vmem:[%s7103_s27 + $0xf4] ss:$8 sps:$4 sm:$0xff]  }
 0xa12   : > { %v2483_v63 = vpop.f32.mrf.mxu0 }
 0xa13   : > { %v2535_v62 = vpack.c.bf16 %v2529_v44, %v2483_v63 }
 0xa14   : > { %v6266_v0 = vpop.f32.mrf.mxu0 }
 0xa15   : > { %5894 = vmatmul.mubr.msk.bf16.vlgmr.msra.gmra.mxu0 %vm1708_vm1, %v2535_v62  ;;  %v6853_v62 = vld [vmem:[%s8451_s14 + $0x8] sm:$0xff] }
 0xa16   : > { %v2486_v1 = vpop.f32.mrf.mxu0  ;;  %6288 = vmatprep.mubr.msk.bf16.mxu0 %vm6940_vm0, %v6939_v24 }
 0xa18   : > { %v6267_v26 = vpop.f32.mrf.mxu0 }
 0xa70   : > { %v2744_v12 = vpop.xlane.xlu0 %2743 }
 0xa71   : > { %6780 = vrcp.f32 %v2744_v12  ;;  %v6854_v12 = vld [vmem:[%s8451_s14 + $0x10] sm:$0xff] }
 0xa74   : > { %v2756_v35 = vpop.permute.xlu0 %2755 }
 0xa75   : > { %v2761_v38 = vsel %vm1829_vm2, %v2756_v35, 0 }
 0xa76   : > { %6287 = vmatpush3.bf16.msra.mxu0 %v2761_v38  ;;  %v6855_v38 = vld [vmem:[%s8451_s14 + $0x18] sm:$0xff] }
 0xa77   : > { %2904 = vmatprep.subr.bf16.mxu0 %v6546_v48 }
 0xa78   : > { %v2747_v2 = vpop.xlane.xlu1 %2746 }
 0xa79   : > { %6782 = vrcp.f32 %v2747_v2 }
 0xa7c   : > { %v2805_v3 = vpop.permute.xlu1 %2804 }
 0xa7d   : > { %v2810_v61 = vsel %vm1829_vm2, %v2805_v3, 0 }
 0xa7e   : > { %v6781_v44 = vpop.eup %6780  ;;  %6293 = vmatpush3.bf16.msra.mxu1 %v2810_v61 }
 0xa7f   : > { %v2750_v24 = vmul.f32 %v6781_v44, %v6777_v45 }
 0xa81   : > { %v2752_v4 = vpack.c.bf16 %v2750_v24, %v2750_v24 }
 0xa83   : > { %6289 = vmatmul.mubr.msk.bf16.vlgmr.msra.gmra.mxu0 %vm1801_vm3, %v2752_v4  ;;  %v3089_v4 = vld [vmem:[%s7120_s3 + $0x1e0] sm:$0xff] }
 0xa84   : > { %2905 = vmatpush1.bf16.msra.mxu0 %v6544_v50  ;;  %2928 = vmatprep.mubr.bf16.mxu0 %v6942_v16  ;;  %v2313_v16 = vadd.f32 %v7496_v21, %v2226_v58  ;;  %v2956_v58 = vrot.slane %v2947_v53, %v7273_v33  ;;  %v3085_v50 = vld [vmem:[%s7120_s3 + $0x1c0] sm:$0xff] }
 0xa85   : > { %2906 = vmatprep.subr.bf16.mxu0 %v6549_v55  ;;  %v3086_v55 = vld [vmem:[%s7120_s3 + $0x1c8] sm:$0xff]  ;;  %v3057_v53 = vld [vmem:[%s7120_s3 + $0xe0] sm:$0xff] }
 0xa86   : > { %v6783_v5 = vpop.eup %6782 }
 0xa87   : > { %v2751_v6 = vmul.f32 %v6783_v5, %v6779_v49  ;;  %v5965_v5 = vcombine.high %v3085_v50, %v3089_v4 }
 0xa88   : > { %2907 = vmatpush1.bf16.msra.mxu0 %v6547_v56  ;;  %v5964_v56 = vcombine.low %v3085_v50, %v3089_v4  ;;  %v3029_v4 = vld [vmem:[%s7120_s3] sm:$0xff] }
 0xa89   : > { %v2753_v7 = vpack.c.bf16 %v2751_v6, %v2751_v6  ;;  %2908 = vmatprep.subr.bf16.mxu0 %v6552_v9  ;;  %v3090_v6 = vld [vmem:[%s7120_s3 + $0x1e8] sm:$0xff]  ;;  %3839 = vmatprep.subr.bf16.mxu1 %v5965_v5 }
 0xa8a   : > { %v5966_v9 = vcombine.low %v3086_v55, %v3090_v6  ;;  %v3034_v5 = vld [vmem:[%s7120_s3 + $0x28] sm:$0xff] }
 0xa8b   : > { %6295 = vmatmul.mubr.msk.bf16.vlgmr.msra.gmra.mxu1 %vm1801_vm3, %v2753_v7  ;;  %v3077_v7 = vld [vmem:[%s7120_s3 + $0x180] sm:$0xff] }
 0xa8c   : > { %2909 = vmatpush1.bf16.msra.mxu0 %v6550_v8  ;;  %v3081_v8 = vld [vmem:[%s7120_s3 + $0x1a0] sm:$0xff]  ;;  %3840 = vmatpush1.bf16.msra.mxu1 %v5964_v56  ;;  %v3030_v56 = vld [vmem:[%s7120_s3 + $0x8] sm:$0xff] }
 0xa8d   : > { %2910 = vmatprep.subr.bf16.mxu0 %v6555_v11  ;;  %v5957_v11 = vcombine.high %v3077_v7, %v3081_v8 }
 0xa8f   : > { %3841 = vmatprep.subr.bf16.mxu1 %v5957_v11  ;;  %v3153_v11 = vld [vmem:[%s7120_s3 + $0x3e0] sm:$0xff] }
 0xa90   : > { %2911 = vmatpush1.bf16.msra.mxu0 %v6553_v10  ;;  %v5967_v10 = vcombine.high %v3086_v55, %v3090_v6  ;;  %v3033_v55 = vld [vmem:[%s7120_s3 + $0x20] sm:$0xff] }
 0xa92   : > { %3882 = vmatprep.subr.bf16.mxu0 %v5967_v10  ;;  %v3149_v10 = vld [vmem:[%s7120_s3 + $0x3c0] sm:$0xff] }
 0xad5   : > { %v2613_v14 = vpop.f32.mrf.mxu0 }
 0xad6   : > { %v2622_v15 = vadd.f32 %v2613_v14, %v2311_v13  ;;  %v3078_v13 = vld [vmem:[%s7120_s3 + $0x188] sm:$0xff] }
 0xad7   : > { %v2615_v17 = vpop.f32.mrf.mxu0  ;;  %v3082_v14 = vld [vmem:[%s7120_s3 + $0x1a8] sm:$0xff] }
 0xad8   : > { %v2623_v19 = vadd.f32 %v2615_v17, %v2313_v16  ;;  %v3069_v16 = vld [vmem:[%s7120_s3 + $0x140] sm:$0xff] }
 0xad9   : > { %v2617_v23 = vpop.f32.mrf.mxu0  ;;  %v3073_v17 = vld [vmem:[%s7120_s3 + $0x160] sm:$0xff] }
 0xada   : > { %v2624_v54 = vadd.f32 %v2617_v23, %v2315_v18  ;;  %v3070_v18 = vld [vmem:[%s7120_s3 + $0x148] sm:$0xff]  ;;  %v5956_v23 = vcombine.low %v3077_v7, %v3081_v8  ;;  %v5909_v8 = vcombine.high %v3029_v4, %v3033_v55 }
 0xadb   : > { %v2619_v27 = vpop.f32.mrf.mxu0 }
 0xadc   : > { %v2625_v63 = vadd.f32 %v2619_v27, %v2317_v42  ;;  %v5949_v27 = vcombine.high %v3069_v16, %v3073_v17  ;;  %3842 = vmatpush1.bf16.msra.mxu1 %v5956_v23  ;;  %v3058_v42 = vld [vmem:[%s7120_s3 + $0xe8] sm:$0xff] }
 0xade   : > { %3843 = vmatprep.subr.bf16.mxu1 %v5949_v27 }
 0xb43   : > { %v2797_v28 = vpop.f32.mrf.mxu0 }
 0xb45   : > { %v6290_v29 = vpop.f32.mrf.mxu0 }
 0xb46   : > { %v3061_v29 = vld [vmem:[%s7120_s3 + $0x100] sm:$0xff] }
 0xb47   : > { %v2800_v30 = vpop.f32.mrf.mxu0 }
 0xb48   : > { %v3065_v30 = vld [vmem:[%s7120_s3 + $0x120] sm:$0xff] }
 0xb49   : > { %v6291_v31 = vpop.f32.mrf.mxu0 }
 0xb4a   : > { %v3062_v31 = vld [vmem:[%s7120_s3 + $0x108] sm:$0xff] }
 0xb4b   : > { %v2846_v36 = vpop.f32.mrf.mxu1 }
 0xb4c   : > { %v2852_v37 = vpack.c.bf16 %v2846_v36, %v2797_v28  ;;  %v3066_v36 = vld [vmem:[%s7120_s3 + $0x128] sm:$0xff] }
 0xb4d   : > { %v6296_v39 = vpop.f32.mrf.mxu1 }
 0xb4e   : > { %5907 = vmatmul.mubr.msk.bf16.vlgmr.msra.gmra.mxu0 %vm1708_vm1, %v2852_v37  ;;  %v5948_v37 = vcombine.low %v3069_v16, %v3073_v17  ;;  %v5908_v16 = vcombine.low %v3029_v4, %v3033_v55  ;;  %v6029_v17 = vcombine.high %v3149_v10, %v3153_v11  ;;  %v3130_v4 = vld [vmem:[%s7120_s3 + $0x328] sm:$0xff]  ;;  %v3117_v55 = vld [vmem:[%s7120_s3 + $0x2c0] sm:$0xff] }
 0xb4f   : > { %v2849_v20 = vpop.f32.mrf.mxu1  ;;  %3883 = vmatpush1.bf16.msra.mxu0 %v5966_v9  ;;  %v5911_v9 = vcombine.high %v3030_v56, %v3034_v5 }
 0xb50   : > { %v5941_v20 = vcombine.high %v3061_v29, %v3065_v30  ;;  %3844 = vmatpush1.bf16.msra.mxu1 %v5948_v37 }
 0xb51   : > { %v6297_v21 = vpop.f32.mrf.mxu1 }
 0xb52   : > { %v5943_v21 = vcombine.high %v3062_v31, %v3066_v36  ;;  %3845 = vmatprep.subr.bf16.mxu1 %v5941_v20 }
 0xc0e   : > { %v2930_v40 = vpop.f32.mrf.mxu0 }
 0xc0f   : > { %v2939_v41 = vadd.f32 %v2930_v40, %v2622_v15  ;;  %v5959_v15 = vcombine.high %v3078_v13, %v3082_v14  ;;  %v3053_v40 = vld [vmem:[%s7120_s3 + $0xc0] sm:$0xff] }
 0xc10   : > { %v2932_v45 = vpop.f32.mrf.mxu0 }
 0xc11   : > { %v2943_v49 = vadd.f32 %v6852_v46, %v2939_v41  ;;  %v2940_v57 = vadd.f32 %v2932_v45, %v2623_v19  ;;  %v3074_v19 = vld [vmem:[%s7120_s3 + $0x168] sm:$0xff]  ;;  %3884 = vmatprep.subr.bf16.mxu0 %v5959_v15  ;;  %v5940_v45 = vcombine.low %v3061_v29, %v3065_v30  ;;  %v5942_v46 = vcombine.low %v3062_v31, %v3066_v36 }
 0xc12   : > { %v2934_v59 = vpop.f32.mrf.mxu0  ;;  %v5951_v28 = vcombine.high %v3070_v18, %v3074_v19  ;;  %v5950_v39 = vcombine.low %v3070_v18, %v3074_v19  ;;  %v3054_v41 = vld [vmem:[%s7120_s3 + $0xc8] sm:$0xff]  ;;  %v5910_v15 = vcombine.low %v3030_v56, %v3034_v5  ;;  %v6028_v19 = vcombine.low %v3149_v10, %v3153_v11  ;;  %v3121_v56 = vld [vmem:[%s7120_s3 + $0x2e0] sm:$0xff] }
 0xc13   : > { %v2944_v0 = vadd.f32 %v6853_v62, %v2940_v57  ;;  %v2941_v22 = vadd.f32 %v2934_v59, %v2624_v54  ;;  %v7580_v1 = vadd.f32 %v2952_v47, %v2943_v49  ;;  %v5958_v54 = vcombine.low %v3078_v13, %v3082_v14  ;;  %v3045_v57 = vld [vmem:[%s7120_s3 + $0x80] sm:$0xff]  ;;  %v3046_v59 = vld [vmem:[%s7120_s3 + $0x88] sm:$0xff]  ;;  %3846 = vmatpush1.bf16.msra.mxu1 %v5940_v45 }
 0xc14   : > { %v2936_v60 = vpop.f32.mrf.mxu0  ;;  %v5933_v49 = vcombine.high %v3053_v40, %v3057_v53  ;;  %v5932_v62 = vcombine.low %v3053_v40, %v3057_v53  ;;  %v3150_v13 = vld [vmem:[%s7120_s3 + $0x3c8] sm:$0xff]  ;;  %v3145_v45 = vld [vmem:[%s7120_s3 + $0x3a0] sm:$0xff] }
 0xc15   : > { %v7582_v26 = vadd.f32 %v2956_v58, %v2944_v0  ;;  %v2945_v48 = vadd.f32 %v6854_v12, %v2941_v22  ;;  %v2942_v35 = vadd.f32 %v2936_v60, %v2625_v63  ;;  %3885 = vmatpush1.bf16.msra.mxu0 %v5958_v54  ;;  %v3050_v63 = vld [vmem:[%s7120_s3 + $0xa8] sm:$0xff]  ;;  %v5934_v0 = vcombine.low %v3054_v41, %v3058_v42  ;;  %v3037_v12 = vld [vmem:[%s7120_s3 + $0x40] sm:$0xff] }
 0xc16   : > { %3886 = vmatprep.subr.bf16.mxu0 %v5951_v28  ;;  %3847 = vmatprep.subr.bf16.mxu1 %v5933_v49  ;;  %v5927_v60 = vcombine.high %v3046_v59, %v3050_v63  ;;  %v3154_v14 = vld [vmem:[%s7120_s3 + $0x3e8] sm:$0xff]  ;;  %v3109_v10 = vld [vmem:[%s7120_s3 + $0x280] sm:$0xff] }
 0xc17   : > { %v2946_v2 = vadd.f32 %v6855_v38, %v2942_v35  ;;  %v2965_v3 = vadd.f32 %v7582_v26, %v7580_v1  ;;  %v7592_v61 = vadd.f32 %v2952_v47, %v2945_v48  ;;  %v5935_v47 = vcombine.high %v3054_v41, %v3058_v42  ;;  %v3041_v48 = vld [vmem:[%s7120_s3 + $0x60] sm:$0xff]  ;;  %v3038_v35 = vld [vmem:[%s7120_s3 + $0x48] sm:$0xff]  ;;  %3848 = vmatpush1.bf16.msra.mxu1 %v5932_v62 }
 0xc18   : > { %v3042_v38 = vld [vmem:[%s7120_s3 + $0x68] sm:$0xff]  ;;  %v5916_v6 = vcombine.low %v3037_v12, %v3041_v48  ;;  %v6031_v18 = vcombine.high %v3150_v13, %v3154_v14  ;;  %v6030_v23 = vcombine.low %v3150_v13, %v3154_v14  ;;  %v3141_v42 = vld [vmem:[%s7120_s3 + $0x380] sm:$0xff] }
 0xc19   : > { %v7594_v44 = vadd.f32 %v2956_v58, %v2946_v2  ;;  %2966 = vadd.xlane.f32.xlu1 %v2965_v3  ;;  %3887 = vmatpush1.bf16.msra.mxu0 %v5950_v39  ;;  %v3049_v58 = vld [vmem:[%s7120_s3 + $0xa0] sm:$0xff]  ;;  %v5926_v3 = vcombine.low %v3046_v59, %v3050_v63  ;;  %v5919_v50 = vcombine.high %v3038_v35, %v3042_v38  ;;  %v3110_v14 = vld [vmem:[%s7120_s3 + $0x288] sm:$0xff] }
 0xc1a   : > { %3888 = vmatprep.subr.bf16.mxu0 %v5943_v21  ;;  %v5925_v22 = vcombine.high %v3045_v57, %v3049_v58  ;;  %v5924_v2 = vcombine.low %v3045_v57, %v3049_v58  ;;  %v5918_v7 = vcombine.low %v3038_v35, %v3042_v38  ;;  %v6021_v49 = vcombine.high %v3141_v42, %v3145_v45  ;;  %v3133_v63 = vld [vmem:[%s7120_s3 + $0x340] sm:$0xff] }
 0xc1b   : > { %v2968_v24 = vadd.f32 %v7594_v44, %v7592_v61  ;;  %v6020_v57 = vcombine.low %v3141_v42, %v3145_v45  ;;  %v3137_v62 = vld [vmem:[%s7120_s3 + $0x360] sm:$0xff]  ;;  %v3098_v42 = vld [vmem:[%s7120_s3 + $0x228] sm:$0xff] }
 0xc1c   : > { %3849 = vmatprep.subr.bf16.mxu1 %v5925_v22  ;;  %v6013_v22 = vcombine.high %v3133_v63, %v3137_v62  ;;  %v3125_v38 = vld [vmem:[%s7120_s3 + $0x300] sm:$0xff] }
 0xc1d   : > { %2969 = vadd.xlane.f32.xlu0 %v2968_v24  ;;  %3889 = vmatpush1.bf16.msra.mxu0 %v5942_v46  ;;  %v5917_v24 = vcombine.high %v3037_v12, %v3041_v48  ;;  %v3142_v46 = vld [vmem:[%s7120_s3 + $0x388] sm:$0xff]  ;;  %v6012_v12 = vcombine.low %v3133_v63, %v3137_v62  ;;  %v3113_v13 = vld [vmem:[%s7120_s3 + $0x2a0] sm:$0xff]  ;;  %v3091_v63 = vld [vmem:[%s7120_s3 + $0x1f0] sm:$0xff] }
 0xc1e   : > { %3890 = vmatprep.subr.bf16.mxu0 %v5935_v47  ;;  %3850 = vmatpush1.bf16.msra.mxu1 %v5924_v2  ;;  %v3146_v47 = vld [vmem:[%s7120_s3 + $0x3a8] sm:$0xff]  ;;  %v3129_v2 = vld [vmem:[%s7120_s3 + $0x320] sm:$0xff]  ;;  %v3088_v62 = vld [vmem:[%s7120_s3 + $0x1d8] sm:$0xff] }
 0xc1f   : > { %3851 = vmatprep.subr.bf16.mxu1 %v5917_v24  ;;  %v6022_v58 = vcombine.low %v3142_v46, %v3146_v47  ;;  %v6023_v59 = vcombine.high %v3142_v46, %v3146_v47  ;;  %v6004_v24 = vcombine.low %v3125_v38, %v3129_v2 }
 0xc21   : > { %3891 = vmatpush1.bf16.msra.mxu0 %v5934_v0  ;;  %v3134_v0 = vld [vmem:[%s7120_s3 + $0x348] sm:$0xff] }
 0xc22   : > { %3892 = vmatprep.subr.bf16.mxu0 %v5927_v60  ;;  %3852 = vmatpush1.bf16.msra.mxu1 %v5916_v6  ;;  %v3138_v60 = vld [vmem:[%s7120_s3 + $0x368] sm:$0xff] }
 0xc23   : > { %3853 = vmatprep.subr.bf16.mxu1 %v5909_v8  ;;  %v6014_v48 = vcombine.low %v3134_v0, %v3138_v60  ;;  %v6015_v35 = vcombine.high %v3134_v0, %v3138_v60  ;;  %v3118_v8 = vld [vmem:[%s7120_s3 + $0x2c8] sm:$0xff] }
 0xc25   : > { %3893 = vmatpush1.bf16.msra.mxu0 %v5926_v3  ;;  %v3126_v3 = vld [vmem:[%s7120_s3 + $0x308] sm:$0xff] }
 0xc26   : > { %3894 = vmatprep.subr.bf16.mxu0 %v5919_v50  ;;  %3854 = vmatpush1.bf16.msra.mxu1 %v5908_v16  ;;  %v6005_v50 = vcombine.high %v3125_v38, %v3129_v2  ;;  %v6006_v5 = vcombine.low %v3126_v3, %v3130_v4  ;;  %v6007_v6 = vcombine.high %v3126_v3, %v3130_v4  ;;  %v3114_v16 = vld [vmem:[%s7120_s3 + $0x2a8] sm:$0xff]  ;;  %v2963_v4 = vld [vmem:[%s799_s23] sm:$0x3] }
 0xc27   : > { %3855 = vmatprep.subr.bf16.mxu1 %v6029_v17 }
 0xc29   : > { %3895 = vmatpush1.bf16.msra.mxu0 %v5918_v7  ;;  %v5997_v7 = vcombine.high %v3117_v55, %v3121_v56 }
 0xc2a   : > { %3896 = vmatprep.subr.bf16.mxu0 %v5911_v9  ;;  %3856 = vmatpush2.bf16.msra.mxu1 %v6028_v19  ;;  %v3122_v9 = vld [vmem:[%s7120_s3 + $0x2e8] sm:$0xff]  ;;  %v5991_v19 = vcombine.high %v3110_v14, %v3114_v16 }
 0xc2b   : > { %3857 = vmatprep.subr.bf16.mxu1 %v6021_v49  ;;  %v5999_v11 = vcombine.high %v3118_v8, %v3122_v9  ;;  %v5998_v17 = vcombine.low %v3118_v8, %v3122_v9  ;;  %v3001_v8 = vrot.slane %v2963_v4, %v7276_v34 }
 0xc2d   : > { %3897 = vmatpush1.bf16.msra.mxu0 %v5910_v15  ;;  %v5996_v15 = vcombine.low %v3117_v55, %v3121_v56  ;;  %v2964_v56 = vld [vmem:[%s8456_s25] sm:$0x3] }
 0xc2e   : > { %3898 = vmatprep.subr.bf16.mxu0 %v6031_v18  ;;  %3858 = vmatpush2.bf16.msra.mxu1 %v6020_v57  ;;  %v5989_v18 = vcombine.high %v3109_v10, %v3113_v13 }
 0xc2f   : > { %3859 = vmatprep.subr.bf16.mxu1 %v6013_v22  ;;  %v3092_v22 = vld [vmem:[%s7120_s3 + $0x1f8] sm:$0xff] }
 0xc31   : > { %3899 = vmatpush2.bf16.msra.mxu0 %v6030_v23  ;;  %v3101_v23 = vld [vmem:[%s7120_s3 + $0x240] sm:$0xff] }
 0xc32   : > { %3900 = vmatprep.subr.bf16.mxu0 %v6023_v59  ;;  %3860 = vmatpush2.bf16.msra.mxu1 %v6012_v12  ;;  %v3087_v59 = vld [vmem:[%s7120_s3 + $0x1d0] sm:$0xff]  ;;  %v5970_v12 = vcombine.low %v3088_v62, %v3092_v22 }
 0xc33   : > { %3861 = vmatprep.subr.bf16.mxu1 %v6005_v50  ;;  %v5969_v0 = vcombine.high %v3087_v59, %v3091_v63  ;;  %v5968_v60 = vcombine.low %v3087_v59, %v3091_v63  ;;  %v3068_v59 = vld [vmem:[%s7120_s3 + $0x138] sm:$0xff] }
 0xc35   : > { %3901 = vmatpush2.bf16.msra.mxu0 %v6022_v58 }
 0xc36   : > { %3902 = vmatprep.subr.bf16.mxu0 %v6015_v35  ;;  %3862 = vmatpush2.bf16.msra.mxu1 %v6004_v24 }
 0xc37   : > { %3863 = vmatprep.subr.bf16.mxu1 %v5997_v7 }
 0xc39   : > { %3903 = vmatpush2.bf16.msra.mxu0 %v6014_v48  ;;  %v5971_v48 = vcombine.high %v3088_v62, %v3092_v22 }
 0xc3a   : > { %3904 = vmatprep.subr.bf16.mxu0 %v6007_v6  ;;  %3864 = vmatpush2.bf16.msra.mxu1 %v5996_v15  ;;  %v3005_v6 = vrot.slane %v2963_v4, %v7273_v33  ;;  %v3051_v4 = vld [vmem:[%s7120_s3 + $0xb0] sm:$0xff] }
 0xc3b   : > { %3865 = vmatprep.subr.bf16.mxu1 %v5989_v18 }
 0xc3d   : > { %3905 = vmatpush2.bf16.msra.mxu0 %v6006_v5 }
 0xc3e   : > { %3906 = vmatprep.subr.bf16.mxu0 %v5999_v11  ;;  %v3016_v11 = vrot.slane %v2964_v56, %v7276_v34 }
 0xc41   : > { %3907 = vmatpush2.bf16.msra.mxu0 %v5998_v17 }
 0xc42   : > { %3908 = vmatprep.subr.bf16.mxu0 %v5991_v19 }
 0xca2   : > { %v2967_v54 = vpop.xlane.xlu1 %2966 }
 0xca3   : > { %v2971_v27 = vmul.f32 0.00390625, %v2967_v54  ;;  %v3105_v54 = vld [vmem:[%s7120_s3 + $0x260] sm:$0xff] }
 0xca4   : > { %v5980_v45 = vcombine.low %v3101_v23, %v3105_v54 }
 0xca5   : > { %v7635_v28 = vsub.f32 %v7580_v1, %v2971_v27  ;;  %v7638_v29 = vsub.f32 %v7582_v26, %v2971_v27  ;;  %v3102_v27 = vld [vmem:[%s7120_s3 + $0x248] sm:$0xff] }
 0xca6   : > { %v2970_v30 = vpop.xlane.xlu0 %2969 }
 0xca7   : > { %v2972_v31 = vmul.f32 0.00390625, %v2970_v30  ;;  %v2977_v36 = vmul.f32 %v7635_v28, %v7635_v28  ;;  %v2978_v37 = vmul.f32 %v7638_v29, %v7638_v29  ;;  %v3106_v30 = vld [vmem:[%s7120_s3 + $0x268] sm:$0xff] }
 0xca8   : > { %v5982_v46 = vcombine.low %v3102_v27, %v3106_v30 }
 0xca9   : > { %v7645_v39 = vsub.f32 %v7592_v61, %v2972_v31  ;;  %v7648_v20 = vsub.f32 %v7594_v44, %v2972_v31  ;;  %v2981_v21 = vadd.f32 %v2978_v37, %v2977_v36  ;;  %v5988_v31 = vcombine.low %v3109_v10, %v3113_v13 }
 0xcaa   : > { %v5990_v36 = vcombine.low %v3110_v14, %v3114_v16  ;;  %v5981_v37 = vcombine.high %v3101_v23, %v3105_v54  ;;  %v3020_v10 = vrot.slane %v2964_v56, %v7273_v33  ;;  %v3079_v54 = vld [vmem:[%s7120_s3 + $0x190] sm:$0xff]  ;;  %v3052_v56 = vld [vmem:[%s7120_s3 + $0xb8] sm:$0xff] }
 0xcab   : > { %2982 = vadd.xlane.f32.xlu0 %v2981_v21  ;;  %v2979_v40 = vmul.f32 %v7645_v39, %v7645_v39  ;;  %v2980_v53 = vmul.f32 %v7648_v20, %v7648_v20  ;;  %v5983_v21 = vcombine.high %v3102_v27, %v3106_v30  ;;  %3866 = vmatpush2.bf16.msra.mxu1 %v5988_v31  ;;  %v3083_v27 = vld [vmem:[%s7120_s3 + $0x1b0] sm:$0xff]  ;;  %v3080_v30 = vld [vmem:[%s7120_s3 + $0x198] sm:$0xff] }
 0xcac   : > { %3909 = vmatpush2.bf16.msra.mxu0 %v5990_v36  ;;  %3867 = vmatprep.subr.bf16.mxu1 %v5981_v37  ;;  %v3084_v31 = vld [vmem:[%s7120_s3 + $0x1b8] sm:$0xff]  ;;  %v3071_v37 = vld [vmem:[%s7120_s3 + $0x150] sm:$0xff] }
 0xcad   : > { %v2984_v41 = vadd.f32 %v2980_v53, %v2979_v40  ;;  %v3093_v40 = vld [vmem:[%s7120_s3 + $0x200] sm:$0xff]  ;;  %3910 = vmatprep.subr.bf16.mxu0 %v5983_v21  ;;  %v5963_v21 = vcombine.high %v3080_v30, %v3084_v31 }
 0xcae   : > { %v3097_v53 = vld [vmem:[%s7120_s3 + $0x220] sm:$0xff] }
 0xcaf   : > { %2985 = vadd.xlane.f32.xlu1 %v2984_v41  ;;  %v3094_v41 = vld [vmem:[%s7120_s3 + $0x208] sm:$0xff]  ;;  %v5973_v49 = vcombine.high %v3093_v40, %v3097_v53  ;;  %3868 = vmatpush2.bf16.msra.mxu1 %v5980_v45  ;;  %v5972_v57 = vcombine.low %v3093_v40, %v3097_v53  ;;  %v3075_v40 = vld [vmem:[%s7120_s3 + $0x170] sm:$0xff]  ;;  %v3072_v53 = vld [vmem:[%s7120_s3 + $0x158] sm:$0xff]  ;;  %v5962_v45 = vcombine.low %v3080_v30, %v3084_v31 }
 0xcb0   : > { %v5975_v47 = vcombine.high %v3094_v41, %v3098_v42  ;;  %3911 = vmatpush2.bf16.msra.mxu0 %v5982_v46  ;;  %v5974_v58 = vcombine.low %v3094_v41, %v3098_v42  ;;  %v3076_v41 = vld [vmem:[%s7120_s3 + $0x178] sm:$0xff]  ;;  %v5960_v42 = vcombine.low %v3079_v54, %v3083_v27  ;;  %v5953_v46 = vcombine.high %v3071_v37, %v3075_v40  ;;  %v3151_v31 = vld [vmem:[%s7120_s3 + $0x3d0] sm:$0xff] }
 0xcb1   : > { %3869 = vmatprep.subr.bf16.mxu1 %v5973_v49  ;;  %v5955_v49 = vcombine.high %v3072_v53, %v3076_v41  ;;  %v5952_v63 = vcombine.low %v3071_v37, %v3075_v40  ;;  %v5954_v62 = vcombine.low %v3072_v53, %v3076_v41  ;;  %v3152_v37 = vld [vmem:[%s7120_s3 + $0x3d8] sm:$0xff] }
 0xcb2   : > { %3912 = vmatprep.subr.bf16.mxu0 %v5975_v47  ;;  %v3063_v47 = vld [vmem:[%s7120_s3 + $0x110] sm:$0xff] }
 0xcb3   : > { %3870 = vmatpush2.bf16.msra.mxu1 %v5972_v57  ;;  %v3067_v57 = vld [vmem:[%s7120_s3 + $0x130] sm:$0xff] }
 0xcb4   : > { %3913 = vmatpush2.bf16.msra.mxu0 %v5974_v58  ;;  %3925 = vmatprep.subr.bf16.mxu1 %v5969_v0  ;;  %v3064_v58 = vld [vmem:[%s7120_s3 + $0x118] sm:$0xff]  ;;  %v5945_v0 = vcombine.high %v3063_v47, %v3067_v57 }
 0xcb5   : > { %3968 = vmatprep.subr.bf16.mxu0 %v5971_v48  ;;  %v5947_v22 = vcombine.high %v3064_v58, %v3068_v59  ;;  %v3056_v48 = vld [vmem:[%s7120_s3 + $0xd8] sm:$0xff] }
 0xd34   : > { %v2983_v35 = vpop.xlane.xlu0 %2982 }
 0xd35   : > { %v2987_v38 = vmul.f32 0.00390625, %v2983_v35  ;;  %v3060_v35 = vld [vmem:[%s7120_s3 + $0xf8] sm:$0xff] }
 0xd37   : > { %v2989_v2 = vadd.f32 1e-06, %v2987_v38  ;;  %v5944_v38 = vcombine.low %v3063_v47, %v3067_v57 }
 0xd38   : > { %v2986_v3 = vpop.xlane.xlu1 %2985 }
 0xd39   : > { %6784 = vrsqrt.f32 %v2989_v2  ;;  %v2988_v24 = vmul.f32 0.00390625, %v2986_v3  ;;  %v5946_v2 = vcombine.low %v3064_v58, %v3068_v59 }
 0xd3b   : > { %v2990_v50 = vadd.f32 1e-06, %v2988_v24  ;;  %v5939_v24 = vcombine.high %v3056_v48, %v3060_v35 }
 0xd3d   : > { %6786 = vrsqrt.f32 %v2990_v50  ;;  %v3047_v50 = vld [vmem:[%s7120_s3 + $0x90] sm:$0xff] }
 0xd46   : > { %v6785_v55 = vpop.eup %6784 }
 0xd47   : > { %v2994_v5 = vmul.f32 %v6785_v55, %v7638_v29  ;;  %v2993_v7 = vmul.f32 %v6785_v55, %v7635_v28  ;;  %v3048_v55 = vld [vmem:[%s7120_s3 + $0x98] sm:$0xff] }
 0xd49   : > { %v3009_v14 = vmul.f32 %v3005_v6, %v2994_v5  ;;  %v3008_v16 = vmul.f32 %v3001_v8, %v2993_v7  ;;  %v5929_v7 = vcombine.high %v3047_v50, %v3051_v4 }
 0xd4a   : > { %v6787_v9 = vpop.eup %6786 }
 0xd4b   : > { %v2996_v13 = vmul.f32 %v6787_v9, %v7648_v20  ;;  %v2995_v29 = vmul.f32 %v6787_v9, %v7645_v39  ;;  %v3024_v28 = vadd.f32 %v3020_v10, %v3009_v14  ;;  %v3023_v19 = vadd.f32 %v3016_v11, %v3008_v16  ;;  %v3039_v9 = vld [vmem:[%s7120_s3 + $0x50] sm:$0xff] }
 0xd4c   : > { %v5961_v39 = vcombine.high %v3079_v54, %v3083_v27  ;;  %v5928_v14 = vcombine.low %v3047_v50, %v3051_v4 }
 0xd4d   : > { %v3011_v15 = vmul.f32 %v3005_v6, %v2996_v13  ;;  %v3010_v17 = vmul.f32 %v3001_v8, %v2995_v29  ;;  %v5938_v6 = vcombine.low %v3056_v48, %v3060_v35  ;;  %v5931_v8 = vcombine.high %v3048_v55, %v3052_v56  ;;  %v3044_v13 = vld [vmem:[%s7120_s3 + $0x78] sm:$0xff] }
 0xd4e   : > { %v5930_v29 = vcombine.low %v3048_v55, %v3052_v56 }
 0xd4f   : > { %v3026_v18 = vadd.f32 %v3020_v10, %v3011_v15  ;;  %v3025_v23 = vadd.f32 %v3016_v11, %v3010_v17  ;;  %v3043_v10 = vld [vmem:[%s7120_s3 + $0x70] sm:$0xff]  ;;  %v3040_v11 = vld [vmem:[%s7120_s3 + $0x58] sm:$0xff] }
 0xd50   : > { %v5921_v16 = vcombine.high %v3039_v9, %v3043_v10  ;;  %v5923_v15 = vcombine.high %v3040_v11, %v3044_v13  ;;  %v3031_v17 = vld [vmem:[%s7120_s3 + $0x10] sm:$0xff]  ;;  %v5922_v54 = vcombine.low %v3040_v11, %v3044_v13 }
 0xd51   : > { %v3028_v36 = vpack.c.bf16 %v3026_v18, %v3024_v28  ;;  %v7708_v20 = vpack.c.bf16 %v3025_v23, %v3023_v19  ;;  %v3035_v28 = vld [vmem:[%s7120_s3 + $0x30] sm:$0xff]  ;;  %v3032_v18 = vld [vmem:[%s7120_s3 + $0x18] sm:$0xff]  ;;  %v5920_v23 = vcombine.low %v3039_v9, %v3043_v10 }
 0xd52   : > { %v3036_v19 = vld [vmem:[%s7120_s3 + $0x38] sm:$0xff]  ;;  %v5913_v27 = vcombine.high %v3031_v17, %v3035_v28 }
 0xd53   : > { %3871 = vmatprep.mubr.bf16.mxu1 %v3028_v36  ;;  %3914 = vmatprep.mubr.bf16.mxu0 %v3028_v36  ;;  %v5915_v30 = vcombine.high %v3032_v18, %v3036_v19  ;;  %v5914_v40 = vcombine.low %v3032_v18, %v3036_v19 }
 0xd54   : > { %3872 = vmatmul.mubr.bf16.vlgmr.msra.gmra.mxu1 %v7708_v20  ;;  %3915 = vmatmul.mubr.bf16.vlgmr.msra.gmra.mxu0 %v7708_v20 }
 0xd55   : > { %3926 = vmatpush1.bf16.msra.mxu1 %v5968_v60  ;;  %3969 = vmatpush1.bf16.msra.mxu0 %v5970_v12  ;;  %v3055_v60 = vld [vmem:[%s7120_s3 + $0xd0] sm:$0xff] }
 0xd56   : > { %3957 = vmatprep.mubr.bf16.mxu1 %v3028_v36  ;;  %4000 = vmatprep.mubr.bf16.mxu0 %v3028_v36  ;;  %v3059_v12 = vld [vmem:[%s7120_s3 + $0xf0] sm:$0xff] }
 0xd57   : > { %3927 = vmatprep.subr.bf16.mxu1 %v5961_v39  ;;  %3970 = vmatprep.subr.bf16.mxu0 %v5963_v21  ;;  %v5937_v3 = vcombine.high %v3055_v60, %v3059_v12  ;;  %v5936_v5 = vcombine.low %v3055_v60, %v3059_v12  ;;  %v3155_v36 = vld [vmem:[%s7120_s3 + $0x3f0] sm:$0xff]  ;;  %v3156_v39 = vld [vmem:[%s7120_s3 + $0x3f8] sm:$0xff]  ;;  %v5912_v21 = vcombine.low %v3031_v17, %v3035_v28 }
 0xd58   : > { %v6033_v53 = vcombine.high %v3151_v31, %v3155_v36  ;;  %v6035_v41 = vcombine.high %v3152_v37, %v3156_v39  ;;  %v6032_v47 = vcombine.low %v3151_v31, %v3155_v36  ;;  %v6034_v57 = vcombine.low %v3152_v37, %v3156_v39 }
 0xd59   : > { %3928 = vmatpush1.bf16.msra.mxu1 %v5960_v42  ;;  %3971 = vmatpush1.bf16.msra.mxu0 %v5962_v45  ;;  %v3143_v42 = vld [vmem:[%s7120_s3 + $0x390] sm:$0xff] }
 0xd5a   : > { %3929 = vmatprep.subr.bf16.mxu1 %v5953_v46  ;;  %3972 = vmatprep.subr.bf16.mxu0 %v5955_v49  ;;  %v3147_v45 = vld [vmem:[%s7120_s3 + $0x3b0] sm:$0xff]  ;;  %v3144_v46 = vld [vmem:[%s7120_s3 + $0x398] sm:$0xff] }
 0xd5b   : > { %v3148_v49 = vld [vmem:[%s7120_s3 + $0x3b8] sm:$0xff]  ;;  %v6025_v58 = vcombine.high %v3143_v42, %v3147_v45  ;;  %v6024_v60 = vcombine.low %v3143_v42, %v3147_v45 }
 0xd5c   : > { %v6027_v59 = vcombine.high %v3144_v46, %v3148_v49  ;;  %v6026_v12 = vcombine.low %v3144_v46, %v3148_v49 }
 0xd5d   : > { %3930 = vmatpush1.bf16.msra.mxu1 %v5952_v63  ;;  %3973 = vmatpush1.bf16.msra.mxu0 %v5954_v62  ;;  %v3135_v63 = vld [vmem:[%s7120_s3 + $0x350] sm:$0xff] }
 0xd5e   : > { %3931 = vmatprep.subr.bf16.mxu1 %v5945_v0  ;;  %3974 = vmatprep.subr.bf16.mxu0 %v5947_v22  ;;  %v3139_v62 = vld [vmem:[%s7120_s3 + $0x370] sm:$0xff]  ;;  %v3136_v0 = vld [vmem:[%s7120_s3 + $0x358] sm:$0xff] }
 0xd5f   : > { %v3140_v22 = vld [vmem:[%s7120_s3 + $0x378] sm:$0xff]  ;;  %v6017_v48 = vcombine.high %v3135_v63, %v3139_v62  ;;  %v6016_v50 = vcombine.low %v3135_v63, %v3139_v62 }
 0xd60   : > { %v6019_v35 = vcombine.high %v3136_v0, %v3140_v22  ;;  %v6018_v4 = vcombine.low %v3136_v0, %v3140_v22  ;;  %v6556_v63 = vld [vmem:[%s7130_s16 + $0x70] ss:$8 sps:$4 sm:$0xff]   ;;  %v6564_v0 = vld [vmem:[%s7130_s16 + $0x64] ss:$8 sps:$4 sm:$0xff]  }
 0xd61   : > { %3932 = vmatpush1.bf16.msra.mxu1 %v5944_v38  ;;  %3975 = vmatpush1.bf16.msra.mxu0 %v5946_v2  ;;  %v3127_v38 = vld [vmem:[%s7120_s3 + $0x310] sm:$0xff]  ;;  %v6567_v22 = vld [vmem:[%s7130_s16 + $0x164] ss:$8 sps:$4 sm:$0xff]  }
 0xd62   : > { %3933 = vmatprep.subr.bf16.mxu1 %v5937_v3  ;;  %3976 = vmatprep.subr.bf16.mxu0 %v5939_v24  ;;  %v3131_v2 = vld [vmem:[%s7120_s3 + $0x330] sm:$0xff]  ;;  %v3128_v3 = vld [vmem:[%s7120_s3 + $0x318] sm:$0xff] }
 0xd63   : > { %v3132_v24 = vld [vmem:[%s7120_s3 + $0x338] sm:$0xff]  ;;  %v6009_v55 = vcombine.high %v3127_v38, %v3131_v2  ;;  %v6008_v9 = vcombine.low %v3127_v38, %v3131_v2  ;;  %v6576_v2 = vld [vmem:[%s7130_s16 + $0x44] ss:$8 sps:$4 sm:$0xff]  }
 0xd64   : > { %v6011_v56 = vcombine.high %v3128_v3, %v3132_v24  ;;  %v6010_v10 = vcombine.low %v3128_v3, %v3132_v24  ;;  %v6559_v62 = vld [vmem:[%s7130_s16 + $0x170] ss:$8 sps:$4 sm:$0xff]   ;;  %v6579_v3 = vld [vmem:[%s7130_s16 + $0x144] ss:$8 sps:$4 sm:$0xff]   ;;  %v6574_v24 = vld [vmem:[%s7130_s16 + $0x40] ss:$8 sps:$4 sm:$0xff]  }
 0xd65   : > { %3934 = vmatpush1.bf16.msra.mxu1 %v5936_v5  ;;  %3977 = vmatpush1.bf16.msra.mxu0 %v5938_v6  ;;  %v3119_v5 = vld [vmem:[%s7120_s3 + $0x2d0] sm:$0xff] }
 0xd66   : > { %3935 = vmatprep.subr.bf16.mxu1 %v5929_v7  ;;  %3978 = vmatprep.subr.bf16.mxu0 %v5931_v8  ;;  %v3123_v6 = vld [vmem:[%s7120_s3 + $0x2f0] sm:$0xff]  ;;  %v3120_v7 = vld [vmem:[%s7120_s3 + $0x2d8] sm:$0xff] }
 0xd67   : > { %v3124_v8 = vld [vmem:[%s7120_s3 + $0x2f8] sm:$0xff]  ;;  %v6001_v11 = vcombine.high %v3119_v5, %v3123_v6  ;;  %v6000_v17 = vcombine.low %v3119_v5, %v3123_v6  ;;  %v6588_v6 = vld [vmem:[%s7130_s16 + $0x24] ss:$8 sps:$4 sm:$0xff]  }
 0xd68   : > { %v6003_v13 = vcombine.high %v3120_v7, %v3124_v8  ;;  %v6002_v28 = vcombine.low %v3120_v7, %v3124_v8  ;;  %v6571_v38 = vld [vmem:[%s7130_s16 + $0x150] ss:$8 sps:$4 sm:$0xff]   ;;  %v6591_v7 = vld [vmem:[%s7130_s16 + $0x124] ss:$8 sps:$4 sm:$0xff]   ;;  %v6586_v8 = vld [vmem:[%s7130_s16 + $0x20] ss:$8 sps:$4 sm:$0xff]  }
 0xd69   : > { %3936 = vmatpush1.bf16.msra.mxu1 %v5928_v14  ;;  %3979 = vmatpush1.bf16.msra.mxu0 %v5930_v29  ;;  %v3111_v14 = vld [vmem:[%s7120_s3 + $0x290] sm:$0xff] }
 0xd6a   : > { %3937 = vmatprep.subr.bf16.mxu1 %v5921_v16  ;;  %3980 = vmatprep.subr.bf16.mxu0 %v5923_v15  ;;  %v3115_v29 = vld [vmem:[%s7120_s3 + $0x2b0] sm:$0xff]  ;;  %v3112_v16 = vld [vmem:[%s7120_s3 + $0x298] sm:$0xff] }
 0xd6b   : > { %v3116_v15 = vld [vmem:[%s7120_s3 + $0x2b8] sm:$0xff]  ;;  %v5993_v18 = vcombine.high %v3111_v14, %v3115_v29  ;;  %v5992_v31 = vcombine.low %v3111_v14, %v3115_v29  ;;  %v6600_v29 = vld [vmem:[%s7130_s16 + $0x4] ss:$8 sps:$4 sm:$0xff]  }
 0xd6c   : > { %v5995_v19 = vcombine.high %v3112_v16, %v3116_v15  ;;  %v5994_v36 = vcombine.low %v3112_v16, %v3116_v15  ;;  %v6583_v5 = vld [vmem:[%s7130_s16 + $0x130] ss:$8 sps:$4 sm:$0xff]   ;;  %v6603_v16 = vld [vmem:[%s7130_s16 + $0x104] ss:$8 sps:$4 sm:$0xff]   ;;  %v6598_v15 = vld [vmem:[%s7130_s16] ss:$8 sps:$4 sm:$0xff]  }
 0xd6d   : > { %3938 = vmatpush1.bf16.msra.mxu1 %v5920_v23  ;;  %3981 = vmatpush1.bf16.msra.mxu0 %v5922_v54  ;;  %v3103_v23 = vld [vmem:[%s7120_s3 + $0x250] sm:$0xff] }
 0xd6e   : > { %3939 = vmatprep.subr.bf16.mxu1 %v5913_v27  ;;  %3982 = vmatprep.subr.bf16.mxu0 %v5915_v30  ;;  %v3107_v54 = vld [vmem:[%s7120_s3 + $0x270] sm:$0xff]  ;;  %v3104_v27 = vld [vmem:[%s7120_s3 + $0x258] sm:$0xff] }
 0xd6f   : > { %v3108_v30 = vld [vmem:[%s7120_s3 + $0x278] sm:$0xff]  ;;  %v5985_v37 = vcombine.high %v3103_v23, %v3107_v54  ;;  %v5984_v42 = vcombine.low %v3103_v23, %v3107_v54  ;;  %v6612_v54 = vld [vmem:[%s7130_s16 + $0xe4] ss:$8 sps:$4 sm:$0xff]  }
 0xd70   : > { %v5987_v39 = vcombine.high %v3104_v27, %v3108_v30  ;;  %v5986_v45 = vcombine.low %v3104_v27, %v3108_v30  ;;  %v6595_v14 = vld [vmem:[%s7130_s16 + $0x110] ss:$8 sps:$4 sm:$0xff]   ;;  %v6615_v27 = vld [vmem:[%s7130_s16 + $0x1e4] ss:$8 sps:$4 sm:$0xff]   ;;  %v6610_v30 = vld [vmem:[%s7130_s16 + $0xe0] ss:$8 sps:$4 sm:$0xff]  }
 0xd71   : > { %3940 = vmatpush1.bf16.msra.mxu1 %v5912_v21  ;;  %3983 = vmatpush1.bf16.msra.mxu0 %v5914_v40  ;;  %v3095_v21 = vld [vmem:[%s7120_s3 + $0x210] sm:$0xff] }
 0xd72   : > { %3941 = vmatprep.subr.bf16.mxu1 %v6033_v53  ;;  %3984 = vmatprep.subr.bf16.mxu0 %v6035_v41  ;;  %v3099_v40 = vld [vmem:[%s7120_s3 + $0x230] sm:$0xff]  ;;  %v3096_v53 = vld [vmem:[%s7120_s3 + $0x218] sm:$0xff] }
 0xd73   : > { %v3100_v41 = vld [vmem:[%s7120_s3 + $0x238] sm:$0xff]  ;;  %v5977_v46 = vcombine.high %v3095_v21, %v3099_v40 }
 0xd74   : > { %v5979_v49 = vcombine.high %v3096_v53, %v3100_v41  ;;  %v6607_v23 = vld [vmem:[%s7130_s16 + $0x1f0] ss:$8 sps:$4 sm:$0xff]  }
 0xd75   : > { %3942 = vmatpush2.bf16.msra.mxu1 %v6032_v47  ;;  %3985 = vmatpush2.bf16.msra.mxu0 %v6034_v57  ;;  %v5976_v47 = vcombine.low %v3095_v21, %v3099_v40  ;;  %v5978_v57 = vcombine.low %v3096_v53, %v3100_v41  ;;  %v6619_v21 = vld [vmem:[%s7130_s16 + $0x1d0] ss:$8 sps:$4 sm:$0xff]   ;;  %v6624_v40 = vld [vmem:[%s7130_s16 + $0xc4] ss:$8 sps:$4 sm:$0xff]   ;;  %v6622_v41 = vld [vmem:[%s7130_s16 + $0xc0] ss:$8 sps:$4 sm:$0xff]  }
 0xd76   : > { %3943 = vmatprep.subr.bf16.mxu1 %v6025_v58  ;;  %3986 = vmatprep.subr.bf16.mxu0 %v6027_v59  ;;  %v6558_v58 = vld [vmem:[%s7130_s16 + $0x74] ss:$8 sps:$4 sm:$0xff]   ;;  %v6627_v53 = vld [vmem:[%s7130_s16 + $0x1c4] ss:$8 sps:$4 sm:$0xff]  }
 0xd77   : > { %v6561_v59 = vld [vmem:[%s7130_s16 + $0x174] ss:$8 sps:$4 sm:$0xff]  }
 0xd79   : > { %3944 = vmatpush2.bf16.msra.mxu1 %v6024_v60  ;;  %3987 = vmatpush2.bf16.msra.mxu0 %v6026_v12  ;;  %v6562_v60 = vld [vmem:[%s7130_s16 + $0x60] ss:$8 sps:$4 sm:$0xff]  }
 0xd7a   : > { %3945 = vmatprep.subr.bf16.mxu1 %v6017_v48  ;;  %3988 = vmatprep.subr.bf16.mxu0 %v6019_v35  ;;  %v6565_v12 = vld [vmem:[%s7130_s16 + $0x160] ss:$8 sps:$4 sm:$0xff]   ;;  %v6573_v48 = vld [vmem:[%s7130_s16 + $0x154] ss:$8 sps:$4 sm:$0xff]   ;;  %v6568_v35 = vld [vmem:[%s7130_s16 + $0x50] ss:$8 sps:$4 sm:$0xff]  }
 0xd7d   : > { %3946 = vmatpush2.bf16.msra.mxu1 %v6016_v50  ;;  %3989 = vmatpush2.bf16.msra.mxu0 %v6018_v4  ;;  %v6577_v50 = vld [vmem:[%s7130_s16 + $0x140] ss:$8 sps:$4 sm:$0xff]   ;;  %v6582_v4 = vld [vmem:[%s7130_s16 + $0x34] ss:$8 sps:$4 sm:$0xff]  }
 0xd7e   : > { %3947 = vmatprep.subr.bf16.mxu1 %v6009_v55  ;;  %3990 = vmatprep.subr.bf16.mxu0 %v6011_v56  ;;  %v6585_v55 = vld [vmem:[%s7130_s16 + $0x134] ss:$8 sps:$4 sm:$0xff]   ;;  %v6580_v56 = vld [vmem:[%s7130_s16 + $0x30] ss:$8 sps:$4 sm:$0xff]  }
 0xd81   : > { %3948 = vmatpush2.bf16.msra.mxu1 %v6008_v9  ;;  %3991 = vmatpush2.bf16.msra.mxu0 %v6010_v10  ;;  %v6589_v9 = vld [vmem:[%s7130_s16 + $0x120] ss:$8 sps:$4 sm:$0xff]   ;;  %v6594_v10 = vld [vmem:[%s7130_s16 + $0x14] ss:$8 sps:$4 sm:$0xff]  }
 0xd82   : > { %3949 = vmatprep.subr.bf16.mxu1 %v6001_v11  ;;  %3992 = vmatprep.subr.bf16.mxu0 %v6003_v13  ;;  %v6597_v11 = vld [vmem:[%s7130_s16 + $0x114] ss:$8 sps:$4 sm:$0xff]   ;;  %v6592_v13 = vld [vmem:[%s7130_s16 + $0x10] ss:$8 sps:$4 sm:$0xff]  }
 0xd85   : > { %3950 = vmatpush2.bf16.msra.mxu1 %v6000_v17  ;;  %3993 = vmatpush2.bf16.msra.mxu0 %v6002_v28  ;;  %v6601_v17 = vld [vmem:[%s7130_s16 + $0x100] ss:$8 sps:$4 sm:$0xff]   ;;  %v6606_v28 = vld [vmem:[%s7130_s16 + $0xf4] ss:$8 sps:$4 sm:$0xff]  }
 0xd86   : > { %3951 = vmatprep.subr.bf16.mxu1 %v5993_v18  ;;  %3994 = vmatprep.subr.bf16.mxu0 %v5995_v19  ;;  %v6609_v18 = vld [vmem:[%s7130_s16 + $0x1f4] ss:$8 sps:$4 sm:$0xff]   ;;  %v6604_v19 = vld [vmem:[%s7130_s16 + $0xf0] ss:$8 sps:$4 sm:$0xff]  }
 0xd89   : > { %3952 = vmatpush2.bf16.msra.mxu1 %v5992_v31  ;;  %3995 = vmatpush2.bf16.msra.mxu0 %v5994_v36  ;;  %v6613_v31 = vld [vmem:[%s7130_s16 + $0x1e0] ss:$8 sps:$4 sm:$0xff]   ;;  %v6618_v36 = vld [vmem:[%s7130_s16 + $0xd4] ss:$8 sps:$4 sm:$0xff]  }
 0xd8a   : > { %3953 = vmatprep.subr.bf16.mxu1 %v5985_v37  ;;  %3996 = vmatprep.subr.bf16.mxu0 %v5987_v39  ;;  %v6621_v37 = vld [vmem:[%s7130_s16 + $0x1d4] ss:$8 sps:$4 sm:$0xff]   ;;  %v6616_v39 = vld [vmem:[%s7130_s16 + $0xd0] ss:$8 sps:$4 sm:$0xff]  }
 0xd8d   : > { %3954 = vmatpush2.bf16.msra.mxu1 %v5984_v42  ;;  %3997 = vmatpush2.bf16.msra.mxu0 %v5986_v45  ;;  %v6625_v42 = vld [vmem:[%s7130_s16 + $0x1c0] ss:$8 sps:$4 sm:$0xff]   ;;  %v6630_v45 = vld [vmem:[%s7130_s16 + $0xb4] ss:$8 sps:$4 sm:$0xff]  }
 0xd8e   : > { %3955 = vmatprep.subr.bf16.mxu1 %v5977_v46  ;;  %3998 = vmatprep.subr.bf16.mxu0 %v5979_v49  ;;  %v6633_v46 = vld [vmem:[%s7130_s16 + $0x1b4] ss:$8 sps:$4 sm:$0xff]   ;;  %v6628_v49 = vld [vmem:[%s7130_s16 + $0xb0] ss:$8 sps:$4 sm:$0xff]  }
 0xd91   : > { %3956 = vmatpush2.bf16.msra.mxu1 %v5976_v47  ;;  %3999 = vmatpush2.bf16.msra.mxu0 %v5978_v57  ;;  %v6631_v47 = vld [vmem:[%s7130_s16 + $0x1b0] ss:$8 sps:$4 sm:$0xff]   ;;  %v6636_v57 = vld [vmem:[%s7130_s16 + $0xa4] ss:$8 sps:$4 sm:$0xff]  }
 0xd92   : > { %5263 = vmatprep.subr.bf16.mxu1 %v6558_v58  ;;  %5306 = vmatprep.subr.bf16.mxu0 %v6561_v59  ;;  %v6639_v58 = vld [vmem:[%s7130_s16 + $0x1a4] ss:$8 sps:$4 sm:$0xff]   ;;  %v6634_v59 = vld [vmem:[%s7130_s16 + $0xa0] ss:$8 sps:$4 sm:$0xff]  }
 0xd94   : > { %3958 = vmatmul.mubr.bf16.vlgmr.msra.gmra.mxu1 %v7708_v20  ;;  %4001 = vmatmul.mubr.bf16.vlgmr.msra.gmra.mxu0 %v7708_v20  ;;  %v6570_v20 = vld [vmem:[%s7130_s16 + $0x54] ss:$8 sps:$4 sm:$0xff]  }
 0xd95   : > { %5264 = vmatpush1.bf16.msra.mxu1 %v6556_v63  ;;  %5307 = vmatpush1.bf16.msra.mxu0 %v6559_v62  ;;  %v6637_v63 = vld [vmem:[%s7130_s16 + $0x1a0] ss:$8 sps:$4 sm:$0xff]   ;;  %v6642_v62 = vld [vmem:[%s7130_s16 + $0x94] ss:$8 sps:$4 sm:$0xff]  }
 0xd96   : > { %5265 = vmatprep.subr.bf16.mxu1 %v6564_v0  ;;  %5308 = vmatprep.subr.bf16.mxu0 %v6567_v22  ;;  %v6645_v0 = vld [vmem:[%s7130_s16 + $0x194] ss:$8 sps:$4 sm:$0xff]   ;;  %v6640_v22 = vld [vmem:[%s7130_s16 + $0x90] ss:$8 sps:$4 sm:$0xff]  }
 0xd99   : > { %5266 = vmatpush1.bf16.msra.mxu1 %v6562_v60  ;;  %5309 = vmatpush1.bf16.msra.mxu0 %v6565_v12  ;;  %v6643_v60 = vld [vmem:[%s7130_s16 + $0x190] ss:$8 sps:$4 sm:$0xff]   ;;  %v6648_v12 = vld [vmem:[%s7130_s16 + $0x84] ss:$8 sps:$4 sm:$0xff]  }
 0xd9a   : > { %5267 = vmatprep.subr.bf16.mxu1 %v6570_v20  ;;  %5310 = vmatprep.subr.bf16.mxu0 %v6573_v48  ;;  %v6651_v20 = vld [vmem:[%s7130_s16 + $0x184] ss:$8 sps:$4 sm:$0xff]   ;;  %v6646_v48 = vld [vmem:[%s7130_s16 + $0x80] ss:$8 sps:$4 sm:$0xff]  }
 0xd9d   : > { %5268 = vmatpush1.bf16.msra.mxu1 %v6568_v35  ;;  %5311 = vmatpush1.bf16.msra.mxu0 %v6571_v38  ;;  %v6649_v35 = vld [vmem:[%s7130_s16 + $0x180] ss:$8 sps:$4 sm:$0xff]   ;;  %v6654_v38 = vld [vmem:[%s7130_s16 + $0x274] ss:$8 sps:$4 sm:$0xff]  }
 0xd9e   : > { %5269 = vmatprep.subr.bf16.mxu1 %v6576_v2  ;;  %5312 = vmatprep.subr.bf16.mxu0 %v6579_v3  ;;  %v6657_v2 = vld [vmem:[%s7130_s16 + $0x374] ss:$8 sps:$4 sm:$0xff]   ;;  %v7837_v3 = vld [vmem:[%s7125_s26] sm:$0xff]  ;;  %s8458_s26 = scalar_lea.vmem %s8424_s12, %s7085_s13 }
 0xda1   : > { %5270 = vmatpush1.bf16.msra.mxu1 %v6574_v24  ;;  %5313 = vmatpush1.bf16.msra.mxu0 %v6577_v50  ;;  %v3162_v24 = vrot.slane %v7837_v3, %v7276_v34  ;;  %v3170_v50 = vrot.slane %v7837_v3, %v1039_v25 }
 0xda2   : > { %5271 = vmatprep.subr.bf16.mxu1 %v6582_v4  ;;  %5314 = vmatprep.subr.bf16.mxu0 %v6585_v55 }
 0xda5   : > { %5272 = vmatpush1.bf16.msra.mxu1 %v6580_v56  ;;  %5315 = vmatpush1.bf16.msra.mxu0 %v6583_v5  ;;  %v3166_v56 = vrot.slane %v7837_v3, %v7273_v33  ;;  %v3174_v5 = vrot.slane %v7837_v3, %v1043_v43 }
 0xda6   : > { %5273 = vmatprep.subr.bf16.mxu1 %v6588_v6  ;;  %5316 = vmatprep.subr.bf16.mxu0 %v6591_v7 }
 0xda9   : > { %5274 = vmatpush1.bf16.msra.mxu1 %v6586_v8  ;;  %5317 = vmatpush1.bf16.msra.mxu0 %v6589_v9 }
 0xdaa   : > { %5275 = vmatprep.subr.bf16.mxu1 %v6594_v10  ;;  %5318 = vmatprep.subr.bf16.mxu0 %v6597_v11 }
 0xdad   : > { %5276 = vmatpush1.bf16.msra.mxu1 %v6592_v13  ;;  %5319 = vmatpush1.bf16.msra.mxu0 %v6595_v14 }
 0xdae   : > { %5277 = vmatprep.subr.bf16.mxu1 %v6600_v29  ;;  %5320 = vmatprep.subr.bf16.mxu0 %v6603_v16 }
 0xdb1   : > { %5278 = vmatpush1.bf16.msra.mxu1 %v6598_v15  ;;  %5321 = vmatpush1.bf16.msra.mxu0 %v6601_v17 }
 0xdb2   : > { %5279 = vmatprep.subr.bf16.mxu1 %v6606_v28  ;;  %5322 = vmatprep.subr.bf16.mxu0 %v6609_v18 }
 0xdb5   : > { %5280 = vmatpush2.bf16.msra.mxu1 %v6604_v19  ;;  %5323 = vmatpush2.bf16.msra.mxu0 %v6607_v23 }
 0xdb6   : > { %5281 = vmatprep.subr.bf16.mxu1 %v6612_v54  ;;  %5324 = vmatprep.subr.bf16.mxu0 %v6615_v27 }
 0xdb9   : > { %5282 = vmatpush2.bf16.msra.mxu1 %v6610_v30  ;;  %5325 = vmatpush2.bf16.msra.mxu0 %v6613_v31 }
 0xdba   : > { %5283 = vmatprep.subr.bf16.mxu1 %v6618_v36  ;;  %5326 = vmatprep.subr.bf16.mxu0 %v6621_v37 }
 0xdbd   : > { %5284 = vmatpush2.bf16.msra.mxu1 %v6616_v39  ;;  %5327 = vmatpush2.bf16.msra.mxu0 %v6619_v21 }
 0xdbe   : > { %5285 = vmatprep.subr.bf16.mxu1 %v6624_v40  ;;  %5328 = vmatprep.subr.bf16.mxu0 %v6627_v53 }
 0xdc1   : > { %5286 = vmatpush2.bf16.msra.mxu1 %v6622_v41  ;;  %5329 = vmatpush2.bf16.msra.mxu0 %v6625_v42 }
 0xdc2   : > { %5287 = vmatprep.subr.bf16.mxu1 %v6630_v45  ;;  %5330 = vmatprep.subr.bf16.mxu0 %v6633_v46 }
 0xdc5   : > { %5288 = vmatpush2.bf16.msra.mxu1 %v6628_v49  ;;  %5331 = vmatpush2.bf16.msra.mxu0 %v6631_v47 }
 0xdc6   : > { %5289 = vmatprep.subr.bf16.mxu1 %v6636_v57  ;;  %5332 = vmatprep.subr.bf16.mxu0 %v6639_v58 }
 0xdc9   : > { %5290 = vmatpush2.bf16.msra.mxu1 %v6634_v59  ;;  %5333 = vmatpush2.bf16.msra.mxu0 %v6637_v63 }
 0xdca   : > { %5291 = vmatprep.subr.bf16.mxu1 %v6642_v62  ;;  %5334 = vmatprep.subr.bf16.mxu0 %v6645_v0 }
 0xdcd   : > { %5292 = vmatpush2.bf16.msra.mxu1 %v6640_v22  ;;  %5335 = vmatpush2.bf16.msra.mxu0 %v6643_v60 }
 0xdce   : > { %5293 = vmatprep.subr.bf16.mxu1 %v6648_v12  ;;  %5336 = vmatprep.subr.bf16.mxu0 %v6651_v20 }
 0xdd1   : > { %5294 = vmatpush2.bf16.msra.mxu1 %v6646_v48  ;;  %5337 = vmatpush2.bf16.msra.mxu0 %v6649_v35 }
 0xdd2   : > { %5349 = vmatprep.subr.bf16.mxu1 %v6654_v38  ;;  %5392 = vmatprep.subr.bf16.mxu0 %v6657_v2 }
 0xe14   : > { %v3873_v4 = vpop.f32.mrf.mxu1  ;;  %v3916_v55 = vpop.f32.mrf.mxu0 }
 0xe15   : > { %v7849_v6 = vadd.f32 %v3873_v4, %v3162_v24  ;;  %v7851_v7 = vadd.f32 %v3916_v55, %v3170_v50 }
 0xe16   : > { %v3875_v8 = vpop.f32.mrf.mxu1  ;;  %v3918_v9 = vpop.f32.mrf.mxu0 }
 0xe17   : > { %v7854_v10 = vmul.f32 0.70710677, %v7849_v6  ;;  %v7857_v25 = vmul.f32 0.70710677, %v7851_v7  ;;  %v7859_v11 = vadd.f32 %v3875_v8, %v3166_v56  ;;  %v7861_v13 = vadd.f32 %v3918_v9, %v3174_v5 }
 0xe18   : > { %v3877_v16 = vpop.f32.mrf.mxu1  ;;  %v3920_v27 = vpop.f32.mrf.mxu0 }
 0xe19   : > { %v4075_v14 = vand.u32 2147483647, %v7854_v10  ;;  %v4077_v43 = vand.u32 2147483647, %v7857_v25  ;;  %v7866_v29 = vmul.f32 0.70710677, %v7859_v11  ;;  %v7878_v37 = vadd.f32 %v3877_v16, %v3162_v24 }
 0xe1a   : > { %v7872_v18 = vmul.f32 0.70710677, %v7861_v13  ;;  %v3879_v30 = vpop.f32.mrf.mxu1  ;;  %v7880_v39 = vadd.f32 %v3920_v27, %v3170_v50  ;;  %v3922_v49 = vpop.f32.mrf.mxu0  ;;  %v3185_v27 = vsub.s32 6, %v7270_v32  ;;  %vm4043_vm4 = vcmp.ge.f32.partialorder %v7854_v10, 0.0 }
 0xe1b   : > { %v4091_v15 = vmul.f32 0.3275911, %v4075_v14  ;;  %v4093_v17 = vmul.f32 0.3275911, %v4077_v43  ;;  %v7869_v28 = vand.u32 2147483647, %v7866_v29  ;;  %v7882_v21 = vadd.f32 %v3879_v30, %v3166_v56 }
 0xe1c   : > { %v7876_v36 = vand.u32 2147483647, %v7872_v18  ;;  %v7886_v53 = vmul.f32 0.70710677, %v7878_v37  ;;  %v7889_v42 = vmul.f32 0.70710677, %v7880_v39  ;;  %v7904_v59 = vadd.f32 %v3922_v49, %v3174_v5 }
 0xe1d   : > { %v4107_v19 = vadd.f32 1.0, %v4091_v15  ;;  %v4109_v23 = vadd.f32 1.0, %v4093_v17  ;;  %v4092_v54 = vmul.f32 0.3275911, %v7869_v28  ;;  %v7895_v46 = vmul.f32 0.70710677, %v7882_v21 }
 0xe1e   : > { %v4094_v40 = vmul.f32 0.3275911, %v7876_v36  ;;  %v7892_v45 = vand.u32 2147483647, %v7886_v53  ;;  %v7899_v57 = vand.u32 2147483647, %v7889_v42 }
 0xe1f   : > { %6788 = vrcp.f32 %v4107_v19  ;;  %v4108_v31 = vadd.f32 1.0, %v4092_v54  ;;  %v7902_v58 = vand.u32 2147483647, %v7895_v46  ;;  %v7911_v20 = vmul.f32 0.70710677, %v7904_v59 }
 0xe20   : > { %6790 = vrcp.f32 %v4109_v23  ;;  %v4110_v41 = vadd.f32 1.0, %v4094_v40  ;;  %v4099_v47 = vmul.f32 0.3275911, %v7892_v45  ;;  %v4101_v62 = vmul.f32 0.3275911, %v7899_v57 }
 0xe21   : > { %6792 = vrcp.f32 %v4108_v31  ;;  %v4100_v0 = vmul.f32 0.3275911, %v7902_v58  ;;  %v4331_v38 = vsub.f32 0.0, %v4075_v14  ;;  %v7914_v50 = vand.u32 2147483647, %v7911_v20 }
 0xe22   : > { %6794 = vrcp.f32 %v4110_v41  ;;  %v4115_v63 = vadd.f32 1.0, %v4099_v47  ;;  %v4117_v22 = vadd.f32 1.0, %v4101_v62  ;;  %v4333_v56 = vsub.f32 0.0, %v4077_v43 }
 0xe23   : > { %v7908_v12 = vadd.f32 1.0, %v4100_v0  ;;  %v4102_v9 = vmul.f32 0.3275911, %v7914_v50  ;;  %v4347_v16 = vmul.f32 %v4331_v38, %v4075_v14  ;;  %v7934_v0 = vrot.slane %v7837_v3, %v1047_v51 }
 0xe24   : > { %6796 = vrcp.f32 %v4115_v63  ;;  %v4349_v40 = vmul.f32 %v4333_v56, %v4077_v43  ;;  %v7939_v43 = vrot.slane %v7837_v3, %v3185_v27  ;;  %v7950_v51 = vmul.f32 0.5, %v7849_v6 }
 0xe25   : > { %6798 = vrcp.f32 %v4117_v22  ;;  %v7923_v54 = vadd.f32 1.0, %v4102_v9  ;;  %v4340_v27 = vsub.f32 0.0, %v7902_v58  ;;  %vm4045_vm5 = vcmp.ge.f32.partialorder %v7857_v25, 0.0 }
 0xe26   : > { %6800 = vrcp.f32 %v7908_v12  ;;  %vm4044_vm6 = vcmp.ge.f32.partialorder %v7866_v29, 0.0  ;;  %vm4046_vm7 = vcmp.ge.f32.partialorder %v7872_v18, 0.0  ;;  %v8027_v18 = vmul.f32 0.5, %v7859_v11 }
 0xe27   : > { %6802 = vrcp.f32 %v7923_v54  ;;  %vm4051_vm8 = vcmp.ge.f32.partialorder %v7886_v53, 0.0  ;;  %vm4052_vm9 = vcmp.ge.f32.partialorder %v7895_v46, 0.0  ;;  %vm4053_vm10 = vcmp.ge.f32.partialorder %v7889_v42, 0.0 }
 0xe28   : > { %vm4054_vm11 = vcmp.ge.f32.partialorder %v7911_v20, 0.0 }
 0xe2c   : > { %v6789_v60 = vpop.eup %6788 }
 0xe2d   : > { %v6791_v48 = vpop.eup %6790  ;;  %v4139_v35 = vmul.f32 %v6789_v60, %v4107_v19 }
 0xe2e   : > { %v4141_v2 = vmul.f32 %v6791_v48, %v4109_v23  ;;  %v6793_v4 = vpop.eup %6792  ;;  %v4332_v23 = vsub.f32 0.0, %v7869_v28 }
 0xe2f   : > { %v4155_v24 = vsub.f32 2.0, %v4139_v35  ;;  %v4140_v8 = vmul.f32 %v6793_v4, %v4108_v31  ;;  %v6795_v17 = vpop.eup %6794  ;;  %v4363_v31 = vmul.f32 1.442695, %v4347_v16 }
 0xe30   : > { %v4157_v55 = vsub.f32 2.0, %v4141_v2  ;;  %v4142_v49 = vmul.f32 %v6795_v17, %v4110_v41  ;;  %v4367_v2 = vmul.f32 1.442695, %v4349_v40 }
 0xe31   : > { %v7917_v5 = vmul.f32 %v6789_v60, %v4155_v24  ;;  %v4156_v19 = vsub.f32 2.0, %v4140_v8  ;;  %v6797_v35 = vpop.eup %6796  ;;  %6804 = vpow2.f32 %v4363_v31  ;;  %v7954_v8 = vmul.f32 0.5, %v7851_v7 }
 0xe32   : > { %v7920_v15 = vmul.f32 %v6791_v48, %v4157_v55  ;;  %v4158_v62 = vsub.f32 2.0, %v4142_v49  ;;  %v4348_v48 = vmul.f32 %v4332_v23, %v7869_v28  ;;  %v4334_v28 = vsub.f32 0.0, %v7876_v36 }
 0xe33   : > { %v4187_v30 = vmul.f32 1.0614054, %v7917_v5  ;;  %v7927_v47 = vmul.f32 %v6793_v4, %v4156_v19  ;;  %v7947_v4 = vrot.slane %v7837_v3, %v1051_v52  ;;  %v4147_v56 = vmul.f32 %v6797_v35, %v4115_v63 }
 0xe34   : > { %v4189_v14 = vmul.f32 1.0614054, %v7920_v15  ;;  %v7942_v24 = vmul.f32 %v6795_v17, %v4158_v62  ;;  %v6799_v17 = vpop.eup %6798  ;;  %v4365_v23 = vmul.f32 1.442695, %v4348_v48  ;;  %6806 = vpow2.f32 %v4367_v2 }
 0xe35   : > { %v4188_v60 = vmul.f32 1.0614054, %v7927_v47  ;;  %v4203_v38 = vadd.f32 -1.4531521, %v4187_v30  ;;  %v4163_v52 = vsub.f32 2.0, %v4147_v56  ;;  %v4149_v40 = vmul.f32 %v6799_v17, %v4117_v22  ;;  %v6801_v63 = vpop.eup %6800 }
 0xe36   : > { %v4205_v9 = vadd.f32 -1.4531521, %v4189_v14  ;;  %v4190_v16 = vmul.f32 1.0614054, %v7942_v24  ;;  %v4350_v49 = vmul.f32 %v4334_v28, %v7876_v36  ;;  %v4339_v31 = vsub.f32 0.0, %v7892_v45 }
 0xe37   : > { %v4204_v55 = vadd.f32 -1.4531521, %v4188_v60  ;;  %v4219_v6 = vmul.f32 %v4203_v38, %v7917_v5  ;;  %v7961_v7 = vmul.f32 %v6797_v35, %v4163_v52  ;;  %v4341_v14 = vsub.f32 0.0, %v7899_v57 }
 0xe38   : > { %v4206_v30 = vadd.f32 -1.4531521, %v4190_v16  ;;  %v4221_v62 = vmul.f32 %v4205_v9, %v7920_v15  ;;  %v4165_v48 = vsub.f32 2.0, %v4149_v40  ;;  %6808 = vpow2.f32 %v4365_v23  ;;  %v6803_v40 = vpop.eup %6802 }
 0xe39   : > { %v4220_v19 = vmul.f32 %v4204_v55, %v7927_v47  ;;  %v4148_v55 = vmul.f32 %v6801_v63, %v7908_v12  ;;  %v4195_v22 = vmul.f32 1.0614054, %v7961_v7  ;;  %v4356_v2 = vmul.f32 %v4340_v27, %v7902_v58 }
 0xe3a   : > { %v4222_v60 = vmul.f32 %v4206_v30, %v7942_v24  ;;  %v4235_v36 = vadd.f32 1.4214138, %v4219_v6  ;;  %v7970_v28 = vmul.f32 %v6799_v17, %v4165_v48  ;;  %v4369_v16 = vmul.f32 1.442695, %v4350_v49 }
 0xe3b   : > { %v4236_v38 = vadd.f32 1.4214138, %v4220_v19  ;;  %v4164_v56 = vsub.f32 2.0, %v4148_v55  ;;  %v4211_v52 = vadd.f32 -1.4531521, %v4195_v22  ;;  %v4355_v9 = vmul.f32 %v4339_v31, %v7892_v45 }
 0xe3c   : > { %v4238_v35 = vadd.f32 1.4214138, %v4222_v60  ;;  %v4342_v30 = vsub.f32 0.0, %v7914_v50  ;;  %v4237_v41 = vadd.f32 1.4214138, %v4221_v62  ;;  %v4357_v19 = vmul.f32 %v4341_v14, %v7899_v57 }
 0xe3d   : > { %v4197_v12 = vmul.f32 1.0614054, %v7970_v28  ;;  %v7976_v23 = vmul.f32 %v6801_v63, %v4164_v56  ;;  %v4252_v58 = vmul.f32 %v4236_v38, %v7927_v47  ;;  %v4227_v17 = vmul.f32 %v4211_v52, %v7961_v7 }
 0xe3e   : > { %v4381_v27 = vmul.f32 1.442695, %v4356_v2  ;;  %v4150_v6 = vmul.f32 %v6803_v40, %v7923_v54  ;;  %v4251_v49 = vmul.f32 %v4235_v36, %v7917_v5  ;;  %v4254_v45 = vmul.f32 %v4238_v35, %v7942_v24  ;;  %v7987_v2 = vpop.eup %6804 }
 0xe3f   : > { %v4213_v31 = vadd.f32 -1.4531521, %v4197_v12  ;;  %v4196_v62 = vmul.f32 1.0614054, %v7976_v23  ;;  %v4243_v60 = vadd.f32 1.4214138, %v4227_v17  ;;  %v4358_v57 = vmul.f32 %v4342_v30, %v7914_v50 }
 0xe40   : > { %v4379_v48 = vmul.f32 1.442695, %v4355_v9  ;;  %v4166_v55 = vsub.f32 2.0, %v4150_v6  ;;  %v4253_v63 = vmul.f32 %v4237_v41, %v7920_v15  ;;  %v4383_v38 = vmul.f32 1.442695, %v4357_v19 }
 0xe41   : > { %v4229_v14 = vmul.f32 %v4213_v31, %v7970_v28  ;;  %v4212_v22 = vadd.f32 -1.4531521, %v4196_v62  ;;  %v4268_v54 = vadd.f32 -0.28449672, %v4252_v58  ;;  %v4259_v36 = vmul.f32 %v4243_v60, %v7961_v7  ;;  %v7993_v50 = vpop.eup %6806 }
 0xe42   : > { %6810 = vpow2.f32 %v4381_v27  ;;  %v7990_v35 = vmul.f32 %v6803_v40, %v4166_v55  ;;  %v4267_v56 = vadd.f32 -0.28449672, %v4251_v49  ;;  %v4270_v52 = vadd.f32 -0.28449672, %v4254_v45 }
 0xe43   : > { %v4245_v9 = vadd.f32 1.4214138, %v4229_v14  ;;  %v4228_v12 = vmul.f32 %v4212_v22, %v7976_v23  ;;  %v4275_v41 = vadd.f32 -0.28449672, %v4259_v36  ;;  %6812 = vpow2.f32 %v4379_v48 }
 0xe44   : > { %v4198_v30 = vmul.f32 1.0614054, %v7990_v35  ;;  %v4385_v19 = vmul.f32 1.442695, %v4358_v57  ;;  %v4269_v17 = vadd.f32 -0.28449672, %v4253_v63  ;;  %6814 = vpow2.f32 %v4369_v16 }
 0xe45   : > { %v4261_v58 = vmul.f32 %v4245_v9, %v7970_v28  ;;  %v4244_v6 = vadd.f32 1.4214138, %v4228_v12  ;;  %v4284_v40 = vmul.f32 %v4268_v54, %v7927_v47  ;;  %v4291_v27 = vmul.f32 %v4275_v41, %v7961_v7  ;;  %v6809_v45 = vpop.eup %6808 }
 0xe46   : > { %6816 = vpow2.f32 %v4383_v38  ;;  %v4214_v49 = vadd.f32 -1.4531521, %v4198_v30  ;;  %v4283_v31 = vmul.f32 %v4267_v56, %v7917_v5  ;;  %v4286_v62 = vmul.f32 %v4270_v52, %v7942_v24 }
 0xe47   : > { %v4277_v60 = vadd.f32 -0.28449672, %v4261_v58  ;;  %v4260_v48 = vmul.f32 %v4244_v6, %v7976_v23  ;;  %6818 = vpow2.f32 %v4385_v19  ;;  %v4285_v55 = vmul.f32 %v4269_v17, %v7920_v15 }
 0xe48   : > { %v4230_v16 = vmul.f32 %v4214_v49, %v7990_v35  ;;  %v4300_v14 = vadd.f32 0.2548296, %v4284_v40  ;;  %v4307_v38 = vadd.f32 0.2548296, %v4291_v27  ;;  %v8457_v54 = vsub.s32 7, %v7270_v32 }
 0xe49   : > { %v4293_v57 = vmul.f32 %v4277_v60, %v7970_v28  ;;  %v4276_v63 = vadd.f32 -0.28449672, %v4260_v48  ;;  %v4299_v56 = vadd.f32 0.2548296, %v4283_v31  ;;  %v4302_v52 = vadd.f32 0.2548296, %v4286_v62 }
 0xe4a   : > { %v4246_v22 = vadd.f32 1.4214138, %v4230_v16  ;;  %v8011_v36 = vrot.slane %v7837_v3, %v8457_v54  ;;  %v6943_v12 = vmov -1.0   ;;  %v4301_v19 = vadd.f32 0.2548296, %v4285_v55 }
 0xe4b   : > { %v4292_v9 = vmul.f32 %v4276_v63, %v7976_v23  ;;  %v8018_v41 = vsel %vm4043_vm4, 1.0, %v6943_v12  ;;  %v8023_v30 = vsel %vm4045_vm5, 1.0, %v6943_v12  ;;  %v4309_v32 = vadd.f32 0.2548296, %v4293_v57 }
 0xe4c   : > { %v4262_v3 = vmul.f32 %v4246_v22, %v7990_v35  ;;  %v4060_v17 = vsel %vm4044_vm6, 1.0, %v6943_v12  ;;  %v4316_v10 = vmul.f32 %v4300_v14, %v7927_v47  ;;  %v8034_v6 = vsel %vm4046_vm7, 1.0, %v6943_v12 }
 0xe4d   : > { %v4308_v58 = vadd.f32 0.2548296, %v4292_v9  ;;  %v4323_v25 = vmul.f32 %v4307_v38, %v7961_v7  ;;  %v4315_v49 = vmul.f32 %v4299_v56, %v7917_v5  ;;  %v4318_v31 = vmul.f32 %v4302_v52, %v7942_v24 }
 0xe4e   : > { %v4278_v40 = vadd.f32 -0.28449672, %v4262_v3  ;;  %v4325_v60 = vmul.f32 %v4309_v32, %v7970_v28  ;;  %v4317_v5 = vmul.f32 %v4301_v19, %v7920_v15  ;;  %v8051_v24 = vmul.f32 0.5, %v7878_v37 }
 0xe4f   : > { %v6811_v27 = vpop.eup %6810  ;;  %v4324_v11 = vmul.f32 %v4308_v58, %v7976_v23  ;;  %v8054_v23 = vmul.f32 0.5, %v7880_v39  ;;  %v4396_v28 = vmul.f32 %v6809_v45, %v4316_v10  ;;  %v4395_v54 = vmul.f32 %v7987_v2, %v4315_v49 }
 0xe50   : > { %v4294_v47 = vmul.f32 %v4278_v40, %v7990_v35  ;;  %v6813_v16 = vpop.eup %6812  ;;  %v4067_v37 = vsel %vm4051_vm8, 1.0, %v6943_v12  ;;  %v4397_v32 = vmul.f32 %v7993_v50, %v4317_v5  ;;  %v4070_v46 = vsel %vm4054_vm11, 1.0, %v6943_v12 }
 0xe51   : > { %v4404_v55 = vmul.f32 %v6811_v27, %v4324_v11  ;;  %v6815_v57 = vpop.eup %6814  ;;  %v4403_v63 = vmul.f32 %v6813_v16, %v4323_v25  ;;  %v4412_v3 = vsub.f32 1.0, %v4396_v28  ;;  %v4411_v40 = vsub.f32 1.0, %v4395_v54 }
 0xe52   : > { %v4310_v14 = vadd.f32 0.2548296, %v4294_v47  ;;  %v4398_v56 = vmul.f32 %v6815_v57, %v4318_v31  ;;  %v4068_v27 = vsel %vm4052_vm9, 1.0, %v6943_v12  ;;  %v4413_v5 = vsub.f32 1.0, %v4397_v32 }
 0xe53   : > { %v6817_v22 = vpop.eup %6816  ;;  %v4420_v2 = vsub.f32 1.0, %v4404_v55  ;;  %v4419_v19 = vsub.f32 1.0, %v4403_v63  ;;  %v4428_v55 = vmul.f32 %v4412_v3, %v4060_v17  ;;  %v4427_v20 = vmul.f32 %v4411_v40, %v8018_v41 }
 0xe54   : > { %v3959_v29 = vpop.f32.mrf.mxu1  ;;  %v4002_v62 = vpop.f32.mrf.mxu0  ;;  %v4405_v39 = vmul.f32 %v6817_v22, %v4325_v60  ;;  %v4326_v45 = vmul.f32 %v4310_v14, %v7990_v35  ;;  %v4414_v35 = vsub.f32 1.0, %v4398_v56  ;;  %v4020_v41 = vmul.f32 0.5, %v7882_v21 }
 0xe55   : > { %v8044_v48 = vadd.f32 %v3959_v29, %v7934_v0  ;;  %v8047_v7 = vadd.f32 %v4002_v62, %v7939_v43  ;;  %v6819_v9 = vpop.eup %6818  ;;  %v4069_v62 = vsel %vm4053_vm10, 1.0, %v6943_v12  ;;  %v4436_v60 = vmul.f32 %v4420_v2, %v4068_v27 }
 0xe56   : > { %v3961_v53 = vpop.f32.mrf.mxu1  ;;  %v4406_v58 = vmul.f32 %v6819_v9, %v4326_v45  ;;  %v4004_v25 = vpop.f32.mrf.mxu0  ;;  %v4421_v49 = vsub.f32 1.0, %v4405_v39  ;;  %v4435_v57 = vmul.f32 %v4419_v19, %v4067_v37  ;;  %v4430_v54 = vmul.f32 %v4414_v35, %v8034_v6 }
 0xe57   : > { %v8057_v38 = vmul.f32 0.70710677, %v8044_v48  ;;  %v8064_v15 = vmul.f32 0.70710677, %v8047_v7  ;;  %v8084_v29 = vadd.f32 %v3961_v53, %v7947_v4  ;;  %v8100_v22 = vadd.f32 %v4004_v25, %v8011_v36 }
 0xe58   : > { %v4422_v31 = vsub.f32 1.0, %v4406_v58  ;;  %v3963_v16 = vpop.f32.mrf.mxu1  ;;  %v4006_v28 = vpop.f32.mrf.mxu0  ;;  %v4437_v56 = vmul.f32 %v4421_v49, %v4069_v62  ;;  %v4452_v37 = vadd.f32 1.0, %v4436_v60  ;;  %v4429_v9 = vmul.f32 %v4413_v5, %v8023_v30 }
 0xe59   : > { %v8069_v52 = vand.u32 2147483647, %v8057_v38  ;;  %v8079_v50 = vand.u32 2147483647, %v8064_v15  ;;  %v8097_v42 = vmul.f32 0.70710677, %v8084_v29  ;;  %v8105_v17 = vadd.f32 %v3963_v16, %v7934_v0 }
 0xe5a   : > { %v4438_v63 = vmul.f32 %v4422_v31, %v4070_v46  ;;  %v8112_v45 = vadd.f32 %v4006_v28, %v7939_v43  ;;  %v4451_v32 = vadd.f32 1.0, %v4435_v57  ;;  %v8117_v6 = vmul.f32 0.70710677, %v8100_v22  ;;  %v3965_v5 = vpop.f32.mrf.mxu1  ;;  %v4008_v28 = vpop.f32.mrf.mxu0 }
 0xe5b   : > { %v4095_v10 = vmul.f32 0.3275911, %v8069_v52  ;;  %v4097_v47 = vmul.f32 0.3275911, %v8079_v50  ;;  %v8109_v39 = vand.u32 2147483647, %v8097_v42  ;;  %v4468_v25 = vmul.f32 %v4452_v37, %v4020_v41 }
 0xe5c   : > { %v4444_v2 = vadd.f32 1.0, %v4428_v55  ;;  %v4022_v0 = vmul.f32 0.5, %v7904_v59  ;;  %v4454_v53 = vadd.f32 1.0, %v4438_v63  ;;  %v4443_v19 = vadd.f32 1.0, %v4427_v20 }
 0xe5d   : > { %v8081_v11 = vadd.f32 1.0, %v4095_v10  ;;  %v8094_v14 = vadd.f32 1.0, %v4097_v47  ;;  %v4096_v3 = vmul.f32 0.3275911, %v8109_v39  ;;  %v4453_v58 = vadd.f32 1.0, %v4437_v56 }
 0xe5e   : > { %v8122_v10 = vand.u32 2147483647, %v8117_v6  ;;  %v8125_v43 = vmul.f32 0.70710677, %v8105_v17  ;;  %v4446_v30 = vadd.f32 1.0, %v4430_v54  ;;  %v4445_v35 = vadd.f32 1.0, %v4429_v9 }
 0xe5f   : > { %6820 = vrcp.f32 %v8081_v11  ;;  %v8127_v21 = vadd.f32 1.0, %v4096_v3  ;;  %v8130_v40 = vmul.f32 0.70710677, %v8112_v45  ;;  %v4467_v59 = vmul.f32 %v4451_v32, %v8051_v24  ;;  %v6655_v9 = vld [vmem:[%s7130_s16 + $0x370] ss:$8 sps:$4 sm:$0xff]  }
 0xe60   : > { %6822 = vrcp.f32 %v8094_v14  ;;  %v4098_v27 = vmul.f32 0.3275911, %v8122_v10  ;;  %v8135_v49 = vand.u32 2147483647, %v8125_v43  ;;  %v4460_v31 = vmul.f32 %v4444_v2, %v8027_v18  ;;  %v6658_v3 = vld [vmem:[%s7130_s16 + $0x260] ss:$8 sps:$4 sm:$0xff]  }
 0xe61   : > { %v4014_v62 = vmul.f32 0.5, %v7861_v13  ;;  %v4470_v60 = vmul.f32 %v4454_v53, %v4022_v0  ;;  %6824 = vrcp.f32 %v8127_v21  ;;  %v4459_v46 = vmul.f32 %v4443_v19, %v7950_v51  ;;  %v6652_v13 = vld [vmem:[%s7130_s16 + $0x270] ss:$8 sps:$4 sm:$0xff]   ;;  %v6663_v0 = vld [vmem:[%s7130_s16 + $0x364] ss:$8 sps:$4 sm:$0xff]  }
 0xe62   : > { %v4469_v47 = vmul.f32 %v4453_v58, %v8054_v23  ;;  %v8142_v16 = vadd.f32 1.0, %v4098_v27  ;;  %v4103_v24 = vmul.f32 0.3275911, %v8135_v49  ;;  %v8146_v57 = vand.u32 2147483647, %v8130_v40 }
 0xe63   : > { %v4462_v55 = vmul.f32 %v4446_v30, %v4014_v62  ;;  %v4476_v18 = vpack.c.bf16 %v4468_v25, %v4460_v31  ;;  %v4461_v63 = vmul.f32 %v4445_v35, %v7954_v8  ;;  %v4475_v20 = vpack.c.bf16 %v4467_v59, %v4459_v46  ;;  %v6660_v23 = vld [vmem:[%s7130_s16 + $0x264] ss:$8 sps:$4 sm:$0xff]   ;;  %v6661_v25 = vld [vmem:[%s7130_s16 + $0x360] ss:$8 sps:$4 sm:$0xff]   ;;  %v6669_v31 = vld [vmem:[%s7130_s16 + $0x354] ss:$8 sps:$4 sm:$0xff]  }
 0xe64   : > { %6826 = vrcp.f32 %v8142_v16  ;;  %v8151_v51 = vadd.f32 1.0, %v4103_v24  ;;  %v4105_v56 = vmul.f32 0.3275911, %v8146_v57  ;;  %v8157_v32 = vadd.f32 %v3965_v5, %v7947_v4  ;;  %v6672_v46 = vld [vmem:[%s7130_s16 + $0x244] ss:$8 sps:$4 sm:$0xff]  }
 0xe65   : > { %5295 = vmatprep.mubr.bf16.mxu1 %v4476_v18  ;;  %v4478_v37 = vpack.c.bf16 %v4470_v60, %v4462_v55  ;;  %v4477_v41 = vpack.c.bf16 %v4469_v47, %v4461_v63  ;;  %v8161_v2 = vadd.f32 %v4008_v28, %v8011_v36  ;;  %v6666_v36 = vld [vmem:[%s7130_s16 + $0x254] ss:$8 sps:$4 sm:$0xff]   ;;  %v4335_v59 = vsub.f32 0.0, %v8069_v52  ;;  %v6667_v55 = vld [vmem:[%s7130_s16 + $0x350] ss:$8 sps:$4 sm:$0xff]  }
 0xe66   : > { %5296 = vmatmul.mubr.bf16.vlgmr.msra.gmra.mxu1 %v4475_v20  ;;  %6828 = vrcp.f32 %v8151_v51  ;;  %v8165_v53 = vadd.f32 1.0, %v4105_v56  ;;  %v6675_v63 = vld [vmem:[%s7130_s16 + $0x344] ss:$8 sps:$4 sm:$0xff]   ;;  %v6670_v56 = vld [vmem:[%s7130_s16 + $0x240] ss:$8 sps:$4 sm:$0xff]   ;;  %vm4048_vm12 = vcmp.ge.f32.partialorder %v8097_v42, 0.0 }
 0xe67   : > { %5338 = vmatprep.mubr.bf16.mxu0 %v4478_v37  ;;  %5350 = vmatpush1.bf16.msra.mxu1 %v6652_v13  ;;  %v8175_v30 = vmul.f32 0.70710677, %v8161_v2  ;;  %v4351_v13 = vmul.f32 %v4335_v59, %v8069_v52  ;;  %v6678_v52 = vld [vmem:[%s7130_s16 + $0x234] ss:$8 sps:$4 sm:$0xff]   ;;  %vm4047_vm13 = vcmp.ge.f32.partialorder %v8057_v38, 0.0  ;;  %vm4050_vm14 = vcmp.ge.f32.partialorder %v8117_v6, 0.0 }
 0xe68   : > { %5339 = vmatmul.mubr.bf16.vlgmr.msra.gmra.mxu0 %v4477_v41  ;;  %5351 = vmatprep.subr.bf16.mxu1 %v6660_v23  ;;  %6830 = vrcp.f32 %v8165_v53  ;;  %v4336_v23 = vsub.f32 0.0, %v8109_v39  ;;  %vm4055_vm15 = vcmp.ge.f32.partialorder %v8125_v43, 0.0  ;;  %vm4057_vm0 = vcmp.ge.f32.partialorder %v8130_v40, 0.0  ;;  %v6738_v6 = vld [vmem:[%s7130_s16 + $0x294] ss:$8 sps:$4 sm:$0xff]  }
 0xe69   : > { %5393 = vmatpush1.bf16.msra.mxu0 %v6655_v9  ;;  %v8192_v5 = vand.u32 2147483647, %v8175_v30  ;;  %v4338_v9 = vsub.f32 0.0, %v8122_v10  ;;  %vm4049_vm2 = vcmp.ge.f32.partialorder %v8064_v15, 0.0  ;;  %v4066_v38 = vsel %vm4050_vm14, 1.0, %v6943_v12 }
 0xe6a   : > { %5394 = vmatprep.subr.bf16.mxu0 %v6663_v0  ;;  %v4352_v59 = vmul.f32 %v4336_v23, %v8109_v39  ;;  %v6679_v39 = vld [vmem:[%s7130_s16 + $0x330] ss:$8 sps:$4 sm:$0xff]   ;;  %vm4058_vm3 = vcmp.ge.f32.partialorder %v8175_v30, 0.0  ;;  %v4023_v15 = vmul.f32 0.5, %v8105_v17  ;;  %v4026_v17 = vmul.f32 0.5, %v8161_v2 }
 0xe6b   : > { %5352 = vmatpush1.bf16.msra.mxu1 %v6658_v3  ;;  %v6673_v3 = vld [vmem:[%s7130_s16 + $0x340] ss:$8 sps:$4 sm:$0xff]  }
 0xe6c   : > { %v6821_v54 = vpop.eup %6820  ;;  %5353 = vmatprep.subr.bf16.mxu1 %v6666_v36  ;;  %v6742_v30 = vld [vmem:[%s7130_s16 + $0x280] ss:$8 sps:$4 sm:$0xff]  }
 0xe6d   : > { %v4143_v8 = vmul.f32 %v6821_v54, %v8081_v11  ;;  %v6823_v4 = vpop.eup %6822  ;;  %v8169_v11 = vmul.f32 0.70710677, %v8157_v32  ;;  %5395 = vmatpush1.bf16.msra.mxu0 %v6661_v25 }
 0xe6e   : > { %v4145_v58 = vmul.f32 %v6823_v4, %v8094_v14  ;;  %v6664_v14 = vld [vmem:[%s7130_s16 + $0x250] ss:$8 sps:$4 sm:$0xff]   ;;  %v6825_v18 = vpop.eup %6824  ;;  %5396 = vmatprep.subr.bf16.mxu0 %v6669_v31 }
 0xe6f   : > { %v4159_v19 = vsub.f32 2.0, %v4143_v8  ;;  %v8182_v27 = vand.u32 2147483647, %v8169_v11  ;;  %v4144_v20 = vmul.f32 %v6825_v18, %v8127_v21  ;;  %5354 = vmatpush1.bf16.msra.mxu1 %v6664_v14  ;;  %v6676_v31 = vld [vmem:[%s7130_s16 + $0x230] ss:$8 sps:$4 sm:$0xff]   ;;  %vm4056_vm1 = vcmp.ge.f32.partialorder %v8169_v11, 0.0 }
 0xe70   : > { %v4161_v62 = vsub.f32 2.0, %v4145_v58  ;;  %5355 = vmatprep.subr.bf16.mxu1 %v6672_v46  ;;  %v6681_v58 = vld [vmem:[%s7130_s16 + $0x334] ss:$8 sps:$4 sm:$0xff]   ;;  %v4354_v46 = vmul.f32 %v4338_v9, %v8122_v10  ;;  %v4343_v10 = vsub.f32 0.0, %v8135_v49  ;;  %v4373_v9 = vmul.f32 1.442695, %v4352_v59 }
 0xe71   : > { %v8178_v35 = vmul.f32 %v6821_v54, %v4159_v19  ;;  %v4104_v60 = vmul.f32 0.3275911, %v8182_v27  ;;  %v4106_v54 = vmul.f32 0.3275911, %v8192_v5  ;;  %v6827_v41 = vpop.eup %6826  ;;  %v4160_v0 = vsub.f32 2.0, %v4144_v20  ;;  %5397 = vmatpush1.bf16.msra.mxu0 %v6667_v55 }
 0xe72   : > { %v8189_v24 = vmul.f32 %v6823_v4, %v4161_v62  ;;  %v4371_v4 = vmul.f32 1.442695, %v4351_v13  ;;  %v4337_v19 = vsub.f32 0.0, %v8079_v50  ;;  %v4146_v36 = vmul.f32 %v6827_v41, %v8142_v16  ;;  %5398 = vmatprep.subr.bf16.mxu0 %v6675_v63  ;;  %v6684_v16 = vld [vmem:[%s7130_s16 + $0x224] ss:$8 sps:$4 sm:$0xff]  }
 0xe73   : > { %v4191_v47 = vmul.f32 1.0614054, %v8178_v35  ;;  %v8196_v28 = vadd.f32 1.0, %v4104_v60  ;;  %v8207_v21 = vadd.f32 1.0, %v4106_v54  ;;  %v8213_v25 = vmul.f32 %v6825_v18, %v4160_v0  ;;  %5356 = vmatpush1.bf16.msra.mxu1 %v6670_v56  ;;  %v6829_v62 = vpop.eup %6828  ;;  %v6687_v13 = vld [vmem:[%s7130_s16 + $0x324] ss:$8 sps:$4 sm:$0xff]  }
 0xe74   : > { %v4193_v37 = vmul.f32 1.0614054, %v8189_v24  ;;  %v4162_v60 = vsub.f32 2.0, %v4146_v36  ;;  %5357 = vmatprep.subr.bf16.mxu1 %v6678_v52  ;;  %v4151_v18 = vmul.f32 %v6829_v62, %v8151_v51  ;;  %v4353_v20 = vmul.f32 %v4337_v19, %v8079_v50  ;;  %v6682_v54 = vld [vmem:[%s7130_s16 + $0x220] ss:$8 sps:$4 sm:$0xff]  }
 0xe75   : > { %6832 = vrcp.f32 %v8196_v28  ;;  %v4207_v8 = vadd.f32 -1.4531521, %v4191_v47  ;;  %v4192_v55 = vmul.f32 1.0614054, %v8213_v25  ;;  %5399 = vmatpush1.bf16.msra.mxu0 %v6673_v3  ;;  %v6831_v63 = vpop.eup %6830  ;;  %v6690_v56 = vld [vmem:[%s7130_s16 + $0x214] ss:$8 sps:$4 sm:$0xff]  }
 0xe76   : > { %6834 = vrcp.f32 %v8207_v21  ;;  %v4209_v14 = vadd.f32 -1.4531521, %v4193_v37  ;;  %v8226_v23 = vmul.f32 %v6827_v41, %v4162_v60  ;;  %5400 = vmatprep.subr.bf16.mxu0 %v6681_v58  ;;  %v4167_v52 = vsub.f32 2.0, %v4151_v18  ;;  %v6693_v59 = vld [vmem:[%s7130_s16 + $0x314] ss:$8 sps:$4 sm:$0xff]  }
 0xe77   : > { %v4223_v47 = vmul.f32 %v4207_v8, %v8178_v35  ;;  %6836 = vpow2.f32 %v4371_v4  ;;  %v4208_v37 = vadd.f32 -1.4531521, %v4192_v55  ;;  %v4153_v51 = vmul.f32 %v6831_v63, %v8165_v53  ;;  %5358 = vmatpush1.bf16.msra.mxu1 %v6676_v31  ;;  %v6685_v8 = vld [vmem:[%s7130_s16 + $0x320] ss:$8 sps:$4 sm:$0xff]  }
 0xe78   : > { %v4225_v0 = vmul.f32 %v4209_v14, %v8189_v24  ;;  %v4194_v3 = vmul.f32 1.0614054, %v8226_v23  ;;  %v4377_v50 = vmul.f32 1.442695, %v4354_v46  ;;  %v4345_v41 = vsub.f32 0.0, %v8146_v57  ;;  %5359 = vmatprep.subr.bf16.mxu1 %v6684_v16 }
 0xe79   : > { %v4239_v4 = vadd.f32 1.4214138, %v4223_v47  ;;  %v4224_v19 = vmul.f32 %v4208_v37, %v8213_v25  ;;  %v8237_v36 = vmul.f32 %v6829_v62, %v4167_v52  ;;  %v4169_v58 = vsub.f32 2.0, %v4153_v51  ;;  %5401 = vmatpush1.bf16.msra.mxu0 %v6679_v39  ;;  %v6688_v62 = vld [vmem:[%s7130_s16 + $0x210] ss:$8 sps:$4 sm:$0xff]  }
 0xe7a   : > { %v8240_v53 = vmul.f32 1.442695, %v4353_v20  ;;  %v4210_v31 = vadd.f32 -1.4531521, %v4194_v3  ;;  %v4359_v14 = vmul.f32 %v4343_v10, %v8135_v49  ;;  %v4344_v60 = vsub.f32 0.0, %v8182_v27  ;;  %5402 = vmatprep.subr.bf16.mxu0 %v6687_v13 }
 0xe7b   : > { %v4240_v46 = vadd.f32 1.4214138, %v4224_v19  ;;  %6838 = vpow2.f32 %v4373_v9  ;;  %v4199_v16 = vmul.f32 1.0614054, %v8237_v36  ;;  %v8245_v47 = vmul.f32 %v6831_v63, %v4169_v58  ;;  %5360 = vmatpush1.bf16.msra.mxu1 %v6682_v54  ;;  %v6691_v49 = vld [vmem:[%s7130_s16 + $0x310] ss:$8 sps:$4 sm:$0xff]  }
 0xe7c   : > { %v4241_v55 = vadd.f32 1.4214138, %v4225_v0  ;;  %v4226_v18 = vmul.f32 %v4210_v31, %v8226_v23  ;;  %6840 = vpow2.f32 %v4377_v50  ;;  %v4361_v39 = vmul.f32 %v4345_v41, %v8146_v57  ;;  %5361 = vmatprep.subr.bf16.mxu1 %v6690_v56  ;;  %v6696_v20 = vld [vmem:[%s7130_s16 + $0x204] ss:$8 sps:$4 sm:$0xff]   ;;  %v6694_v56 = vld [vmem:[%s7130_s16 + $0x200] ss:$8 sps:$4 sm:$0xff]  }
 0xe7d   : > { %v4255_v10 = vmul.f32 %v4239_v4, %v8178_v35  ;;  %v4256_v37 = vmul.f32 %v4240_v46, %v8213_v25  ;;  %v4215_v63 = vadd.f32 -1.4531521, %v4199_v16  ;;  %v4201_v9 = vmul.f32 1.0614054, %v8245_v47  ;;  %5403 = vmatpush1.bf16.msra.mxu0 %v6685_v8  ;;  %v6699_v54 = vld [vmem:[%s7130_s16 + $0x304] ss:$8 sps:$4 sm:$0xff]  }
 0xe7e   : > { %v4242_v52 = vadd.f32 1.4214138, %v4226_v18  ;;  %v4387_v51 = vmul.f32 1.442695, %v4359_v14  ;;  %v4360_v57 = vmul.f32 %v4344_v60, %v8182_v27  ;;  %5404 = vmatprep.subr.bf16.mxu0 %v6693_v59  ;;  %v4346_v4 = vsub.f32 0.0, %v8192_v5 }
 0xe7f   : > { %v4272_v3 = vadd.f32 -0.28449672, %v4256_v37  ;;  %v4231_v50 = vmul.f32 %v4215_v63, %v8237_v36  ;;  %v4217_v41 = vadd.f32 -1.4531521, %v4201_v9  ;;  %5362 = vmatpush1.bf16.msra.mxu1 %v6688_v62  ;;  %v4257_v8 = vmul.f32 %v4241_v55, %v8189_v24  ;;  %v6702_v27 = vld [vmem:[%s7130_s16 + $0x2f4] ss:$8 sps:$4 sm:$0xff]  }
 0xe80   : > { %v4258_v58 = vmul.f32 %v4242_v52, %v8226_v23  ;;  %v4391_v31 = vmul.f32 1.442695, %v4361_v39  ;;  %5363 = vmatprep.subr.bf16.mxu1 %v6696_v20  ;;  %v4271_v59 = vadd.f32 -0.28449672, %v4255_v10  ;;  %v6697_v16 = vld [vmem:[%s7130_s16 + $0x300] ss:$8 sps:$4 sm:$0xff]   ;;  %6842 = vpow2.f32 %v4387_v51 }
 0xe81   : > { %v4288_v14 = vmul.f32 %v4272_v3, %v8213_v25  ;;  %v4247_v60 = vadd.f32 1.4214138, %v4231_v50  ;;  %v4233_v46 = vmul.f32 %v4217_v41, %v8245_v47  ;;  %5405 = vmatpush1.bf16.msra.mxu0 %v6691_v49  ;;  %v6700_v39 = vld [vmem:[%s7130_s16 + $0x2f0] ss:$8 sps:$4 sm:$0xff]   ;;  %v6705_v37 = vld [vmem:[%s7130_s16 + $0x3f4] ss:$8 sps:$4 sm:$0xff]   ;;  %v4362_v52 = vmul.f32 %v4346_v4, %v8192_v5 }
 0xe82   : > { %v6833_v13 = vpop.eup %6832  ;;  %v4274_v62 = vadd.f32 -0.28449672, %v4258_v58  ;;  %5406 = vmatprep.subr.bf16.mxu0 %v6699_v54  ;;  %v4389_v9 = vmul.f32 1.442695, %v4360_v57  ;;  %v6708_v49 = vld [vmem:[%s7130_s16 + $0x2e4] ss:$8 sps:$4 sm:$0xff]   ;;  %6844 = vpow2.f32 %v4391_v31  ;;  %v4287_v54 = vmul.f32 %v4271_v59, %v8178_v35 }
 0xe83   : > { %v4152_v0 = vmul.f32 %v6833_v13, %v8196_v28  ;;  %v6835_v19 = vpop.eup %6834  ;;  %v4263_v10 = vmul.f32 %v4247_v60, %v8237_v36  ;;  %v4249_v63 = vadd.f32 1.4214138, %v4233_v46  ;;  %5364 = vmatpush1.bf16.msra.mxu1 %v6694_v56  ;;  %v4304_v51 = vadd.f32 0.2548296, %v4288_v14  ;;  %v6703_v57 = vld [vmem:[%s7130_s16 + $0x3f0] ss:$8 sps:$4 sm:$0xff]  }
 0xe84   : > { %v4154_v18 = vmul.f32 %v6835_v19, %v8207_v21  ;;  %v8272_v20 = vpop.eup %6836  ;;  %5365 = vmatprep.subr.bf16.mxu1 %v6702_v27  ;;  %6846 = vpow2.f32 %v8240_v53  ;;  %v4290_v5 = vmul.f32 %v4274_v62, %v8226_v23  ;;  %v6711_v4 = vld [vmem:[%s7130_s16 + $0x3e4] ss:$8 sps:$4 sm:$0xff]   ;;  %v4393_v31 = vmul.f32 1.442695, %v4362_v52  ;;  %v6714_v60 = vld [vmem:[%s7130_s16 + $0x2d4] ss:$8 sps:$4 sm:$0xff]  }
 0xe85   : > { %v4168_v28 = vsub.f32 2.0, %v4152_v0  ;;  %v4273_v0 = vadd.f32 -0.28449672, %v4257_v8  ;;  %v4279_v3 = vadd.f32 -0.28449672, %v4263_v10  ;;  %v4265_v50 = vmul.f32 %v4249_v63, %v8245_v47  ;;  %5407 = vmatpush1.bf16.msra.mxu0 %v6697_v16 }
 0xe86   : > { %v4170_v21 = vsub.f32 2.0, %v4154_v18  ;;  %5408 = vmatprep.subr.bf16.mxu0 %v6705_v37  ;;  %6848 = vpow2.f32 %v4389_v9  ;;  %v4303_v16 = vadd.f32 0.2548296, %v4287_v54  ;;  %v4320_v62 = vmul.f32 %v4304_v51, %v8213_v25  ;;  %v6717_v37 = vld [vmem:[%s7130_s16 + $0x3d4] ss:$8 sps:$4 sm:$0xff]  }
 0xe87   : > { %v8267_v55 = vmul.f32 %v6833_v13, %v4168_v28  ;;  %v4295_v8 = vmul.f32 %v4279_v3, %v8237_v36  ;;  %v4281_v58 = vadd.f32 -0.28449672, %v4265_v50  ;;  %5366 = vmatpush2.bf16.msra.mxu1 %v6700_v39  ;;  %v6706_v28 = vld [vmem:[%s7130_s16 + $0x2e0] ss:$8 sps:$4 sm:$0xff]   ;;  %v4289_v59 = vmul.f32 %v4273_v0, %v8189_v24  ;;  %v6720_v54 = vld [vmem:[%s7130_s16 + $0x2c4] ss:$8 sps:$4 sm:$0xff]  }
 0xe88   : > { %v8283_v41 = vmul.f32 %v6835_v19, %v4170_v21  ;;  %v6839_v27 = vpop.eup %6838  ;;  %5367 = vmatprep.subr.bf16.mxu1 %v6708_v49  ;;  %v6709_v19 = vld [vmem:[%s7130_s16 + $0x3e0] ss:$8 sps:$4 sm:$0xff]   ;;  %v4306_v10 = vadd.f32 0.2548296, %v4290_v5  ;;  %6850 = vpow2.f32 %v4393_v31  ;;  %v6712_v49 = vld [vmem:[%s7130_s16 + $0x2d0] ss:$8 sps:$4 sm:$0xff]   ;;  %v4319_v51 = vmul.f32 %v4303_v16, %v8178_v35 }
 0xe89   : > { %v4200_v13 = vmul.f32 1.0614054, %v8267_v55  ;;  %v6841_v46 = vpop.eup %6840  ;;  %v4311_v18 = vadd.f32 0.2548296, %v4295_v8  ;;  %v4297_v39 = vmul.f32 %v4281_v58, %v8245_v47  ;;  %5409 = vmatpush2.bf16.msra.mxu0 %v6703_v57  ;;  %v4305_v0 = vadd.f32 0.2548296, %v4289_v59 }
 0xe8a   : > { %v4202_v14 = vmul.f32 1.0614054, %v8283_v41  ;;  %5410 = vmatprep.subr.bf16.mxu0 %v6711_v4  ;;  %v4400_v3 = vmul.f32 %v6839_v27, %v4320_v62  ;;  %v6715_v50 = vld [vmem:[%s7130_s16 + $0x3d0] ss:$8 sps:$4 sm:$0xff]   ;;  %v4322_v57 = vmul.f32 %v4306_v10, %v8226_v23  ;;  %v6718_v58 = vld [vmem:[%s7130_s16 + $0x2c0] ss:$8 sps:$4 sm:$0xff]   ;;  %v4399_v59 = vmul.f32 %v8272_v20, %v4319_v51 }
 0xe8b   : > { %v4216_v56 = vadd.f32 -1.4531521, %v4200_v13  ;;  %v4313_v52 = vadd.f32 0.2548296, %v4297_v39  ;;  %5368 = vmatpush2.bf16.msra.mxu1 %v6706_v28  ;;  %v4327_v13 = vmul.f32 %v4311_v18, %v8237_v36  ;;  %v6723_v36 = vld [vmem:[%s7130_s16 + $0x3c4] ss:$8 sps:$4 sm:$0xff]   ;;  %v4321_v35 = vmul.f32 %v4305_v0, %v8189_v24 }
 0xe8c   : > { %v4218_v9 = vadd.f32 -1.4531521, %v4202_v14  ;;  %5369 = vmatprep.subr.bf16.mxu1 %v6714_v60  ;;  %v6721_v14 = vld [vmem:[%s7130_s16 + $0x3c0] ss:$8 sps:$4 sm:$0xff]   ;;  %v6729_v62 = vld [vmem:[%s7130_s16 + $0x3b4] ss:$8 sps:$4 sm:$0xff]  }
 0xe8d   : > { %v4232_v53 = vmul.f32 %v4216_v56, %v8267_v55  ;;  %5411 = vmatpush2.bf16.msra.mxu0 %v6709_v19  ;;  %v4329_v5 = vmul.f32 %v4313_v52, %v8245_v47  ;;  %v6843_v8 = vpop.eup %6842  ;;  %v6726_v47 = vld [vmem:[%s7130_s16 + $0x2b4] ss:$8 sps:$4 sm:$0xff]   ;;  %v4402_v19 = vmul.f32 %v6841_v46, %v4322_v57  ;;  %v4064_v39 = vsel %vm4048_vm12, 1.0, %v6943_v12  ;;  %v6724_v20 = vld [vmem:[%s7130_s16 + $0x2b0] ss:$8 sps:$4 sm:$0xff]  }
 0xe8e   : > { %v4234_v21 = vmul.f32 %v4218_v9, %v8283_v41  ;;  %5412 = vmatprep.subr.bf16.mxu0 %v6717_v37  ;;  %v4407_v31 = vmul.f32 %v6843_v8, %v4327_v13  ;;  %v6732_v9 = vld [vmem:[%s7130_s16 + $0x2a4] ss:$8 sps:$4 sm:$0xff]   ;;  %v4063_v52 = vsel %vm4047_vm13, 1.0, %v6943_v12  ;;  %v6727_v13 = vld [vmem:[%s7130_s16 + $0x3b0] ss:$8 sps:$4 sm:$0xff]   ;;  %v4072_v40 = vsel %vm4056_vm1, 1.0, %v6943_v12 }
 0xe8f   : > { %v4248_v63 = vadd.f32 1.4214138, %v4232_v53  ;;  %5370 = vmatpush2.bf16.msra.mxu1 %v6712_v49  ;;  %v6845_v27 = vpop.eup %6844  ;;  %v4416_v53 = vsub.f32 1.0, %v4400_v3  ;;  %v4415_v49 = vsub.f32 1.0, %v4399_v59  ;;  %v6735_v51 = vld [vmem:[%s7130_s16 + $0x3a4] ss:$8 sps:$4 sm:$0xff]  }
 0xe90   : > { %v4250_v4 = vadd.f32 1.4214138, %v4234_v21  ;;  %5371 = vmatprep.subr.bf16.mxu1 %v6720_v54  ;;  %v4409_v60 = vmul.f32 %v6845_v27, %v4329_v5  ;;  %v4423_v37 = vsub.f32 1.0, %v4407_v31  ;;  %v4071_v3 = vsel %vm4055_vm15, 1.0, %v6943_v12  ;;  %v6730_v57 = vld [vmem:[%s7130_s16 + $0x2a0] ss:$8 sps:$4 sm:$0xff]  }
 0xe91   : > { %v4264_v25 = vmul.f32 %v4248_v63, %v8267_v55  ;;  %5413 = vmatpush2.bf16.msra.mxu0 %v6715_v50  ;;  %v6847_v18 = vpop.eup %6846  ;;  %v4432_v0 = vmul.f32 %v4416_v53, %v4064_v39  ;;  %v4073_v50 = vsel %vm4057_vm0, 1.0, %v6943_v12  ;;  %v4065_v27 = vsel %vm4049_vm2, 1.0, %v6943_v12  ;;  %v6736_v53 = vld [vmem:[%s7130_s16 + $0x290] ss:$8 sps:$4 sm:$0xff]  }
 0xe92   : > { %v4266_v23 = vmul.f32 %v4250_v4, %v8283_v41  ;;  %5414 = vmatprep.subr.bf16.mxu0 %v6723_v36  ;;  %v4401_v46 = vmul.f32 %v6847_v18, %v4321_v35  ;;  %v4425_v21 = vsub.f32 1.0, %v4409_v60  ;;  %v4439_v4 = vmul.f32 %v4423_v37, %v4071_v3  ;;  %v6733_v35 = vld [vmem:[%s7130_s16 + $0x3a0] ss:$8 sps:$4 sm:$0xff]  }
 0xe93   : > { %v4280_v56 = vadd.f32 -0.28449672, %v4264_v25  ;;  %5372 = vmatpush2.bf16.msra.mxu1 %v6718_v58  ;;  %v6849_v42 = vpop.eup %6848  ;;  %v4418_v25 = vsub.f32 1.0, %v4402_v19  ;;  %v4431_v58 = vmul.f32 %v4415_v49, %v4063_v52  ;;  %v4448_v43 = vadd.f32 1.0, %v4432_v0 }
 0xe94   : > { %v4282_v16 = vadd.f32 -0.28449672, %v4266_v23  ;;  %5373 = vmatprep.subr.bf16.mxu1 %v6726_v47  ;;  %v4016_v59 = vmul.f32 0.5, %v8084_v29  ;;  %v4024_v11 = vmul.f32 0.5, %v8157_v32  ;;  %v4455_v19 = vadd.f32 1.0, %v4439_v4 }
 0xe95   : > { %v4296_v28 = vmul.f32 %v4280_v56, %v8267_v55  ;;  %5415 = vmatpush2.bf16.msra.mxu0 %v6721_v14  ;;  %v6851_v5 = vpop.eup %6850  ;;  %v4417_v56 = vsub.f32 1.0, %v4401_v46  ;;  %v4434_v31 = vmul.f32 %v4418_v25, %v4066_v38  ;;  %v4074_v29 = vsel %vm4058_vm3, 1.0, %v6943_v12  ;;  %v6739_v32 = vld [vmem:[%s7130_s16 + $0x390] ss:$8 sps:$4 sm:$0xff]   ;;  %v6745_v25 = vld [vmem:[%s7130_s16 + $0x380] ss:$8 sps:$4 sm:$0xff]  }
 0xe96   : > { %v4298_v63 = vmul.f32 %v4282_v16, %v8283_v41  ;;  %5416 = vmatprep.subr.bf16.mxu0 %v6729_v62  ;;  %v6744_v16 = vld [vmem:[%s7130_s16 + $0x284] ss:$8 sps:$4 sm:$0xff]   ;;  %v4447_v62 = vadd.f32 1.0, %v4431_v58  ;;  %v4464_v18 = vmul.f32 %v4448_v43, %v4016_v59  ;;  %v4471_v52 = vmul.f32 %v4455_v19, %v4023_v15 }
 0xe97   : > { %v4312_v24 = vadd.f32 0.2548296, %v4296_v28  ;;  %5374 = vmatpush2.bf16.msra.mxu1 %v6724_v20  ;;  %v4441_v28 = vmul.f32 %v4425_v21, %v4073_v50  ;;  %v4433_v14 = vmul.f32 %v4417_v56, %v4065_v27  ;;  %v4450_v39 = vadd.f32 1.0, %v4434_v31 }
 0xe98   : > { %v4314_v54 = vadd.f32 0.2548296, %v4298_v63  ;;  %5375 = vmatprep.subr.bf16.mxu1 %v6732_v9  ;;  %v4015_v63 = vmul.f32 0.5, %v8044_v48  ;;  %v4018_v9 = vmul.f32 0.5, %v8100_v22  ;;  %v4017_v21 = vmul.f32 0.5, %v8047_v7 }
 0xe99   : > { %v4328_v10 = vmul.f32 %v4312_v24, %v8267_v55  ;;  %5417 = vmatpush2.bf16.msra.mxu0 %v6727_v13  ;;  %v4457_v20 = vadd.f32 1.0, %v4441_v28  ;;  %v4449_v12 = vadd.f32 1.0, %v4433_v14  ;;  %v4611_v7 = vld [vmem:[%s8458_s26] sm:$0x3] }
 0xe9a   : > { %v4330_v8 = vmul.f32 %v4314_v54, %v8283_v41  ;;  %5418 = vmatprep.subr.bf16.mxu0 %v6735_v51  ;;  %v6741_v41 = vld [vmem:[%s7130_s16 + $0x394] ss:$8 sps:$4 sm:$0xff]   ;;  %v4463_v13 = vmul.f32 %v4447_v62, %v4015_v63  ;;  %v4466_v48 = vmul.f32 %v4450_v39, %v4018_v9  ;;  %v4620_v56 = vrot.slane %v4611_v7, %v7273_v33 }
 0xe9b   : > { %v4408_v55 = vmul.f32 %v6849_v42, %v4328_v10  ;;  %5376 = vmatpush2.bf16.msra.mxu1 %v6730_v57  ;;  %v6747_v10 = vld [vmem:[%s7130_s16 + $0x384] ss:$8 sps:$4 sm:$0xff]   ;;  %v4025_v42 = vmul.f32 0.5, %v8112_v45  ;;  %v4465_v45 = vmul.f32 %v4449_v12, %v4017_v21  ;;  %v4616_v57 = vrot.slane %v4611_v7, %v7276_v34 }
 0xe9c   : > { %v4410_v47 = vmul.f32 %v6851_v5, %v4330_v8  ;;  %5377 = vmatprep.subr.bf16.mxu1 %v6738_v6  ;;  %v4479_v2 = vpack.c.bf16 %v4471_v52, %v4463_v13 }
 0xe9d   : > { %v4424_v36 = vsub.f32 1.0, %v4408_v55  ;;  %5419 = vmatpush2.bf16.msra.mxu0 %v6733_v35  ;;  %v4473_v55 = vmul.f32 %v4457_v20, %v4025_v42 }
 0xe9e   : > { %v4426_v24 = vsub.f32 1.0, %v4410_v47  ;;  %5420 = vmatprep.subr.bf16.mxu0 %v6741_v41 }
 0xe9f   : > { %v4440_v23 = vmul.f32 %v4424_v36, %v4072_v40  ;;  %5378 = vmatpush2.bf16.msra.mxu1 %v6736_v53  ;;  %v4481_v51 = vpack.c.bf16 %v4473_v55, %v4465_v45 }
 0xea0   : > { %v4442_v37 = vmul.f32 %v4426_v24, %v4074_v29  ;;  %5379 = vmatprep.subr.bf16.mxu1 %v6744_v16 }
 0xea1   : > { %v4456_v60 = vadd.f32 1.0, %v4440_v23  ;;  %5421 = vmatpush2.bf16.msra.mxu0 %v6739_v32 }
 0xea2   : > { %v4458_v49 = vadd.f32 1.0, %v4442_v37  ;;  %5422 = vmatprep.subr.bf16.mxu0 %v6747_v10 }
 0xea3   : > { %v4472_v46 = vmul.f32 %v4456_v60, %v4024_v11  ;;  %5380 = vmatpush2.bf16.msra.mxu1 %v6742_v30 }
 0xea4   : > { %v4474_v22 = vmul.f32 %v4458_v49, %v4026_v17 }
 0xea5   : > { %v4480_v0 = vpack.c.bf16 %v4472_v46, %v4464_v18  ;;  %5423 = vmatpush2.bf16.msra.mxu0 %v6745_v25 }
 0xea6   : > { %v4482_v54 = vpack.c.bf16 %v4474_v22, %v4466_v48 }
 0xea7   : > { %5381 = vmatprep.mubr.bf16.mxu1 %v4480_v0 }
 0xea8   : > { %5424 = vmatprep.mubr.bf16.mxu0 %v4482_v54  ;;  %5382 = vmatmul.mubr.bf16.vlgmr.msra.gmra.mxu1 %v4479_v2 }
 0xea9   : > { %5425 = vmatmul.mubr.bf16.vlgmr.msra.gmra.mxu0 %v4481_v51 }
 0xf26   : > { %v5297_v38 = vpop.f32.mrf.mxu1 }
 0xf27   : > { %v5298_v36 = vadd.f32 %v5297_v38, %v4616_v57 }
 0xf28   : > { %v5340_v3 = vpop.f32.mrf.mxu0  ;;  %v5299_v50 = vpop.f32.mrf.mxu1 }
 0xf29   : > { %v5300_v6 = vadd.f32 %v5299_v50, %v4620_v56  ;;  %v5341_v43 = vadd.f32 %v5340_v3, %v5298_v36 }
 0xf2a   : > { %v5342_v5 = vpop.f32.mrf.mxu0  ;;  %v5301_v4 = vpop.f32.mrf.mxu1 }
 0xf2b   : > { %v5302_v40 = vadd.f32 %v5301_v4, %v4616_v57  ;;  %v5343_v28 = vadd.f32 %v5342_v5, %v5300_v6 }
 0xf2c   : > { %v5344_v8 = vpop.f32.mrf.mxu0  ;;  %v5303_v58 = vpop.f32.mrf.mxu1 }
 0xf2d   : > { %v5304_v23 = vadd.f32 %v5303_v58, %v4620_v56  ;;  %v5345_v59 = vadd.f32 %v5344_v8, %v5302_v40 }
 0xf2e   : > { %v5346_v35 = vpop.f32.mrf.mxu0 }
 0xf2f   : > { %v5347_v33 = vadd.f32 %v5346_v35, %v5304_v23 }
 0xf68   : > { %v5383_v31 = vpop.f32.mrf.mxu1 }
 0xf69   : > { %v5384_v47 = vadd.f32 %v5383_v31, %v5341_v43  ;;  %v5426_v41 = vpop.f32.mrf.mxu0 }
 0xf6a   : > { %v5385_v27 = vpop.f32.mrf.mxu1 }
 0xf6b   : > { %v5427_v11 = vadd.f32 %v5426_v41, %v5384_v47  ;;  %v5386_v34 = vadd.f32 %v5385_v27, %v5343_v28  ;;  %v5428_v53 = vpop.f32.mrf.mxu0 }
 0xf6c   : > { %v5387_v14 = vpop.f32.mrf.mxu1 }
 0xf6d   : > { %v5435_v19 = vadd.f32 %v5427_v11, %v7580_v1  ;;  %v5429_v60 = vadd.f32 %v5428_v53, %v5386_v34  ;;  %v5388_v24 = vadd.f32 %v5387_v14, %v5345_v59  ;;  %v5430_v16 = vpop.f32.mrf.mxu0 }
 0xf6e   : > { %v5389_v62 = vpop.f32.mrf.mxu1 }
 0xf6f   : > { %5439 = vst [vmem:[%s8451_s14] sm:$0xff] %v5435_v19  ;;  %v5436_v18 = vadd.f32 %v5429_v60, %v7582_v26  ;;  %v5431_v15 = vadd.f32 %v5430_v16, %v5388_v24  ;;  %v5390_v29 = vadd.f32 %v5389_v62, %v5347_v33  ;;  %v5432_v32 = vpop.f32.mrf.mxu0 }
 0xf71   : > { %5440 = vst [vmem:[%s8451_s14 + $0x8] sm:$0xff] %v5436_v18  ;;  %v5437_v39 = vadd.f32 %v5431_v15, %v7592_v61  ;;  %v5433_v1 = vadd.f32 %v5432_v32, %v5390_v29 }
 0xf73   : > { %5441 = vst [vmem:[%s8451_s14 + $0x10] sm:$0xff] %v5437_v39  ;;  %v5438_v20 = vadd.f32 %v5433_v1, %v7594_v44 }
 0xf75   : > { %5442 = vst [vmem:[%s8451_s14 + $0x18] sm:$0xff] %v5438_v20 }
 0xf76 PF: > { %s8459_s20 = sld [smem:[#allocation8_spill]] }
 0xf77   : > { %s8460_s25 = sld [smem:[#allocation5_spill]] }
 0xf78   : > { %s8461_s26 = sld [smem:[#allocation6_spill]] }
 0xf79   : > { %s8462_s27 = sld [smem:[#allocation10_spill]] }
 0xf7a   : > { %s8463_s28 = sld [smem:[#allocation7_spill]] }
 0xf7b   : > { %s8464_s29 = sld [smem:[#allocation9_spill]] }
 0xf7c   : > { %s26_s30 = sadd.s32 1, %s8459_s20  }
 0xf7d   : > { %p23_p9 = scmp.ge.s32.totalorder %s26_s30, 6  }
 0xf7f   :  { %25 = sbr.rel (!%p23_p9) target bundleno = 9 (0x9), region = 152 }
 0xf84   :  { %5464 = vsyncpa [#allocation3], 1 }
 0xf85   :  { %5466 = vsyncpa [#allocation3 + $0x1], 1 }

// kernel: model_forward.8
= control target key start
LH: loop header
LB: loop body
LE: loop exit
PB: predicated region body
PF: predicated region fallthrough
CT: control target
= control target key end

     0   :  { %s4832_s25 = smov 0   ;;  %s4834_s26 = smov 0   ;;  %s5875_s0 = inlined_call_operand.vmem [shape: f32[3,32,128], index: 0, kind: input, shape index: {}]   ;;  %s5876_s1 = inlined_call_operand.vmem [shape: f32[3,2,1,128], index: 1, kind: input, shape index: {}]   ;;  %s5877_s2 = inlined_call_operand.vmem [shape: f32[3,2,1,128], index: 2, kind: input, shape index: {}]   ;;  %s5878_s3 = inlined_call_operand.vmem [shape: bf16[3,2,128,384], index: 3, kind: input, shape index: {}]   ;;  %s5879_s4 = inlined_call_operand.vmem [shape: f32[3,2,1,384], index: 4, kind: input, shape index: {}]   ;;  %s5880_s5 = inlined_call_operand.vmem [shape: bf16[3,2,128,128], index: 5, kind: input, shape index: {}]   ;;  %s5881_s6 = inlined_call_operand.vmem [shape: f32[3,2,1,128], index: 6, kind: input, shape index: {}]   ;;  %s5882_s7 = inlined_call_operand.vmem [shape: f32[3,2,1,128], index: 7, kind: input, shape index: {}]   ;;  %s5883_s8 = inlined_call_operand.vmem [shape: f32[3,2,1,128], index: 8, kind: input, shape index: {}]   ;;  %s5884_s9 = inlined_call_operand.vmem [shape: bf16[3,2,128,512], index: 9, kind: input, shape index: {}]   ;;  %s5885_s10 = inlined_call_operand.vmem [shape: f32[3,2,1,512], index: 10, kind: input, shape index: {}]   ;;  %s5886_s11 = inlined_call_operand.vmem [shape: bf16[3,2,512,128], index: 11, kind: input, shape index: {}]   ;;  %s5887_s12 = inlined_call_operand.vmem [shape: f32[3,2,1,128], index: 12, kind: input, shape index: {}]   ;;  %s5888_s13 = inlined_call_operand.vmem [shape: f32[3,32,128], index: 13, kind: output, shape index: {}]  }
   0x1   :  { %5899 = sst [smem:[#allocation14_spill]] %s5875_s0  ;;  %s4836_s27 = smov 0  }
   0x2   :  { %5900 = sst [smem:[#allocation15_spill]] %s5876_s1  ;;  %s4838_s28 = smov 0  }
   0x3   :  { %5901 = sst [smem:[#allocation16_spill]] %s5877_s2  ;;  %s4840_s29 = smov 0  }
   0x4   :  { %5902 = sst [smem:[#allocation17_spill]] %s5878_s3 }
   0x5   :  { %5903 = sst [smem:[#allocation18_spill]] %s5879_s4 }
   0x6   :  { %5904 = sst [smem:[#allocation19_spill]] %s5880_s5 }
   0x7 LB: > { %5905 = sst [smem:[#allocation2_spill]] %s4737_s25  ;;  %s32_s30 = sadd.s32 1, %s4745_s27  ;;  %s4753_s29 = sphi %s4840_s29, %s23_s29   ;;  %s4749_s28 = sphi %s4838_s28, %s5941_s28   ;;  %s4745_s27 = sphi %s4836_s27, %s5940_s27   ;;  %s4741_s26 = sphi %s4834_s26, %s5939_s26   ;;  %s4737_s25 = sphi %s4832_s25, %s5938_s25  }
   0x8   : > { %5906 = sst [smem:[#allocation3_spill]] %s4745_s27  ;;  %s35_s14 = sadd.s32 1, %s4749_s28 }
   0x9   : > { %5907 = sst [smem:[#allocation4_spill]] %s4749_s28  ;;  %p33_p0 = scmp.ge.s32.totalorder %s32_s30, 2 }
   0xa   : > { %5908 = sst [smem:[#allocation5_spill]] %s4753_s29  ;;  %p3980_p1 = scmp.ge.s32.totalorder %s4753_s29, 1 }
   0xb   : > { %p577_p2 = scmp.lt.s32.totalorder %s4753_s29, 7  ;;  %s5943_s30 = smov (%p33_p0, %s32_s30), 0 }
   0xc   : > { %5909 = sst [smem:[#allocation6_spill]] %s5943_s30  ;;  %s5945_s14 = smov (!%p33_p0, %s35_s14), %s4749_s28 }
   0xd   : > { %p578_p3 = pnand %p3980_p1, %p577_p2  ;;  %p37_p4 = scmp.ge.s32.totalorder %s5945_s14, 3 }
   0xf   : > { %s5947_s14 = smov (%p37_p4, %s5945_s14), 0  ;;  %581 = sbr.rel (%p578_p3) target bundleno = 4365 (0x110d), region = 72 }
  0x10   : > { %5910 = sst [smem:[#allocation7_spill]] %s5947_s14 }
  0x14   : > { %p715_p5 = scmp.lt.s32.totalorder %s4741_s26, 2  ;;  %p722_p6 = scmp.lt.s32.totalorder %s4737_s25, 1 }
  0x15   : > { %s5911_s0 = sld [smem:[#allocation14_spill]] }
  0x16   : > { %s5949_s26 = smov (!%p715_p5, %s4741_s26), 2  ;;  %s5915_s5 = sld [smem:[#allocation19_spill]] }
  0x17   : > { %s4868_s15 = scalar_select %p722_p6, %s4737_s25, 1 }
  0x18   : > { %s4871_s16 = sshll.u32 %s5949_s26, 5  ;;  %s3983_s17 = sshll.u32 %s5949_s26, 1 }
  0x19   : > { %s4881_s21 = sadd.s32 %s3983_s17, %s4868_s15  ;;  %s4396_s27 = smul.u32 48, %s4868_s15 }
  0x1a   : > { %s3986_s18 = sshll.u32 %s4868_s15, 4  ;;  %s4397_s19 = smul.u32 96, %s5949_s26 }
  0x1b   : > { %s4878_s20 = scalar_lea.vmem %s5911_s0, %s4871_s16  ;;  %s757_s17 = sadd.s32 %s4871_s16, %s3986_s18 }
  0x1c   : > { %5912 = sst [smem:[#allocation8_spill]] %s4878_s20  ;;  %s4398_s0 = smul.u32 3, %s4868_s15 }
  0x1d   : > { %s3988_s29 = sshll.u32 %s757_s17, 2  ;;  %s740_s22 = sadd.s32 %s4397_s19, %s4396_s27 }
  0x1e   : > { %s4399_s23 = smul.u32 6, %s5949_s26  ;;  %s3985_s20 = sshll.u32 %s740_s22, 2 }
  0x1f   : > { %s4900_s30 = scalar_lea.vmem %s5915_s5, %s3988_s29  ;;  %s5917_s3 = sld [smem:[#allocation17_spill]] }
  0x20   : > { %5916 = sst [smem:[#allocation9_spill]] %s4900_s30  ;;  %s4907_s25 = sadd.s32 %s4399_s23, %s4398_s0 }
  0x21   : > { %s766_s1 = scalar_lea.vmem %s5881_s6, %s4881_s21  ;;  %s773_s5 = scalar_lea.vmem %s5882_s7, %s4881_s21 }
  0x22   : > { %s3992_s0 = sshll.u32 %s4868_s15, 6  ;;  %s3993_s23 = sshll.u32 %s5949_s26, 7 }
  0x23   : > { %s3995_s30 = sshll.u32 %s4868_s15, 2  ;;  %s3996_s18 = sshll.u32 %s5949_s26, 3 }
  0x24   : > { %s4934_s19 = sadd.s32 %s3996_s18, %s3995_s30  ;;  %s813_s26 = scalar_lea.vmem %s5887_s12, %s4881_s21 }
  0x25   : > { %s4905_s2 = scalar_lea.vmem %s5917_s3, %s3985_s20  ;;  %s787_s3 = sadd.s32 %s3993_s23, %s3992_s0 }
  0x26   : > { %5918 = sst [smem:[#allocation10_spill]] %s4905_s2  ;;  %s3994_s2 = sshll.u32 %s787_s3, 2 }
  0x27   : > { %s4932_s4 = scalar_lea.vmem %s5884_s9, %s3994_s2  ;;  %s797_s24 = scalar_lea.vmem %s5885_s10, %s4934_s19 }
  0x28   : > { %s4943_s14 = scalar_lea.vmem %s5886_s11, %s3994_s2  ;;  %s4953_s23 = scalar_lea.vmem %s5888_s13, %s4871_s16 }
  0x29   : > { %s5920_s30 = sld [smem:[#allocation2_spill]] }
  0x2f   : > { %p4003_p7 = scmp.ne.s32.totalorder %s5920_s30, 0 }
  0x30   : > { %s5921_s18 = sld [smem:[#allocation8_spill]] (!%p4003_p7) }
  0x31   : > { %823 = sbr.rel (%p4003_p7) target bundleno = 57 (0x39), region = 76 }
  0x36   : > { %v824_v0 = vld [vmem:[%s5921_s18] sm:$0xff]  ;;  %v825_v1 = vld [vmem:[%s5921_s18 + $0x8] sm:$0xff]  ;;  %v826_v2 = vld [vmem:[%s5921_s18 + $0x10] sm:$0xff] }
  0x37   : > { %828 = vst [vmem:[%s4953_s23] sm:$0xff] %v824_v0  ;;  %829 = vst [vmem:[%s4953_s23 + $0x8] sm:$0xff] %v825_v1  ;;  %v827_v3 = vld [vmem:[%s5921_s18 + $0x18] sm:$0xff] }
  0x38   : > { %830 = vst [vmem:[%s4953_s23 + $0x10] sm:$0xff] %v826_v2  ;;  %831 = vst [vmem:[%s4953_s23 + $0x18] sm:$0xff] %v827_v3 }
  0x39 PF: > { %s5922_s2 = sld [smem:[#allocation10_spill]]  ;;  %v4755_v43 = vmov 0   ;;  %vm4757_vm0 = vmmov 0   ;;  %vm1210_vm1 = vcmask 261120   ;;  %vm1305_vm2 = vcmask 130048   ;;  %s4760_s17 = smov 32  }
  0x3a   : > { %1114 = vmatprep.mubr.bf16.mxu0 %v4755_v43  ;;  %s5923_s22 = sld [smem:[#allocation15_spill]] }
  0x3b   : > { %s5925_s15 = sld [smem:[#allocation16_spill]] }
  0x3c   : > { %s5927_s30 = sld [smem:[#allocation18_spill]] }
  0x3d   : > { %s5929_s16 = sld [smem:[#allocation9_spill]] }
  0x3e   : > { %v832_v4 = vld [vmem:[%s4953_s23] sm:$0xff]  ;;  %v833_v6 = vld [vmem:[%s4953_s23 + $0x8] sm:$0xff] }
  0x3f   : > { %v834_v5 = vld [vmem:[%s4953_s23 + $0x10] sm:$0xff]  ;;  %838 = vadd.xlane.f32.xlu0 %v832_v4  ;;  %v835_v7 = vld [vmem:[%s4953_s23 + $0x18] sm:$0xff]  ;;  %v4460_v33 = vld [vmem:[%s5922_s2 + $0x80] ss:$12 sps:$4 sm:$0xff]  }
  0x40   : > { %842 = vadd.xlane.f32.xlu1 %v834_v5  ;;  %v4447_v8 = vld [vmem:[%s5922_s2 + $0xac] ss:$12 sps:$4 sm:$0xff]   ;;  %v4449_v9 = vld [vmem:[%s5922_s2 + $0xa8] ss:$12 sps:$4 sm:$0xff]   ;;  %v4452_v27 = vld [vmem:[%s5922_s2 + $0xb0] ss:$12 sps:$4 sm:$0xff]   ;;  %s5924_s29 = scalar_lea.vmem %s5923_s22, %s4881_s21 }
  0x41   : > { %1082 = vmatprep.subr.bf16.mxu0 %v4447_v8  ;;  %v4450_v26 = vld [vmem:[%s5922_s2 + $0x94] ss:$12 sps:$4 sm:$0xff]   ;;  %v4453_v28 = vld [vmem:[%s5922_s2 + $0x90] ss:$12 sps:$4 sm:$0xff]   ;;  %4248 = vmatprep.subr.bf16.mxu1 %v4452_v27  ;;  %v4456_v30 = vld [vmem:[%s5922_s2 + $0x98] ss:$12 sps:$4 sm:$0xff]   ;;  %s5926_s3 = scalar_lea.vmem %s5925_s15, %s4881_s21  ;;  %s5933_s15 = scalar_lea.vmem %s5883_s8, %s4881_s21 }
  0x42   : > { %1083 = vmatpush1.bf16.msra.mxu0 %v4449_v9  ;;  %4249 = vmatpush3.bf16.msra.mxu1 %v4452_v27  ;;  %v4454_v29 = vld [vmem:[%s5922_s2 + $0x7c] ss:$12 sps:$4 sm:$0xff]   ;;  %v4457_v31 = vld [vmem:[%s5922_s2 + $0x78] ss:$12 sps:$4 sm:$0xff]   ;;  %v4461_v34 = vld [vmem:[%s5922_s2 + $0x60] ss:$12 sps:$4 sm:$0xff]   ;;  %s5928_s18 = scalar_lea.vmem %s5927_s30, %s4907_s25 }
  0x43   : > { %840 = vadd.xlane.f32.xlu0 %v833_v6  ;;  %1084 = vmatprep.subr.bf16.mxu0 %v4450_v26  ;;  %v4458_v32 = vld [vmem:[%s5922_s2 + $0x64] ss:$12 sps:$4 sm:$0xff]   ;;  %v4462_v35 = vld [vmem:[%s5922_s2 + $0x4c] ss:$12 sps:$4 sm:$0xff]   ;;  %v4464_v36 = vld [vmem:[%s5922_s2 + $0x68] ss:$12 sps:$4 sm:$0xff]  }
  0x44   : > { %844 = vadd.xlane.f32.xlu1 %v835_v7  ;;  %4250 = vmatprep.subr.bf16.mxu1 %v4456_v30  ;;  %v4465_v37 = vld [vmem:[%s5922_s2 + $0x48] ss:$12 sps:$4 sm:$0xff]   ;;  %v4468_v39 = vld [vmem:[%s5922_s2 + $0x50] ss:$12 sps:$4 sm:$0xff]   ;;  %v4472_v42 = vld [vmem:[%s5922_s2 + $0x38] ss:$12 sps:$4 sm:$0xff]  }
  0x45   : > { %v4466_v38 = vld [vmem:[%s5922_s2 + $0x34] ss:$12 sps:$4 sm:$0xff]   ;;  %v4469_v40 = vld [vmem:[%s5922_s2 + $0x30] ss:$12 sps:$4 sm:$0xff]   ;;  %v4473_v44 = vld [vmem:[%s5922_s2 + $0x18] ss:$12 sps:$4 sm:$0xff]  }
  0x46   : > { %1085 = vmatpush1.bf16.msra.mxu0 %v4453_v28  ;;  %4251 = vmatpush3.bf16.msra.mxu1 %v4456_v30  ;;  %v4470_v41 = vld [vmem:[%s5922_s2 + $0x1c] ss:$12 sps:$4 sm:$0xff]   ;;  %v4474_v45 = vld [vmem:[%s5922_s2 + $0x4] ss:$12 sps:$4 sm:$0xff]   ;;  %v4476_v46 = vld [vmem:[%s5922_s2 + $0x20] ss:$12 sps:$4 sm:$0xff]  }
  0x47   : > { %1086 = vmatprep.subr.bf16.mxu0 %v4454_v29  ;;  %4252 = vmatprep.subr.bf16.mxu1 %v4460_v33  ;;  %v4477_v47 = vld [vmem:[%s5922_s2] ss:$12 sps:$4 sm:$0xff]   ;;  %v4478_v48 = vld [vmem:[%s5922_s2 + $0x8] ss:$12 sps:$4 sm:$0xff]   ;;  %s4758_s25 = smov 96   ;;  %s4759_s2 = smov 64  }
  0x48   : > { %v4004_v63 = vld [vmem:[%s5924_s29] ss:$0 sm:$0xff] }
  0x4a   : > { %1087 = vmatpush1.bf16.msra.mxu0 %v4457_v31  ;;  %4253 = vmatpush3.bf16.msra.mxu1 %v4460_v33 }
  0x4b   : > { %1088 = vmatprep.subr.bf16.mxu0 %v4458_v32  ;;  %4254 = vmatprep.subr.bf16.mxu1 %v4464_v36 }
  0x4e   : > { %1089 = vmatpush1.bf16.msra.mxu0 %v4461_v34  ;;  %4255 = vmatpush3.bf16.msra.mxu1 %v4464_v36 }
  0x4f   : > { %1090 = vmatprep.subr.bf16.mxu0 %v4462_v35  ;;  %4256 = vmatprep.subr.bf16.mxu1 %v4468_v39 }
  0x52   : > { %1091 = vmatpush1.bf16.msra.mxu0 %v4465_v37  ;;  %4257 = vmatpush3.bf16.msra.mxu1 %v4468_v39 }
  0x53   : > { %1092 = vmatprep.subr.bf16.mxu0 %v4466_v38  ;;  %4258 = vmatprep.subr.bf16.mxu1 %v4472_v42 }
  0x56   : > { %1093 = vmatpush1.bf16.msra.mxu0 %v4469_v40  ;;  %4259 = vmatpush3.bf16.msra.mxu1 %v4472_v42 }
  0x57   : > { %1094 = vmatprep.subr.bf16.mxu0 %v4470_v41  ;;  %4260 = vmatprep.subr.bf16.mxu1 %v4476_v46 }
  0x5a   : > { %1095 = vmatpush1.bf16.msra.mxu0 %v4473_v44  ;;  %4261 = vmatpush3.bf16.msra.mxu1 %v4476_v46 }
  0x5b   : > { %1096 = vmatprep.subr.bf16.mxu0 %v4474_v45  ;;  %4262 = vmatprep.subr.bf16.mxu1 %v4478_v48 }
  0x5e   : > { %1097 = vmatpush1.bf16.msra.mxu0 %v4477_v47  ;;  %4263 = vmatpush3.bf16.msra.mxu1 %v4478_v48 }
  0xc8   : > { %v839_v10 = vpop.xlane.xlu0 %838 }
  0xc9   : > { %v843_v11 = vpop.xlane.xlu1 %842  ;;  %v847_v12 = vmul.f32 0.0078125, %v839_v10 }
  0xca   : > { %v849_v13 = vmul.f32 0.0078125, %v843_v11 }
  0xcb   : > { %v4970_v14 = vsub.f32 %v832_v4, %v847_v12  ;;  %v4005_v4 = vld [vmem:[%s5926_s3] ss:$0 sm:$0xff] }
  0xcc   : > { %v4972_v15 = vsub.f32 %v834_v5, %v849_v13  ;;  %v841_v16 = vpop.xlane.xlu0 %840 }
  0xcd   : > { %v845_v17 = vpop.xlane.xlu1 %844  ;;  %v848_v18 = vmul.f32 0.0078125, %v841_v16  ;;  %v855_v19 = vmul.f32 %v4970_v14, %v4970_v14 }
  0xce   : > { %v850_v20 = vmul.f32 0.0078125, %v845_v17  ;;  %v857_v23 = vmul.f32 %v4972_v15, %v4972_v15 }
  0xcf   : > { %v4976_v21 = vsub.f32 %v833_v6, %v848_v18  ;;  %859 = vadd.xlane.f32.xlu0 %v855_v19  ;;  %v939_v18 = vlaneseq }
  0xd0   : > { %v4978_v22 = vsub.f32 %v835_v7, %v850_v20 }
  0xd1   : > { %v856_v24 = vmul.f32 %v4976_v21, %v4976_v21  ;;  %v5030_v19 = vshrl.u32 %v939_v18, 7 }
  0xd2   : > { %v858_v25 = vmul.f32 %v4978_v22, %v4978_v22 }
  0xd3   : > { %863 = vadd.xlane.f32.xlu0 %v857_v23  ;;  %861 = vadd.xlane.f32.xlu1 %v856_v24  ;;  %v945_v20 = vsub.s32 1, %v5030_v19  ;;  %v949_v35 = vsub.s32 2, %v5030_v19 }
  0xd7   : > { %865 = vadd.xlane.f32.xlu1 %v858_v25  ;;  %v941_v25 = vsub.s32 0, %v5030_v19 }
 0x158   : > { %v860_v49 = vpop.xlane.xlu0 %859 }
 0x159   : > { %v867_v50 = vmul.f32 0.0078125, %v860_v49 }
 0x15b   : > { %v871_v51 = vadd.f32 1e-06, %v867_v50 }
 0x15c   : > { %v862_v52 = vpop.xlane.xlu1 %861  ;;  %v864_v53 = vpop.xlane.xlu0 %863 }
 0x15d   : > { %4567 = vrsqrt.f32 %v871_v51  ;;  %v868_v54 = vmul.f32 0.0078125, %v862_v52  ;;  %v869_v55 = vmul.f32 0.0078125, %v864_v53 }
 0x15f   : > { %v872_v56 = vadd.f32 1e-06, %v868_v54  ;;  %v873_v57 = vadd.f32 1e-06, %v869_v55 }
 0x160   : > { %v866_v58 = vpop.xlane.xlu1 %865 }
 0x161   : > { %4569 = vrsqrt.f32 %v872_v56  ;;  %v870_v59 = vmul.f32 0.0078125, %v866_v58 }
 0x162   : > { %4571 = vrsqrt.f32 %v873_v57 }
 0x163   : > { %v874_v60 = vadd.f32 1e-06, %v870_v59 }
 0x165   : > { %4573 = vrsqrt.f32 %v874_v60 }
 0x16a   : > { %v4568_v61 = vpop.eup %4567 }
 0x16b   : > { %v879_v62 = vmul.f32 %v4568_v61, %v4970_v14 }
 0x16d   : > { %v889_v3 = vmul.f32 %v4004_v63, %v879_v62 }
 0x16e   : > { %v4570_v0 = vpop.eup %4569 }
 0x16f   : > { %v4572_v1 = vpop.eup %4571  ;;  %v880_v2 = vmul.f32 %v4570_v0, %v4976_v21  ;;  %v899_v8 = vadd.f32 %v4005_v4, %v889_v3 }
 0x170   : > { %v881_v5 = vmul.f32 %v4572_v1, %v4972_v15  ;;  %v4756_v15 = vmov 0.0  }
 0x171   : > { %v890_v6 = vmul.f32 %v4004_v63, %v880_v2  ;;  %4268 = vmatprep.subr.bf16.mxu1 %v4756_v15  ;;  %4274 = vmatprep.subr.bf16.mxu0 %v4756_v15 }
 0x172   : > { %v4574_v7 = vpop.eup %4573  ;;  %v891_v11 = vmul.f32 %v4004_v63, %v881_v5 }
 0x173   : > { %v900_v9 = vadd.f32 %v4005_v4, %v890_v6  ;;  %v882_v10 = vmul.f32 %v4574_v7, %v4978_v22  ;;  %v937_v22 = vld [vmem:[%s5928_s18] sm:$0x7] }
 0x174   : > { %v901_v14 = vadd.f32 %v4005_v4, %v891_v11  ;;  %v946_v24 = vrot.slane %v937_v22, %v945_v20  ;;  %v942_v32 = vrot.slane %v937_v22, %v941_v25  ;;  %v950_v44 = vrot.slane %v937_v22, %v949_v35 }
 0x175   : > { %v903_v12 = vpack.c.bf16 %v900_v9, %v899_v8  ;;  %v892_v13 = vmul.f32 %v4004_v63, %v882_v10 }
 0x177   : > { %1115 = vmatmul.mubr.bf16.vlgmr.msra.gmra.mxu0 %v903_v12  ;;  %4264 = vmatprep.mubr.bf16.mxu1 %v903_v12  ;;  %v902_v16 = vadd.f32 %v4005_v4, %v892_v13 }
 0x178   : > { %1124 = vmatprep.mubr.bf16.mxu0 %v4755_v43 }
 0x179   : > { %v904_v17 = vpack.c.bf16 %v902_v16, %v901_v14 }
 0x17b   : > { %4265 = vmatmul.mubr.bf16.vlgmr.msra.gmra.mxu1 %v904_v17 }
 0x17c   : > { %4270 = vmatprep.mubr.msk.bf16.mxu1 %vm4757_vm0, %v4756_v15 }
 0x17f   : > { %1125 = vmatmul.mubr.bf16.gmra.mxu0 %v904_v17 }
 0x180   : > { %4276 = vmatprep.mubr.msk.bf16.mxu0 %vm4757_vm0, %v4756_v15 }
 0x237   : > { %v1116_v21 = vpop.f32.mrf.mxu0 }
 0x238   : > { %v1117_v39 = vadd.f32 %v1116_v21, %v942_v32 }
 0x239   : > { %v1118_v23 = vpop.f32.mrf.mxu0 }
 0x23a   : > { %v1119_v30 = vadd.f32 %v1118_v23, %v946_v24  ;;  %v1200_v50 = vmul.f32 0.17677669, %v1117_v39 }
 0x23b   : > { %v1120_v26 = vpop.f32.mrf.mxu0  ;;  %v4266_v27 = vpop.f32.mrf.mxu1 }
 0x23c   : > { %v1121_v37 = vadd.f32 %v1120_v26, %v942_v32  ;;  %v1178_v61 = vadd.f32 %v4266_v27, %v950_v44 }
 0x23d   : > { %v1122_v28 = vpop.f32.mrf.mxu0  ;;  %v1169_v29 = vpop.f32.mrf.mxu1 }
 0x23e   : > { %v1123_v31 = vadd.f32 %v1122_v28, %v946_v24  ;;  %v1201_v45 = vmul.f32 0.17677669, %v1121_v37  ;;  %v1170_v51 = vadd.f32 %v1169_v29, %v950_v44 }
 0x23f   : > { %v1126_v33 = vpop.f32.mrf.mxu0  ;;  %v4267_v34 = vpop.f32.mrf.mxu1 }
 0x240   : > { %v5044_v36 = vpack.c.bf16 %v1123_v31, %v1119_v30  ;;  %v5053_v54 = vpack.c.bf16 %v1201_v45, %v1200_v50  ;;  %v1127_v55 = vadd.f32 %v1126_v33, %v942_v32  ;;  %v1181_v59 = vadd.f32 %v4267_v34, %v950_v44 }
 0x241   : > { %v1128_v38 = vpop.f32.mrf.mxu0  ;;  %v1172_v40 = vpop.f32.mrf.mxu1 }
 0x242   : > { %v1215_v42 = vsel %vm1210_vm1, %v5044_v36, 0  ;;  %v1129_v47 = vadd.f32 %v1128_v38, %v946_v24  ;;  %v1173_v48 = vadd.f32 %v1172_v40, %v950_v44  ;;  %v1202_v60 = vmul.f32 0.17677669, %v1127_v55 }
 0x243   : > { %v1130_v41 = vpop.f32.mrf.mxu0  ;;  %4269 = vmatpush3.bf16.xpose.msra.mxu1 %v1215_v42  ;;  %v5068_v63 = vpack.c.bf16 %v1181_v59, %v1178_v61 }
 0x244   : > { %4280 = vmatprep.subr.bf16.mxu1 %v4756_v15  ;;  %v1131_v52 = vadd.f32 %v1130_v41, %v942_v32  ;;  %v5055_v56 = vpack.c.bf16 %v1173_v48, %v1170_v51 }
 0x245   : > { %v1132_v46 = vpop.f32.mrf.mxu0 }
 0x246   : > { %v1133_v49 = vadd.f32 %v1132_v46, %v946_v24  ;;  %v1203_v58 = vmul.f32 0.17677669, %v1131_v52 }
 0x248   : > { %v5051_v53 = vpack.c.bf16 %v1133_v49, %v1129_v47  ;;  %v5066_v62 = vpack.c.bf16 %v1203_v58, %v1202_v60 }
 0x24a   : > { %v1262_v57 = vsel %vm1210_vm1, %v5051_v53, 0  ;;  %4271 = vmatmul.mubr.msk.bf16.vlgmr.msra.gmra.mxu1 %vm1210_vm1, %v5053_v54 }
 0x24b   : > { %4275 = vmatpush3.bf16.xpose.msra.mxu0 %v1262_v57  ;;  %4281 = vmatpush3.bf16.msra.mxu1 %v5055_v56 }
 0x24c   : > { %4286 = vmatprep.subr.bf16.mxu0 %v4756_v15  ;;  %4282 = vmatprep.mubr.msk.bf16.mxu1 %vm4757_vm0, %v4756_v15 }
 0x24d   : > { %4292 = vmatprep.subr.bf16.mxu1 %v4756_v15 }
 0x252   : > { %4277 = vmatmul.mubr.msk.bf16.vlgmr.msra.gmra.mxu0 %vm1210_vm1, %v5066_v62 }
 0x253   : > { %4287 = vmatpush3.bf16.msra.mxu0 %v5068_v63  ;;  %4288 = vmatprep.mubr.msk.bf16.mxu0 %vm4757_vm0, %v4756_v15 }
 0x254   : > { %4298 = vmatprep.subr.bf16.mxu0 %v4756_v15 }
 0x30a   : > { %v1251_v0 = vpop.f32.mrf.mxu1 }
 0x30b   : > { %v1306_v1 = vsel %vm1305_vm2, %v1251_v0, -inf }
 0x30c   : > { %1307 = vmax.xlane.f32.xlu0 %v1306_v1  ;;  %v4272_v2 = vpop.f32.mrf.mxu1 }
 0x30e   : > { %v1254_v3 = vpop.f32.mrf.mxu1 }
 0x30f   : > { %v1309_v4 = vsel %vm1305_vm2, %v1254_v3, -inf }
 0x310   : > { %1310 = vmax.xlane.f32.xlu1 %v1309_v4  ;;  %v4273_v5 = vpop.f32.mrf.mxu1 }
 0x312   : > { %v1298_v6 = vpop.f32.mrf.mxu0 }
 0x313   : > { %v1312_v7 = vsel %vm1305_vm2, %v1298_v6, -inf }
 0x314   : > { %1313 = vmax.xlane.f32.xlu0 %v1312_v7  ;;  %v4278_v8 = vpop.f32.mrf.mxu0 }
 0x316   : > { %v1301_v9 = vpop.f32.mrf.mxu0 }
 0x317   : > { %v1315_v10 = vsel %vm1305_vm2, %v1301_v9, -inf }
 0x318   : > { %1316 = vmax.xlane.f32.xlu1 %v1315_v10  ;;  %v4279_v11 = vpop.f32.mrf.mxu0 }
 0x395   : > { %v1308_v12 = vpop.xlane.xlu0 %1307 }
 0x396   : > { %v1318_v13 = vsub.f32 %v1251_v0, %v1308_v12 }
 0x398   : > { %v1322_v14 = vmul.f32 1.442695, %v1318_v13 }
 0x399   : > { %v1311_v16 = vpop.xlane.xlu1 %1310 }
 0x39a   : > { %4575 = vpow2.f32 %v1322_v14  ;;  %v1319_v17 = vsub.f32 %v1254_v3, %v1311_v16 }
 0x39c   : > { %v1324_v18 = vmul.f32 1.442695, %v1319_v17 }
 0x39d   : > { %v1314_v21 = vpop.xlane.xlu0 %1313 }
 0x39e   : > { %v1320_v22 = vsub.f32 %v1298_v6, %v1314_v21  ;;  %4577 = vpow2.f32 %v1324_v18 }
 0x3a0   : > { %v1326_v23 = vmul.f32 1.442695, %v1320_v22 }
 0x3a1   : > { %v1317_v31 = vpop.xlane.xlu1 %1316 }
 0x3a2   : > { %4579 = vpow2.f32 %v1326_v23  ;;  %v1321_v32 = vsub.f32 %v1301_v9, %v1317_v31 }
 0x3a4   : > { %v1328_v33 = vmul.f32 1.442695, %v1321_v32 }
 0x3a6   : > { %4581 = vpow2.f32 %v1328_v33 }
 0x3a7   : > { %v4576_v24 = vpop.eup %4575 }
 0x3a8   : > { %v1330_v26 = vsel %vm1305_vm2, %v4576_v24, 0.0 }
 0x3a9   : > { %1331 = vadd.xlane.f32.xlu0 %v1330_v26 }
 0x3ab   : > { %v4578_v27 = vpop.eup %4577 }
 0x3ac   : > { %v1333_v28 = vsel %vm1305_vm2, %v4578_v27, 0.0 }
 0x3ad   : > { %1334 = vadd.xlane.f32.xlu1 %v1333_v28 }
 0x3af   : > { %v4580_v29 = vpop.eup %4579 }
 0x3b0   : > { %v1336_v30 = vsel %vm1305_vm2, %v4580_v29, 0.0 }
 0x3b1   : > { %1337 = vadd.xlane.f32.xlu0 %v1336_v30 }
 0x3b3   : > { %v4582_v34 = vpop.eup %4581 }
 0x3b4   : > { %v1339_v37 = vsel %vm1305_vm2, %v4582_v34, 0.0 }
 0x3be   : > { %1499 = vrot.lane.b32.xlu1 %v5051_v53, %s4758_s25 }
 0x3c7   : > { %1446 = vrot.lane.b32.xlu0 %v5044_v36, %s4758_s25 }
 0x3e2   : > { %1340 = vadd.xlane.f32.xlu1 %v1339_v37 }
 0x3f3   : > { %1443 = vrot.lane.b32.xlu1 %v5053_v54, %s4758_s25 }
 0x3f7   : > { %1496 = vrot.lane.b32.xlu1 %v5066_v62, %s4758_s25 }
 0x432   : > { %v1332_v38 = vpop.xlane.xlu0 %1331 }
 0x433   : > { %4583 = vrcp.f32 %v1332_v38 }
 0x436   : > { %v1335_v39 = vpop.xlane.xlu1 %1334 }
 0x437   : > { %4585 = vrcp.f32 %v1335_v39 }
 0x43a   : > { %v1338_v40 = vpop.xlane.xlu0 %1337  ;;  %v1500_v49 = vpop.permute.xlu1 %1499 }
 0x43b   : > { %4587 = vrcp.f32 %v1338_v40  ;;  %v1505_v60 = vsel %vm1210_vm1, %v1500_v49, 0 }
 0x43e   : > { %v1447_v46 = vpop.permute.xlu0 %1446 }
 0x43f   : > { %v1452_v48 = vsel %vm1210_vm1, %v1447_v46, 0 }
 0x440   : > { %v4584_v41 = vpop.eup %4583 }
 0x441   : > { %v1346_v44 = vmul.f32 %v4584_v41, %v4576_v24 }
 0x444   : > { %v4586_v42 = vpop.eup %4585 }
 0x445   : > { %v1347_v45 = vmul.f32 %v4586_v42, %v4578_v27 }
 0x447   : > { %v1350_v47 = vpack.c.bf16 %v1347_v45, %v1346_v44 }
 0x448   : > { %v4588_v52 = vpop.eup %4587 }
 0x449   : > { %4283 = vmatmul.mubr.msk.bf16.vlgmr.msra.gmra.mxu1 %vm1305_vm2, %v1350_v47  ;;  %v1348_v57 = vmul.f32 %v4588_v52, %v4580_v29 }
 0x44a   : > { %4293 = vmatpush3.bf16.xpose.msra.mxu1 %v1452_v48  ;;  %4294 = vmatprep.mubr.msk.bf16.mxu1 %vm4757_vm0, %v4756_v15 }
 0x44b   : > { %4304 = vmatprep.subr.bf16.mxu1 %v4756_v15 }
 0x46b   : > { %v1341_v50 = vpop.xlane.xlu1 %1340 }
 0x46c   : > { %4589 = vrcp.f32 %v1341_v50 }
 0x46f   : > { %v1444_v51 = vpop.permute.xlu1 %1443 }
 0x470   : > { %4295 = vmatmul.mubr.msk.bf16.vlgmr.msra.gmra.mxu1 %vm1210_vm1, %v1444_v51 }
 0x471   : > { %4306 = vmatprep.mubr.msk.bf16.mxu1 %vm4757_vm0, %v4756_v15 }
 0x473   : > { %v1497_v61 = vpop.permute.xlu1 %1496 }
 0x479   : > { %v4590_v55 = vpop.eup %4589 }
 0x47a   : > { %v1349_v58 = vmul.f32 %v4590_v55, %v4582_v34 }
 0x47c   : > { %v1351_v59 = vpack.c.bf16 %v1349_v58, %v1348_v57 }
 0x47e   : > { %4289 = vmatmul.mubr.msk.bf16.vlgmr.msra.gmra.mxu0 %vm1305_vm2, %v1351_v59 }
 0x47f   : > { %4299 = vmatpush3.bf16.xpose.msra.mxu0 %v1505_v60  ;;  %4300 = vmatprep.mubr.msk.bf16.mxu0 %vm4757_vm0, %v4756_v15 }
 0x480   : > { %4310 = vmatprep.subr.bf16.mxu0 %v4756_v15 }
 0x486   : > { %4301 = vmatmul.mubr.msk.bf16.vlgmr.msra.gmra.mxu0 %vm1210_vm1, %v1497_v61 }
 0x487   : > { %4312 = vmatprep.mubr.msk.bf16.mxu0 %vm4757_vm0, %v4756_v15 }
 0x509   : > { %v5108_v0 = vpop.f32.mrf.mxu1 }
 0x50b   : > { %v4284_v1 = vpop.f32.mrf.mxu1 }
 0x50c   : > { %v4479_v1 = vld [vmem:[%s5929_s16 + $0x8] sm:$0xff]  }
 0x50d   : > { %v5110_v2 = vpop.f32.mrf.mxu1 }
 0x50e   : > { %v1440_v3 = vpack.c.bf16 %v5110_v2, %v5108_v0  ;;  %v4481_v2 = vld [vmem:[%s5929_s16 + $0x18] sm:$0xff]  }
 0x50f   : > { %v4285_v4 = vpop.f32.mrf.mxu1 }
 0x530   : > { %v1488_v5 = vpop.f32.mrf.mxu1 }
 0x531   : > { %v1548_v6 = vsel %vm1305_vm2, %v1488_v5, -inf }
 0x532   : > { %1549 = vmax.xlane.f32.xlu0 %v1548_v6  ;;  %v4296_v7 = vpop.f32.mrf.mxu1 }
 0x534   : > { %v1491_v8 = vpop.f32.mrf.mxu1 }
 0x535   : > { %v1551_v9 = vsel %vm1305_vm2, %v1491_v8, -inf }
 0x536   : > { %1552 = vmax.xlane.f32.xlu1 %v1551_v9  ;;  %v4297_v10 = vpop.f32.mrf.mxu1 }
 0x537   : > { %v4480_v10 = vld [vmem:[%s5929_s16] sm:$0xff]  }
 0x53e   : > { %v5116_v11 = vpop.f32.mrf.mxu0 }
 0x540   : > { %v4290_v12 = vpop.f32.mrf.mxu0 }
 0x542   : > { %v5118_v13 = vpop.f32.mrf.mxu0 }
 0x543   : > { %v1441_v14 = vpack.c.bf16 %v5118_v13, %v5116_v11 }
 0x544   : > { %v4291_v16 = vpop.f32.mrf.mxu0 }
 0x546   : > { %v1541_v17 = vpop.f32.mrf.mxu0 }
 0x547   : > { %v1554_v18 = vsel %vm1305_vm2, %v1541_v17, -inf }
 0x548   : > { %1555 = vmax.xlane.f32.xlu0 %v1554_v18  ;;  %v4302_v21 = vpop.f32.mrf.mxu0 }
 0x54a   : > { %v1544_v22 = vpop.f32.mrf.mxu0 }
 0x54b   : > { %v1557_v23 = vsel %vm1305_vm2, %v1544_v22, -inf }
 0x54c   : > { %1558 = vmax.xlane.f32.xlu0 %v1557_v23  ;;  %v4303_v24 = vpop.f32.mrf.mxu0 }
 0x5bb   : > { %v1550_v26 = vpop.xlane.xlu0 %1549 }
 0x5bc   : > { %v1560_v27 = vsub.f32 %v1488_v5, %v1550_v26 }
 0x5be   : > { %v1564_v28 = vmul.f32 1.442695, %v1560_v27 }
 0x5bf   : > { %v1553_v29 = vpop.xlane.xlu1 %1552 }
 0x5c0   : > { %4591 = vpow2.f32 %v1564_v28  ;;  %v1561_v30 = vsub.f32 %v1491_v8, %v1553_v29 }
 0x5c2   : > { %v1566_v31 = vmul.f32 1.442695, %v1561_v30 }
 0x5c4   : > { %4593 = vpow2.f32 %v1566_v31 }
 0x5cd   : > { %v4592_v32 = vpop.eup %4591 }
 0x5ce   : > { %v1572_v33 = vsel %vm1305_vm2, %v4592_v32, 0.0 }
 0x5cf   : > { %1573 = vadd.xlane.f32.xlu0 %v1572_v33 }
 0x5d1   : > { %v4594_v34 = vpop.eup %4593  ;;  %v1556_v37 = vpop.xlane.xlu0 %1555 }
 0x5d2   : > { %v1562_v38 = vsub.f32 %v1541_v17, %v1556_v37  ;;  %v1575_v39 = vsel %vm1305_vm2, %v4594_v34, 0.0 }
 0x5d3   : > { %1576 = vadd.xlane.f32.xlu1 %v1575_v39 }
 0x5d4   : > { %v1568_v40 = vmul.f32 1.442695, %v1562_v38 }
 0x5d5   : > { %v1559_v41 = vpop.xlane.xlu0 %1558 }
 0x5d6   : > { %4595 = vpow2.f32 %v1568_v40  ;;  %v1563_v42 = vsub.f32 %v1544_v22, %v1559_v41 }
 0x5d8   : > { %v1570_v44 = vmul.f32 1.442695, %v1563_v42 }
 0x5da   : > { %4597 = vpow2.f32 %v1570_v44 }
 0x5e3   : > { %v4596_v45 = vpop.eup %4595 }
 0x5e4   : > { %v1578_v46 = vsel %vm1305_vm2, %v4596_v45, 0.0 }
 0x5e5   : > { %1579 = vadd.xlane.f32.xlu0 %v1578_v46 }
 0x5e7   : > { %v4598_v47 = vpop.eup %4597 }
 0x5e8   : > { %v1581_v48 = vsel %vm1305_vm2, %v4598_v47, 0.0 }
 0x5e9   : > { %1582 = vadd.xlane.f32.xlu1 %v1581_v48 }
 0x5fa   : > { %1643 = vrot.lane.b32.xlu1 %v5068_v63, %s4758_s25 }
 0x5fb   : > { %1595 = vrot.lane.b32.xlu0 %v5055_v56, %s4758_s25 }
 0x5fe   : > { %1828 = vrot.lane.b32.xlu1 %v5044_v36, %s4759_s2 }
 0x5ff   : > { %1826 = vrot.lane.b32.xlu0 %v5053_v54, %s4759_s2 }
 0x602   : > { %1879 = vrot.lane.b32.xlu1 %v5051_v53, %s4759_s2 }
 0x606   : > { %1877 = vrot.lane.b32.xlu1 %v5066_v62, %s4759_s2 }
 0x658   : > { %v1574_v50 = vpop.xlane.xlu0 %1573 }
 0x65c   : > { %v1577_v49 = vpop.xlane.xlu1 %1576 }
 0x65d   : > { %4599 = vrcp.f32 %v1577_v49 }
 0x65e   : > { %4601 = vrcp.f32 %v1574_v50 }
 0x66a   : > { %v4600_v51 = vpop.eup %4599 }
 0x66b   : > { %v4602_v55 = vpop.eup %4601  ;;  %v1589_v57 = vmul.f32 %v4600_v51, %v4594_v34 }
 0x66c   : > { %v1588_v60 = vmul.f32 %v4602_v55, %v4592_v32 }
 0x66e   : > { %v1580_v52 = vpop.xlane.xlu0 %1579  ;;  %v1592_v61 = vpack.c.bf16 %v1589_v57, %v1588_v60 }
 0x66f   : > { %4603 = vrcp.f32 %v1580_v52 }
 0x672   : > { %v1583_v58 = vpop.xlane.xlu1 %1582  ;;  %v1596_v59 = vpop.permute.xlu0 %1595 }
 0x673   : > { %4605 = vrcp.f32 %v1583_v58  ;;  %4305 = vmatpush3.bf16.msra.mxu1 %v1596_v59 }
 0x674   : > { %4316 = vmatprep.subr.bf16.mxu1 %v4481_v2 }
 0x676   : > { %v1644_v4 = vpop.permute.xlu1 %1643  ;;  %4307 = vmatmul.mubr.msk.bf16.vlgmr.msra.gmra.mxu1 %vm1305_vm2, %v1592_v61  ;;  %v1827_v32 = vpop.permute.xlu0 %1826 }
 0x677   : > { %4311 = vmatpush3.bf16.msra.mxu0 %v1644_v4  ;;  %4317 = vmatpush3.bf16.msra.mxu1 %v4481_v2 }
 0x678   : > { %4324 = vmatprep.subr.bf16.mxu0 %v4479_v1 }
 0x67a   : > { %v1829_v12 = vpop.permute.xlu1 %1828 }
 0x67b   : > { %v1834_v28 = vsel %vm1210_vm1, %v1829_v12, 0 }
 0x67c   : > { %v4604_v5 = vpop.eup %4603 }
 0x67d   : > { %v1590_v7 = vmul.f32 %v4604_v5, %v4596_v45 }
 0x67e   : > { %v1880_v16 = vpop.permute.xlu1 %1879 }
 0x67f   : > { %v1885_v17 = vsel %vm1210_vm1, %v1880_v16, 0 }
 0x680   : > { %v4606_v6 = vpop.eup %4605 }
 0x681   : > { %v1591_v8 = vmul.f32 %v4606_v6, %v4598_v47 }
 0x682   : > { %v1878_v0 = vpop.permute.xlu1 %1877 }
 0x683   : > { %v1593_v9 = vpack.c.bf16 %v1591_v8, %v1590_v7 }
 0x685   : > { %4313 = vmatmul.mubr.msk.bf16.vlgmr.msra.gmra.mxu0 %vm1305_vm2, %v1593_v9 }
 0x686   : > { %4325 = vmatpush3.bf16.msra.mxu0 %v4479_v1  ;;  %4328 = vmatprep.mubr.msk.bf16.mxu0 %vm1210_vm1, %v1440_v3  ;;  %v4482_v3 = vld [vmem:[%s5929_s16 + $0x10] sm:$0xff]  }
 0x687   : > { %4326 = vmatprep.subr.bf16.mxu0 %v4480_v10  ;;  %4318 = vmatprep.subr.bf16.mxu1 %v4482_v3 }
 0x688   : > { %4319 = vmatpush3.bf16.msra.mxu1 %v4482_v3 }
 0x689   : > { %4332 = vmatprep.subr.bf16.mxu1 %v4756_v15 }
 0x68a   : > { %4327 = vmatpush3.bf16.msra.mxu0 %v4480_v10 }
 0x68b   : > { %4338 = vmatprep.subr.bf16.mxu0 %v4756_v15 }
 0x68d   : > { %4329 = vmatmul.mubr.msk.bf16.vlgmr.msra.gmra.mxu0 %vm1210_vm1, %v1441_v14 }
 0x68e   : > { %4339 = vmatpush3.bf16.xpose.msra.mxu0 %v1885_v17  ;;  %4340 = vmatprep.mubr.msk.bf16.mxu0 %vm4757_vm0, %v4756_v15 }
 0x68f   : > { %4350 = vmatprep.subr.bf16.mxu0 %v4756_v15 }
 0x695   : > { %4341 = vmatmul.mubr.msk.bf16.vlgmr.msra.gmra.mxu0 %vm1210_vm1, %v1878_v0 }
 0x696   : > { %4352 = vmatprep.mubr.msk.bf16.mxu0 %vm4757_vm0, %v4756_v15 }
 0x736   : > { %v1635_v11 = vpop.f32.mrf.mxu1 }
 0x738   : > { %v4308_v13 = vpop.f32.mrf.mxu1 }
 0x73a   : > { %v1638_v14 = vpop.f32.mrf.mxu1 }
 0x73b   : > { %v1690_v18 = vpack.c.bf16 %v1638_v14, %v1635_v11 }
 0x73c   : > { %v4309_v21 = vpop.f32.mrf.mxu1 }
 0x73d   : > { %4320 = vmatprep.mubr.msk.bf16.mxu1 %vm1210_vm1, %v1690_v18 }
 0x745   : > { %v1683_v22 = vpop.f32.mrf.mxu0 }
 0x747   : > { %v4314_v23 = vpop.f32.mrf.mxu0 }
 0x749   : > { %v1686_v24 = vpop.f32.mrf.mxu0 }
 0x74a   : > { %v1691_v26 = vpack.c.bf16 %v1686_v24, %v1683_v22 }
 0x74b   : > { %v4315_v27 = vpop.f32.mrf.mxu0 }
 0x74c   : > { %4321 = vmatmul.mubr.msk.bf16.vlgmr.msra.gmra.mxu1 %vm1210_vm1, %v1691_v26 }
 0x74d   : > { %4333 = vmatpush3.bf16.xpose.msra.mxu1 %v1834_v28  ;;  %v5166_v29 = vpop.f32.mrf.mxu0  ;;  %4334 = vmatprep.mubr.msk.bf16.mxu1 %vm4757_vm0, %v4756_v15 }
 0x74e   : > { %4344 = vmatprep.subr.bf16.mxu1 %v4756_v15 }
 0x74f   : > { %v5171_v30 = vpop.f32.mrf.mxu0 }
 0x751   : > { %v5173_v31 = vpop.f32.mrf.mxu0 }
 0x753   : > { %v5175_v33 = vpop.f32.mrf.mxu0 }
 0x754   : > { %4335 = vmatmul.mubr.msk.bf16.vlgmr.msra.gmra.mxu1 %vm1210_vm1, %v1827_v32 }
 0x755   : > { %v1921_v34 = vpop.f32.mrf.mxu0  ;;  %4346 = vmatprep.mubr.msk.bf16.mxu1 %vm4757_vm0, %v4756_v15 }
 0x756   : > { %v1934_v50 = vsel %vm1305_vm2, %v1921_v34, -inf }
 0x757   : > { %v4342_v37 = vpop.f32.mrf.mxu0 }
 0x759   : > { %v1924_v38 = vpop.f32.mrf.mxu0 }
 0x75a   : > { %v1937_v52 = vsel %vm1305_vm2, %v1924_v38, -inf }
 0x75b   : > { %v4343_v39 = vpop.f32.mrf.mxu0 }
 0x75c   : > { %v4483_v39 = vld [vmem:[%s5929_s16 + $0x28] sm:$0xff]  }
 0x80c   : > { %v5180_v40 = vpop.f32.mrf.mxu1 }
 0x80e   : > { %v5182_v41 = vpop.f32.mrf.mxu1 }
 0x810   : > { %v5184_v42 = vpop.f32.mrf.mxu1 }
 0x812   : > { %v5186_v44 = vpop.f32.mrf.mxu1 }
 0x814   : > { %v1870_v45 = vpop.f32.mrf.mxu1 }
 0x815   : > { %v1928_v46 = vsel %vm1305_vm2, %v1870_v45, -inf }
 0x816   : > { %1929 = vmax.xlane.f32.xlu0 %v1928_v46  ;;  %v4336_v47 = vpop.f32.mrf.mxu1 }
 0x818   : > { %v1873_v48 = vpop.f32.mrf.mxu1 }
 0x819   : > { %v1931_v49 = vsel %vm1305_vm2, %v1873_v48, -inf }
 0x81a   : > { %1932 = vmax.xlane.f32.xlu1 %v1931_v49  ;;  %v4337_v51 = vpop.f32.mrf.mxu1  ;;  %1935 = vmax.xlane.f32.xlu0 %v1934_v50 }
 0x81e   : > { %1938 = vmax.xlane.f32.xlu0 %v1937_v52 }
 0x89f   : > { %v1930_v55 = vpop.xlane.xlu0 %1929 }
 0x8a0   : > { %v1940_v57 = vsub.f32 %v1870_v45, %v1930_v55  ;;  %v4484_v45 = vld [vmem:[%s5929_s16 + $0x20] sm:$0xff]  }
 0x8a2   : > { %v1944_v4 = vmul.f32 1.442695, %v1940_v57 }
 0x8a3   : > { %v1933_v58 = vpop.xlane.xlu1 %1932  ;;  %v1936_v59 = vpop.xlane.xlu0 %1935 }
 0x8a4   : > { %v1942_v60 = vsub.f32 %v1921_v34, %v1936_v59  ;;  %v1941_v61 = vsub.f32 %v1873_v48, %v1933_v58 }
 0x8a6   : > { %v1948_v1 = vmul.f32 1.442695, %v1942_v60  ;;  %v1946_v7 = vmul.f32 1.442695, %v1941_v61 }
 0x8a7   : > { %v1939_v5 = vpop.xlane.xlu0 %1938 }
 0x8a8   : > { %v1943_v6 = vsub.f32 %v1924_v38, %v1939_v5  ;;  %4607 = vpow2.f32 %v1948_v1 }
 0x8a9   : > { %4609 = vpow2.f32 %v1944_v4 }
 0x8aa   : > { %v1950_v8 = vmul.f32 1.442695, %v1943_v6 }
 0x8ac   : > { %4611 = vpow2.f32 %v1950_v8 }
 0x8ad   : > { %4613 = vpow2.f32 %v1946_v7 }
 0x8b5   : > { %v4608_v9 = vpop.eup %4607 }
 0x8b6   : > { %v1958_v10 = vsel %vm1305_vm2, %v4608_v9, 0.0  ;;  %v4610_v12 = vpop.eup %4609 }
 0x8b7   : > { %1959 = vadd.xlane.f32.xlu0 %v1958_v10  ;;  %v1952_v2 = vsel %vm1305_vm2, %v4610_v12, 0.0 }
 0x8b9   : > { %v4612_v16 = vpop.eup %4611 }
 0x8ba   : > { %v1961_v17 = vsel %vm1305_vm2, %v4612_v16, 0.0  ;;  %v4614_v0 = vpop.eup %4613 }
 0x8bb   : > { %1962 = vadd.xlane.f32.xlu1 %v1961_v17  ;;  %1953 = vadd.xlane.f32.xlu0 %v1952_v2  ;;  %v1955_v3 = vsel %vm1305_vm2, %v4614_v0, 0.0 }
 0x8bf   : > { %1956 = vadd.xlane.f32.xlu1 %v1955_v3 }
 0x8d0   : > { %2021 = vrot.lane.b32.xlu1 %v5068_v63, %s4759_s2 }
 0x8d1   : > { %1974 = vrot.lane.b32.xlu0 %v5055_v56, %s4759_s2 }
 0x8d4   : > { %2143 = vrot.lane.b32.xlu1 %v5044_v36, %s4760_s17 }
 0x8d5   : > { %2141 = vrot.lane.b32.xlu0 %v5053_v54, %s4760_s17 }
 0x8d8   : > { %2194 = vrot.lane.b32.xlu1 %v5051_v53, %s4760_s17 }
 0x8dc   : > { %2192 = vrot.lane.b32.xlu1 %v5066_v62, %s4760_s17 }
 0x940   : > { %v1960_v11 = vpop.xlane.xlu0 %1959 }
 0x941   : > { %4615 = vrcp.f32 %v1960_v11  ;;  %v1820_v11 = vadd.f32 %v5166_v29, %v5180_v40 }
 0x944   : > { %v1963_v13 = vpop.xlane.xlu1 %1962  ;;  %v1954_v14 = vpop.xlane.xlu0 %1953 }
 0x945   : > { %4617 = vrcp.f32 %v1963_v13 }
 0x946   : > { %4619 = vrcp.f32 %v1954_v14  ;;  %v1812_v14 = vadd.f32 %v5171_v30, %v5182_v41 }
 0x948   : > { %v1957_v18 = vpop.xlane.xlu1 %1956  ;;  %v1975_v21 = vpop.permute.xlu0 %1974 }
 0x949   : > { %4621 = vrcp.f32 %v1957_v18  ;;  %4345 = vmatpush3.bf16.msra.mxu1 %v1975_v21  ;;  %v1823_v21 = vadd.f32 %v5173_v31, %v5184_v42 }
 0x94a   : > { %4356 = vmatprep.subr.bf16.mxu1 %v4483_v39 }
 0x94c   : > { %v2022_v36 = vpop.permute.xlu1 %2021  ;;  %v2142_v38 = vpop.permute.xlu0 %2141 }
 0x94d   : > { %4351 = vmatpush3.bf16.msra.mxu0 %v2022_v36 }
 0x94e   : > { %4364 = vmatprep.subr.bf16.mxu0 %v4756_v15  ;;  %v4616_v54 = vpop.eup %4615 }
 0x94f   : > { %v1970_v53 = vmul.f32 %v4616_v54, %v4608_v9 }
 0x950   : > { %v2144_v62 = vpop.permute.xlu1 %2143 }
 0x951   : > { %v2149_v28 = vsel %vm1210_vm1, %v2144_v62, 0 }
 0x952   : > { %v4618_v22 = vpop.eup %4617 }
 0x953   : > { %v1971_v23 = vmul.f32 %v4618_v22, %v4612_v16  ;;  %v4620_v24 = vpop.eup %4619  ;;  %v1815_v22 = vadd.f32 %v5175_v33, %v5186_v44 }
 0x954   : > { %v1968_v32 = vmul.f32 %v4620_v24, %v4610_v12  ;;  %v2195_v57 = vpop.permute.xlu1 %2194 }
 0x955   : > { %v1973_v26 = vpack.c.bf16 %v1971_v23, %v1970_v53  ;;  %v2200_v4 = vsel %vm1210_vm1, %v2195_v57, 0 }
 0x956   : > { %v4622_v27 = vpop.eup %4621 }
 0x957   : > { %4353 = vmatmul.mubr.msk.bf16.vlgmr.msra.gmra.mxu0 %vm1305_vm2, %v1973_v26  ;;  %v1969_v34 = vmul.f32 %v4622_v27, %v4614_v0 }
 0x958   : > { %4365 = vmatpush3.bf16.xpose.msra.mxu0 %v2149_v28  ;;  %4366 = vmatprep.mubr.msk.bf16.mxu0 %vm4757_vm0, %v4756_v15  ;;  %v2193_v8 = vpop.permute.xlu1 %2192 }
 0x959   : > { %v1972_v37 = vpack.c.bf16 %v1969_v34, %v1968_v32  ;;  %4376 = vmatprep.subr.bf16.mxu0 %v4756_v15 }
 0x95b   : > { %4347 = vmatmul.mubr.msk.bf16.vlgmr.msra.gmra.mxu1 %vm1305_vm2, %v1972_v37 }
 0x95c   : > { %4357 = vmatpush3.bf16.msra.mxu1 %v4483_v39 }
 0x95d   : > { %4358 = vmatprep.subr.bf16.mxu1 %v4484_v45 }
 0x95f   : > { %4367 = vmatmul.mubr.msk.bf16.vlgmr.msra.gmra.mxu0 %vm1210_vm1, %v2142_v38 }
 0x960   : > { %4378 = vmatprep.mubr.msk.bf16.mxu0 %vm4757_vm0, %v4756_v15  ;;  %4359 = vmatpush3.bf16.msra.mxu1 %v4484_v45 }
 0x961   : > { %4370 = vmatprep.subr.bf16.mxu1 %v4756_v15 }
 0xa17   : > { %v2061_v46 = vpop.f32.mrf.mxu0 }
 0xa19   : > { %v4354_v47 = vpop.f32.mrf.mxu0 }
 0xa1b   : > { %v2014_v48 = vpop.f32.mrf.mxu1  ;;  %v2064_v49 = vpop.f32.mrf.mxu0 }
 0xa1c   : > { %v2069_v60 = vpack.c.bf16 %v2064_v49, %v2061_v46 }
 0xa1d   : > { %v4348_v50 = vpop.f32.mrf.mxu1  ;;  %v4355_v51 = vpop.f32.mrf.mxu0 }
 0xa1f   : > { %v2017_v52 = vpop.f32.mrf.mxu1  ;;  %v2185_v55 = vpop.f32.mrf.mxu0 }
 0xa20   : > { %v2068_v58 = vpack.c.bf16 %v2017_v52, %v2014_v48  ;;  %v2243_v59 = vsel %vm1305_vm2, %v2185_v55, -inf }
 0xa21   : > { %v4349_v61 = vpop.f32.mrf.mxu1  ;;  %2244 = vmax.xlane.f32.xlu0 %v2243_v59  ;;  %v4368_v1 = vpop.f32.mrf.mxu0 }
 0xa22   : > { %4360 = vmatprep.mubr.msk.bf16.mxu1 %vm1210_vm1, %v2068_v58 }
 0xa23   : > { %4361 = vmatmul.mubr.msk.bf16.vlgmr.msra.gmra.mxu1 %vm1210_vm1, %v2069_v60  ;;  %v2188_v5 = vpop.f32.mrf.mxu0 }
 0xa24   : > { %4371 = vmatpush3.bf16.xpose.msra.mxu1 %v2200_v4  ;;  %v2246_v6 = vsel %vm1305_vm2, %v2188_v5, -inf  ;;  %4372 = vmatprep.mubr.msk.bf16.mxu1 %vm4757_vm0, %v4756_v15  ;;  %v4485_v4 = vld [vmem:[%s5929_s16 + $0x38] sm:$0xff]  }
 0xa25   : > { %2247 = vmax.xlane.f32.xlu1 %v2246_v6  ;;  %v4369_v7 = vpop.f32.mrf.mxu0  ;;  %4382 = vmatprep.subr.bf16.mxu1 %v4756_v15 }
 0xa2b   : > { %4373 = vmatmul.mubr.msk.bf16.vlgmr.msra.gmra.mxu1 %vm1210_vm1, %v2193_v8 }
 0xa2c   : > { %4384 = vmatprep.mubr.msk.bf16.mxu1 %vm4757_vm0, %v4756_v15 }
 0xaaa   : > { %v2245_v0 = vpop.xlane.xlu0 %2244 }
 0xaab   : > { %v2255_v2 = vsub.f32 %v2185_v55, %v2245_v0 }
 0xaad   : > { %v2259_v3 = vmul.f32 1.442695, %v2255_v2 }
 0xaae   : > { %v2248_v9 = vpop.xlane.xlu1 %2247 }
 0xaaf   : > { %v2256_v10 = vsub.f32 %v2188_v5, %v2248_v9  ;;  %v4486_v5 = vld [vmem:[%s5929_s16 + $0x30] sm:$0xff]  }
 0xab1   : > { %v2261_v12 = vmul.f32 1.442695, %v2256_v10 }
 0xab3   : > { %4623 = vpow2.f32 %v2261_v12 }
 0xab4   : > { %4625 = vpow2.f32 %v2259_v3 }
 0xac0   : > { %v4624_v16 = vpop.eup %4623 }
 0xac1   : > { %v2270_v17 = vsel %vm1305_vm2, %v4624_v16, 0.0  ;;  %v4626_v31 = vpop.eup %4625 }
 0xac2   : > { %2271 = vadd.xlane.f32.xlu1 %v2270_v17  ;;  %v2267_v26 = vsel %vm1305_vm2, %v4626_v31, 0.0 }
 0xae3   : > { %v4362_v13 = vpop.f32.mrf.mxu1 }
 0xae4   : > { %v5237_v15 = vadd.f32 %v4362_v13, %v1820_v11 }
 0xae5   : > { %v2122_v18 = vpop.f32.mrf.mxu1 }
 0xae6   : > { %v5241_v36 = vadd.f32 %v2122_v18, %v1812_v14  ;;  %v4711_v18 = vld [vmem:[%s4953_s23] sm:$0xff] }
 0xae7   : > { %v4363_v54 = vpop.f32.mrf.mxu1 }
 0xae8   : > { %v5245_v53 = vadd.f32 %v4363_v54, %v1823_v21 }
 0xae9   : > { %v2125_v29 = vpop.f32.mrf.mxu1 }
 0xaea   : > { %v5247_v40 = vadd.f32 %v2125_v29, %v1815_v22  ;;  %v4062_v29 = vld [vmem:[%s766_s1] ss:$0 sm:$0xff] }
 0xaeb   : > { %v2236_v23 = vpop.f32.mrf.mxu1 }
 0xaec   : > { %v2249_v30 = vsel %vm1305_vm2, %v2236_v23, -inf }
 0xaed   : > { %v4374_v41 = vpop.f32.mrf.mxu1  ;;  %2250 = vmax.xlane.f32.xlu0 %v2249_v30  ;;  %v4712_v30 = vld [vmem:[%s4953_s23 + $0x18] sm:$0xff] }
 0xaef   : > { %v2239_v24 = vpop.f32.mrf.mxu1 }
 0xaf0   : > { %v2252_v62 = vsel %vm1305_vm2, %v2239_v24, -inf }
 0xaf1   : > { %v4375_v42 = vpop.f32.mrf.mxu1  ;;  %2253 = vmax.xlane.f32.xlu0 %v2252_v62  ;;  %v4713_v62 = vld [vmem:[%s4953_s23 + $0x8] sm:$0xff] }
 0xaf5   : > { %2268 = vadd.xlane.f32.xlu0 %v2267_v26 }
 0xb4b   : > { %v2272_v47 = vpop.xlane.xlu1 %2271 }
 0xb76   : > { %v2251_v33 = vpop.xlane.xlu0 %2250 }
 0xb77   : > { %v2257_v44 = vsub.f32 %v2236_v23, %v2251_v33 }
 0xb79   : > { %v2263_v27 = vmul.f32 1.442695, %v2257_v44  ;;  %v4489_v44 = vld [vmem:[%s4932_s4 + $0xe4] ss:$16 sps:$4 sm:$0xff]  }
 0xb7a   : > { %v2254_v28 = vpop.xlane.xlu0 %2253 }
 0xb7b   : > { %4627 = vpow2.f32 %v2263_v27  ;;  %v2258_v32 = vsub.f32 %v2239_v24, %v2254_v28  ;;  %v4490_v27 = vld [vmem:[%s4932_s4 + $0xe8] ss:$16 sps:$4 sm:$0xff]   ;;  %v4492_v28 = vld [vmem:[%s4932_s4 + $0xec] ss:$16 sps:$4 sm:$0xff]  }
 0xb7d   : > { %v2265_v34 = vmul.f32 1.442695, %v2258_v32 }
 0xb7e   : > { %v2269_v46 = vpop.xlane.xlu0 %2268 }
 0xb7f   : > { %4629 = vpow2.f32 %v2265_v34 }
 0xb80   : > { %4631 = vrcp.f32 %v2269_v46 }
 0xb81   : > { %4633 = vrcp.f32 %v2272_v47 }
 0xb88   : > { %v4628_v37 = vpop.eup %4627 }
 0xb89   : > { %v2273_v38 = vsel %vm1305_vm2, %v4628_v37, 0.0 }
 0xb8a   : > { %2274 = vadd.xlane.f32.xlu0 %v2273_v38 }
 0xb8c   : > { %v4630_v39 = vpop.eup %4629 }
 0xb8d   : > { %v2276_v45 = vsel %vm1305_vm2, %v4630_v39, 0.0  ;;  %v4632_v48 = vpop.eup %4631 }
 0xb8e   : > { %2277 = vadd.xlane.f32.xlu1 %v2276_v45  ;;  %v4634_v50 = vpop.eup %4633  ;;  %v2283_v51 = vmul.f32 %v4632_v48, %v4626_v31  ;;  %v4714_v31 = vld [vmem:[%s4953_s23 + $0x10] sm:$0xff] }
 0xb8f   : > { %v2284_v57 = vmul.f32 %v4634_v50, %v4624_v16 }
 0xb9f   : > { %2336 = vrot.lane.b32.xlu1 %v5068_v63, %s4760_s17  ;;  %v2287_v63 = vpack.c.bf16 %v2284_v57, %v2283_v51 }
 0xba0   : > { %2289 = vrot.lane.b32.xlu0 %v5055_v56, %s4760_s17 }
 0xc13   : > { %v2275_v49 = vpop.xlane.xlu0 %2274 }
 0xc14   : > { %4635 = vrcp.f32 %v2275_v49 }
 0xc17   : > { %v2290_v52 = vpop.permute.xlu0 %2289  ;;  %v2278_v55 = vpop.xlane.xlu1 %2277 }
 0xc18   : > { %4637 = vrcp.f32 %v2278_v55  ;;  %4377 = vmatpush3.bf16.msra.mxu0 %v2290_v52 }
 0xc19   : > { %4388 = vmatprep.subr.bf16.mxu0 %v4485_v4 }
 0xc1b   : > { %4379 = vmatmul.mubr.msk.bf16.vlgmr.msra.gmra.mxu0 %vm1305_vm2, %v2287_v63  ;;  %v2337_v56 = vpop.permute.xlu1 %2336 }
 0xc1c   : > { %4383 = vmatpush3.bf16.msra.mxu1 %v2337_v56  ;;  %4389 = vmatpush3.bf16.msra.mxu0 %v4485_v4  ;;  %v4495_v56 = vld [vmem:[%s4932_s4 + $0xc4] ss:$16 sps:$4 sm:$0xff]   ;;  %v4499_v4 = vld [vmem:[%s4932_s4 + $0xa0] ss:$16 sps:$4 sm:$0xff]  }
 0xc1d   : > { %4390 = vmatprep.subr.bf16.mxu0 %v4486_v5  ;;  %2753 = vmatprep.subr.bf16.mxu1 %v4489_v44 }
 0xc20   : > { %4391 = vmatpush3.bf16.msra.mxu0 %v4486_v5  ;;  %v4502_v5 = vld [vmem:[%s4932_s4 + $0xa8] ss:$16 sps:$4 sm:$0xff]  }
 0xc21   : > { %v4636_v58 = vpop.eup %4635  ;;  %2806 = vmatprep.subr.bf16.mxu0 %v4492_v28 }
 0xc22   : > { %v2285_v60 = vmul.f32 %v4636_v58, %v4628_v37  ;;  %v4498_v58 = vld [vmem:[%s4932_s4 + $0xcc] ss:$16 sps:$4 sm:$0xff]  }
 0xc25   : > { %v4638_v59 = vpop.eup %4637 }
 0xc26   : > { %v2286_v61 = vmul.f32 %v4638_v59, %v4630_v39  ;;  %v4493_v59 = vld [vmem:[%s4932_s4 + $0xc0] ss:$16 sps:$4 sm:$0xff]  }
 0xc28   : > { %v2288_v1 = vpack.c.bf16 %v2286_v61, %v2285_v60  ;;  %v4496_v60 = vld [vmem:[%s4932_s4 + $0xc8] ss:$16 sps:$4 sm:$0xff]   ;;  %v4501_v61 = vld [vmem:[%s4932_s4 + $0xa4] ss:$16 sps:$4 sm:$0xff]  }
 0xc2a   : > { %4385 = vmatmul.mubr.msk.bf16.vlgmr.msra.gmra.mxu1 %vm1305_vm2, %v2288_v1  ;;  %v4504_v1 = vld [vmem:[%s4932_s4 + $0xac] ss:$16 sps:$4 sm:$0xff]  }
 0xc2b   : > { %2785 = vmatprep.mubr.bf16.mxu1 %v4755_v43 }
 0xcdb   : > { %v2329_v6 = vpop.f32.mrf.mxu0 }
 0xcdd   : > { %v4380_v7 = vpop.f32.mrf.mxu0 }
 0xcde   : > { %v4510_v7 = vld [vmem:[%s4932_s4 + $0x8c] ss:$16 sps:$4 sm:$0xff]  }
 0xcdf   : > { %v2332_v8 = vpop.f32.mrf.mxu0 }
 0xce0   : > { %v2383_v9 = vpack.c.bf16 %v2332_v8, %v2329_v6  ;;  %v4507_v6 = vld [vmem:[%s4932_s4 + $0x84] ss:$16 sps:$4 sm:$0xff]   ;;  %v4505_v8 = vld [vmem:[%s4932_s4 + $0x80] ss:$16 sps:$4 sm:$0xff]  }
 0xce1   : > { %v4381_v10 = vpop.f32.mrf.mxu0 }
 0xce2   : > { %4392 = vmatprep.mubr.msk.bf16.mxu0 %vm1210_vm1, %v2383_v9  ;;  %v4508_v9 = vld [vmem:[%s4932_s4 + $0x88] ss:$16 sps:$4 sm:$0xff]   ;;  %v4511_v10 = vld [vmem:[%s4932_s4 + $0x60] ss:$16 sps:$4 sm:$0xff]  }
 0xcea   : > { %v2376_v12 = vpop.f32.mrf.mxu1 }
 0xcec   : > { %v4386_v16 = vpop.f32.mrf.mxu1 }
 0xced   : > { %v4514_v16 = vld [vmem:[%s4932_s4 + $0x68] ss:$16 sps:$4 sm:$0xff]  }
 0xcee   : > { %v2379_v17 = vpop.f32.mrf.mxu1 }
 0xcef   : > { %v2384_v0 = vpack.c.bf16 %v2379_v17, %v2376_v12  ;;  %v4513_v12 = vld [vmem:[%s4932_s4 + $0x64] ss:$16 sps:$4 sm:$0xff]   ;;  %v4516_v17 = vld [vmem:[%s4932_s4 + $0x6c] ss:$16 sps:$4 sm:$0xff]  }
 0xcf0   : > { %v4387_v2 = vpop.f32.mrf.mxu1 }
 0xcf1   : > { %4393 = vmatmul.mubr.msk.bf16.vlgmr.msra.gmra.mxu0 %vm1210_vm1, %v2384_v0  ;;  %v4519_v0 = vld [vmem:[%s4932_s4 + $0x44] ss:$16 sps:$4 sm:$0xff]   ;;  %v4522_v2 = vld [vmem:[%s4932_s4 + $0x4c] ss:$16 sps:$4 sm:$0xff]  }
 0xcf2   : > { %2838 = vmatprep.mubr.bf16.mxu0 %v4755_v43  ;;  %2807 = vmatpush1.bf16.msra.mxu0 %v4490_v27 }
 0xcf3   : > { %2808 = vmatprep.subr.bf16.mxu0 %v4498_v58 }
 0xcf6   : > { %2809 = vmatpush1.bf16.msra.mxu0 %v4496_v60 }
 0xcf7   : > { %2810 = vmatprep.subr.bf16.mxu0 %v4504_v1 }
 0xcfa   : > { %2811 = vmatpush1.bf16.msra.mxu0 %v4502_v5  ;;  %v4537_v5 = vld [vmem:[%s4943_s14 + $0x38] sm:$0xff]  }
 0xcfb   : > { %2812 = vmatprep.subr.bf16.mxu0 %v4510_v7  ;;  %v4540_v7 = vld [vmem:[%s4943_s14 + $0xf0] sm:$0xff]  }
 0xcfe   : > { %2813 = vmatpush1.bf16.msra.mxu0 %v4508_v9  ;;  %v4542_v9 = vld [vmem:[%s4943_s14 + $0xb0] sm:$0xff]  }
 0xcff   : > { %2814 = vmatprep.subr.bf16.mxu0 %v4516_v17  ;;  %v4546_v17 = vld [vmem:[%s4943_s14 + $0xa8] sm:$0xff]  }
 0xd02   : > { %2815 = vmatpush1.bf16.msra.mxu0 %v4514_v16  ;;  %v4545_v16 = vld [vmem:[%s4943_s14 + $0x28] sm:$0xff]  }
 0xd03   : > { %2816 = vmatprep.subr.bf16.mxu0 %v4522_v2  ;;  %v4548_v2 = vld [vmem:[%s4943_s14 + $0xe0] sm:$0xff]  }
 0xdb1   : > { %v4394_v3 = vpop.f32.mrf.mxu0 }
 0xdb2   : > { %v2454_v23 = vadd.f32 %v4394_v3, %v5237_v15  ;;  %v4517_v3 = vld [vmem:[%s4932_s4 + $0x40] ss:$16 sps:$4 sm:$0xff]  }
 0xdb3   : > { %v2437_v11 = vpop.f32.mrf.mxu0 }
 0xdb4   : > { %v2452_v13 = vadd.f32 %v2437_v11, %v5241_v36  ;;  %v2458_v42 = vadd.f32 %v4714_v31, %v2454_v23  ;;  %v4520_v11 = vld [vmem:[%s4932_s4 + $0x48] ss:$16 sps:$4 sm:$0xff]  }
 0xdb5   : > { %v4395_v14 = vpop.f32.mrf.mxu0  ;;  %2817 = vmatpush1.bf16.msra.mxu0 %v4520_v11  ;;  %v4532_v23 = vld [vmem:[%s4932_s4 + $0x8] ss:$16 sps:$4 sm:$0xff]   ;;  %v4549_v11 = vld [vmem:[%s4943_s14 + $0x20] sm:$0xff]  }
 0xdb6   : > { %v2456_v21 = vadd.f32 %v4711_v18, %v2452_v13  ;;  %v2455_v54 = vadd.f32 %v4395_v14, %v5245_v53  ;;  %v5288_v15 = vadd.f32 %v4062_v29, %v2458_v42  ;;  %v4525_v13 = vld [vmem:[%s4932_s4 + $0x24] ss:$16 sps:$4 sm:$0xff]   ;;  %v4528_v14 = vld [vmem:[%s4932_s4 + $0x2c] ss:$16 sps:$4 sm:$0xff]   ;;  %v4523_v18 = vld [vmem:[%s4932_s4 + $0x20] ss:$16 sps:$4 sm:$0xff]  }
 0xdb7   : > { %v2440_v22 = vpop.f32.mrf.mxu0  ;;  %2818 = vmatprep.subr.bf16.mxu0 %v4528_v14  ;;  %v2587_v14 = vsub.s32 3, %v5030_v19 }
 0xdb8   : > { %v2459_v41 = vadd.f32 %v4712_v30, %v2455_v54  ;;  %v2453_v36 = vadd.f32 %v2440_v22, %v5247_v40  ;;  %v5277_v24 = vadd.f32 %v4062_v29, %v2456_v21  ;;  %5932 = vst [vmem:[#allocation13_spill] sm:$0xff] %v5288_v15  ;;  %v4487_v40 = vld [vmem:[%s4932_s4 + $0xe0] ss:$16 sps:$4 sm:$0xff]   ;;  %v4526_v21 = vld [vmem:[%s4932_s4 + $0x28] ss:$16 sps:$4 sm:$0xff]  }
 0xdb9   : > { %2754 = vmatpush1.bf16.msra.mxu1 %v4487_v40  ;;  %v4531_v54 = vld [vmem:[%s4932_s4 + $0x4] ss:$16 sps:$4 sm:$0xff]   ;;  %v4534_v22 = vld [vmem:[%s4932_s4 + $0xc] ss:$16 sps:$4 sm:$0xff]   ;;  %2819 = vmatpush1.bf16.msra.mxu0 %v4526_v21 }
 0xdba   : > { %v2457_v53 = vadd.f32 %v4713_v62, %v2453_v36  ;;  %2473 = vadd.xlane.f32.xlu1 %v5277_v24  ;;  %v5284_v33 = vadd.f32 %v4062_v29, %v2459_v41  ;;  %2755 = vmatprep.subr.bf16.mxu1 %v4495_v56 }
 0xdbb   : > { %2820 = vmatprep.subr.bf16.mxu0 %v4534_v22  ;;  %v4552_v22 = vld [vmem:[%s4943_s14 + $0xd8] sm:$0xff]  }
 0xdbc   : > { %v5282_v26 = vadd.f32 %v4062_v29, %v2457_v53  ;;  %5931 = vst [vmem:[#allocation12_spill] sm:$0xff] %v5284_v33  ;;  %v4529_v29 = vld [vmem:[%s4932_s4] ss:$16 sps:$4 sm:$0xff]  }
 0xdbd   : > { %2756 = vmatpush1.bf16.msra.mxu1 %v4493_v59  ;;  %2821 = vmatpush1.bf16.msra.mxu0 %v4532_v23  ;;  %v4554_v23 = vld [vmem:[%s4943_s14 + $0x98] sm:$0xff]  }
 0xdbe   : > { %5930 = vst [vmem:[#allocation11_spill] sm:$0xff] %v5282_v26  ;;  %2475 = vadd.xlane.f32.xlu0 %v5282_v26  ;;  %2479 = vadd.xlane.f32.xlu1 %v5284_v33 }
 0xdbf   : > { %2757 = vmatprep.subr.bf16.mxu1 %v4501_v61 }
 0xdc1   : > { %2758 = vmatpush1.bf16.msra.mxu1 %v4499_v4  ;;  %v4536_v4 = vld [vmem:[%s4943_s14 + $0xf8] sm:$0xff]  }
 0xdc2   : > { %2477 = vadd.xlane.f32.xlu0 %v5288_v15  ;;  %2759 = vmatprep.subr.bf16.mxu1 %v4507_v6  ;;  %v4538_v6 = vld [vmem:[%s4943_s14 + $0xb8] sm:$0xff]  }
 0xdc3   : > { %4220 = vmatprep.subr.bf16.mxu0 %v4536_v4  ;;  %v4565_v4 = vld [vmem:[%s4943_s14] sm:$0xff]  }
 0xdc5   : > { %2760 = vmatpush1.bf16.msra.mxu1 %v4505_v8  ;;  %v4541_v8 = vld [vmem:[%s4943_s14 + $0x30] sm:$0xff]  }
 0xdc6   : > { %2761 = vmatprep.subr.bf16.mxu1 %v4513_v12  ;;  %v4544_v12 = vld [vmem:[%s4943_s14 + $0xe8] sm:$0xff]  }
 0xdc9   : > { %2762 = vmatpush1.bf16.msra.mxu1 %v4511_v10  ;;  %v4543_v10 = vld [vmem:[%s4943_s14 + $0x68] sm:$0xff]  }
 0xdca   : > { %2763 = vmatprep.subr.bf16.mxu1 %v4519_v0  ;;  %v4547_v0 = vld [vmem:[%s4943_s14 + $0x60] sm:$0xff]  }
 0xdcd   : > { %2764 = vmatpush1.bf16.msra.mxu1 %v4517_v3  ;;  %v2571_v3 = vld [vmem:[%s797_s24] sm:$0xf] }
 0xdce   : > { %2765 = vmatprep.subr.bf16.mxu1 %v4525_v13  ;;  %v4550_v13 = vld [vmem:[%s4943_s14 + $0xa0] sm:$0xff]   ;;  %v5387_v21 = vrot.slane %v2571_v3, %v949_v35 }
 0xdd1   : > { %2766 = vmatpush1.bf16.msra.mxu1 %v4523_v18  ;;  %v5383_v18 = vrot.slane %v2571_v3, %v941_v25  ;;  %v5395_v25 = vrot.slane %v2571_v3, %v945_v20 }
 0xdd2   : > { %2767 = vmatprep.subr.bf16.mxu1 %v4531_v54  ;;  %v4551_v54 = vld [vmem:[%s4943_s14 + $0x58] sm:$0xff]  }
 0xdd5   : > { %2768 = vmatpush1.bf16.msra.mxu1 %v4529_v29  ;;  %v4553_v29 = vld [vmem:[%s4943_s14 + $0x18] sm:$0xff]  }
 0xe43   : > { %v2474_v32 = vpop.xlane.xlu1 %2473 }
 0xe44   : > { %v2481_v34 = vmul.f32 0.0078125, %v2474_v32 }
 0xe46   : > { %v5296_v37 = vsub.f32 %v5277_v24, %v2481_v34 }
 0xe47   : > { %v2476_v38 = vpop.xlane.xlu0 %2475  ;;  %v2480_v39 = vpop.xlane.xlu1 %2479 }
 0xe48   : > { %v2482_v45 = vmul.f32 0.0078125, %v2476_v38  ;;  %v2484_v46 = vmul.f32 0.0078125, %v2480_v39  ;;  %v2489_v47 = vmul.f32 %v5296_v37, %v5296_v37  ;;  %v4063_v39 = vld [vmem:[%s773_s5] ss:$0 sm:$0xff] }
 0xe4a   : > { %v5301_v48 = vsub.f32 %v5282_v26, %v2482_v45  ;;  %2493 = vadd.xlane.f32.xlu0 %v2489_v47  ;;  %v5304_v50 = vsub.f32 %v5284_v33, %v2484_v46 }
 0xe4b   : > { %v2478_v49 = vpop.xlane.xlu0 %2477 }
 0xe4c   : > { %v2483_v51 = vmul.f32 0.0078125, %v2478_v49  ;;  %v2490_v52 = vmul.f32 %v5301_v48, %v5301_v48  ;;  %v2492_v63 = vmul.f32 %v5304_v50, %v5304_v50  ;;  %v4064_v49 = vld [vmem:[%s5933_s15] ss:$0 sm:$0xff] }
 0xe4e   : > { %v5309_v55 = vsub.f32 %v5288_v15, %v2483_v51  ;;  %2495 = vadd.xlane.f32.xlu1 %v2490_v52 }
 0xe50   : > { %v2491_v57 = vmul.f32 %v5309_v55, %v5309_v55 }
 0xe52   : > { %2497 = vadd.xlane.f32.xlu0 %v2491_v57  ;;  %2499 = vadd.xlane.f32.xlu1 %v2492_v63 }
 0xed3   : > { %v2494_v30 = vpop.xlane.xlu0 %2493 }
 0xed4   : > { %v2501_v41 = vmul.f32 0.0078125, %v2494_v30 }
 0xed6   : > { %v2505_v36 = vadd.f32 1e-06, %v2501_v41 }
 0xed7   : > { %v2496_v62 = vpop.xlane.xlu1 %2495 }
 0xed8   : > { %4639 = vrsqrt.f32 %v2505_v36  ;;  %v2502_v53 = vmul.f32 0.0078125, %v2496_v62  ;;  %v5397_v36 = vrot.slane %v2571_v3, %v2587_v14 }
 0xeda   : > { %v2506_v31 = vadd.f32 1e-06, %v2502_v53  ;;  %v4555_v53 = vld [vmem:[%s4943_s14 + $0x50] sm:$0xff]  }
 0xedb   : > { %v2498_v42 = vpop.xlane.xlu0 %2497  ;;  %v2500_v40 = vpop.xlane.xlu1 %2499 }
 0xedc   : > { %4641 = vrsqrt.f32 %v2506_v31  ;;  %v2503_v44 = vmul.f32 0.0078125, %v2498_v42  ;;  %v2504_v27 = vmul.f32 0.0078125, %v2500_v40  ;;  %v4556_v31 = vld [vmem:[%s4943_s14 + $0xd0] sm:$0xff]  }
 0xede   : > { %v2507_v28 = vadd.f32 1e-06, %v2503_v44  ;;  %v2508_v32 = vadd.f32 1e-06, %v2504_v27  ;;  %v4557_v44 = vld [vmem:[%s4943_s14 + $0x10] sm:$0xff]  }
 0xedf   : > { %v4558_v27 = vld [vmem:[%s4943_s14 + $0x90] sm:$0xff]  }
 0xee0   : > { %4643 = vrsqrt.f32 %v2507_v28 }
 0xee1   : > { %4645 = vrsqrt.f32 %v2508_v32 }
 0xee5   : > { %v4640_v34 = vpop.eup %4639 }
 0xee6   : > { %v2513_v38 = vmul.f32 %v4640_v34, %v5296_v37 }
 0xee8   : > { %v2523_v47 = vmul.f32 %v4063_v39, %v2513_v38 }
 0xee9   : > { %v4642_v45 = vpop.eup %4641 }
 0xeea   : > { %v2514_v46 = vmul.f32 %v4642_v45, %v5301_v48  ;;  %v2533_v63 = vadd.f32 %v4064_v49, %v2523_v47 }
 0xeec   : > { %v2524_v51 = vmul.f32 %v4063_v39, %v2514_v46  ;;  %v4559_v46 = vld [vmem:[%s4943_s14 + $0x48] sm:$0xff]  }
 0xeed   : > { %v4644_v52 = vpop.eup %4643 }
 0xeee   : > { %v4646_v57 = vpop.eup %4645  ;;  %v2534_v37 = vadd.f32 %v4064_v49, %v2524_v51  ;;  %v2515_v56 = vmul.f32 %v4644_v52, %v5309_v55 }
 0xeef   : > { %v2516_v58 = vmul.f32 %v4646_v57, %v5304_v50  ;;  %v4535_v50 = vld [vmem:[%s4943_s14 + $0x78] sm:$0xff]  }
 0xef0   : > { %v2537_v48 = vpack.c.bf16 %v2534_v37, %v2533_v63  ;;  %v2525_v59 = vmul.f32 %v4063_v39, %v2515_v56  ;;  %4192 = vmatprep.subr.bf16.mxu1 %v4535_v50  ;;  %v4560_v37 = vld [vmem:[%s4943_s14 + $0xc8] sm:$0xff]  }
 0xef1   : > { %v2526_v60 = vmul.f32 %v4063_v39, %v2516_v58  ;;  %v4561_v56 = vld [vmem:[%s4943_s14 + $0x8] sm:$0xff]  }
 0xef2   : > { %2786 = vmatmul.mubr.bf16.vlgmr.msra.gmra.mxu1 %v2537_v48  ;;  %2839 = vmatmul.mubr.bf16.vlgmr.msra.gmra.mxu0 %v2537_v48  ;;  %v2535_v61 = vadd.f32 %v4064_v49, %v2525_v59  ;;  %v4562_v58 = vld [vmem:[%s4943_s14 + $0x88] sm:$0xff]  }
 0xef3   : > { %2795 = vmatprep.mubr.bf16.mxu1 %v4755_v43  ;;  %2848 = vmatprep.mubr.bf16.mxu0 %v4755_v43  ;;  %v2536_v1 = vadd.f32 %v4064_v49, %v2526_v60  ;;  %v4539_v43 = vld [vmem:[%s4943_s14 + $0x70] sm:$0xff]  }
 0xef4   : > { %4193 = vmatpush3.bf16.msra.mxu1 %v4537_v5  ;;  %4221 = vmatpush3.bf16.msra.mxu0 %v4538_v6  ;;  %v4566_v5 = vld [vmem:[%s4943_s14 + $0x80] sm:$0xff]  }
 0xef5   : > { %v2538_v55 = vpack.c.bf16 %v2536_v1, %v2535_v61  ;;  %4194 = vmatprep.subr.bf16.mxu1 %v4539_v43  ;;  %4222 = vmatprep.subr.bf16.mxu0 %v4540_v7  ;;  %v4563_v61 = vld [vmem:[%s4943_s14 + $0x40] sm:$0xff]  }
 0xef6   : > { %v4564_v1 = vld [vmem:[%s4943_s14 + $0xc0] sm:$0xff]  }
 0xef8   : > { %4195 = vmatpush3.bf16.msra.mxu1 %v4541_v8  ;;  %4223 = vmatpush3.bf16.msra.mxu0 %v4542_v9 }
 0xef9   : > { %4196 = vmatprep.subr.bf16.mxu1 %v4543_v10  ;;  %4224 = vmatprep.subr.bf16.mxu0 %v4544_v12 }
 0xefa   : > { %2796 = vmatmul.mubr.bf16.gmra.mxu1 %v2538_v55  ;;  %2849 = vmatmul.mubr.bf16.gmra.mxu0 %v2538_v55 }
 0xefc   : > { %4197 = vmatpush3.bf16.msra.mxu1 %v4545_v16  ;;  %4225 = vmatpush3.bf16.msra.mxu0 %v4546_v17 }
 0xefd   : > { %4198 = vmatprep.subr.bf16.mxu1 %v4547_v0  ;;  %4226 = vmatprep.subr.bf16.mxu0 %v4548_v2 }
 0xf00   : > { %4199 = vmatpush3.bf16.msra.mxu1 %v4549_v11  ;;  %4227 = vmatpush3.bf16.msra.mxu0 %v4550_v13 }
 0xf01   : > { %4200 = vmatprep.subr.bf16.mxu1 %v4551_v54  ;;  %4228 = vmatprep.subr.bf16.mxu0 %v4552_v22 }
 0xf04   : > { %4201 = vmatpush3.bf16.msra.mxu1 %v4553_v29  ;;  %4229 = vmatpush3.bf16.msra.mxu0 %v4554_v23 }
 0xf05   : > { %4202 = vmatprep.subr.bf16.mxu1 %v4555_v53  ;;  %4230 = vmatprep.subr.bf16.mxu0 %v4556_v31 }
 0xf08   : > { %4203 = vmatpush3.bf16.msra.mxu1 %v4557_v44  ;;  %4231 = vmatpush3.bf16.msra.mxu0 %v4558_v27 }
 0xf09   : > { %4204 = vmatprep.subr.bf16.mxu1 %v4559_v46  ;;  %4232 = vmatprep.subr.bf16.mxu0 %v4560_v37 }
 0xf0c   : > { %4205 = vmatpush3.bf16.msra.mxu1 %v4561_v56  ;;  %4233 = vmatpush3.bf16.msra.mxu0 %v4562_v58 }
 0xf0d   : > { %4206 = vmatprep.subr.bf16.mxu1 %v4563_v61  ;;  %4234 = vmatprep.subr.bf16.mxu0 %v4564_v1 }
 0xf10   : > { %4207 = vmatpush3.bf16.msra.mxu1 %v4565_v4  ;;  %4235 = vmatpush3.bf16.msra.mxu0 %v4566_v5 }
 0xfb2   : > { %v2787_v30 = vpop.f32.mrf.mxu1  ;;  %v2840_v41 = vpop.f32.mrf.mxu0 }
 0xfb3   : > { %v5400_v35 = vadd.f32 %v2787_v30, %v5383_v18  ;;  %v5403_v62 = vadd.f32 %v2840_v41, %v5387_v21 }
 0xfb4   : > { %v2789_v42 = vpop.f32.mrf.mxu1  ;;  %v2842_v40 = vpop.f32.mrf.mxu0 }
 0xfb5   : > { %v5410_v19 = vmul.f32 0.70710677, %v5400_v35  ;;  %v5413_v20 = vmul.f32 0.70710677, %v5403_v62  ;;  %v5416_v28 = vadd.f32 %v2789_v42, %v5395_v25  ;;  %v5419_v32 = vadd.f32 %v2842_v40, %v5397_v36 }
 0xfb6   : > { %v2791_v45 = vpop.f32.mrf.mxu1  ;;  %v2844_v59 = vpop.f32.mrf.mxu0 }
 0xfb7   : > { %v5422_v34 = vand.u32 2147483647, %v5410_v19  ;;  %v5425_v38 = vand.u32 2147483647, %v5413_v20  ;;  %v5428_v39 = vmul.f32 0.70710677, %v5416_v28  ;;  %v5449_v6 = vadd.f32 %v2791_v45, %v5383_v18 }
 0xfb8   : > { %v5437_v52 = vmul.f32 0.70710677, %v5419_v32  ;;  %v2793_v60 = vpop.f32.mrf.mxu1  ;;  %v5452_v43 = vadd.f32 %v2844_v59, %v5387_v21  ;;  %v2846_v0 = vpop.f32.mrf.mxu0  ;;  %vm2891_vm3 = vcmp.ge.f32.partialorder %v5410_v19, 0.0  ;;  %vm2893_vm4 = vcmp.ge.f32.partialorder %v5413_v20, 0.0 }
 0xfb9   : > { %v2939_v47 = vmul.f32 0.3275911, %v5422_v34  ;;  %v2941_v49 = vmul.f32 0.3275911, %v5425_v38  ;;  %v5434_v51 = vand.u32 2147483647, %v5428_v39  ;;  %v5455_v7 = vadd.f32 %v2793_v60, %v5395_v25 }
 0xfba   : > { %v2926_v50 = vand.u32 2147483647, %v5437_v52  ;;  %v5458_v9 = vmul.f32 0.70710677, %v5449_v6  ;;  %v5461_v12 = vmul.f32 0.70710677, %v5452_v43  ;;  %v5477_v13 = vadd.f32 %v2846_v0, %v5397_v36 }
 0xfbb   : > { %v2955_v57 = vadd.f32 1.0, %v2939_v47  ;;  %v2957_v63 = vadd.f32 1.0, %v2941_v49  ;;  %v2940_v48 = vmul.f32 0.3275911, %v5434_v51  ;;  %v5467_v17 = vmul.f32 0.70710677, %v5455_v7 }
 0xfbc   : > { %v2942_v8 = vmul.f32 0.3275911, %v2926_v50  ;;  %v5464_v16 = vand.u32 2147483647, %v5458_v9  ;;  %v5471_v3 = vand.u32 2147483647, %v5461_v12 }
 0xfbd   : > { %4647 = vrcp.f32 %v2955_v57  ;;  %v2956_v55 = vadd.f32 1.0, %v2940_v48  ;;  %v5474_v11 = vand.u32 2147483647, %v5467_v17  ;;  %v5482_v41 = vmul.f32 0.70710677, %v5477_v13 }
 0xfbe   : > { %4649 = vrcp.f32 %v2957_v63  ;;  %v2958_v10 = vadd.f32 1.0, %v2942_v8  ;;  %v2943_v2 = vmul.f32 0.3275911, %v5464_v16  ;;  %v2945_v54 = vmul.f32 0.3275911, %v5471_v3 }
 0xfbf   : > { %4651 = vrcp.f32 %v2956_v55  ;;  %v2944_v22 = vmul.f32 0.3275911, %v5474_v11  ;;  %v5485_v40 = vand.u32 2147483647, %v5482_v41  ;;  %v3179_v27 = vsub.f32 0.0, %v5422_v34 }
 0xfc0   : > { %4653 = vrcp.f32 %v2958_v10  ;;  %v2959_v14 = vadd.f32 1.0, %v2943_v2  ;;  %v2961_v29 = vadd.f32 1.0, %v2945_v54  ;;  %v3181_v46 = vsub.f32 0.0, %v5425_v38 }
 0xfc1   : > { %v2960_v30 = vadd.f32 1.0, %v2944_v22  ;;  %v2946_v49 = vmul.f32 0.3275911, %v5485_v40  ;;  %v3195_v48 = vmul.f32 %v3179_v27, %v5422_v34  ;;  %v3182_v60 = vsub.f32 0.0, %v2926_v50  ;;  %v2797_v34 = vpop.f32.mrf.mxu1 }
 0xfc2   : > { %4655 = vrcp.f32 %v2959_v14  ;;  %v3197_v1 = vmul.f32 %v3181_v46, %v5425_v38  ;;  %v5504_v38 = vmul.f32 0.5, %v5400_v35  ;;  %v5510_v46 = vadd.f32 %v2797_v34, %v5383_v18  ;;  %v2850_v34 = vpop.f32.mrf.mxu0 }
 0xfc3   : > { %4657 = vrcp.f32 %v2961_v29  ;;  %v3211_v2 = vmul.f32 1.442695, %v3195_v48  ;;  %v3198_v22 = vmul.f32 %v3182_v60, %v2926_v50  ;;  %vm2892_vm5 = vcmp.ge.f32.partialorder %v5428_v39, 0.0 }
 0xfc4   : > { %4659 = vrcp.f32 %v2960_v30  ;;  %vm2894_vm6 = vcmp.ge.f32.partialorder %v5437_v52, 0.0  ;;  %vm2895_vm7 = vcmp.ge.f32.partialorder %v5458_v9, 0.0  ;;  %vm2897_vm8 = vcmp.ge.f32.partialorder %v5461_v12, 0.0 }
 0xfc5   : > { %v3217_v50 = vmul.f32 1.442695, %v3198_v22  ;;  %v3184_v22 = vsub.f32 0.0, %v5474_v11  ;;  %vm2896_vm9 = vcmp.ge.f32.partialorder %v5467_v17, 0.0  ;;  %vm2898_vm10 = vcmp.ge.f32.partialorder %v5482_v41, 0.0 }
 0xfca   : > { %v4648_v23 = vpop.eup %4647 }
 0xfcb   : > { %v4650_v53 = vpop.eup %4649  ;;  %v2987_v31 = vmul.f32 %v4648_v23, %v2955_v57  ;;  %v3180_v57 = vsub.f32 0.0, %v5434_v51 }
 0xfcc   : > { %v2989_v42 = vmul.f32 %v4650_v53, %v2957_v63  ;;  %v4652_v44 = vpop.eup %4651  ;;  %v2962_v63 = vadd.f32 1.0, %v2946_v49 }
 0xfcd   : > { %v3003_v45 = vsub.f32 2.0, %v2987_v31  ;;  %v2988_v47 = vmul.f32 %v4652_v44, %v2956_v55  ;;  %v4654_v56 = vpop.eup %4653  ;;  %v3196_v8 = vmul.f32 %v3180_v57, %v5434_v51 }
 0xfce   : > { %v3005_v37 = vsub.f32 2.0, %v2989_v42  ;;  %v2990_v59 = vmul.f32 %v4654_v56, %v2958_v10  ;;  %4661 = vrcp.f32 %v2962_v63 }
 0xfcf   : > { %v3004_v58 = vsub.f32 2.0, %v2988_v47  ;;  %v5492_v61 = vmul.f32 %v4648_v23, %v3003_v45  ;;  %v4656_v0 = vpop.eup %4655  ;;  %v3215_v23 = vmul.f32 1.442695, %v3197_v1  ;;  %v3213_v27 = vmul.f32 1.442695, %v3196_v8 }
 0xfd0   : > { %v5495_v4 = vmul.f32 %v4650_v53, %v3005_v37  ;;  %v3006_v5 = vsub.f32 2.0, %v2990_v59  ;;  %v2991_v31 = vmul.f32 %v4656_v0, %v2959_v14  ;;  %4663 = vpow2.f32 %v3211_v2 }
 0xfd1   : > { %v5497_v55 = vmul.f32 %v4652_v44, %v3004_v58  ;;  %v3035_v10 = vmul.f32 1.0614054, %v5492_v61  ;;  %v4658_v44 = vpop.eup %4657  ;;  %v3183_v47 = vsub.f32 0.0, %v5464_v16  ;;  %v5514_v37 = vmul.f32 0.5, %v5403_v62 }
 0xfd2   : > { %v5500_v54 = vmul.f32 %v4654_v56, %v3006_v5  ;;  %v3037_v53 = vmul.f32 1.0614054, %v5495_v4  ;;  %v3007_v45 = vsub.f32 2.0, %v2991_v31  ;;  %v2993_v14 = vmul.f32 %v4658_v44, %v2961_v29  ;;  %v4660_v49 = vpop.eup %4659 }
 0xfd3   : > { %v3036_v42 = vmul.f32 1.0614054, %v5497_v55  ;;  %v3051_v35 = vadd.f32 -1.4531521, %v3035_v10  ;;  %4665 = vpow2.f32 %v3215_v23  ;;  %v2992_v59 = vmul.f32 %v4660_v49, %v2960_v30 }
 0xfd4   : > { %v3038_v51 = vmul.f32 1.0614054, %v5500_v54  ;;  %v5516_v56 = vmul.f32 %v4656_v0, %v3007_v45  ;;  %v3053_v58 = vadd.f32 -1.4531521, %v3037_v53  ;;  %v3009_v48 = vsub.f32 2.0, %v2993_v14 }
 0xfd5   : > { %v3052_v57 = vadd.f32 -1.4531521, %v3036_v42  ;;  %4667 = vpow2.f32 %v3213_v27  ;;  %v5520_v5 = vmul.f32 0.70710677, %v5510_v46  ;;  %v3199_v29 = vmul.f32 %v3183_v47, %v5464_v16 }
 0xfd6   : > { %v3054_v60 = vadd.f32 -1.4531521, %v3038_v51  ;;  %v3039_v1 = vmul.f32 1.0614054, %v5516_v56  ;;  %4669 = vpow2.f32 %v3217_v50  ;;  %v5523_v8 = vmul.f32 %v4658_v44, %v3009_v48 }
 0xfd7   : > { %v3008_v62 = vsub.f32 2.0, %v2992_v59  ;;  %v3067_v0 = vmul.f32 %v3051_v35, %v5492_v61  ;;  %v3186_v30 = vsub.f32 0.0, %v5485_v40  ;;  %v3069_v23 = vmul.f32 %v3053_v58, %v5495_v4 }
 0xfd8   : > { %v3055_v2 = vadd.f32 -1.4531521, %v3039_v1  ;;  %v3068_v31 = vmul.f32 %v3052_v57, %v5497_v55  ;;  %v3041_v53 = vmul.f32 1.0614054, %v5523_v8  ;;  %v3070_v16 = vmul.f32 %v3054_v60, %v5500_v54 }
 0xfd9   : > { %v5531_v42 = vmul.f32 %v4660_v49, %v3008_v62  ;;  %v5536_v51 = vand.u32 2147483647, %v5520_v5  ;;  %v3185_v50 = vsub.f32 0.0, %v5471_v3  ;;  %v5541_v14 = vadd.f32 %v2850_v34, %v5387_v21 }
 0xfda   : > { %v3071_v44 = vmul.f32 %v3055_v2, %v5516_v56  ;;  %v3057_v45 = vadd.f32 -1.4531521, %v3041_v53  ;;  %v3083_v49 = vadd.f32 1.4214138, %v3067_v0  ;;  %v3200_v58 = vmul.f32 %v3184_v22, %v5474_v11 }
 0xfdb   : > { %v4662_v10 = vpop.eup %4661  ;;  %v3040_v47 = vmul.f32 1.0614054, %v5531_v42  ;;  %v3085_v48 = vadd.f32 1.4214138, %v3069_v23  ;;  %v3086_v1 = vadd.f32 1.4214138, %v3070_v16  ;;  %v3202_v2 = vmul.f32 %v3186_v30, %v5485_v40 }
 0xfdc   : > { %v2994_v27 = vmul.f32 %v4662_v10, %v2962_v63  ;;  %v3087_v35 = vadd.f32 1.4214138, %v3071_v44  ;;  %v3084_v63 = vadd.f32 1.4214138, %v3068_v31  ;;  %v3073_v59 = vmul.f32 %v3057_v45, %v5523_v8 }
 0xfdd   : > { %v3056_v60 = vadd.f32 -1.4531521, %v3040_v47  ;;  %v2947_v34 = vmul.f32 0.3275911, %v5536_v51  ;;  %v5554_v22 = vmul.f32 0.70710677, %v5541_v14  ;;  %v5556_v23 = vpop.eup %4663  ;;  %v3099_v31 = vmul.f32 %v3083_v49, %v5492_v61 }
 0xfde   : > { %v3010_v57 = vsub.f32 2.0, %v2994_v27  ;;  %v3103_v0 = vmul.f32 %v3087_v35, %v5516_v56  ;;  %v3089_v53 = vadd.f32 1.4214138, %v3073_v59  ;;  %v3201_v16 = vmul.f32 %v3185_v50, %v5471_v3 }
 0xfdf   : > { %v3072_v11 = vmul.f32 %v3056_v60, %v5531_v42  ;;  %v3101_v44 = vmul.f32 %v3085_v48, %v5495_v4  ;;  %v3100_v27 = vmul.f32 %v3084_v63, %v5497_v55  ;;  %v3221_v47 = vmul.f32 1.442695, %v3200_v58 }
 0xfe0   : > { %v5546_v62 = vmul.f32 %v4662_v10, %v3010_v57  ;;  %v3219_v10 = vmul.f32 1.442695, %v3199_v29  ;;  %v5561_v30 = vpop.eup %4665  ;;  %v3102_v35 = vmul.f32 %v3086_v1, %v5500_v54  ;;  %v3105_v57 = vmul.f32 %v3089_v53, %v5523_v8 }
 0xfe1   : > { %v3088_v45 = vadd.f32 1.4214138, %v3072_v11  ;;  %v3225_v60 = vmul.f32 1.442695, %v3202_v2  ;;  %v3119_v29 = vadd.f32 -0.28449672, %v3103_v0 }
 0xfe2   : > { %v3042_v40 = vmul.f32 1.0614054, %v5546_v62  ;;  %v5567_v49 = vpop.eup %4667  ;;  %v5570_v50 = vadd.f32 1.0, %v2947_v34  ;;  %v5573_v33 = vand.u32 2147483647, %v5554_v22  ;;  %4671 = vpow2.f32 %v3219_v10  ;;  %v2799_v34 = vpop.f32.mrf.mxu1 }
 0xfe3   : > { %v3104_v3 = vmul.f32 %v3088_v45, %v5531_v42  ;;  %v5575_v48 = vpop.eup %4669  ;;  %v3115_v63 = vadd.f32 -0.28449672, %v3099_v31  ;;  %v3223_v58 = vmul.f32 1.442695, %v3201_v16  ;;  %v3117_v53 = vadd.f32 -0.28449672, %v3101_v44 }
 0xfe4   : > { %v3058_v59 = vadd.f32 -1.4531521, %v3042_v40  ;;  %v3116_v11 = vadd.f32 -0.28449672, %v3100_v27  ;;  %4673 = vpow2.f32 %v3221_v47  ;;  %v3118_v40 = vadd.f32 -0.28449672, %v3102_v35 }
 0xfe5   : > { %v3120_v2 = vadd.f32 -0.28449672, %v3104_v3  ;;  %v3121_v0 = vadd.f32 -0.28449672, %v3105_v57  ;;  %4675 = vpow2.f32 %v3225_v60  ;;  %v4761_v45 = vmov -1.0  }
 0xfe6   : > { %v3074_v1 = vmul.f32 %v3058_v59, %v5546_v62  ;;  %v5581_v26 = vsel %vm2891_vm3, 1.0, %v4761_v45  ;;  %v3135_v31 = vmul.f32 %v3119_v29, %v5516_v56  ;;  %4677 = vrcp.f32 %v5570_v50 }
 0xfe7   : > { %v2949_v10 = vmul.f32 0.3275911, %v5573_v33  ;;  %v3131_v16 = vmul.f32 %v3115_v63, %v5492_v61  ;;  %4679 = vpow2.f32 %v3223_v58  ;;  %v3136_v44 = vmul.f32 %v3120_v2, %v5531_v42 }
 0xfe8   : > { %v3090_v15 = vadd.f32 1.4214138, %v3074_v1  ;;  %v3133_v47 = vmul.f32 %v3117_v53, %v5495_v4  ;;  %v3132_v35 = vmul.f32 %v3116_v11, %v5497_v55  ;;  %v5594_v57 = vadd.f32 %v2799_v34, %v5395_v25  ;;  %v2852_v1 = vpop.f32.mrf.mxu0 }
 0xfe9   : > { %v5591_v19 = vadd.f32 1.0, %v2949_v10  ;;  %v5599_v59 = vsel %vm2893_vm4, 1.0, %v4761_v45  ;;  %v3134_v60 = vmul.f32 %v3118_v40, %v5500_v54  ;;  %v3137_v29 = vmul.f32 %v3121_v0, %v5523_v8 }
 0xfea   : > { %v3106_v27 = vmul.f32 %v3090_v15, %v5546_v62  ;;  %v5604_v15 = vmul.f32 0.5, %v5416_v28  ;;  %v5608_v63 = vmul.f32 0.5, %v5419_v32  ;;  %v3151_v58 = vadd.f32 0.2548296, %v3135_v31 }
 0xfeb   : > { %v3147_v53 = vadd.f32 0.2548296, %v3131_v16  ;;  %v3152_v20 = vadd.f32 0.2548296, %v3136_v44  ;;  %v3149_v2 = vadd.f32 0.2548296, %v3133_v47  ;;  %4681 = vrcp.f32 %v5591_v19 }
 0xfec   : > { %v3122_v3 = vadd.f32 -0.28449672, %v3106_v27  ;;  %v3148_v40 = vadd.f32 0.2548296, %v3132_v35  ;;  %v5614_v28 = vmul.f32 0.70710677, %v5594_v57  ;;  %v5617_v32 = vadd.f32 %v2852_v1, %v5397_v36 }
 0xfed   : > { %v3150_v0 = vadd.f32 0.2548296, %v3134_v60  ;;  %v3153_v34 = vadd.f32 0.2548296, %v3137_v29  ;;  %v5622_v52 = vsel %vm2892_vm5, 1.0, %v4761_v45  ;;  %v5625_v31 = vsel %vm2894_vm6, 1.0, %v4761_v45 }
 0xfee   : > { %v3138_v11 = vmul.f32 %v3122_v3, %v5546_v62  ;;  %v5628_v16 = vmul.f32 0.5, %v5449_v6  ;;  %v3167_v44 = vmul.f32 %v3151_v58, %v5516_v56  ;;  %v5633_v27 = vmul.f32 0.5, %v5452_v43 }
 0xfef   : > { %v3168_v47 = vmul.f32 %v3152_v20, %v5531_v42  ;;  %v4672_v39 = vpop.eup %4671  ;;  %v3163_v35 = vmul.f32 %v3147_v53, %v5492_v61  ;;  %v3165_v60 = vmul.f32 %v3149_v2, %v5495_v4  ;;  %v5641_v6 = vand.u32 2147483647, %v5614_v28  ;;  %v2801_v20 = vpop.f32.mrf.mxu1 }
 0xff0   : > { %v3154_v10 = vadd.f32 0.2548296, %v3138_v11  ;;  %v3164_v9 = vmul.f32 %v3148_v40, %v5497_v55  ;;  %v3166_v43 = vmul.f32 %v3150_v0, %v5500_v54  ;;  %v3169_v3 = vmul.f32 %v3153_v34, %v5523_v8  ;;  %v2854_v34 = vpop.f32.mrf.mxu0 }
 0xff1   : > { %v4674_v56 = vpop.eup %4673  ;;  %v5647_v58 = vmul.f32 0.70710677, %v5617_v32  ;;  %v2911_v61 = vsel %vm2895_vm7, 1.0, %v4761_v45  ;;  %v3247_v1 = vmul.f32 %v4672_v39, %v3167_v44  ;;  %v5651_v4 = vmul.f32 0.5, %v5455_v7 }
 0xff2   : > { %v3170_v29 = vmul.f32 %v3154_v10, %v5546_v62  ;;  %v4676_v42 = vpop.eup %4675  ;;  %v2948_v62 = vmul.f32 0.3275911, %v5641_v6  ;;  %v2913_v55 = vsel %vm2897_vm8, 1.0, %v4761_v45  ;;  %v3248_v54 = vmul.f32 %v4674_v56, %v3168_v47 }
 0xff3   : > { %v4678_v53 = vpop.eup %4677  ;;  %v5659_v8 = vand.u32 2147483647, %v5647_v58  ;;  %v3243_v2 = vmul.f32 %v5556_v23, %v3163_v35  ;;  %v3245_v7 = vmul.f32 %v5561_v30, %v3165_v60  ;;  %v3244_v10 = vmul.f32 %v5567_v49, %v3164_v9  ;;  %v2803_v9 = vpop.f32.mrf.mxu1 }
 0xff4   : > { %v4680_v11 = vpop.eup %4679  ;;  %v3250_v40 = vmul.f32 %v4676_v42, %v3170_v29  ;;  %v5663_v0 = vadd.f32 1.0, %v2948_v62  ;;  %v3246_v12 = vmul.f32 %v5575_v48, %v3166_v43  ;;  %v3263_v39 = vsub.f32 1.0, %v3247_v1 }
 0xff5   : > { %v3249_v44 = vmul.f32 %v4680_v11, %v3169_v3  ;;  %v2950_v47 = vmul.f32 0.3275911, %v5659_v8  ;;  %v2995_v56 = vmul.f32 %v4678_v53, %v5570_v50  ;;  %v5671_v23 = vadd.f32 %v2801_v20, %v5383_v18 }
 0xff6   : > { %4683 = vrcp.f32 %v5663_v0  ;;  %v2912_v30 = vsel %vm2896_vm9, 1.0, %v4761_v45  ;;  %v3264_v35 = vsub.f32 1.0, %v3248_v54  ;;  %v5679_v49 = vadd.f32 %v2854_v34, %v5387_v21  ;;  %v2856_v34 = vpop.f32.mrf.mxu0 }
 0xff7   : > { %v5676_v60 = vadd.f32 1.0, %v2950_v47  ;;  %v3259_v48 = vsub.f32 1.0, %v3243_v2  ;;  %v3261_v29 = vsub.f32 1.0, %v3245_v7  ;;  %v3266_v50 = vsub.f32 1.0, %v3250_v40 }
 0xff8   : > { %v4682_v43 = vpop.eup %4681  ;;  %v3260_v3 = vsub.f32 1.0, %v3244_v10  ;;  %v3265_v18 = vsub.f32 1.0, %v3249_v44  ;;  %v5684_v17 = vmul.f32 0.70710677, %v5671_v23  ;;  %v3262_v42 = vsub.f32 1.0, %v3246_v12 }
 0xff9   : > { %4685 = vrcp.f32 %v5676_v60  ;;  %v3279_v1 = vmul.f32 %v3263_v39, %v2911_v61  ;;  %v3011_v62 = vsub.f32 2.0, %v2995_v56  ;;  %v5687_v21 = vmul.f32 0.70710677, %v5679_v49 }
 0xffa   : > { %v3280_v54 = vmul.f32 %v3264_v35, %v2912_v30  ;;  %v2914_v20 = vsel %vm2898_vm10, 1.0, %v4761_v45  ;;  %v5691_v41 = vand.u32 2147483647, %v5684_v17  ;;  %v5694_v11 = vadd.f32 %v2803_v9, %v5395_v25 }
 0xffb   : > { %v3275_v2 = vmul.f32 %v3259_v48, %v5581_v26  ;;  %v2866_v7 = vmul.f32 0.5, %v5477_v13  ;;  %v3282_v40 = vmul.f32 %v3266_v50, %v2914_v20  ;;  %v2997_v61 = vmul.f32 %v4682_v43, %v5591_v19 }
 0xffc   : > { %v3277_v10 = vmul.f32 %v3261_v29, %v5599_v59  ;;  %v3276_v12 = vmul.f32 %v3260_v3, %v5622_v52  ;;  %v3281_v44 = vmul.f32 %v3265_v18, %v2913_v55  ;;  %v2951_v47 = vmul.f32 0.3275911, %v5691_v41 }
 0xffd   : > { %v3278_v39 = vmul.f32 %v3262_v42, %v5625_v31  ;;  %v3295_v56 = vadd.f32 1.0, %v3279_v1  ;;  %v5703_v25 = vmul.f32 %v4678_v53, %v3011_v62  ;;  %v5706_v26 = vand.u32 2147483647, %v5687_v21 }
 0xffe   : > { %v3296_v13 = vadd.f32 1.0, %v3280_v54  ;;  %v5708_v30 = vadd.f32 1.0, %v2951_v47  ;;  %v5711_v19 = vmul.f32 0.70710677, %v5694_v11  ;;  %v5714_v59 = vadd.f32 %v2856_v34, %v5397_v36 }
 0xfff   : > { %v3298_v52 = vadd.f32 1.0, %v3282_v40  ;;  %v3187_v55 = vsub.f32 0.0, %v5536_v51  ;;  %v3013_v35 = vsub.f32 2.0, %v2997_v61  ;;  %v2953_v31 = vmul.f32 0.3275911, %v5706_v26 }
0x1000   : > { %v3291_v53 = vadd.f32 1.0, %v3275_v2  ;;  %v3293_v48 = vadd.f32 1.0, %v3277_v10  ;;  %v3297_v29 = vadd.f32 1.0, %v3281_v44  ;;  %4687 = vrcp.f32 %v5708_v30 }
0x1001   : > { %v3292_v50 = vadd.f32 1.0, %v3276_v12  ;;  %v3294_v9 = vadd.f32 1.0, %v3278_v39  ;;  %v3043_v3 = vmul.f32 1.0614054, %v5703_v25  ;;  %v5720_v18 = vadd.f32 1.0, %v2953_v31 }
0x1002   : > { %v3311_v36 = vmul.f32 %v3295_v56, %v5628_v16  ;;  %v3312_v1 = vmul.f32 %v3296_v13, %v5651_v4  ;;  %v5725_v62 = vand.u32 2147483647, %v5711_v19  ;;  %v5728_v54 = vmul.f32 0.70710677, %v5714_v59 }
0x1003   : > { %v4684_v42 = vpop.eup %4683  ;;  %v3314_v20 = vmul.f32 %v3298_v52, %v2866_v7  ;;  %v5730_v2 = vmul.f32 %v4682_v43, %v3013_v35  ;;  %4689 = vrcp.f32 %v5720_v18  ;;  %v3307_v61 = vmul.f32 %v3291_v53, %v5504_v38 }
0x1004   : > { %v2996_v40 = vmul.f32 %v4684_v42, %v5663_v0  ;;  %v3309_v34 = vmul.f32 %v3293_v48, %v5514_v37  ;;  %v3313_v16 = vmul.f32 %v3297_v29, %v5633_v27  ;;  %v2952_v4 = vmul.f32 0.3275911, %v5725_v62 }
0x1005   : > { %v3308_v12 = vmul.f32 %v3292_v50, %v5604_v15  ;;  %v3310_v44 = vmul.f32 %v3294_v9, %v5608_v63  ;;  %v3059_v7 = vadd.f32 -1.4531521, %v3043_v3  ;;  %v3323_v47 = vpack.c.bf16 %v3311_v36, %v3307_v61 }
0x1006   : > { %v4686_v10 = vpop.eup %4685  ;;  %v3012_v43 = vsub.f32 2.0, %v2996_v40  ;;  %v5741_v39 = vadd.f32 1.0, %v2952_v4  ;;  %v5744_v38 = vand.u32 2147483647, %v5728_v54  ;;  %v3045_v37 = vmul.f32 1.0614054, %v5730_v2 }
0x1007   : > { %v2998_v0 = vmul.f32 %v4686_v10, %v5676_v60  ;;  %v3324_v56 = vpack.c.bf16 %v3312_v1, %v3308_v12  ;;  %v3326_v13 = vpack.c.bf16 %v3314_v20, %v3310_v44  ;;  %v3325_v52 = vpack.c.bf16 %v3313_v16, %v3309_v34 }
0x1008   : > { %v5747_v27 = vmul.f32 %v4684_v42, %v3012_v43  ;;  %4691 = vrcp.f32 %v5741_v39  ;;  %v2954_v63 = vmul.f32 0.3275911, %v5744_v38  ;;  %v3075_v35 = vmul.f32 %v3059_v7, %v5703_v25 }
0x1009   : > { %v3014_v15 = vsub.f32 2.0, %v2998_v0  ;;  %3626 = vmatprep.mubr.bf16.mxu1 %v3324_v56  ;;  %3675 = vmatprep.mubr.bf16.mxu0 %v3326_v13  ;;  %v3188_v31 = vsub.f32 0.0, %v5641_v6  ;;  %v3203_v29 = vmul.f32 %v3187_v55, %v5536_v51  ;;  %v3061_v50 = vadd.f32 -1.4531521, %v3045_v37 }
0x100a   : > { %v3044_v60 = vmul.f32 1.0614054, %v5747_v27  ;;  %v5756_v48 = vadd.f32 1.0, %v2954_v63  ;;  %3627 = vmatmul.mubr.bf16.vlgmr.msra.gmra.mxu1 %v3323_v47  ;;  %3676 = vmatmul.mubr.bf16.vlgmr.msra.gmra.mxu0 %v3325_v52  ;;  %v3189_v3 = vsub.f32 0.0, %v5573_v33  ;;  %v3191_v36 = vsub.f32 0.0, %v5691_v41 }
0x100b   : > { %v5754_v53 = vmul.f32 %v4686_v10, %v3014_v15  ;;  %v3091_v20 = vadd.f32 1.4214138, %v3075_v35  ;;  %v3204_v61 = vmul.f32 %v3188_v31, %v5641_v6  ;;  %v3190_v16 = vsub.f32 0.0, %v5659_v8 }
0x100c   : > { %v3060_v9 = vadd.f32 -1.4531521, %v3044_v60  ;;  %4693 = vrcp.f32 %v5756_v48  ;;  %v3227_v55 = vmul.f32 1.442695, %v3203_v29  ;;  %v3077_v4 = vmul.f32 %v3061_v50, %v5730_v2 }
0x100d   : > { %v3046_v42 = vmul.f32 1.0614054, %v5754_v53  ;;  %v4688_v1 = vpop.eup %4687  ;;  %v3193_v12 = vsub.f32 0.0, %v5706_v26  ;;  %v3205_v7 = vmul.f32 %v3189_v3, %v5573_v33  ;;  %v3207_v0 = vmul.f32 %v3191_v36, %v5691_v41 }
0x100e   : > { %v3076_v40 = vmul.f32 %v3060_v9, %v5747_v27  ;;  %v2999_v51 = vmul.f32 %v4688_v1, %v5708_v30  ;;  %v3107_v6 = vmul.f32 %v3091_v20, %v5703_v25  ;;  %v3229_v56 = vmul.f32 1.442695, %v3204_v61 }
0x100f   : > { %v3062_v34 = vadd.f32 -1.4531521, %v3046_v42  ;;  %v3206_v52 = vmul.f32 %v3190_v16, %v5659_v8  ;;  %v3093_v63 = vadd.f32 1.4214138, %v3077_v4  ;;  %v3209_v33 = vmul.f32 %v3193_v12, %v5706_v26 }
0x1010   : > { %v3092_v10 = vadd.f32 1.4214138, %v3076_v40  ;;  %v4690_v44 = vpop.eup %4689  ;;  %v3015_v47 = vsub.f32 2.0, %v2999_v51  ;;  %v3192_v60 = vsub.f32 0.0, %v5725_v62  ;;  %4695 = vpow2.f32 %v3227_v55 }
0x1011   : > { %v3078_v43 = vmul.f32 %v3062_v34, %v5754_v53  ;;  %v3001_v30 = vmul.f32 %v4690_v44, %v5720_v18  ;;  %v3231_v41 = vmul.f32 1.442695, %v3205_v7  ;;  %v3235_v29 = vmul.f32 1.442695, %v3207_v0 }
0x1012   : > { %v3108_v37 = vmul.f32 %v3092_v10, %v5747_v27  ;;  %v5776_v15 = vmul.f32 %v4688_v1, %v3015_v47  ;;  %v3123_v9 = vadd.f32 -0.28449672, %v3107_v6  ;;  %4697 = vpow2.f32 %v3229_v56 }
0x1013   : > { %v3094_v13 = vadd.f32 1.4214138, %v3078_v43  ;;  %v3017_v35 = vsub.f32 2.0, %v3001_v30  ;;  %v3233_v8 = vmul.f32 1.442695, %v3206_v52  ;;  %v3109_v26 = vmul.f32 %v3093_v63, %v5730_v2 }
0x1014   : > { %v3047_v31 = vmul.f32 1.0614054, %v5776_v15  ;;  %v3124_v18 = vadd.f32 -0.28449672, %v3108_v37  ;;  %v3239_v40 = vmul.f32 1.442695, %v3209_v33  ;;  %v3208_v61 = vmul.f32 %v3192_v60, %v5725_v62 }
0x1015   : > { %v4692_v50 = vpop.eup %4691  ;;  %v3110_v3 = vmul.f32 %v3094_v13, %v5754_v53  ;;  %v5782_v42 = vmul.f32 %v4690_v44, %v3017_v35  ;;  %4699 = vpow2.f32 %v3235_v29  ;;  %v3194_v51 = vsub.f32 0.0, %v5744_v38 }
0x1016   : > { %v3063_v36 = vadd.f32 -1.4531521, %v3047_v31  ;;  %v3000_v1 = vmul.f32 %v4692_v50, %v5741_v39  ;;  %v3139_v4 = vmul.f32 %v3123_v9, %v5703_v25  ;;  %v3140_v10 = vmul.f32 %v3124_v18, %v5747_v27 }
0x1017   : > { %v3049_v20 = vmul.f32 1.0614054, %v5782_v42  ;;  %v3126_v12 = vadd.f32 -0.28449672, %v3110_v3  ;;  %4701 = vpow2.f32 %v3233_v8  ;;  %v3125_v62 = vadd.f32 -0.28449672, %v3109_v26 }
0x1018   : > { %v3079_v34 = vmul.f32 %v3063_v36, %v5776_v15  ;;  %v3016_v16 = vsub.f32 2.0, %v3000_v1  ;;  %4703 = vpow2.f32 %v3239_v40  ;;  %v3237_v0 = vmul.f32 1.442695, %v3208_v61 }
0x1019   : > { %v4694_v55 = vpop.eup %4693  ;;  %v3065_v39 = vadd.f32 -1.4531521, %v3049_v20  ;;  %v3210_v56 = vmul.f32 %v3194_v51, %v5744_v38  ;;  %4705 = vpow2.f32 %v3231_v41  ;;  %v3156_v13 = vadd.f32 0.2548296, %v3140_v10 }
0x101a   : > { %v3095_v44 = vadd.f32 1.4214138, %v3079_v34  ;;  %v5792_v7 = vmul.f32 %v4692_v50, %v3016_v16  ;;  %v3002_v43 = vmul.f32 %v4694_v55, %v5756_v48  ;;  %v3142_v52 = vmul.f32 %v3126_v12, %v5754_v53 }
0x101b   : > { %v3081_v47 = vmul.f32 %v3065_v39, %v5782_v42  ;;  %v3155_v60 = vadd.f32 0.2548296, %v3139_v4  ;;  %v3141_v31 = vmul.f32 %v3125_v62, %v5730_v2  ;;  %4707 = vpow2.f32 %v3237_v0 }
0x101c   : > { %v3111_v6 = vmul.f32 %v3095_v44, %v5776_v15  ;;  %v3048_v37 = vmul.f32 1.0614054, %v5792_v7  ;;  %v3018_v30 = vsub.f32 2.0, %v3002_v43  ;;  %v3241_v41 = vmul.f32 1.442695, %v3210_v56 }
0x101d   : > { %v3097_v63 = vadd.f32 1.4214138, %v3081_v47  ;;  %v4696_v18 = vpop.eup %4695  ;;  %v3172_v3 = vmul.f32 %v3156_v13, %v5747_v27  ;;  %v3158_v8 = vadd.f32 0.2548296, %v3142_v52  ;;  %v3171_v61 = vmul.f32 %v3155_v60, %v5703_v25 }
0x101e   : > { %v3127_v35 = vadd.f32 -0.28449672, %v3111_v6  ;;  %v3064_v33 = vadd.f32 -1.4531521, %v3048_v37  ;;  %v5800_v48 = vmul.f32 %v4694_v55, %v3018_v30  ;;  %v3157_v34 = vadd.f32 0.2548296, %v3141_v31 }
0x101f   : > { %v3113_v29 = vmul.f32 %v3097_v63, %v5782_v42  ;;  %v4698_v40 = vpop.eup %4697  ;;  %4709 = vpow2.f32 %v3241_v41  ;;  %vm2899_vm11 = vcmp.ge.f32.partialorder %v5520_v5, 0.0  ;;  %v3174_v39 = vmul.f32 %v3158_v8, %v5754_v53 }
0x1020   : > { %v3143_v50 = vmul.f32 %v3127_v35, %v5776_v15  ;;  %v3080_v9 = vmul.f32 %v3064_v33, %v5792_v7  ;;  %v3050_v38 = vmul.f32 1.0614054, %v5800_v48  ;;  %v3252_v27 = vmul.f32 %v4698_v40, %v3172_v3 }
0x1021   : > { %v3129_v36 = vadd.f32 -0.28449672, %v3113_v29  ;;  %v3251_v47 = vmul.f32 %v4696_v18, %v3171_v61  ;;  %v3173_v0 = vmul.f32 %v3157_v34, %v5730_v2  ;;  %vm2900_vm12 = vcmp.ge.f32.partialorder %v5614_v28, 0.0 }
0x1022   : > { %v3159_v1 = vadd.f32 0.2548296, %v3143_v50  ;;  %v3096_v26 = vadd.f32 1.4214138, %v3080_v9  ;;  %v3066_v20 = vadd.f32 -1.4531521, %v3050_v38  ;;  %v4700_v10 = vpop.eup %4699 }
0x1023   : > { %v3145_v16 = vmul.f32 %v3129_v36, %v5782_v42  ;;  %v2915_v30 = vsel %vm2899_vm11, 1.0, %v4761_v45  ;;  %vm2903_vm13 = vcmp.ge.f32.partialorder %v5684_v17, 0.0  ;;  %v3268_v52 = vsub.f32 1.0, %v3252_v27 }
0x1024   : > { %v3175_v51 = vmul.f32 %v3159_v1, %v5776_v15  ;;  %v3112_v55 = vmul.f32 %v3096_v26, %v5792_v7  ;;  %v3082_v4 = vmul.f32 %v3066_v20, %v5800_v48  ;;  %v4702_v62 = vpop.eup %4701  ;;  %v3267_v33 = vsub.f32 1.0, %v3251_v47 }
0x1025   : > { %v3161_v12 = vadd.f32 0.2548296, %v3145_v16  ;;  %v4704_v6 = vpop.eup %4703  ;;  %v3254_v63 = vmul.f32 %v4702_v62, %v3174_v39  ;;  %vm2901_vm14 = vcmp.ge.f32.partialorder %v5554_v22, 0.0  ;;  %v2916_v28 = vsel %vm2900_vm12, 1.0, %v4761_v45 }
0x1026   : > { %v3255_v44 = vmul.f32 %v4700_v10, %v3175_v51  ;;  %v3128_v43 = vadd.f32 -0.28449672, %v3112_v55  ;;  %v3098_v25 = vadd.f32 1.4214138, %v3082_v4  ;;  %v4706_v13 = vpop.eup %4705  ;;  %vm2902_vm15 = vcmp.ge.f32.partialorder %v5647_v58, 0.0 }
0x1027   : > { %v3177_v15 = vmul.f32 %v3161_v12, %v5782_v42  ;;  %v3253_v42 = vmul.f32 %v4706_v13, %v3173_v0  ;;  %v2919_v31 = vsel %vm2903_vm13, 1.0, %v4761_v45  ;;  %vm2905_vm0 = vcmp.ge.f32.partialorder %v5687_v21, 0.0 }
0x1028   : > { %v3144_v37 = vmul.f32 %v3128_v43, %v5792_v7  ;;  %v3114_v5 = vmul.f32 %v3098_v25, %v5800_v48  ;;  %v3271_v53 = vsub.f32 1.0, %v3255_v44  ;;  %v4708_v60 = vpop.eup %4707  ;;  %vm2904_vm1 = vcmp.ge.f32.partialorder %v5711_v19, 0.0 }
0x1029   : > { %v3257_v56 = vmul.f32 %v4704_v6, %v3177_v15  ;;  %v3284_v38 = vmul.f32 %v3268_v52, %v2916_v28  ;;  %v3270_v41 = vsub.f32 1.0, %v3254_v63  ;;  %v3283_v8 = vmul.f32 %v3267_v33, %v2915_v30 }
0x102a   : > { %v3160_v35 = vadd.f32 0.2548296, %v3144_v37  ;;  %v3130_v2 = vadd.f32 -0.28449672, %v3114_v5  ;;  %v3287_v50 = vmul.f32 %v3271_v53, %v2919_v31  ;;  %v2917_v58 = vsel %vm2901_vm14, 1.0, %v4761_v45 }
0x102b   : > { %v3273_v9 = vsub.f32 1.0, %v3257_v56  ;;  %v3269_v36 = vsub.f32 1.0, %v3253_v42  ;;  %v2921_v1 = vsel %vm2905_vm0, 1.0, %v4761_v45  ;;  %v2920_v61 = vsel %vm2904_vm1, 1.0, %v4761_v45 }
0x102c   : > { %v3176_v17 = vmul.f32 %v3160_v35, %v5792_v7  ;;  %v3146_v29 = vmul.f32 %v3130_v2, %v5800_v48  ;;  %v2918_v7 = vsel %vm2902_vm15, 1.0, %v4761_v45  ;;  %v4710_v20 = vpop.eup %4709  ;;  %v3303_v40 = vadd.f32 1.0, %v3287_v50 }
0x102d   : > { %v3289_v19 = vmul.f32 %v3273_v9, %v2921_v1  ;;  %vm2906_vm2 = vcmp.ge.f32.partialorder %v5728_v54, 0.0  ;;  %v3300_v34 = vadd.f32 1.0, %v3284_v38  ;;  %v3286_v16 = vmul.f32 %v3270_v41, %v2918_v7 }
0x102e   : > { %v3256_v18 = vmul.f32 %v4708_v60, %v3176_v17  ;;  %v3162_v3 = vadd.f32 0.2548296, %v3146_v29  ;;  %v3299_v55 = vadd.f32 1.0, %v3283_v8  ;;  %v3285_v4 = vmul.f32 %v3269_v36, %v2917_v58  ;;  %v5934_v8 = vld [vmem:[#allocation11_spill] sm:$0xff] }
0x102f   : > { %v2871_v10 = vmul.f32 0.5, %v5671_v23  ;;  %v2868_v27 = vmul.f32 0.5, %v5594_v57  ;;  %v2872_v12 = vmul.f32 0.5, %v5694_v11  ;;  %v2867_v44 = vmul.f32 0.5, %v5510_v46 }
0x1030   : > { %v3272_v26 = vsub.f32 1.0, %v3256_v18  ;;  %v3178_v21 = vmul.f32 %v3162_v3, %v5800_v48  ;;  %v3305_v25 = vadd.f32 1.0, %v3289_v19  ;;  %v2922_v54 = vsel %vm2906_vm2, 1.0, %v4761_v45 }
0x1031   : > { %v3319_v43 = vmul.f32 %v3303_v40, %v2871_v10  ;;  %v3316_v62 = vmul.f32 %v3300_v34, %v2868_v27  ;;  %v3302_v47 = vadd.f32 1.0, %v3286_v16  ;;  %v3315_v6 = vmul.f32 %v3299_v55, %v2867_v44  ;;  %v5935_v55 = vld [vmem:[#allocation13_spill] sm:$0xff] }
0x1032   : > { %v3288_v51 = vmul.f32 %v3272_v26, %v2920_v61  ;;  %v3258_v22 = vmul.f32 %v4710_v20, %v3178_v21  ;;  %v3301_v37 = vadd.f32 1.0, %v3285_v4  ;;  %v2873_v23 = vmul.f32 0.5, %v5679_v49 }
0x1033   : > { %v2870_v57 = vmul.f32 0.5, %v5617_v32  ;;  %v2874_v11 = vmul.f32 0.5, %v5714_v59  ;;  %v2869_v46 = vmul.f32 0.5, %v5541_v14  ;;  %v3327_v56 = vpack.c.bf16 %v3319_v43, %v3315_v6  ;;  %v4097_v59 = vld [vmem:[%s813_s26] ss:$0 sm:$0xff] }
0x1034   : > { %v3304_v48 = vadd.f32 1.0, %v3288_v51  ;;  %v3274_v39 = vsub.f32 1.0, %v3258_v22  ;;  %v3321_v53 = vmul.f32 %v3305_v25, %v2873_v23 }
0x1035   : > { %v3318_v45 = vmul.f32 %v3302_v47, %v2870_v57  ;;  %v3317_v52 = vmul.f32 %v3301_v37, %v2869_v46 }
0x1036   : > { %v3320_v0 = vmul.f32 %v3304_v48, %v2872_v12  ;;  %v3290_v15 = vmul.f32 %v3274_v39, %v2922_v54  ;;  %v5936_v12 = vld [vmem:[#allocation12_spill] sm:$0xff] }
0x1037   : > { %v3329_v35 = vpack.c.bf16 %v3321_v53, %v3317_v52 }
0x1038   : > { %v3306_v5 = vadd.f32 1.0, %v3290_v15  ;;  %v3328_v30 = vpack.c.bf16 %v3320_v0, %v3316_v62 }
0x103a   : > { %v3322_v13 = vmul.f32 %v3306_v5, %v2874_v11  ;;  %3634 = vmatprep.mubr.bf16.mxu1 %v3328_v30 }
0x103b   : > { %3635 = vmatmul.mubr.bf16.gmra.mxu1 %v3327_v56 }
0x103c   : > { %v3330_v63 = vpack.c.bf16 %v3322_v13, %v3318_v45 }
0x103e   : > { %3683 = vmatprep.mubr.bf16.mxu0 %v3330_v63 }
0x103f   : > { %3684 = vmatmul.mubr.bf16.gmra.mxu0 %v3329_v35 }
0x10ca   : > { %v4208_v49 = vpop.f32.mrf.mxu1  ;;  %v4236_v32 = vpop.f32.mrf.mxu0 }
0x10cc   : > { %v4209_v14 = vpop.f32.mrf.mxu1  ;;  %v4237_v2 = vpop.f32.mrf.mxu0 }
0x10cd   : > { %v4210_v33 = vadd.f32 %v4209_v14, %v4208_v49  ;;  %v4238_v31 = vadd.f32 %v4237_v2, %v4236_v32 }
0x10ce   : > { %v4211_v42 = vpop.f32.mrf.mxu1  ;;  %v4239_v28 = vpop.f32.mrf.mxu0 }
0x10cf   : > { %v3629_v60 = vadd.f32 %v4210_v33, %v4097_v59 }
0x10d0   : > { %v4212_v17 = vpop.f32.mrf.mxu1  ;;  %v4240_v29 = vpop.f32.mrf.mxu0 }
0x10d1   : > { %v3678_v50 = vadd.f32 %v4238_v31, %v3629_v60  ;;  %v4213_v9 = vadd.f32 %v4212_v17, %v4211_v42  ;;  %v4241_v18 = vadd.f32 %v4240_v29, %v4239_v28 }
0x10d3   : > { %v3692_v38 = vadd.f32 %v3678_v50, %v5277_v24  ;;  %v3632_v41 = vadd.f32 %v4213_v9, %v4097_v59 }
0x10d5   : > { %3696 = vst [vmem:[%s4953_s23] sm:$0xff] %v3692_v38  ;;  %v3681_v3 = vadd.f32 %v4241_v18, %v3632_v41 }
0x10d7   : > { %v3693_v58 = vadd.f32 %v3681_v3, %v5934_v8 }
0x10d9   : > { %3697 = vst [vmem:[%s4953_s23 + $0x8] sm:$0xff] %v3693_v58 }
0x10fb   : > { %v4214_v36 = vpop.f32.mrf.mxu1 }
0x10fd   : > { %v4215_v7 = vpop.f32.mrf.mxu1 }
0x10fe   : > { %v4216_v1 = vadd.f32 %v4215_v7, %v4214_v36 }
0x10ff   : > { %v4242_v26 = vpop.f32.mrf.mxu0  ;;  %v4217_v21 = vpop.f32.mrf.mxu1 }
0x1100   : > { %v3637_v20 = vadd.f32 %v4216_v1, %v4097_v59 }
0x1101   : > { %v4243_v40 = vpop.f32.mrf.mxu0  ;;  %v4218_v19 = vpop.f32.mrf.mxu1 }
0x1102   : > { %v4244_v61 = vadd.f32 %v4243_v40, %v4242_v26  ;;  %v4219_v34 = vadd.f32 %v4218_v19, %v4217_v21 }
0x1103   : > { %v4245_v24 = vpop.f32.mrf.mxu0 }
0x1104   : > { %v3686_v16 = vadd.f32 %v4244_v61, %v3637_v20  ;;  %v3640_v51 = vadd.f32 %v4219_v34, %v4097_v59 }
0x1105   : > { %v4246_v22 = vpop.f32.mrf.mxu0 }
0x1106   : > { %v3694_v4 = vadd.f32 %v3686_v16, %v5935_v55  ;;  %v4247_v10 = vadd.f32 %v4246_v22, %v4245_v24 }
0x1108   : > { %3698 = vst [vmem:[%s4953_s23 + $0x10] sm:$0xff] %v3694_v4  ;;  %v3689_v27 = vadd.f32 %v4247_v10, %v3640_v51 }
0x110a   : > { %v3695_v48 = vadd.f32 %v3689_v27, %v5936_v12 }
0x110c   : > { %3699 = vst [vmem:[%s4953_s23 + $0x18] sm:$0xff] %v3695_v48 }
0x110d PF: > { %s5937_s21 = sld [smem:[#allocation5_spill]] }
0x110e   : > { %s5938_s25 = sld [smem:[#allocation3_spill]] }
0x110f   : > { %s5939_s26 = sld [smem:[#allocation4_spill]] }
0x1110   : > { %s5940_s27 = sld [smem:[#allocation6_spill]] }
0x1111   : > { %s5941_s28 = sld [smem:[#allocation7_spill]] }
0x1113   : > { %s23_s29 = sadd.s32 1, %s5937_s21  }
0x1114   : > { %p20_p8 = scmp.ge.s32.totalorder %s23_s29, 8  }
0x1116   :  { %22 = sbr.rel (!%p20_p8) target bundleno = 7 (0x7), region = 142 }

</bundles_post_ra>
